<compile_context>
chip_gen: v7x
topology: tpu7x:2x2x1
jax: 0.10.0
libtpu: 0.0.40
codegen_flags: <defaults>
</compile_context>

<pallas_src>
from functools import partial

import jax
import jax.numpy as jnp
from jax import lax
from jax.experimental import pallas as pl
from jax.experimental.pallas import tpu as pltpu


def _dwconv3d_kernel(x_ref, w_ref, b_ref, o_ref, shift_ref):
    # x_ref    : (1, K, H, W, tC)   input tile, channel-last
    # w_ref    : (3, 3, 3, tC)      depthwise weights, channel-last
    # b_ref    : (1, tC)            bias
    # o_ref    : (1, K, H, W, tC)   output tile (each row written exactly once)
    # shift_ref: (2, W + 8, tC)     f32 staging rows for the +/-1 W shifts
    _, K, H, W, tC = o_ref.shape
    f32 = jnp.float32

    # Slot-0 row 0 and slot-1 rows >= W are never written below, so zeroing the
    # scratch once per invocation provides the zero padding of the W boundary.
    # (A few-vreg memset -- negligible next to the 27-tap VALU work.)
    shift_ref[...] = jnp.zeros_like(shift_ref)

    # Hoisted parameter loads + broadcasts.  JAX does not CSE broadcast_in_dim,
    # so these MUST stay outside the tap loops: one (W, tC) splat per tap for
    # the whole invocation instead of one per tap per output row.
    # TODO(synk): if the bundle dump shows vreg spills at large W, load these
    # in per-dw groups of 9 instead of all 27 up front.
    wb = [[[jnp.broadcast_to(w_ref[dk, dh, dw:dw + 1, :].astype(f32), (W, tC))
            for dw in range(3)] for dh in range(3)] for dk in range(3)]
    bias_b = jnp.broadcast_to(b_ref[...].astype(f32), (W, tC))

    # TODO(synk): on v6e/v7x the tap multiplies could run in bf16 (f32
    # accumulate) for ~2x VALU/vld relief; kept f32 here for strict parity with
    # the PyTorch module and because v5e has no bf16 VPU.
    for k in range(K):
        for h in range(H):
            # Three vreg-resident f32 accumulators, one per W-shift of the taps:
            #   out[w] = a1[w] + a0[w-1] + a2[w+1]      (zero off the W edges)
            a0 = jnp.zeros((W, tC), f32)   # taps reaching out[w] from x[w-1]
            a1 = bias_b                    # center taps, bias folded in
            a2 = jnp.zeros((W, tC), f32)   # taps reaching out[w] from x[w+1]
            for dk in range(3):
                kk = k + dk - 1
                if kk < 0 or kk >= K:
                    continue                       # K halo: statically skipped
                for dh in range(3):
                    hh = h + dh - 1
                    if hh < 0 or hh >= H:
                        continue                   # H halo: statically skipped
                    row = x_ref[0, kk, hh, :, :].astype(f32)        # (W, tC)
                    a0 = a0 + row * wb[dk][dh][0]
                    a1 = a1 + row * wb[dk][dh][1]
                    a2 = a2 + row * wb[dk][dh][2]
            # W halo (sublane axis): shift a0 down / a2 up by one row through a
            # tiny staging scratch whose never-written edge rows stay zero.
            # Costs 2 small vst + 2 vld per output row, far below the ~13.5
            # cycle/vreg VALU floor of the 27 taps on every chip generation.
            # TODO(synk): switch to pltpu.roll (XLU slot) + edge mask to drop
            # even these staging stores.
            shift_ref[0, 1:W + 1, :] = a0
            shift_ref[1, 0:W, :] = a2
            s0 = shift_ref[0, 0:W, :]          # s0[w] = a0[w-1], s0[0]   = 0
            s2 = shift_ref[1, 1:W + 1, :]      # s2[w] = a2[w+1], s2[W-1] = 0
            o_ref[0, k, h, :, :] = (a1 + s0 + s2).astype(o_ref.dtype)


def _pick_channel_tile(C):
    # Lane-dense 128-wide channel tiles when possible (dim=768 -> 6 tiles).
    # Fallback tC=C is functionally fine (single lane-padded block) but puts
    # the whole channel dim in one block -- watch VMEM for huge non-128x C.
    return 128 if C % 128 == 0 else C


@partial(jax.jit, static_argnames=("H", "W"))
def dwconv_pallas(x, weight, bias, H, W):
    """DWConv forward.

    Args:
      x:      (B, H*W, C, K) float32 activations.
      weight: (C, 3, 3, 3)   float32 depthwise kernel (PyTorch (C,1,3,3,3) squeezed).
      bias:   (C,)           float32.
    Returns:
      (B, H*W, C, K) float32.
    """
    B, N, C, K = x.shape
    assert N == H * W

    # 'b (h w) c k -> b k h w c': the reshape is free; the transpose is one XLA op.
    # TODO(synk): fuse this layout change (and the inverse below) into the
    # adjacent linear/pointwise ops of the block so the channel-last layout flows
    # through; as standalone copies they cost ~2x the kernel's own HBM traffic.
    x_kl = x.reshape(B, H, W, C, K).transpose(0, 4, 1, 2, 3)    # (B, K, H, W, C)
    w_kl = weight.transpose(1, 2, 3, 0)                         # (3, 3, 3, C)
    b_kl = bias.reshape(1, C)                                   # (1, C)

    tC = _pick_channel_tile(C)
    nC = C // tC

    # TODO(synk): at production spatial sizes (H=W=64+) add an H grid axis with a
    # 1-row halo so per-step VMEM stays bounded on v7x and the in-kernel unroll
    # stays small; with the slabs removed the footprint here is just the
    # double-buffered in/out blocks.
    out = pl.pallas_call(
        _dwconv3d_kernel,
        out_shape=jax.ShapeDtypeStruct((B, K, H, W, C), x.dtype),
        grid_spec=pltpu.PrefetchScalarGridSpec(
            num_scalar_prefetch=0,
            grid=(nC, B),                      # channel tile outer, batch inner
            in_specs=[
                pl.BlockSpec((1, K, H, W, tC), lambda c, b: (b, 0, 0, 0, c)),
                pl.BlockSpec((3, 3, 3, tC),    lambda c, b: (0, 0, 0, c)),
                pl.BlockSpec((1, tC),          lambda c, b: (0, c)),
            ],
            out_specs=pl.BlockSpec((1, K, H, W, tC), lambda c, b: (b, 0, 0, 0, c)),
            scratch_shapes=[
                pltpu.VMEM((2, W + 8, tC), jnp.float32),   # W-shift staging rows
            ],
        ),
        compiler_params=pltpu.CompilerParams(
            dimension_semantics=("parallel", "parallel"),
            # The double-buffered in/out blocks are the whole footprint now;
            # 48 MiB is safe on v5e/v6e (128 MiB) and leaves headroom on v7x (64 MiB).
            vmem_limit_bytes=48 * 1024 * 1024,
        ),
    )(x_kl, w_kl, b_kl)

    # 'b k h w c -> b (h w) c k'
    return out.transpose(0, 2, 3, 4, 1).reshape(B, H * W, C, K)


def _reference(x, weight, bias, H, W):
    """Pure-JAX reference matching the PyTorch module exactly (f32 precision)."""
    B, N, C, K = x.shape
    xr = x.reshape(B, H, W, C, K).transpose(0, 3, 4, 1, 2)   # (B, C, K, H, W)
    w = weight[:, None, :, :, :]                             # (C, 1, 3, 3, 3)
    y = lax.conv_general_dilated(
        xr, w,
        window_strides=(1, 1, 1),
        padding=((1, 1), (1, 1), (1, 1)),
        dimension_numbers=("NCDHW", "OIDHW", "NCDHW"),
        feature_group_count=C,
        precision=lax.Precision.HIGHEST,
    )
    y = y + bias[None, :, None, None, None]
    return y.transpose(0, 3, 4, 1, 2).reshape(B, H * W, C, K)


if __name__ == "__main__":
    # Small shapes consistent with the module's forward: x is (B, H*W, C, K).
    # C is a multiple of 128 (real module default is dim=768) so lanes are dense;
    # grid = (C/128=2, B=2) -> 4 independent blocks; W=8 -> one sublane tile.
    B, H, W, C, K = 2, 8, 8, 256, 4

    key = jax.random.PRNGKey(0)
    kx, kw, kb = jax.random.split(key, 3)
    x = jax.random.normal(kx, (B, H * W, C, K), dtype=jnp.float32)
    # Conv3d(dim, dim, 3, groups=dim, bias=True) params, weight stored squeezed.
    weight = jax.random.normal(kw, (C, 3, 3, 3), dtype=jnp.float32) * 0.1
    bias = jax.random.normal(kb, (C,), dtype=jnp.float32) * 0.1

    y = dwconv_pallas(x, weight, bias, H, W)
    y = jax.block_until_ready(y)

    y_ref = _reference(x, weight, bias, H, W)
    assert y.shape == (B, H * W, C, K)
    err = float(jnp.max(jnp.abs(y - y_ref)))
    assert jnp.allclose(y, y_ref, atol=1e-5, rtol=1e-5), err

    print("KERNEL_OK")
</pallas_src>

<mosaic_0001>
module attributes {stable_mosaic.version = 11 : i64} {
  func.func @_dwconv3d_kernel(%arg0: i32, %arg1: i32, %arg2: memref<1x4x8x8x128xf32, #tpu.memory_space<vmem>>, %arg3: memref<3x3x3x128xf32, #tpu.memory_space<vmem>>, %arg4: memref<1x128xf32, #tpu.memory_space<vmem>>, %arg5: memref<1x4x8x8x128xf32, #tpu.memory_space<vmem>>, %arg6: memref<2x16x128xf32, #tpu.memory_space<vmem>>) attributes {dimension_semantics = [#tpu.dimension_semantics<parallel>, #tpu.dimension_semantics<parallel>], iteration_bounds = array<i64: 2, 2>, scalar_prefetch = 0 : i64, scratch_operands = 1 : i64, tpu.core_type = #tpu.core_type<tc>, window_params = [{transform_indices = @transform_0, window_bounds = array<i64: 1, 4, 8, 8, 128>}, {transform_indices = @transform_1, window_bounds = array<i64: 3, 3, 3, 128>}, {transform_indices = @transform_2, window_bounds = array<i64: 1, 128>}, {transform_indices = @transform_3, window_bounds = array<i64: 1, 4, 8, 8, 128>}]} {
    %cst = arith.constant 0.000000e+00 : f32
    %0 = vector.broadcast %cst : f32 to vector<2x16x128xf32>
    %c0 = arith.constant 0 : index
    %c0_0 = arith.constant 0 : index
    %c0_1 = arith.constant 0 : index
    %1 = vector.load %arg6[%c0, %c0_0, %c0_1] : memref<2x16x128xf32, #tpu.memory_space<vmem>>, vector<2x16x128xf32>
    tpu.vector_store %arg6[%c0, %c0_0, %c0_1], %0 {strides = array<i32>} : memref<2x16x128xf32, #tpu.memory_space<vmem>>, vector<2x16x128xf32>,
    %c0_2 = arith.constant 0 : index
    %c0_3 = arith.constant 0 : index
    %c0_4 = arith.constant 0 : index
    %c0_5 = arith.constant 0 : index
    %2 = vector.load %arg3[%c0_2, %c0_3, %c0_4, %c0_5] : memref<3x3x3x128xf32, #tpu.memory_space<vmem>>, vector<1x1x1x128xf32>
    %3 = vector.shape_cast %2 : vector<1x1x1x128xf32> to vector<1x128xf32>
    %4 = vector.shape_cast %3 : vector<1x128xf32> to vector<1x128xf32>
    %5 = vector.broadcast %4 : vector<1x128xf32> to vector<8x128xf32>
    %c0_6 = arith.constant 0 : index
    %c0_7 = arith.constant 0 : index
    %c1 = arith.constant 1 : index
    %c0_8 = arith.constant 0 : index
    %6 = vector.load %arg3[%c0_6, %c0_7, %c1, %c0_8] : memref<3x3x3x128xf32, #tpu.memory_space<vmem>>, vector<1x1x1x128xf32>
    %7 = vector.shape_cast %6 : vector<1x1x1x128xf32> to vector<1x128xf32>
    %8 = vector.shape_cast %7 : vector<1x128xf32> to vector<1x128xf32>
    %9 = vector.broadcast %8 : vector<1x128xf32> to vector<8x128xf32>
    %c0_9 = arith.constant 0 : index
    %c0_10 = arith.constant 0 : index
    %c2 = arith.constant 2 : index
    %c0_11 = arith.constant 0 : index
    %10 = vector.load %arg3[%c0_9, %c0_10, %c2, %c0_11] : memref<3x3x3x128xf32, #tpu.memory_space<vmem>>, vector<1x1x1x128xf32>
    %11 = vector.shape_cast %10 : vector<1x1x1x128xf32> to vector<1x128xf32>
    %12 = vector.shape_cast %11 : vector<1x128xf32> to vector<1x128xf32>
    %13 = vector.broadcast %12 : vector<1x128xf32> to vector<8x128xf32>
    %c0_12 = arith.constant 0 : index
    %c1_13 = arith.constant 1 : index
    %c0_14 = arith.constant 0 : index
    %c0_15 = arith.constant 0 : index
    %14 = vector.load %arg3[%c0_12, %c1_13, %c0_14, %c0_15] : memref<3x3x3x128xf32, #tpu.memory_space<vmem>>, vector<1x1x1x128xf32>
    %15 = vector.shape_cast %14 : vector<1x1x1x128xf32> to vector<1x128xf32>
    %16 = vector.shape_cast %15 : vector<1x128xf32> to vector<1x128xf32>
    %17 = vector.broadcast %16 : vector<1x128xf32> to vector<8x128xf32>
    %c0_16 = arith.constant 0 : index
    %c1_17 = arith.constant 1 : index
    %c1_18 = arith.constant 1 : index
    %c0_19 = arith.constant 0 : index
    %18 = vector.load %arg3[%c0_16, %c1_17, %c1_18, %c0_19] : memref<3x3x3x128xf32, #tpu.memory_space<vmem>>, vector<1x1x1x128xf32>
    %19 = vector.shape_cast %18 : vector<1x1x1x128xf32> to vector<1x128xf32>
    %20 = vector.shape_cast %19 : vector<1x128xf32> to vector<1x128xf32>
    %21 = vector.broadcast %20 : vector<1x128xf32> to vector<8x128xf32>
    %c0_20 = arith.constant 0 : index
    %c1_21 = arith.constant 1 : index
    %c2_22 = arith.constant 2 : index
    %c0_23 = arith.constant 0 : index
    %22 = vector.load %arg3[%c0_20, %c1_21, %c2_22, %c0_23] : memref<3x3x3x128xf32, #tpu.memory_space<vmem>>, vector<1x1x1x128xf32>
    %23 = vector.shape_cast %22 : vector<1x1x1x128xf32> to vector<1x128xf32>
    %24 = vector.shape_cast %23 : vector<1x128xf32> to vector<1x128xf32>
    %25 = vector.broadcast %24 : vector<1x128xf32> to vector<8x128xf32>
    %c0_24 = arith.constant 0 : index
    %c2_25 = arith.constant 2 : index
    %c0_26 = arith.constant 0 : index
    %c0_27 = arith.constant 0 : index
    %26 = vector.load %arg3[%c0_24, %c2_25, %c0_26, %c0_27] : memref<3x3x3x128xf32, #tpu.memory_space<vmem>>, vector<1x1x1x128xf32>
    %27 = vector.shape_cast %26 : vector<1x1x1x128xf32> to vector<1x128xf32>
    %28 = vector.shape_cast %27 : vector<1x128xf32> to vector<1x128xf32>
    %29 = vector.broadcast %28 : vector<1x128xf32> to vector<8x128xf32>
    %c0_28 = arith.constant 0 : index
    %c2_29 = arith.constant 2 : index
    %c1_30 = arith.constant 1 : index
    %c0_31 = arith.constant 0 : index
    %30 = vector.load %arg3[%c0_28, %c2_29, %c1_30, %c0_31] : memref<3x3x3x128xf32, #tpu.memory_space<vmem>>, vector<1x1x1x128xf32>
    %31 = vector.shape_cast %30 : vector<1x1x1x128xf32> to vector<1x128xf32>
    %32 = vector.shape_cast %31 : vector<1x128xf32> to vector<1x128xf32>
    %33 = vector.broadcast %32 : vector<1x128xf32> to vector<8x128xf32>
    %c0_32 = arith.constant 0 : index
    %c2_33 = arith.constant 2 : index
    %c2_34 = arith.constant 2 : index
    %c0_35 = arith.constant 0 : index
    %34 = vector.load %arg3[%c0_32, %c2_33, %c2_34, %c0_35] : memref<3x3x3x128xf32, #tpu.memory_space<vmem>>, vector<1x1x1x128xf32>
    %35 = vector.shape_cast %34 : vector<1x1x1x128xf32> to vector<1x128xf32>
    %36 = vector.shape_cast %35 : vector<1x128xf32> to vector<1x128xf32>
    %37 = vector.broadcast %36 : vector<1x128xf32> to vector<8x128xf32>
    %c1_36 = arith.constant 1 : index
    %c0_37 = arith.constant 0 : index
    %c0_38 = arith.constant 0 : index
    %c0_39 = arith.constant 0 : index
    %38 = vector.load %arg3[%c1_36, %c0_37, %c0_38, %c0_39] : memref<3x3x3x128xf32, #tpu.memory_space<vmem>>, vector<1x1x1x128xf32>
    %39 = vector.shape_cast %38 : vector<1x1x1x128xf32> to vector<1x128xf32>
    %40 = vector.shape_cast %39 : vector<1x128xf32> to vector<1x128xf32>
    %41 = vector.broadcast %40 : vector<1x128xf32> to vector<8x128xf32>
    %c1_40 = arith.constant 1 : index
    %c0_41 = arith.constant 0 : index
    %c1_42 = arith.constant 1 : index
    %c0_43 = arith.constant 0 : index
    %42 = vector.load %arg3[%c1_40, %c0_41, %c1_42, %c0_43] : memref<3x3x3x128xf32, #tpu.memory_space<vmem>>, vector<1x1x1x128xf32>
    %43 = vector.shape_cast %42 : vector<1x1x1x128xf32> to vector<1x128xf32>
    %44 = vector.shape_cast %43 : vector<1x128xf32> to vector<1x128xf32>
    %45 = vector.broadcast %44 : vector<1x128xf32> to vector<8x128xf32>
    %c1_44 = arith.constant 1 : index
    %c0_45 = arith.constant 0 : index
    %c2_46 = arith.constant 2 : index
    %c0_47 = arith.constant 0 : index
    %46 = vector.load %arg3[%c1_44, %c0_45, %c2_46, %c0_47] : memref<3x3x3x128xf32, #tpu.memory_space<vmem>>, vector<1x1x1x128xf32>
    %47 = vector.shape_cast %46 : vector<1x1x1x128xf32> to vector<1x128xf32>
    %48 = vector.shape_cast %47 : vector<1x128xf32> to vector<1x128xf32>
    %49 = vector.broadcast %48 : vector<1x128xf32> to vector<8x128xf32>
    %c1_48 = arith.constant 1 : index
    %c1_49 = arith.constant 1 : index
    %c0_50 = arith.constant 0 : index
    %c0_51 = arith.constant 0 : index
    %50 = vector.load %arg3[%c1_48, %c1_49, %c0_50, %c0_51] : memref<3x3x3x128xf32, #tpu.memory_space<vmem>>, vector<1x1x1x128xf32>
    %51 = vector.shape_cast %50 : vector<1x1x1x128xf32> to vector<1x128xf32>
    %52 = vector.shape_cast %51 : vector<1x128xf32> to vector<1x128xf32>
    %53 = vector.broadcast %52 : vector<1x128xf32> to vector<8x128xf32>
    %c1_52 = arith.constant 1 : index
    %c1_53 = arith.constant 1 : index
    %c1_54 = arith.constant 1 : index
    %c0_55 = arith.constant 0 : index
    %54 = vector.load %arg3[%c1_52, %c1_53, %c1_54, %c0_55] : memref<3x3x3x128xf32, #tpu.memory_space<vmem>>, vector<1x1x1x128xf32>
    %55 = vector.shape_cast %54 : vector<1x1x1x128xf32> to vector<1x128xf32>
    %56 = vector.shape_cast %55 : vector<1x128xf32> to vector<1x128xf32>
    %57 = vector.broadcast %56 : vector<1x128xf32> to vector<8x128xf32>
    %c1_56 = arith.constant 1 : index
    %c1_57 = arith.constant 1 : index
    %c2_58 = arith.constant 2 : index
    %c0_59 = arith.constant 0 : index
    %58 = vector.load %arg3[%c1_56, %c1_57, %c2_58, %c0_59] : memref<3x3x3x128xf32, #tpu.memory_space<vmem>>, vector<1x1x1x128xf32>
    %59 = vector.shape_cast %58 : vector<1x1x1x128xf32> to vector<1x128xf32>
    %60 = vector.shape_cast %59 : vector<1x128xf32> to vector<1x128xf32>
    %61 = vector.broadcast %60 : vector<1x128xf32> to vector<8x128xf32>
    %c1_60 = arith.constant 1 : index
    %c2_61 = arith.constant 2 : index
    %c0_62 = arith.constant 0 : index
    %c0_63 = arith.constant 0 : index
    %62 = vector.load %arg3[%c1_60, %c2_61, %c0_62, %c0_63] : memref<3x3x3x128xf32, #tpu.memory_space<vmem>>, vector<1x1x1x128xf32>
    %63 = vector.shape_cast %62 : vector<1x1x1x128xf32> to vector<1x128xf32>
    %64 = vector.shape_cast %63 : vector<1x128xf32> to vector<1x128xf32>
    %65 = vector.broadcast %64 : vector<1x128xf32> to vector<8x128xf32>
    %c1_64 = arith.constant 1 : index
    %c2_65 = arith.constant 2 : index
    %c1_66 = arith.constant 1 : index
    %c0_67 = arith.constant 0 : index
    %66 = vector.load %arg3[%c1_64, %c2_65, %c1_66, %c0_67] : memref<3x3x3x128xf32, #tpu.memory_space<vmem>>, vector<1x1x1x128xf32>
    %67 = vector.shape_cast %66 : vector<1x1x1x128xf32> to vector<1x128xf32>
    %68 = vector.shape_cast %67 : vector<1x128xf32> to vector<1x128xf32>
    %69 = vector.broadcast %68 : vector<1x128xf32> to vector<8x128xf32>
    %c1_68 = arith.constant 1 : index
    %c2_69 = arith.constant 2 : index
    %c2_70 = arith.constant 2 : index
    %c0_71 = arith.constant 0 : index
    %70 = vector.load %arg3[%c1_68, %c2_69, %c2_70, %c0_71] : memref<3x3x3x128xf32, #tpu.memory_space<vmem>>, vector<1x1x1x128xf32>
    %71 = vector.shape_cast %70 : vector<1x1x1x128xf32> to vector<1x128xf32>
    %72 = vector.shape_cast %71 : vector<1x128xf32> to vector<1x128xf32>
    %73 = vector.broadcast %72 : vector<1x128xf32> to vector<8x128xf32>
    %c2_72 = arith.constant 2 : index
    %c0_73 = arith.constant 0 : index
    %c0_74 = arith.constant 0 : index
    %c0_75 = arith.constant 0 : index
    %74 = vector.load %arg3[%c2_72, %c0_73, %c0_74, %c0_75] : memref<3x3x3x128xf32, #tpu.memory_space<vmem>>, vector<1x1x1x128xf32>
    %75 = vector.shape_cast %74 : vector<1x1x1x128xf32> to vector<1x128xf32>
    %76 = vector.shape_cast %75 : vector<1x128xf32> to vector<1x128xf32>
    %77 = vector.broadcast %76 : vector<1x128xf32> to vector<8x128xf32>
    %c2_76 = arith.constant 2 : index
    %c0_77 = arith.constant 0 : index
    %c1_78 = arith.constant 1 : index
    %c0_79 = arith.constant 0 : index
    %78 = vector.load %arg3[%c2_76, %c0_77, %c1_78, %c0_79] : memref<3x3x3x128xf32, #tpu.memory_space<vmem>>, vector<1x1x1x128xf32>
    %79 = vector.shape_cast %78 : vector<1x1x1x128xf32> to vector<1x128xf32>
    %80 = vector.shape_cast %79 : vector<1x128xf32> to vector<1x128xf32>
    %81 = vector.broadcast %80 : vector<1x128xf32> to vector<8x128xf32>
    %c2_80 = arith.constant 2 : index
    %c0_81 = arith.constant 0 : index
    %c2_82 = arith.constant 2 : index
    %c0_83 = arith.constant 0 : index
    %82 = vector.load %arg3[%c2_80, %c0_81, %c2_82, %c0_83] : memref<3x3x3x128xf32, #tpu.memory_space<vmem>>, vector<1x1x1x128xf32>
    %83 = vector.shape_cast %82 : vector<1x1x1x128xf32> to vector<1x128xf32>
    %84 = vector.shape_cast %83 : vector<1x128xf32> to vector<1x128xf32>
    %85 = vector.broadcast %84 : vector<1x128xf32> to vector<8x128xf32>
    %c2_84 = arith.constant 2 : index
    %c1_85 = arith.constant 1 : index
    %c0_86 = arith.constant 0 : index
    %c0_87 = arith.constant 0 : index
    %86 = vector.load %arg3[%c2_84, %c1_85, %c0_86, %c0_87] : memref<3x3x3x128xf32, #tpu.memory_space<vmem>>, vector<1x1x1x128xf32>
    %87 = vector.shape_cast %86 : vector<1x1x1x128xf32> to vector<1x128xf32>
    %88 = vector.shape_cast %87 : vector<1x128xf32> to vector<1x128xf32>
    %89 = vector.broadcast %88 : vector<1x128xf32> to vector<8x128xf32>
    %c2_88 = arith.constant 2 : index
    %c1_89 = arith.constant 1 : index
    %c1_90 = arith.constant 1 : index
    %c0_91 = arith.constant 0 : index
    %90 = vector.load %arg3[%c2_88, %c1_89, %c1_90, %c0_91] : memref<3x3x3x128xf32, #tpu.memory_space<vmem>>, vector<1x1x1x128xf32>
    %91 = vector.shape_cast %90 : vector<1x1x1x128xf32> to vector<1x128xf32>
    %92 = vector.shape_cast %91 : vector<1x128xf32> to vector<1x128xf32>
    %93 = vector.broadcast %92 : vector<1x128xf32> to vector<8x128xf32>
    %c2_92 = arith.constant 2 : index
    %c1_93 = arith.constant 1 : index
    %c2_94 = arith.constant 2 : index
    %c0_95 = arith.constant 0 : index
    %94 = vector.load %arg3[%c2_92, %c1_93, %c2_94, %c0_95] : memref<3x3x3x128xf32, #tpu.memory_space<vmem>>, vector<1x1x1x128xf32>
    %95 = vector.shape_cast %94 : vector<1x1x1x128xf32> to vector<1x128xf32>
    %96 = vector.shape_cast %95 : vector<1x128xf32> to vector<1x128xf32>
    %97 = vector.broadcast %96 : vector<1x128xf32> to vector<8x128xf32>
    %c2_96 = arith.constant 2 : index
    %c2_97 = arith.constant 2 : index
    %c0_98 = arith.constant 0 : index
    %c0_99 = arith.constant 0 : index
    %98 = vector.load %arg3[%c2_96, %c2_97, %c0_98, %c0_99] : memref<3x3x3x128xf32, #tpu.memory_space<vmem>>, vector<1x1x1x128xf32>
    %99 = vector.shape_cast %98 : vector<1x1x1x128xf32> to vector<1x128xf32>
    %100 = vector.shape_cast %99 : vector<1x128xf32> to vector<1x128xf32>
    %101 = vector.broadcast %100 : vector<1x128xf32> to vector<8x128xf32>
    %c2_100 = arith.constant 2 : index
    %c2_101 = arith.constant 2 : index
    %c1_102 = arith.constant 1 : index
    %c0_103 = arith.constant 0 : index
    %102 = vector.load %arg3[%c2_100, %c2_101, %c1_102, %c0_103] : memref<3x3x3x128xf32, #tpu.memory_space<vmem>>, vector<1x1x1x128xf32>
    %103 = vector.shape_cast %102 : vector<1x1x1x128xf32> to vector<1x128xf32>
    %104 = vector.shape_cast %103 : vector<1x128xf32> to vector<1x128xf32>
    %105 = vector.broadcast %104 : vector<1x128xf32> to vector<8x128xf32>
    %c2_104 = arith.constant 2 : index
    %c2_105 = arith.constant 2 : index
    %c2_106 = arith.constant 2 : index
    %c0_107 = arith.constant 0 : index
    %106 = vector.load %arg3[%c2_104, %c2_105, %c2_106, %c0_107] : memref<3x3x3x128xf32, #tpu.memory_space<vmem>>, vector<1x1x1x128xf32>
    %107 = vector.shape_cast %106 : vector<1x1x1x128xf32> to vector<1x128xf32>
    %108 = vector.shape_cast %107 : vector<1x128xf32> to vector<1x128xf32>
    %109 = vector.broadcast %108 : vector<1x128xf32> to vector<8x128xf32>
    %c0_108 = arith.constant 0 : index
    %c0_109 = arith.constant 0 : index
    %110 = vector.load %arg4[%c0_108, %c0_109] : memref<1x128xf32, #tpu.memory_space<vmem>>, vector<1x128xf32>
    %111 = vector.shape_cast %110 : vector<1x128xf32> to vector<1x128xf32>
    %112 = vector.broadcast %111 : vector<1x128xf32> to vector<8x128xf32>
    %cst_110 = arith.constant 0.000000e+00 : f32
    %113 = vector.broadcast %cst_110 : f32 to vector<8x128xf32>
    %cst_111 = arith.constant 0.000000e+00 : f32
    %114 = vector.broadcast %cst_111 : f32 to vector<8x128xf32>
    %c0_112 = arith.constant 0 : index
    %c0_113 = arith.constant 0 : index
    %c0_114 = arith.constant 0 : index
    %c0_115 = arith.constant 0 : index
    %c0_116 = arith.constant 0 : index
    %115 = vector.load %arg2[%c0_112, %c0_113, %c0_114, %c0_115, %c0_116] : memref<1x4x8x8x128xf32, #tpu.memory_space<vmem>>, vector<1x1x1x8x128xf32>
    %116 = vector.shape_cast %115 : vector<1x1x1x8x128xf32> to vector<8x128xf32>
    %117 = arith.mulf %116, %53 : vector<8x128xf32>
    %118 = arith.addf %113, %117 : vector<8x128xf32>
    %119 = arith.mulf %116, %57 : vector<8x128xf32>
    %120 = arith.addf %112, %119 : vector<8x128xf32>
    %121 = arith.mulf %116, %61 : vector<8x128xf32>
    %122 = arith.addf %114, %121 : vector<8x128xf32>
    %c0_117 = arith.constant 0 : index
    %c0_118 = arith.constant 0 : index
    %c1_119 = arith.constant 1 : index
    %c0_120 = arith.constant 0 : index
    %c0_121 = arith.constant 0 : index
    %123 = vector.load %arg2[%c0_117, %c0_118, %c1_119, %c0_120, %c0_121] : memref<1x4x8x8x128xf32, #tpu.memory_space<vmem>>, vector<1x1x1x8x128xf32>
    %124 = vector.shape_cast %123 : vector<1x1x1x8x128xf32> to vector<8x128xf32>
    %125 = arith.mulf %124, %65 : vector<8x128xf32>
    %126 = arith.addf %118, %125 : vector<8x128xf32>
    %127 = arith.mulf %124, %69 : vector<8x128xf32>
    %128 = arith.addf %120, %127 : vector<8x128xf32>
    %129 = arith.mulf %124, %73 : vector<8x128xf32>
    %130 = arith.addf %122, %129 : vector<8x128xf32>
    %c0_122 = arith.constant 0 : index
    %c1_123 = arith.constant 1 : index
    %c0_124 = arith.constant 0 : index
    %c0_125 = arith.constant 0 : index
    %c0_126 = arith.constant 0 : index
    %131 = vector.load %arg2[%c0_122, %c1_123, %c0_124, %c0_125, %c0_126] : memref<1x4x8x8x128xf32, #tpu.memory_space<vmem>>, vector<1x1x1x8x128xf32>
    %132 = vector.shape_cast %131 : vector<1x1x1x8x128xf32> to vector<8x128xf32>
    %133 = arith.mulf %132, %89 : vector<8x128xf32>
    %134 = arith.addf %126, %133 : vector<8x128xf32>
    %135 = arith.mulf %132, %93 : vector<8x128xf32>
    %136 = arith.addf %128, %135 : vector<8x128xf32>
    %137 = arith.mulf %132, %97 : vector<8x128xf32>
    %138 = arith.addf %130, %137 : vector<8x128xf32>
    %c0_127 = arith.constant 0 : index
    %c1_128 = arith.constant 1 : index
    %c1_129 = arith.constant 1 : index
    %c0_130 = arith.constant 0 : index
    %c0_131 = arith.constant 0 : index
    %139 = vector.load %arg2[%c0_127, %c1_128, %c1_129, %c0_130, %c0_131] : memref<1x4x8x8x128xf32, #tpu.memory_space<vmem>>, vector<1x1x1x8x128xf32>
    %140 = vector.shape_cast %139 : vector<1x1x1x8x128xf32> to vector<8x128xf32>
    %141 = arith.mulf %140, %101 : vector<8x128xf32>
    %142 = arith.addf %134, %141 : vector<8x128xf32>
    %143 = arith.mulf %140, %105 : vector<8x128xf32>
    %144 = arith.addf %136, %143 : vector<8x128xf32>
    %145 = arith.mulf %140, %109 : vector<8x128xf32>
    %146 = arith.addf %138, %145 : vector<8x128xf32>
    %c0_132 = arith.constant 0 : index
    %c1_133 = arith.constant 1 : index
    %c0_134 = arith.constant 0 : index
    %147 = vector.load %arg6[%c0_132, %c1_133, %c0_134] : memref<2x16x128xf32, #tpu.memory_space<vmem>>, vector<1x8x128xf32>
    %148 = vector.shape_cast %147 : vector<1x8x128xf32> to vector<8x128xf32>
    %149 = vector.shape_cast %142 : vector<8x128xf32> to vector<1x8x128xf32>
    tpu.vector_store %arg6[%c0_132, %c1_133, %c0_134], %149 {strides = array<i32>} : memref<2x16x128xf32, #tpu.memory_space<vmem>>, vector<1x8x128xf32>,
    %c1_135 = arith.constant 1 : index
    %c0_136 = arith.constant 0 : index
    %c0_137 = arith.constant 0 : index
    %150 = vector.load %arg6[%c1_135, %c0_136, %c0_137] : memref<2x16x128xf32, #tpu.memory_space<vmem>>, vector<1x8x128xf32>
    %151 = vector.shape_cast %150 : vector<1x8x128xf32> to vector<8x128xf32>
    %152 = vector.shape_cast %146 : vector<8x128xf32> to vector<1x8x128xf32>
    tpu.vector_store %arg6[%c1_135, %c0_136, %c0_137], %152 {strides = array<i32>} : memref<2x16x128xf32, #tpu.memory_space<vmem>>, vector<1x8x128xf32>,
    %c0_138 = arith.constant 0 : index
    %c0_139 = arith.constant 0 : index
    %c0_140 = arith.constant 0 : index
    %153 = vector.load %arg6[%c0_138, %c0_139, %c0_140] : memref<2x16x128xf32, #tpu.memory_space<vmem>>, vector<1x8x128xf32>
    %154 = vector.shape_cast %153 : vector<1x8x128xf32> to vector<8x128xf32>
    %c1_141 = arith.constant 1 : index
    %c1_142 = arith.constant 1 : index
    %c0_143 = arith.constant 0 : index
    %155 = vector.load %arg6[%c1_141, %c1_142, %c0_143] : memref<2x16x128xf32, #tpu.memory_space<vmem>>, vector<1x8x128xf32>
    %156 = vector.shape_cast %155 : vector<1x8x128xf32> to vector<8x128xf32>
    %157 = arith.addf %144, %154 : vector<8x128xf32>
    %158 = arith.addf %157, %156 : vector<8x128xf32>
    %c0_144 = arith.constant 0 : index
    %c0_145 = arith.constant 0 : index
    %c0_146 = arith.constant 0 : index
    %c0_147 = arith.constant 0 : index
    %c0_148 = arith.constant 0 : index
    %159 = vector.load %arg5[%c0_144, %c0_145, %c0_146, %c0_147, %c0_148] : memref<1x4x8x8x128xf32, #tpu.memory_space<vmem>>, vector<1x1x1x8x128xf32>
    %160 = vector.shape_cast %159 : vector<1x1x1x8x128xf32> to vector<8x128xf32>
    %161 = vector.shape_cast %158 : vector<8x128xf32> to vector<1x1x1x8x128xf32>
    tpu.vector_store %arg5[%c0_144, %c0_145, %c0_146, %c0_147, %c0_148], %161 {strides = array<i32>} : memref<1x4x8x8x128xf32, #tpu.memory_space<vmem>>, vector<1x1x1x8x128xf32>,
    %cst_149 = arith.constant 0.000000e+00 : f32
    %162 = vector.broadcast %cst_149 : f32 to vector<8x128xf32>
    %cst_150 = arith.constant 0.000000e+00 : f32
    %163 = vector.broadcast %cst_150 : f32 to vector<8x128xf32>
    %c0_151 = arith.constant 0 : index
    %c0_152 = arith.constant 0 : index
    %c0_153 = arith.constant 0 : index
    %c0_154 = arith.constant 0 : index
    %c0_155 = arith.constant 0 : index
    %164 = vector.load %arg2[%c0_151, %c0_152, %c0_153, %c0_154, %c0_155] : memref<1x4x8x8x128xf32, #tpu.memory_space<vmem>>, vector<1x1x1x8x128xf32>
    %165 = vector.shape_cast %164 : vector<1x1x1x8x128xf32> to vector<8x128xf32>
    %166 = arith.mulf %165, %41 : vector<8x128xf32>
    %167 = arith.addf %162, %166 : vector<8x128xf32>
    %168 = arith.mulf %165, %45 : vector<8x128xf32>
    %169 = arith.addf %112, %168 : vector<8x128xf32>
    %170 = arith.mulf %165, %49 : vector<8x128xf32>
    %171 = arith.addf %163, %170 : vector<8x128xf32>
    %c0_156 = arith.constant 0 : index
    %c0_157 = arith.constant 0 : index
    %c1_158 = arith.constant 1 : index
    %c0_159 = arith.constant 0 : index
    %c0_160 = arith.constant 0 : index
    %172 = vector.load %arg2[%c0_156, %c0_157, %c1_158, %c0_159, %c0_160] : memref<1x4x8x8x128xf32, #tpu.memory_space<vmem>>, vector<1x1x1x8x128xf32>
    %173 = vector.shape_cast %172 : vector<1x1x1x8x128xf32> to vector<8x128xf32>
    %174 = arith.mulf %173, %53 : vector<8x128xf32>
    %175 = arith.addf %167, %174 : vector<8x128xf32>
    %176 = arith.mulf %173, %57 : vector<8x128xf32>
    %177 = arith.addf %169, %176 : vector<8x128xf32>
    %178 = arith.mulf %173, %61 : vector<8x128xf32>
    %179 = arith.addf %171, %178 : vector<8x128xf32>
    %c0_161 = arith.constant 0 : index
    %c0_162 = arith.constant 0 : index
    %c2_163 = arith.constant 2 : index
    %c0_164 = arith.constant 0 : index
    %c0_165 = arith.constant 0 : index
    %180 = vector.load %arg2[%c0_161, %c0_162, %c2_163, %c0_164, %c0_165] : memref<1x4x8x8x128xf32, #tpu.memory_space<vmem>>, vector<1x1x1x8x128xf32>
    %181 = vector.shape_cast %180 : vector<1x1x1x8x128xf32> to vector<8x128xf32>
    %182 = arith.mulf %181, %65 : vector<8x128xf32>
    %183 = arith.addf %175, %182 : vector<8x128xf32>
    %184 = arith.mulf %181, %69 : vector<8x128xf32>
    %185 = arith.addf %177, %184 : vector<8x128xf32>
    %186 = arith.mulf %181, %73 : vector<8x128xf32>
    %187 = arith.addf %179, %186 : vector<8x128xf32>
    %c0_166 = arith.constant 0 : index
    %c1_167 = arith.constant 1 : index
    %c0_168 = arith.constant 0 : index
    %c0_169 = arith.constant 0 : index
    %c0_170 = arith.constant 0 : index
    %188 = vector.load %arg2[%c0_166, %c1_167, %c0_168, %c0_169, %c0_170] : memref<1x4x8x8x128xf32, #tpu.memory_space<vmem>>, vector<1x1x1x8x128xf32>
    %189 = vector.shape_cast %188 : vector<1x1x1x8x128xf32> to vector<8x128xf32>
    %190 = arith.mulf %189, %77 : vector<8x128xf32>
    %191 = arith.addf %183, %190 : vector<8x128xf32>
    %192 = arith.mulf %189, %81 : vector<8x128xf32>
    %193 = arith.addf %185, %192 : vector<8x128xf32>
    %194 = arith.mulf %189, %85 : vector<8x128xf32>
    %195 = arith.addf %187, %194 : vector<8x128xf32>
    %c0_171 = arith.constant 0 : index
    %c1_172 = arith.constant 1 : index
    %c1_173 = arith.constant 1 : index
    %c0_174 = arith.constant 0 : index
    %c0_175 = arith.constant 0 : index
    %196 = vector.load %arg2[%c0_171, %c1_172, %c1_173, %c0_174, %c0_175] : memref<1x4x8x8x128xf32, #tpu.memory_space<vmem>>, vector<1x1x1x8x128xf32>
    %197 = vector.shape_cast %196 : vector<1x1x1x8x128xf32> to vector<8x128xf32>
    %198 = arith.mulf %197, %89 : vector<8x128xf32>
    %199 = arith.addf %191, %198 : vector<8x128xf32>
    %200 = arith.mulf %197, %93 : vector<8x128xf32>
    %201 = arith.addf %193, %200 : vector<8x128xf32>
    %202 = arith.mulf %197, %97 : vector<8x128xf32>
    %203 = arith.addf %195, %202 : vector<8x128xf32>
    %c0_176 = arith.constant 0 : index
    %c1_177 = arith.constant 1 : index
    %c2_178 = arith.constant 2 : index
    %c0_179 = arith.constant 0 : index
    %c0_180 = arith.constant 0 : index
    %204 = vector.load %arg2[%c0_176, %c1_177, %c2_178, %c0_179, %c0_180] : memref<1x4x8x8x128xf32, #tpu.memory_space<vmem>>, vector<1x1x1x8x128xf32>
    %205 = vector.shape_cast %204 : vector<1x1x1x8x128xf32> to vector<8x128xf32>
    %206 = arith.mulf %205, %101 : vector<8x128xf32>
    %207 = arith.addf %199, %206 : vector<8x128xf32>
    %208 = arith.mulf %205, %105 : vector<8x128xf32>
    %209 = arith.addf %201, %208 : vector<8x128xf32>
    %210 = arith.mulf %205, %109 : vector<8x128xf32>
    %211 = arith.addf %203, %210 : vector<8x128xf32>
    %c0_181 = arith.constant 0 : index
    %c1_182 = arith.constant 1 : index
    %c0_183 = arith.constant 0 : index
    %212 = vector.load %arg6[%c0_181, %c1_182, %c0_183] : memref<2x16x128xf32, #tpu.memory_space<vmem>>, vector<1x8x128xf32>
    %213 = vector.shape_cast %212 : vector<1x8x128xf32> to vector<8x128xf32>
    %214 = vector.shape_cast %207 : vector<8x128xf32> to vector<1x8x128xf32>
    tpu.vector_store %arg6[%c0_181, %c1_182, %c0_183], %214 {strides = array<i32>} : memref<2x16x128xf32, #tpu.memory_space<vmem>>, vector<1x8x128xf32>,
    %c1_184 = arith.constant 1 : index
    %c0_185 = arith.constant 0 : index
    %c0_186 = arith.constant 0 : index
    %215 = vector.load %arg6[%c1_184, %c0_185, %c0_186] : memref<2x16x128xf32, #tpu.memory_space<vmem>>, vector<1x8x128xf32>
    %216 = vector.shape_cast %215 : vector<1x8x128xf32> to vector<8x128xf32>
    %217 = vector.shape_cast %211 : vector<8x128xf32> to vector<1x8x128xf32>
    tpu.vector_store %arg6[%c1_184, %c0_185, %c0_186], %217 {strides = array<i32>} : memref<2x16x128xf32, #tpu.memory_space<vmem>>, vector<1x8x128xf32>,
    %c0_187 = arith.constant 0 : index
    %c0_188 = arith.constant 0 : index
    %c0_189 = arith.constant 0 : index
    %218 = vector.load %arg6[%c0_187, %c0_188, %c0_189] : memref<2x16x128xf32, #tpu.memory_space<vmem>>, vector<1x8x128xf32>
    %219 = vector.shape_cast %218 : vector<1x8x128xf32> to vector<8x128xf32>
    %c1_190 = arith.constant 1 : index
    %c1_191 = arith.constant 1 : index
    %c0_192 = arith.constant 0 : index
    %220 = vector.load %arg6[%c1_190, %c1_191, %c0_192] : memref<2x16x128xf32, #tpu.memory_space<vmem>>, vector<1x8x128xf32>
    %221 = vector.shape_cast %220 : vector<1x8x128xf32> to vector<8x128xf32>
    %222 = arith.addf %209, %219 : vector<8x128xf32>
    %223 = arith.addf %222, %221 : vector<8x128xf32>
    %c0_193 = arith.constant 0 : index
    %c0_194 = arith.constant 0 : index
    %c1_195 = arith.constant 1 : index
    %c0_196 = arith.constant 0 : index
    %c0_197 = arith.constant 0 : index
    %224 = vector.load %arg5[%c0_193, %c0_194, %c1_195, %c0_196, %c0_197] : memref<1x4x8x8x128xf32, #tpu.memory_space<vmem>>, vector<1x1x1x8x128xf32>
    %225 = vector.shape_cast %224 : vector<1x1x1x8x128xf32> to vector<8x128xf32>
    %226 = vector.shape_cast %223 : vector<8x128xf32> to vector<1x1x1x8x128xf32>
    tpu.vector_store %arg5[%c0_193, %c0_194, %c1_195, %c0_196, %c0_197], %226 {strides = array<i32>} : memref<1x4x8x8x128xf32, #tpu.memory_space<vmem>>, vector<1x1x1x8x128xf32>,
    %cst_198 = arith.constant 0.000000e+00 : f32
    %227 = vector.broadcast %cst_198 : f32 to vector<8x128xf32>
    %cst_199 = arith.constant 0.000000e+00 : f32
    %228 = vector.broadcast %cst_199 : f32 to vector<8x128xf32>
    %c0_200 = arith.constant 0 : index
    %c0_201 = arith.constant 0 : index
    %c1_202 = arith.constant 1 : index
    %c0_203 = arith.constant 0 : index
    %c0_204 = arith.constant 0 : index
    %229 = vector.load %arg2[%c0_200, %c0_201, %c1_202, %c0_203, %c0_204] : memref<1x4x8x8x128xf32, #tpu.memory_space<vmem>>, vector<1x1x1x8x128xf32>
    %230 = vector.shape_cast %229 : vector<1x1x1x8x128xf32> to vector<8x128xf32>
    %231 = arith.mulf %230, %41 : vector<8x128xf32>
    %232 = arith.addf %227, %231 : vector<8x128xf32>
    %233 = arith.mulf %230, %45 : vector<8x128xf32>
    %234 = arith.addf %112, %233 : vector<8x128xf32>
    %235 = arith.mulf %230, %49 : vector<8x128xf32>
    %236 = arith.addf %228, %235 : vector<8x128xf32>
    %c0_205 = arith.constant 0 : index
    %c0_206 = arith.constant 0 : index
    %c2_207 = arith.constant 2 : index
    %c0_208 = arith.constant 0 : index
    %c0_209 = arith.constant 0 : index
    %237 = vector.load %arg2[%c0_205, %c0_206, %c2_207, %c0_208, %c0_209] : memref<1x4x8x8x128xf32, #tpu.memory_space<vmem>>, vector<1x1x1x8x128xf32>
    %238 = vector.shape_cast %237 : vector<1x1x1x8x128xf32> to vector<8x128xf32>
    %239 = arith.mulf %238, %53 : vector<8x128xf32>
    %240 = arith.addf %232, %239 : vector<8x128xf32>
    %241 = arith.mulf %238, %57 : vector<8x128xf32>
    %242 = arith.addf %234, %241 : vector<8x128xf32>
    %243 = arith.mulf %238, %61 : vector<8x128xf32>
    %244 = arith.addf %236, %243 : vector<8x128xf32>
    %c0_210 = arith.constant 0 : index
    %c0_211 = arith.constant 0 : index
    %c3 = arith.constant 3 : index
    %c0_212 = arith.constant 0 : index
    %c0_213 = arith.constant 0 : index
    %245 = vector.load %arg2[%c0_210, %c0_211, %c3, %c0_212, %c0_213] : memref<1x4x8x8x128xf32, #tpu.memory_space<vmem>>, vector<1x1x1x8x128xf32>
    %246 = vector.shape_cast %245 : vector<1x1x1x8x128xf32> to vector<8x128xf32>
    %247 = arith.mulf %246, %65 : vector<8x128xf32>
    %248 = arith.addf %240, %247 : vector<8x128xf32>
    %249 = arith.mulf %246, %69 : vector<8x128xf32>
    %250 = arith.addf %242, %249 : vector<8x128xf32>
    %251 = arith.mulf %246, %73 : vector<8x128xf32>
    %252 = arith.addf %244, %251 : vector<8x128xf32>
    %c0_214 = arith.constant 0 : index
    %c1_215 = arith.constant 1 : index
    %c1_216 = arith.constant 1 : index
    %c0_217 = arith.constant 0 : index
    %c0_218 = arith.constant 0 : index
    %253 = vector.load %arg2[%c0_214, %c1_215, %c1_216, %c0_217, %c0_218] : memref<1x4x8x8x128xf32, #tpu.memory_space<vmem>>, vector<1x1x1x8x128xf32>
    %254 = vector.shape_cast %253 : vector<1x1x1x8x128xf32> to vector<8x128xf32>
    %255 = arith.mulf %254, %77 : vector<8x128xf32>
    %256 = arith.addf %248, %255 : vector<8x128xf32>
    %257 = arith.mulf %254, %81 : vector<8x128xf32>
    %258 = arith.addf %250, %257 : vector<8x128xf32>
    %259 = arith.mulf %254, %85 : vector<8x128xf32>
    %260 = arith.addf %252, %259 : vector<8x128xf32>
    %c0_219 = arith.constant 0 : index
    %c1_220 = arith.constant 1 : index
    %c2_221 = arith.constant 2 : index
    %c0_222 = arith.constant 0 : index
    %c0_223 = arith.constant 0 : index
    %261 = vector.load %arg2[%c0_219, %c1_220, %c2_221, %c0_222, %c0_223] : memref<1x4x8x8x128xf32, #tpu.memory_space<vmem>>, vector<1x1x1x8x128xf32>
    %262 = vector.shape_cast %261 : vector<1x1x1x8x128xf32> to vector<8x128xf32>
    %263 = arith.mulf %262, %89 : vector<8x128xf32>
    %264 = arith.addf %256, %263 : vector<8x128xf32>
    %265 = arith.mulf %262, %93 : vector<8x128xf32>
    %266 = arith.addf %258, %265 : vector<8x128xf32>
    %267 = arith.mulf %262, %97 : vector<8x128xf32>
    %268 = arith.addf %260, %267 : vector<8x128xf32>
    %c0_224 = arith.constant 0 : index
    %c1_225 = arith.constant 1 : index
    %c3_226 = arith.constant 3 : index
    %c0_227 = arith.constant 0 : index
    %c0_228 = arith.constant 0 : index
    %269 = vector.load %arg2[%c0_224, %c1_225, %c3_226, %c0_227, %c0_228] : memref<1x4x8x8x128xf32, #tpu.memory_space<vmem>>, vector<1x1x1x8x128xf32>
    %270 = vector.shape_cast %269 : vector<1x1x1x8x128xf32> to vector<8x128xf32>
    %271 = arith.mulf %270, %101 : vector<8x128xf32>
    %272 = arith.addf %264, %271 : vector<8x128xf32>
    %273 = arith.mulf %270, %105 : vector<8x128xf32>
    %274 = arith.addf %266, %273 : vector<8x128xf32>
    %275 = arith.mulf %270, %109 : vector<8x128xf32>
    %276 = arith.addf %268, %275 : vector<8x128xf32>
    %c0_229 = arith.constant 0 : index
    %c1_230 = arith.constant 1 : index
    %c0_231 = arith.constant 0 : index
    %277 = vector.load %arg6[%c0_229, %c1_230, %c0_231] : memref<2x16x128xf32, #tpu.memory_space<vmem>>, vector<1x8x128xf32>
    %278 = vector.shape_cast %277 : vector<1x8x128xf32> to vector<8x128xf32>
    %279 = vector.shape_cast %272 : vector<8x128xf32> to vector<1x8x128xf32>
    tpu.vector_store %arg6[%c0_229, %c1_230, %c0_231], %279 {strides = array<i32>} : memref<2x16x128xf32, #tpu.memory_space<vmem>>, vector<1x8x128xf32>,
    %c1_232 = arith.constant 1 : index
    %c0_233 = arith.constant 0 : index
    %c0_234 = arith.constant 0 : index
    %280 = vector.load %arg6[%c1_232, %c0_233, %c0_234] : memref<2x16x128xf32, #tpu.memory_space<vmem>>, vector<1x8x128xf32>
    %281 = vector.shape_cast %280 : vector<1x8x128xf32> to vector<8x128xf32>
    %282 = vector.shape_cast %276 : vector<8x128xf32> to vector<1x8x128xf32>
    tpu.vector_store %arg6[%c1_232, %c0_233, %c0_234], %282 {strides = array<i32>} : memref<2x16x128xf32, #tpu.memory_space<vmem>>, vector<1x8x128xf32>,
    %c0_235 = arith.constant 0 : index
    %c0_236 = arith.constant 0 : index
    %c0_237 = arith.constant 0 : index
    %283 = vector.load %arg6[%c0_235, %c0_236, %c0_237] : memref<2x16x128xf32, #tpu.memory_space<vmem>>, vector<1x8x128xf32>
    %284 = vector.shape_cast %283 : vector<1x8x128xf32> to vector<8x128xf32>
    %c1_238 = arith.constant 1 : index
    %c1_239 = arith.constant 1 : index
    %c0_240 = arith.constant 0 : index
    %285 = vector.load %arg6[%c1_238, %c1_239, %c0_240] : memref<2x16x128xf32, #tpu.memory_space<vmem>>, vector<1x8x128xf32>
    %286 = vector.shape_cast %285 : vector<1x8x128xf32> to vector<8x128xf32>
    %287 = arith.addf %274, %284 : vector<8x128xf32>
    %288 = arith.addf %287, %286 : vector<8x128xf32>
    %c0_241 = arith.constant 0 : index
    %c0_242 = arith.constant 0 : index
    %c2_243 = arith.constant 2 : index
    %c0_244 = arith.constant 0 : index
    %c0_245 = arith.constant 0 : index
    %289 = vector.load %arg5[%c0_241, %c0_242, %c2_243, %c0_244, %c0_245] : memref<1x4x8x8x128xf32, #tpu.memory_space<vmem>>, vector<1x1x1x8x128xf32>
    %290 = vector.shape_cast %289 : vector<1x1x1x8x128xf32> to vector<8x128xf32>
    %291 = vector.shape_cast %288 : vector<8x128xf32> to vector<1x1x1x8x128xf32>
    tpu.vector_store %arg5[%c0_241, %c0_242, %c2_243, %c0_244, %c0_245], %291 {strides = array<i32>} : memref<1x4x8x8x128xf32, #tpu.memory_space<vmem>>, vector<1x1x1x8x128xf32>,
    %cst_246 = arith.constant 0.000000e+00 : f32
    %292 = vector.broadcast %cst_246 : f32 to vector<8x128xf32>
    %cst_247 = arith.constant 0.000000e+00 : f32
    %293 = vector.broadcast %cst_247 : f32 to vector<8x128xf32>
    %c0_248 = arith.constant 0 : index
    %c0_249 = arith.constant 0 : index
    %c2_250 = arith.constant 2 : index
    %c0_251 = arith.constant 0 : index
    %c0_252 = arith.constant 0 : index
    %294 = vector.load %arg2[%c0_248, %c0_249, %c2_250, %c0_251, %c0_252] : memref<1x4x8x8x128xf32, #tpu.memory_space<vmem>>, vector<1x1x1x8x128xf32>
    %295 = vector.shape_cast %294 : vector<1x1x1x8x128xf32> to vector<8x128xf32>
    %296 = arith.mulf %295, %41 : vector<8x128xf32>
    %297 = arith.addf %292, %296 : vector<8x128xf32>
    %298 = arith.mulf %295, %45 : vector<8x128xf32>
    %299 = arith.addf %112, %298 : vector<8x128xf32>
    %300 = arith.mulf %295, %49 : vector<8x128xf32>
    %301 = arith.addf %293, %300 : vector<8x128xf32>
    %c0_253 = arith.constant 0 : index
    %c0_254 = arith.constant 0 : index
    %c3_255 = arith.constant 3 : index
    %c0_256 = arith.constant 0 : index
    %c0_257 = arith.constant 0 : index
    %302 = vector.load %arg2[%c0_253, %c0_254, %c3_255, %c0_256, %c0_257] : memref<1x4x8x8x128xf32, #tpu.memory_space<vmem>>, vector<1x1x1x8x128xf32>
    %303 = vector.shape_cast %302 : vector<1x1x1x8x128xf32> to vector<8x128xf32>
    %304 = arith.mulf %303, %53 : vector<8x128xf32>
    %305 = arith.addf %297, %304 : vector<8x128xf32>
    %306 = arith.mulf %303, %57 : vector<8x128xf32>
    %307 = arith.addf %299, %306 : vector<8x128xf32>
    %308 = arith.mulf %303, %61 : vector<8x128xf32>
    %309 = arith.addf %301, %308 : vector<8x128xf32>
    %c0_258 = arith.constant 0 : index
    %c0_259 = arith.constant 0 : index
    %c4 = arith.constant 4 : index
    %c0_260 = arith.constant 0 : index
    %c0_261 = arith.constant 0 : index
    %310 = vector.load %arg2[%c0_258, %c0_259, %c4, %c0_260, %c0_261] : memref<1x4x8x8x128xf32, #tpu.memory_space<vmem>>, vector<1x1x1x8x128xf32>
    %311 = vector.shape_cast %310 : vector<1x1x1x8x128xf32> to vector<8x128xf32>
    %312 = arith.mulf %311, %65 : vector<8x128xf32>
    %313 = arith.addf %305, %312 : vector<8x128xf32>
    %314 = arith.mulf %311, %69 : vector<8x128xf32>
    %315 = arith.addf %307, %314 : vector<8x128xf32>
    %316 = arith.mulf %311, %73 : vector<8x128xf32>
    %317 = arith.addf %309, %316 : vector<8x128xf32>
    %c0_262 = arith.constant 0 : index
    %c1_263 = arith.constant 1 : index
    %c2_264 = arith.constant 2 : index
    %c0_265 = arith.constant 0 : index
    %c0_266 = arith.constant 0 : index
    %318 = vector.load %arg2[%c0_262, %c1_263, %c2_264, %c0_265, %c0_266] : memref<1x4x8x8x128xf32, #tpu.memory_space<vmem>>, vector<1x1x1x8x128xf32>
    %319 = vector.shape_cast %318 : vector<1x1x1x8x128xf32> to vector<8x128xf32>
    %320 = arith.mulf %319, %77 : vector<8x128xf32>
    %321 = arith.addf %313, %320 : vector<8x128xf32>
    %322 = arith.mulf %319, %81 : vector<8x128xf32>
    %323 = arith.addf %315, %322 : vector<8x128xf32>
    %324 = arith.mulf %319, %85 : vector<8x128xf32>
    %325 = arith.addf %317, %324 : vector<8x128xf32>
    %c0_267 = arith.constant 0 : index
    %c1_268 = arith.constant 1 : index
    %c3_269 = arith.constant 3 : index
    %c0_270 = arith.constant 0 : index
    %c0_271 = arith.constant 0 : index
    %326 = vector.load %arg2[%c0_267, %c1_268, %c3_269, %c0_270, %c0_271] : memref<1x4x8x8x128xf32, #tpu.memory_space<vmem>>, vector<1x1x1x8x128xf32>
    %327 = vector.shape_cast %326 : vector<1x1x1x8x128xf32> to vector<8x128xf32>
    %328 = arith.mulf %327, %89 : vector<8x128xf32>
    %329 = arith.addf %321, %328 : vector<8x128xf32>
    %330 = arith.mulf %327, %93 : vector<8x128xf32>
    %331 = arith.addf %323, %330 : vector<8x128xf32>
    %332 = arith.mulf %327, %97 : vector<8x128xf32>
    %333 = arith.addf %325, %332 : vector<8x128xf32>
    %c0_272 = arith.constant 0 : index
    %c1_273 = arith.constant 1 : index
    %c4_274 = arith.constant 4 : index
    %c0_275 = arith.constant 0 : index
    %c0_276 = arith.constant 0 : index
    %334 = vector.load %arg2[%c0_272, %c1_273, %c4_274, %c0_275, %c0_276] : memref<1x4x8x8x128xf32, #tpu.memory_space<vmem>>, vector<1x1x1x8x128xf32>
    %335 = vector.shape_cast %334 : vector<1x1x1x8x128xf32> to vector<8x128xf32>
    %336 = arith.mulf %335, %101 : vector<8x128xf32>
    %337 = arith.addf %329, %336 : vector<8x128xf32>
    %338 = arith.mulf %335, %105 : vector<8x128xf32>
    %339 = arith.addf %331, %338 : vector<8x128xf32>
    %340 = arith.mulf %335, %109 : vector<8x128xf32>
    %341 = arith.addf %333, %340 : vector<8x128xf32>
    %c0_277 = arith.constant 0 : index
    %c1_278 = arith.constant 1 : index
    %c0_279 = arith.constant 0 : index
    %342 = vector.load %arg6[%c0_277, %c1_278, %c0_279] : memref<2x16x128xf32, #tpu.memory_space<vmem>>, vector<1x8x128xf32>
    %343 = vector.shape_cast %342 : vector<1x8x128xf32> to vector<8x128xf32>
    %344 = vector.shape_cast %337 : vector<8x128xf32> to vector<1x8x128xf32>
    tpu.vector_store %arg6[%c0_277, %c1_278, %c0_279], %344 {strides = array<i32>} : memref<2x16x128xf32, #tpu.memory_space<vmem>>, vector<1x8x128xf32>,
    %c1_280 = arith.constant 1 : index
    %c0_281 = arith.constant 0 : index
    %c0_282 = arith.constant 0 : index
    %345 = vector.load %arg6[%c1_280, %c0_281, %c0_282] : memref<2x16x128xf32, #tpu.memory_space<vmem>>, vector<1x8x128xf32>
    %346 = vector.shape_cast %345 : vector<1x8x128xf32> to vector<8x128xf32>
    %347 = vector.shape_cast %341 : vector<8x128xf32> to vector<1x8x128xf32>
    tpu.vector_store %arg6[%c1_280, %c0_281, %c0_282], %347 {strides = array<i32>} : memref<2x16x128xf32, #tpu.memory_space<vmem>>, vector<1x8x128xf32>,
    %c0_283 = arith.constant 0 : index
    %c0_284 = arith.constant 0 : index
    %c0_285 = arith.constant 0 : index
    %348 = vector.load %arg6[%c0_283, %c0_284, %c0_285] : memref<2x16x128xf32, #tpu.memory_space<vmem>>, vector<1x8x128xf32>
    %349 = vector.shape_cast %348 : vector<1x8x128xf32> to vector<8x128xf32>
    %c1_286 = arith.constant 1 : index
    %c1_287 = arith.constant 1 : index
    %c0_288 = arith.constant 0 : index
    %350 = vector.load %arg6[%c1_286, %c1_287, %c0_288] : memref<2x16x128xf32, #tpu.memory_space<vmem>>, vector<1x8x128xf32>
    %351 = vector.shape_cast %350 : vector<1x8x128xf32> to vector<8x128xf32>
    %352 = arith.addf %339, %349 : vector<8x128xf32>
    %353 = arith.addf %352, %351 : vector<8x128xf32>
    %c0_289 = arith.constant 0 : index
    %c0_290 = arith.constant 0 : index
    %c3_291 = arith.constant 3 : index
    %c0_292 = arith.constant 0 : index
    %c0_293 = arith.constant 0 : index
    %354 = vector.load %arg5[%c0_289, %c0_290, %c3_291, %c0_292, %c0_293] : memref<1x4x8x8x128xf32, #tpu.memory_space<vmem>>, vector<1x1x1x8x128xf32>
    %355 = vector.shape_cast %354 : vector<1x1x1x8x128xf32> to vector<8x128xf32>
    %356 = vector.shape_cast %353 : vector<8x128xf32> to vector<1x1x1x8x128xf32>
    tpu.vector_store %arg5[%c0_289, %c0_290, %c3_291, %c0_292, %c0_293], %356 {strides = array<i32>} : memref<1x4x8x8x128xf32, #tpu.memory_space<vmem>>, vector<1x1x1x8x128xf32>,
    %cst_294 = arith.constant 0.000000e+00 : f32
    %357 = vector.broadcast %cst_294 : f32 to vector<8x128xf32>
    %cst_295 = arith.constant 0.000000e+00 : f32
    %358 = vector.broadcast %cst_295 : f32 to vector<8x128xf32>
    %c0_296 = arith.constant 0 : index
    %c0_297 = arith.constant 0 : index
    %c3_298 = arith.constant 3 : index
    %c0_299 = arith.constant 0 : index
    %c0_300 = arith.constant 0 : index
    %359 = vector.load %arg2[%c0_296, %c0_297, %c3_298, %c0_299, %c0_300] : memref<1x4x8x8x128xf32, #tpu.memory_space<vmem>>, vector<1x1x1x8x128xf32>
    %360 = vector.shape_cast %359 : vector<1x1x1x8x128xf32> to vector<8x128xf32>
    %361 = arith.mulf %360, %41 : vector<8x128xf32>
    %362 = arith.addf %357, %361 : vector<8x128xf32>
    %363 = arith.mulf %360, %45 : vector<8x128xf32>
    %364 = arith.addf %112, %363 : vector<8x128xf32>
    %365 = arith.mulf %360, %49 : vector<8x128xf32>
    %366 = arith.addf %358, %365 : vector<8x128xf32>
    %c0_301 = arith.constant 0 : index
    %c0_302 = arith.constant 0 : index
    %c4_303 = arith.constant 4 : index
    %c0_304 = arith.constant 0 : index
    %c0_305 = arith.constant 0 : index
    %367 = vector.load %arg2[%c0_301, %c0_302, %c4_303, %c0_304, %c0_305] : memref<1x4x8x8x128xf32, #tpu.memory_space<vmem>>, vector<1x1x1x8x128xf32>
    %368 = vector.shape_cast %367 : vector<1x1x1x8x128xf32> to vector<8x128xf32>
    %369 = arith.mulf %368, %53 : vector<8x128xf32>
    %370 = arith.addf %362, %369 : vector<8x128xf32>
    %371 = arith.mulf %368, %57 : vector<8x128xf32>
    %372 = arith.addf %364, %371 : vector<8x128xf32>
    %373 = arith.mulf %368, %61 : vector<8x128xf32>
    %374 = arith.addf %366, %373 : vector<8x128xf32>
    %c0_306 = arith.constant 0 : index
    %c0_307 = arith.constant 0 : index
    %c5 = arith.constant 5 : index
    %c0_308 = arith.constant 0 : index
    %c0_309 = arith.constant 0 : index
    %375 = vector.load %arg2[%c0_306, %c0_307, %c5, %c0_308, %c0_309] : memref<1x4x8x8x128xf32, #tpu.memory_space<vmem>>, vector<1x1x1x8x128xf32>
    %376 = vector.shape_cast %375 : vector<1x1x1x8x128xf32> to vector<8x128xf32>
    %377 = arith.mulf %376, %65 : vector<8x128xf32>
    %378 = arith.addf %370, %377 : vector<8x128xf32>
    %379 = arith.mulf %376, %69 : vector<8x128xf32>
    %380 = arith.addf %372, %379 : vector<8x128xf32>
    %381 = arith.mulf %376, %73 : vector<8x128xf32>
    %382 = arith.addf %374, %381 : vector<8x128xf32>
    %c0_310 = arith.constant 0 : index
    %c1_311 = arith.constant 1 : index
    %c3_312 = arith.constant 3 : index
    %c0_313 = arith.constant 0 : index
    %c0_314 = arith.constant 0 : index
    %383 = vector.load %arg2[%c0_310, %c1_311, %c3_312, %c0_313, %c0_314] : memref<1x4x8x8x128xf32, #tpu.memory_space<vmem>>, vector<1x1x1x8x128xf32>
    %384 = vector.shape_cast %383 : vector<1x1x1x8x128xf32> to vector<8x128xf32>
    %385 = arith.mulf %384, %77 : vector<8x128xf32>
    %386 = arith.addf %378, %385 : vector<8x128xf32>
    %387 = arith.mulf %384, %81 : vector<8x128xf32>
    %388 = arith.addf %380, %387 : vector<8x128xf32>
    %389 = arith.mulf %384, %85 : vector<8x128xf32>
    %390 = arith.addf %382, %389 : vector<8x128xf32>
    %c0_315 = arith.constant 0 : index
    %c1_316 = arith.constant 1 : index
    %c4_317 = arith.constant 4 : index
    %c0_318 = arith.constant 0 : index
    %c0_319 = arith.constant 0 : index
    %391 = vector.load %arg2[%c0_315, %c1_316, %c4_317, %c0_318, %c0_319] : memref<1x4x8x8x128xf32, #tpu.memory_space<vmem>>, vector<1x1x1x8x128xf32>
    %392 = vector.shape_cast %391 : vector<1x1x1x8x128xf32> to vector<8x128xf32>
    %393 = arith.mulf %392, %89 : vector<8x128xf32>
    %394 = arith.addf %386, %393 : vector<8x128xf32>
    %395 = arith.mulf %392, %93 : vector<8x128xf32>
    %396 = arith.addf %388, %395 : vector<8x128xf32>
    %397 = arith.mulf %392, %97 : vector<8x128xf32>
    %398 = arith.addf %390, %397 : vector<8x128xf32>
    %c0_320 = arith.constant 0 : index
    %c1_321 = arith.constant 1 : index
    %c5_322 = arith.constant 5 : index
    %c0_323 = arith.constant 0 : index
    %c0_324 = arith.constant 0 : index
    %399 = vector.load %arg2[%c0_320, %c1_321, %c5_322, %c0_323, %c0_324] : memref<1x4x8x8x128xf32, #tpu.memory_space<vmem>>, vector<1x1x1x8x128xf32>
    %400 = vector.shape_cast %399 : vector<1x1x1x8x128xf32> to vector<8x128xf32>
    %401 = arith.mulf %400, %101 : vector<8x128xf32>
    %402 = arith.addf %394, %401 : vector<8x128xf32>
    %403 = arith.mulf %400, %105 : vector<8x128xf32>
    %404 = arith.addf %396, %403 : vector<8x128xf32>
    %405 = arith.mulf %400, %109 : vector<8x128xf32>
    %406 = arith.addf %398, %405 : vector<8x128xf32>
    %c0_325 = arith.constant 0 : index
    %c1_326 = arith.constant 1 : index
    %c0_327 = arith.constant 0 : index
    %407 = vector.load %arg6[%c0_325, %c1_326, %c0_327] : memref<2x16x128xf32, #tpu.memory_space<vmem>>, vector<1x8x128xf32>
    %408 = vector.shape_cast %407 : vector<1x8x128xf32> to vector<8x128xf32>
    %409 = vector.shape_cast %402 : vector<8x128xf32> to vector<1x8x128xf32>
    tpu.vector_store %arg6[%c0_325, %c1_326, %c0_327], %409 {strides = array<i32>} : memref<2x16x128xf32, #tpu.memory_space<vmem>>, vector<1x8x128xf32>,
    %c1_328 = arith.constant 1 : index
    %c0_329 = arith.constant 0 : index
    %c0_330 = arith.constant 0 : index
    %410 = vector.load %arg6[%c1_328, %c0_329, %c0_330] : memref<2x16x128xf32, #tpu.memory_space<vmem>>, vector<1x8x128xf32>
    %411 = vector.shape_cast %410 : vector<1x8x128xf32> to vector<8x128xf32>
    %412 = vector.shape_cast %406 : vector<8x128xf32> to vector<1x8x128xf32>
    tpu.vector_store %arg6[%c1_328, %c0_329, %c0_330], %412 {strides = array<i32>} : memref<2x16x128xf32, #tpu.memory_space<vmem>>, vector<1x8x128xf32>,
    %c0_331 = arith.constant 0 : index
    %c0_332 = arith.constant 0 : index
    %c0_333 = arith.constant 0 : index
    %413 = vector.load %arg6[%c0_331, %c0_332, %c0_333] : memref<2x16x128xf32, #tpu.memory_space<vmem>>, vector<1x8x128xf32>
    %414 = vector.shape_cast %413 : vector<1x8x128xf32> to vector<8x128xf32>
    %c1_334 = arith.constant 1 : index
    %c1_335 = arith.constant 1 : index
    %c0_336 = arith.constant 0 : index
    %415 = vector.load %arg6[%c1_334, %c1_335, %c0_336] : memref<2x16x128xf32, #tpu.memory_space<vmem>>, vector<1x8x128xf32>
    %416 = vector.shape_cast %415 : vector<1x8x128xf32> to vector<8x128xf32>
    %417 = arith.addf %404, %414 : vector<8x128xf32>
    %418 = arith.addf %417, %416 : vector<8x128xf32>
    %c0_337 = arith.constant 0 : index
    %c0_338 = arith.constant 0 : index
    %c4_339 = arith.constant 4 : index
    %c0_340 = arith.constant 0 : index
    %c0_341 = arith.constant 0 : index
    %419 = vector.load %arg5[%c0_337, %c0_338, %c4_339, %c0_340, %c0_341] : memref<1x4x8x8x128xf32, #tpu.memory_space<vmem>>, vector<1x1x1x8x128xf32>
    %420 = vector.shape_cast %419 : vector<1x1x1x8x128xf32> to vector<8x128xf32>
    %421 = vector.shape_cast %418 : vector<8x128xf32> to vector<1x1x1x8x128xf32>
    tpu.vector_store %arg5[%c0_337, %c0_338, %c4_339, %c0_340, %c0_341], %421 {strides = array<i32>} : memref<1x4x8x8x128xf32, #tpu.memory_space<vmem>>, vector<1x1x1x8x128xf32>,
    %cst_342 = arith.constant 0.000000e+00 : f32
    %422 = vector.broadcast %cst_342 : f32 to vector<8x128xf32>
    %cst_343 = arith.constant 0.000000e+00 : f32
    %423 = vector.broadcast %cst_343 : f32 to vector<8x128xf32>
    %c0_344 = arith.constant 0 : index
    %c0_345 = arith.constant 0 : index
    %c4_346 = arith.constant 4 : index
    %c0_347 = arith.constant 0 : index
    %c0_348 = arith.constant 0 : index
    %424 = vector.load %arg2[%c0_344, %c0_345, %c4_346, %c0_347, %c0_348] : memref<1x4x8x8x128xf32, #tpu.memory_space<vmem>>, vector<1x1x1x8x128xf32>
    %425 = vector.shape_cast %424 : vector<1x1x1x8x128xf32> to vector<8x128xf32>
    %426 = arith.mulf %425, %41 : vector<8x128xf32>
    %427 = arith.addf %422, %426 : vector<8x128xf32>
    %428 = arith.mulf %425, %45 : vector<8x128xf32>
    %429 = arith.addf %112, %428 : vector<8x128xf32>
    %430 = arith.mulf %425, %49 : vector<8x128xf32>
    %431 = arith.addf %423, %430 : vector<8x128xf32>
    %c0_349 = arith.constant 0 : index
    %c0_350 = arith.constant 0 : index
    %c5_351 = arith.constant 5 : index
    %c0_352 = arith.constant 0 : index
    %c0_353 = arith.constant 0 : index
    %432 = vector.load %arg2[%c0_349, %c0_350, %c5_351, %c0_352, %c0_353] : memref<1x4x8x8x128xf32, #tpu.memory_space<vmem>>, vector<1x1x1x8x128xf32>
    %433 = vector.shape_cast %432 : vector<1x1x1x8x128xf32> to vector<8x128xf32>
    %434 = arith.mulf %433, %53 : vector<8x128xf32>
    %435 = arith.addf %427, %434 : vector<8x128xf32>
    %436 = arith.mulf %433, %57 : vector<8x128xf32>
    %437 = arith.addf %429, %436 : vector<8x128xf32>
    %438 = arith.mulf %433, %61 : vector<8x128xf32>
    %439 = arith.addf %431, %438 : vector<8x128xf32>
    %c0_354 = arith.constant 0 : index
    %c0_355 = arith.constant 0 : index
    %c6 = arith.constant 6 : index
    %c0_356 = arith.constant 0 : index
    %c0_357 = arith.constant 0 : index
    %440 = vector.load %arg2[%c0_354, %c0_355, %c6, %c0_356, %c0_357] : memref<1x4x8x8x128xf32, #tpu.memory_space<vmem>>, vector<1x1x1x8x128xf32>
    %441 = vector.shape_cast %440 : vector<1x1x1x8x128xf32> to vector<8x128xf32>
    %442 = arith.mulf %441, %65 : vector<8x128xf32>
    %443 = arith.addf %435, %442 : vector<8x128xf32>
    %444 = arith.mulf %441, %69 : vector<8x128xf32>
    %445 = arith.addf %437, %444 : vector<8x128xf32>
    %446 = arith.mulf %441, %73 : vector<8x128xf32>
    %447 = arith.addf %439, %446 : vector<8x128xf32>
    %c0_358 = arith.constant 0 : index
    %c1_359 = arith.constant 1 : index
    %c4_360 = arith.constant 4 : index
    %c0_361 = arith.constant 0 : index
    %c0_362 = arith.constant 0 : index
    %448 = vector.load %arg2[%c0_358, %c1_359, %c4_360, %c0_361, %c0_362] : memref<1x4x8x8x128xf32, #tpu.memory_space<vmem>>, vector<1x1x1x8x128xf32>
    %449 = vector.shape_cast %448 : vector<1x1x1x8x128xf32> to vector<8x128xf32>
    %450 = arith.mulf %449, %77 : vector<8x128xf32>
    %451 = arith.addf %443, %450 : vector<8x128xf32>
    %452 = arith.mulf %449, %81 : vector<8x128xf32>
    %453 = arith.addf %445, %452 : vector<8x128xf32>
    %454 = arith.mulf %449, %85 : vector<8x128xf32>
    %455 = arith.addf %447, %454 : vector<8x128xf32>
    %c0_363 = arith.constant 0 : index
    %c1_364 = arith.constant 1 : index
    %c5_365 = arith.constant 5 : index
    %c0_366 = arith.constant 0 : index
    %c0_367 = arith.constant 0 : index
    %456 = vector.load %arg2[%c0_363, %c1_364, %c5_365, %c0_366, %c0_367] : memref<1x4x8x8x128xf32, #tpu.memory_space<vmem>>, vector<1x1x1x8x128xf32>
    %457 = vector.shape_cast %456 : vector<1x1x1x8x128xf32> to vector<8x128xf32>
    %458 = arith.mulf %457, %89 : vector<8x128xf32>
    %459 = arith.addf %451, %458 : vector<8x128xf32>
    %460 = arith.mulf %457, %93 : vector<8x128xf32>
    %461 = arith.addf %453, %460 : vector<8x128xf32>
    %462 = arith.mulf %457, %97 : vector<8x128xf32>
    %463 = arith.addf %455, %462 : vector<8x128xf32>
    %c0_368 = arith.constant 0 : index
    %c1_369 = arith.constant 1 : index
    %c6_370 = arith.constant 6 : index
    %c0_371 = arith.constant 0 : index
    %c0_372 = arith.constant 0 : index
    %464 = vector.load %arg2[%c0_368, %c1_369, %c6_370, %c0_371, %c0_372] : memref<1x4x8x8x128xf32, #tpu.memory_space<vmem>>, vector<1x1x1x8x128xf32>
    %465 = vector.shape_cast %464 : vector<1x1x1x8x128xf32> to vector<8x128xf32>
    %466 = arith.mulf %465, %101 : vector<8x128xf32>
    %467 = arith.addf %459, %466 : vector<8x128xf32>
    %468 = arith.mulf %465, %105 : vector<8x128xf32>
    %469 = arith.addf %461, %468 : vector<8x128xf32>
    %470 = arith.mulf %465, %109 : vector<8x128xf32>
    %471 = arith.addf %463, %470 : vector<8x128xf32>
    %c0_373 = arith.constant 0 : index
    %c1_374 = arith.constant 1 : index
    %c0_375 = arith.constant 0 : index
    %472 = vector.load %arg6[%c0_373, %c1_374, %c0_375] : memref<2x16x128xf32, #tpu.memory_space<vmem>>, vector<1x8x128xf32>
    %473 = vector.shape_cast %472 : vector<1x8x128xf32> to vector<8x128xf32>
    %474 = vector.shape_cast %467 : vector<8x128xf32> to vector<1x8x128xf32>
    tpu.vector_store %arg6[%c0_373, %c1_374, %c0_375], %474 {strides = array<i32>} : memref<2x16x128xf32, #tpu.memory_space<vmem>>, vector<1x8x128xf32>,
    %c1_376 = arith.constant 1 : index
    %c0_377 = arith.constant 0 : index
    %c0_378 = arith.constant 0 : index
    %475 = vector.load %arg6[%c1_376, %c0_377, %c0_378] : memref<2x16x128xf32, #tpu.memory_space<vmem>>, vector<1x8x128xf32>
    %476 = vector.shape_cast %475 : vector<1x8x128xf32> to vector<8x128xf32>
    %477 = vector.shape_cast %471 : vector<8x128xf32> to vector<1x8x128xf32>
    tpu.vector_store %arg6[%c1_376, %c0_377, %c0_378], %477 {strides = array<i32>} : memref<2x16x128xf32, #tpu.memory_space<vmem>>, vector<1x8x128xf32>,
    %c0_379 = arith.constant 0 : index
    %c0_380 = arith.constant 0 : index
    %c0_381 = arith.constant 0 : index
    %478 = vector.load %arg6[%c0_379, %c0_380, %c0_381] : memref<2x16x128xf32, #tpu.memory_space<vmem>>, vector<1x8x128xf32>
    %479 = vector.shape_cast %478 : vector<1x8x128xf32> to vector<8x128xf32>
    %c1_382 = arith.constant 1 : index
    %c1_383 = arith.constant 1 : index
    %c0_384 = arith.constant 0 : index
    %480 = vector.load %arg6[%c1_382, %c1_383, %c0_384] : memref<2x16x128xf32, #tpu.memory_space<vmem>>, vector<1x8x128xf32>
    %481 = vector.shape_cast %480 : vector<1x8x128xf32> to vector<8x128xf32>
    %482 = arith.addf %469, %479 : vector<8x128xf32>
    %483 = arith.addf %482, %481 : vector<8x128xf32>
    %c0_385 = arith.constant 0 : index
    %c0_386 = arith.constant 0 : index
    %c5_387 = arith.constant 5 : index
    %c0_388 = arith.constant 0 : index
    %c0_389 = arith.constant 0 : index
    %484 = vector.load %arg5[%c0_385, %c0_386, %c5_387, %c0_388, %c0_389] : memref<1x4x8x8x128xf32, #tpu.memory_space<vmem>>, vector<1x1x1x8x128xf32>
    %485 = vector.shape_cast %484 : vector<1x1x1x8x128xf32> to vector<8x128xf32>
    %486 = vector.shape_cast %483 : vector<8x128xf32> to vector<1x1x1x8x128xf32>
    tpu.vector_store %arg5[%c0_385, %c0_386, %c5_387, %c0_388, %c0_389], %486 {strides = array<i32>} : memref<1x4x8x8x128xf32, #tpu.memory_space<vmem>>, vector<1x1x1x8x128xf32>,
    %cst_390 = arith.constant 0.000000e+00 : f32
    %487 = vector.broadcast %cst_390 : f32 to vector<8x128xf32>
    %cst_391 = arith.constant 0.000000e+00 : f32
    %488 = vector.broadcast %cst_391 : f32 to vector<8x128xf32>
    %c0_392 = arith.constant 0 : index
    %c0_393 = arith.constant 0 : index
    %c5_394 = arith.constant 5 : index
    %c0_395 = arith.constant 0 : index
    %c0_396 = arith.constant 0 : index
    %489 = vector.load %arg2[%c0_392, %c0_393, %c5_394, %c0_395, %c0_396] : memref<1x4x8x8x128xf32, #tpu.memory_space<vmem>>, vector<1x1x1x8x128xf32>
    %490 = vector.shape_cast %489 : vector<1x1x1x8x128xf32> to vector<8x128xf32>
    %491 = arith.mulf %490, %41 : vector<8x128xf32>
    %492 = arith.addf %487, %491 : vector<8x128xf32>
    %493 = arith.mulf %490, %45 : vector<8x128xf32>
    %494 = arith.addf %112, %493 : vector<8x128xf32>
    %495 = arith.mulf %490, %49 : vector<8x128xf32>
    %496 = arith.addf %488, %495 : vector<8x128xf32>
    %c0_397 = arith.constant 0 : index
    %c0_398 = arith.constant 0 : index
    %c6_399 = arith.constant 6 : index
    %c0_400 = arith.constant 0 : index
    %c0_401 = arith.constant 0 : index
    %497 = vector.load %arg2[%c0_397, %c0_398, %c6_399, %c0_400, %c0_401] : memref<1x4x8x8x128xf32, #tpu.memory_space<vmem>>, vector<1x1x1x8x128xf32>
    %498 = vector.shape_cast %497 : vector<1x1x1x8x128xf32> to vector<8x128xf32>
    %499 = arith.mulf %498, %53 : vector<8x128xf32>
    %500 = arith.addf %492, %499 : vector<8x128xf32>
    %501 = arith.mulf %498, %57 : vector<8x128xf32>
    %502 = arith.addf %494, %501 : vector<8x128xf32>
    %503 = arith.mulf %498, %61 : vector<8x128xf32>
    %504 = arith.addf %496, %503 : vector<8x128xf32>
    %c0_402 = arith.constant 0 : index
    %c0_403 = arith.constant 0 : index
    %c7 = arith.constant 7 : index
    %c0_404 = arith.constant 0 : index
    %c0_405 = arith.constant 0 : index
    %505 = vector.load %arg2[%c0_402, %c0_403, %c7, %c0_404, %c0_405] : memref<1x4x8x8x128xf32, #tpu.memory_space<vmem>>, vector<1x1x1x8x128xf32>
    %506 = vector.shape_cast %505 : vector<1x1x1x8x128xf32> to vector<8x128xf32>
    %507 = arith.mulf %506, %65 : vector<8x128xf32>
    %508 = arith.addf %500, %507 : vector<8x128xf32>
    %509 = arith.mulf %506, %69 : vector<8x128xf32>
    %510 = arith.addf %502, %509 : vector<8x128xf32>
    %511 = arith.mulf %506, %73 : vector<8x128xf32>
    %512 = arith.addf %504, %511 : vector<8x128xf32>
    %c0_406 = arith.constant 0 : index
    %c1_407 = arith.constant 1 : index
    %c5_408 = arith.constant 5 : index
    %c0_409 = arith.constant 0 : index
    %c0_410 = arith.constant 0 : index
    %513 = vector.load %arg2[%c0_406, %c1_407, %c5_408, %c0_409, %c0_410] : memref<1x4x8x8x128xf32, #tpu.memory_space<vmem>>, vector<1x1x1x8x128xf32>
    %514 = vector.shape_cast %513 : vector<1x1x1x8x128xf32> to vector<8x128xf32>
    %515 = arith.mulf %514, %77 : vector<8x128xf32>
    %516 = arith.addf %508, %515 : vector<8x128xf32>
    %517 = arith.mulf %514, %81 : vector<8x128xf32>
    %518 = arith.addf %510, %517 : vector<8x128xf32>
    %519 = arith.mulf %514, %85 : vector<8x128xf32>
    %520 = arith.addf %512, %519 : vector<8x128xf32>
    %c0_411 = arith.constant 0 : index
    %c1_412 = arith.constant 1 : index
    %c6_413 = arith.constant 6 : index
    %c0_414 = arith.constant 0 : index
    %c0_415 = arith.constant 0 : index
    %521 = vector.load %arg2[%c0_411, %c1_412, %c6_413, %c0_414, %c0_415] : memref<1x4x8x8x128xf32, #tpu.memory_space<vmem>>, vector<1x1x1x8x128xf32>
    %522 = vector.shape_cast %521 : vector<1x1x1x8x128xf32> to vector<8x128xf32>
    %523 = arith.mulf %522, %89 : vector<8x128xf32>
    %524 = arith.addf %516, %523 : vector<8x128xf32>
    %525 = arith.mulf %522, %93 : vector<8x128xf32>
    %526 = arith.addf %518, %525 : vector<8x128xf32>
    %527 = arith.mulf %522, %97 : vector<8x128xf32>
    %528 = arith.addf %520, %527 : vector<8x128xf32>
    %c0_416 = arith.constant 0 : index
    %c1_417 = arith.constant 1 : index
    %c7_418 = arith.constant 7 : index
    %c0_419 = arith.constant 0 : index
    %c0_420 = arith.constant 0 : index
    %529 = vector.load %arg2[%c0_416, %c1_417, %c7_418, %c0_419, %c0_420] : memref<1x4x8x8x128xf32, #tpu.memory_space<vmem>>, vector<1x1x1x8x128xf32>
    %530 = vector.shape_cast %529 : vector<1x1x1x8x128xf32> to vector<8x128xf32>
    %531 = arith.mulf %530, %101 : vector<8x128xf32>
    %532 = arith.addf %524, %531 : vector<8x128xf32>
    %533 = arith.mulf %530, %105 : vector<8x128xf32>
    %534 = arith.addf %526, %533 : vector<8x128xf32>
    %535 = arith.mulf %530, %109 : vector<8x128xf32>
    %536 = arith.addf %528, %535 : vector<8x128xf32>
    %c0_421 = arith.constant 0 : index
    %c1_422 = arith.constant 1 : index
    %c0_423 = arith.constant 0 : index
    %537 = vector.load %arg6[%c0_421, %c1_422, %c0_423] : memref<2x16x128xf32, #tpu.memory_space<vmem>>, vector<1x8x128xf32>
    %538 = vector.shape_cast %537 : vector<1x8x128xf32> to vector<8x128xf32>
    %539 = vector.shape_cast %532 : vector<8x128xf32> to vector<1x8x128xf32>
    tpu.vector_store %arg6[%c0_421, %c1_422, %c0_423], %539 {strides = array<i32>} : memref<2x16x128xf32, #tpu.memory_space<vmem>>, vector<1x8x128xf32>,
    %c1_424 = arith.constant 1 : index
    %c0_425 = arith.constant 0 : index
    %c0_426 = arith.constant 0 : index
    %540 = vector.load %arg6[%c1_424, %c0_425, %c0_426] : memref<2x16x128xf32, #tpu.memory_space<vmem>>, vector<1x8x128xf32>
    %541 = vector.shape_cast %540 : vector<1x8x128xf32> to vector<8x128xf32>
    %542 = vector.shape_cast %536 : vector<8x128xf32> to vector<1x8x128xf32>
    tpu.vector_store %arg6[%c1_424, %c0_425, %c0_426], %542 {strides = array<i32>} : memref<2x16x128xf32, #tpu.memory_space<vmem>>, vector<1x8x128xf32>,
    %c0_427 = arith.constant 0 : index
    %c0_428 = arith.constant 0 : index
    %c0_429 = arith.constant 0 : index
    %543 = vector.load %arg6[%c0_427, %c0_428, %c0_429] : memref<2x16x128xf32, #tpu.memory_space<vmem>>, vector<1x8x128xf32>
    %544 = vector.shape_cast %543 : vector<1x8x128xf32> to vector<8x128xf32>
    %c1_430 = arith.constant 1 : index
    %c1_431 = arith.constant 1 : index
    %c0_432 = arith.constant 0 : index
    %545 = vector.load %arg6[%c1_430, %c1_431, %c0_432] : memref<2x16x128xf32, #tpu.memory_space<vmem>>, vector<1x8x128xf32>
    %546 = vector.shape_cast %545 : vector<1x8x128xf32> to vector<8x128xf32>
    %547 = arith.addf %534, %544 : vector<8x128xf32>
    %548 = arith.addf %547, %546 : vector<8x128xf32>
    %c0_433 = arith.constant 0 : index
    %c0_434 = arith.constant 0 : index
    %c6_435 = arith.constant 6 : index
    %c0_436 = arith.constant 0 : index
    %c0_437 = arith.constant 0 : index
    %549 = vector.load %arg5[%c0_433, %c0_434, %c6_435, %c0_436, %c0_437] : memref<1x4x8x8x128xf32, #tpu.memory_space<vmem>>, vector<1x1x1x8x128xf32>
    %550 = vector.shape_cast %549 : vector<1x1x1x8x128xf32> to vector<8x128xf32>
    %551 = vector.shape_cast %548 : vector<8x128xf32> to vector<1x1x1x8x128xf32>
    tpu.vector_store %arg5[%c0_433, %c0_434, %c6_435, %c0_436, %c0_437], %551 {strides = array<i32>} : memref<1x4x8x8x128xf32, #tpu.memory_space<vmem>>, vector<1x1x1x8x128xf32>,
    %cst_438 = arith.constant 0.000000e+00 : f32
    %552 = vector.broadcast %cst_438 : f32 to vector<8x128xf32>
    %cst_439 = arith.constant 0.000000e+00 : f32
    %553 = vector.broadcast %cst_439 : f32 to vector<8x128xf32>
    %c0_440 = arith.constant 0 : index
    %c0_441 = arith.constant 0 : index
    %c6_442 = arith.constant 6 : index
    %c0_443 = arith.constant 0 : index
    %c0_444 = arith.constant 0 : index
    %554 = vector.load %arg2[%c0_440, %c0_441, %c6_442, %c0_443, %c0_444] : memref<1x4x8x8x128xf32, #tpu.memory_space<vmem>>, vector<1x1x1x8x128xf32>
    %555 = vector.shape_cast %554 : vector<1x1x1x8x128xf32> to vector<8x128xf32>
    %556 = arith.mulf %555, %41 : vector<8x128xf32>
    %557 = arith.addf %552, %556 : vector<8x128xf32>
    %558 = arith.mulf %555, %45 : vector<8x128xf32>
    %559 = arith.addf %112, %558 : vector<8x128xf32>
    %560 = arith.mulf %555, %49 : vector<8x128xf32>
    %561 = arith.addf %553, %560 : vector<8x128xf32>
    %c0_445 = arith.constant 0 : index
    %c0_446 = arith.constant 0 : index
    %c7_447 = arith.constant 7 : index
    %c0_448 = arith.constant 0 : index
    %c0_449 = arith.constant 0 : index
    %562 = vector.load %arg2[%c0_445, %c0_446, %c7_447, %c0_448, %c0_449] : memref<1x4x8x8x128xf32, #tpu.memory_space<vmem>>, vector<1x1x1x8x128xf32>
    %563 = vector.shape_cast %562 : vector<1x1x1x8x128xf32> to vector<8x128xf32>
    %564 = arith.mulf %563, %53 : vector<8x128xf32>
    %565 = arith.addf %557, %564 : vector<8x128xf32>
    %566 = arith.mulf %563, %57 : vector<8x128xf32>
    %567 = arith.addf %559, %566 : vector<8x128xf32>
    %568 = arith.mulf %563, %61 : vector<8x128xf32>
    %569 = arith.addf %561, %568 : vector<8x128xf32>
    %c0_450 = arith.constant 0 : index
    %c1_451 = arith.constant 1 : index
    %c6_452 = arith.constant 6 : index
    %c0_453 = arith.constant 0 : index
    %c0_454 = arith.constant 0 : index
    %570 = vector.load %arg2[%c0_450, %c1_451, %c6_452, %c0_453, %c0_454] : memref<1x4x8x8x128xf32, #tpu.memory_space<vmem>>, vector<1x1x1x8x128xf32>
    %571 = vector.shape_cast %570 : vector<1x1x1x8x128xf32> to vector<8x128xf32>
    %572 = arith.mulf %571, %77 : vector<8x128xf32>
    %573 = arith.addf %565, %572 : vector<8x128xf32>
    %574 = arith.mulf %571, %81 : vector<8x128xf32>
    %575 = arith.addf %567, %574 : vector<8x128xf32>
    %576 = arith.mulf %571, %85 : vector<8x128xf32>
    %577 = arith.addf %569, %576 : vector<8x128xf32>
    %c0_455 = arith.constant 0 : index
    %c1_456 = arith.constant 1 : index
    %c7_457 = arith.constant 7 : index
    %c0_458 = arith.constant 0 : index
    %c0_459 = arith.constant 0 : index
    %578 = vector.load %arg2[%c0_455, %c1_456, %c7_457, %c0_458, %c0_459] : memref<1x4x8x8x128xf32, #tpu.memory_space<vmem>>, vector<1x1x1x8x128xf32>
    %579 = vector.shape_cast %578 : vector<1x1x1x8x128xf32> to vector<8x128xf32>
    %580 = arith.mulf %579, %89 : vector<8x128xf32>
    %581 = arith.addf %573, %580 : vector<8x128xf32>
    %582 = arith.mulf %579, %93 : vector<8x128xf32>
    %583 = arith.addf %575, %582 : vector<8x128xf32>
    %584 = arith.mulf %579, %97 : vector<8x128xf32>
    %585 = arith.addf %577, %584 : vector<8x128xf32>
    %c0_460 = arith.constant 0 : index
    %c1_461 = arith.constant 1 : index
    %c0_462 = arith.constant 0 : index
    %586 = vector.load %arg6[%c0_460, %c1_461, %c0_462] : memref<2x16x128xf32, #tpu.memory_space<vmem>>, vector<1x8x128xf32>
    %587 = vector.shape_cast %586 : vector<1x8x128xf32> to vector<8x128xf32>
    %588 = vector.shape_cast %581 : vector<8x128xf32> to vector<1x8x128xf32>
    tpu.vector_store %arg6[%c0_460, %c1_461, %c0_462], %588 {strides = array<i32>} : memref<2x16x128xf32, #tpu.memory_space<vmem>>, vector<1x8x128xf32>,
    %c1_463 = arith.constant 1 : index
    %c0_464 = arith.constant 0 : index
    %c0_465 = arith.constant 0 : index
    %589 = vector.load %arg6[%c1_463, %c0_464, %c0_465] : memref<2x16x128xf32, #tpu.memory_space<vmem>>, vector<1x8x128xf32>
    %590 = vector.shape_cast %589 : vector<1x8x128xf32> to vector<8x128xf32>
    %591 = vector.shape_cast %585 : vector<8x128xf32> to vector<1x8x128xf32>
    tpu.vector_store %arg6[%c1_463, %c0_464, %c0_465], %591 {strides = array<i32>} : memref<2x16x128xf32, #tpu.memory_space<vmem>>, vector<1x8x128xf32>,
    %c0_466 = arith.constant 0 : index
    %c0_467 = arith.constant 0 : index
    %c0_468 = arith.constant 0 : index
    %592 = vector.load %arg6[%c0_466, %c0_467, %c0_468] : memref<2x16x128xf32, #tpu.memory_space<vmem>>, vector<1x8x128xf32>
    %593 = vector.shape_cast %592 : vector<1x8x128xf32> to vector<8x128xf32>
    %c1_469 = arith.constant 1 : index
    %c1_470 = arith.constant 1 : index
    %c0_471 = arith.constant 0 : index
    %594 = vector.load %arg6[%c1_469, %c1_470, %c0_471] : memref<2x16x128xf32, #tpu.memory_space<vmem>>, vector<1x8x128xf32>
    %595 = vector.shape_cast %594 : vector<1x8x128xf32> to vector<8x128xf32>
    %596 = arith.addf %583, %593 : vector<8x128xf32>
    %597 = arith.addf %596, %595 : vector<8x128xf32>
    %c0_472 = arith.constant 0 : index
    %c0_473 = arith.constant 0 : index
    %c7_474 = arith.constant 7 : index
    %c0_475 = arith.constant 0 : index
    %c0_476 = arith.constant 0 : index
    %598 = vector.load %arg5[%c0_472, %c0_473, %c7_474, %c0_475, %c0_476] : memref<1x4x8x8x128xf32, #tpu.memory_space<vmem>>, vector<1x1x1x8x128xf32>
    %599 = vector.shape_cast %598 : vector<1x1x1x8x128xf32> to vector<8x128xf32>
    %600 = vector.shape_cast %597 : vector<8x128xf32> to vector<1x1x1x8x128xf32>
    tpu.vector_store %arg5[%c0_472, %c0_473, %c7_474, %c0_475, %c0_476], %600 {strides = array<i32>} : memref<1x4x8x8x128xf32, #tpu.memory_space<vmem>>, vector<1x1x1x8x128xf32>,
    %cst_477 = arith.constant 0.000000e+00 : f32
    %601 = vector.broadcast %cst_477 : f32 to vector<8x128xf32>
    %cst_478 = arith.constant 0.000000e+00 : f32
    %602 = vector.broadcast %cst_478 : f32 to vector<8x128xf32>
    %c0_479 = arith.constant 0 : index
    %c0_480 = arith.constant 0 : index
    %c0_481 = arith.constant 0 : index
    %c0_482 = arith.constant 0 : index
    %c0_483 = arith.constant 0 : index
    %603 = vector.load %arg2[%c0_479, %c0_480, %c0_481, %c0_482, %c0_483] : memref<1x4x8x8x128xf32, #tpu.memory_space<vmem>>, vector<1x1x1x8x128xf32>
    %604 = vector.shape_cast %603 : vector<1x1x1x8x128xf32> to vector<8x128xf32>
    %605 = arith.mulf %604, %17 : vector<8x128xf32>
    %606 = arith.addf %601, %605 : vector<8x128xf32>
    %607 = arith.mulf %604, %21 : vector<8x128xf32>
    %608 = arith.addf %112, %607 : vector<8x128xf32>
    %609 = arith.mulf %604, %25 : vector<8x128xf32>
    %610 = arith.addf %602, %609 : vector<8x128xf32>
    %c0_484 = arith.constant 0 : index
    %c0_485 = arith.constant 0 : index
    %c1_486 = arith.constant 1 : index
    %c0_487 = arith.constant 0 : index
    %c0_488 = arith.constant 0 : index
    %611 = vector.load %arg2[%c0_484, %c0_485, %c1_486, %c0_487, %c0_488] : memref<1x4x8x8x128xf32, #tpu.memory_space<vmem>>, vector<1x1x1x8x128xf32>
    %612 = vector.shape_cast %611 : vector<1x1x1x8x128xf32> to vector<8x128xf32>
    %613 = arith.mulf %612, %29 : vector<8x128xf32>
    %614 = arith.addf %606, %613 : vector<8x128xf32>
    %615 = arith.mulf %612, %33 : vector<8x128xf32>
    %616 = arith.addf %608, %615 : vector<8x128xf32>
    %617 = arith.mulf %612, %37 : vector<8x128xf32>
    %618 = arith.addf %610, %617 : vector<8x128xf32>
    %c0_489 = arith.constant 0 : index
    %c1_490 = arith.constant 1 : index
    %c0_491 = arith.constant 0 : index
    %c0_492 = arith.constant 0 : index
    %c0_493 = arith.constant 0 : index
    %619 = vector.load %arg2[%c0_489, %c1_490, %c0_491, %c0_492, %c0_493] : memref<1x4x8x8x128xf32, #tpu.memory_space<vmem>>, vector<1x1x1x8x128xf32>
    %620 = vector.shape_cast %619 : vector<1x1x1x8x128xf32> to vector<8x128xf32>
    %621 = arith.mulf %620, %53 : vector<8x128xf32>
    %622 = arith.addf %614, %621 : vector<8x128xf32>
    %623 = arith.mulf %620, %57 : vector<8x128xf32>
    %624 = arith.addf %616, %623 : vector<8x128xf32>
    %625 = arith.mulf %620, %61 : vector<8x128xf32>
    %626 = arith.addf %618, %625 : vector<8x128xf32>
    %c0_494 = arith.constant 0 : index
    %c1_495 = arith.constant 1 : index
    %c1_496 = arith.constant 1 : index
    %c0_497 = arith.constant 0 : index
    %c0_498 = arith.constant 0 : index
    %627 = vector.load %arg2[%c0_494, %c1_495, %c1_496, %c0_497, %c0_498] : memref<1x4x8x8x128xf32, #tpu.memory_space<vmem>>, vector<1x1x1x8x128xf32>
    %628 = vector.shape_cast %627 : vector<1x1x1x8x128xf32> to vector<8x128xf32>
    %629 = arith.mulf %628, %65 : vector<8x128xf32>
    %630 = arith.addf %622, %629 : vector<8x128xf32>
    %631 = arith.mulf %628, %69 : vector<8x128xf32>
    %632 = arith.addf %624, %631 : vector<8x128xf32>
    %633 = arith.mulf %628, %73 : vector<8x128xf32>
    %634 = arith.addf %626, %633 : vector<8x128xf32>
    %c0_499 = arith.constant 0 : index
    %c2_500 = arith.constant 2 : index
    %c0_501 = arith.constant 0 : index
    %c0_502 = arith.constant 0 : index
    %c0_503 = arith.constant 0 : index
    %635 = vector.load %arg2[%c0_499, %c2_500, %c0_501, %c0_502, %c0_503] : memref<1x4x8x8x128xf32, #tpu.memory_space<vmem>>, vector<1x1x1x8x128xf32>
    %636 = vector.shape_cast %635 : vector<1x1x1x8x128xf32> to vector<8x128xf32>
    %637 = arith.mulf %636, %89 : vector<8x128xf32>
    %638 = arith.addf %630, %637 : vector<8x128xf32>
    %639 = arith.mulf %636, %93 : vector<8x128xf32>
    %640 = arith.addf %632, %639 : vector<8x128xf32>
    %641 = arith.mulf %636, %97 : vector<8x128xf32>
    %642 = arith.addf %634, %641 : vector<8x128xf32>
    %c0_504 = arith.constant 0 : index
    %c2_505 = arith.constant 2 : index
    %c1_506 = arith.constant 1 : index
    %c0_507 = arith.constant 0 : index
    %c0_508 = arith.constant 0 : index
    %643 = vector.load %arg2[%c0_504, %c2_505, %c1_506, %c0_507, %c0_508] : memref<1x4x8x8x128xf32, #tpu.memory_space<vmem>>, vector<1x1x1x8x128xf32>
    %644 = vector.shape_cast %643 : vector<1x1x1x8x128xf32> to vector<8x128xf32>
    %645 = arith.mulf %644, %101 : vector<8x128xf32>
    %646 = arith.addf %638, %645 : vector<8x128xf32>
    %647 = arith.mulf %644, %105 : vector<8x128xf32>
    %648 = arith.addf %640, %647 : vector<8x128xf32>
    %649 = arith.mulf %644, %109 : vector<8x128xf32>
    %650 = arith.addf %642, %649 : vector<8x128xf32>
    %c0_509 = arith.constant 0 : index
    %c1_510 = arith.constant 1 : index
    %c0_511 = arith.constant 0 : index
    %651 = vector.load %arg6[%c0_509, %c1_510, %c0_511] : memref<2x16x128xf32, #tpu.memory_space<vmem>>, vector<1x8x128xf32>
    %652 = vector.shape_cast %651 : vector<1x8x128xf32> to vector<8x128xf32>
    %653 = vector.shape_cast %646 : vector<8x128xf32> to vector<1x8x128xf32>
    tpu.vector_store %arg6[%c0_509, %c1_510, %c0_511], %653 {strides = array<i32>} : memref<2x16x128xf32, #tpu.memory_space<vmem>>, vector<1x8x128xf32>,
    %c1_512 = arith.constant 1 : index
    %c0_513 = arith.constant 0 : index
    %c0_514 = arith.constant 0 : index
    %654 = vector.load %arg6[%c1_512, %c0_513, %c0_514] : memref<2x16x128xf32, #tpu.memory_space<vmem>>, vector<1x8x128xf32>
    %655 = vector.shape_cast %654 : vector<1x8x128xf32> to vector<8x128xf32>
    %656 = vector.shape_cast %650 : vector<8x128xf32> to vector<1x8x128xf32>
    tpu.vector_store %arg6[%c1_512, %c0_513, %c0_514], %656 {strides = array<i32>} : memref<2x16x128xf32, #tpu.memory_space<vmem>>, vector<1x8x128xf32>,
    %c0_515 = arith.constant 0 : index
    %c0_516 = arith.constant 0 : index
    %c0_517 = arith.constant 0 : index
    %657 = vector.load %arg6[%c0_515, %c0_516, %c0_517] : memref<2x16x128xf32, #tpu.memory_space<vmem>>, vector<1x8x128xf32>
    %658 = vector.shape_cast %657 : vector<1x8x128xf32> to vector<8x128xf32>
    %c1_518 = arith.constant 1 : index
    %c1_519 = arith.constant 1 : index
    %c0_520 = arith.constant 0 : index
    %659 = vector.load %arg6[%c1_518, %c1_519, %c0_520] : memref<2x16x128xf32, #tpu.memory_space<vmem>>, vector<1x8x128xf32>
    %660 = vector.shape_cast %659 : vector<1x8x128xf32> to vector<8x128xf32>
    %661 = arith.addf %648, %658 : vector<8x128xf32>
    %662 = arith.addf %661, %660 : vector<8x128xf32>
    %c0_521 = arith.constant 0 : index
    %c1_522 = arith.constant 1 : index
    %c0_523 = arith.constant 0 : index
    %c0_524 = arith.constant 0 : index
    %c0_525 = arith.constant 0 : index
    %663 = vector.load %arg5[%c0_521, %c1_522, %c0_523, %c0_524, %c0_525] : memref<1x4x8x8x128xf32, #tpu.memory_space<vmem>>, vector<1x1x1x8x128xf32>
    %664 = vector.shape_cast %663 : vector<1x1x1x8x128xf32> to vector<8x128xf32>
    %665 = vector.shape_cast %662 : vector<8x128xf32> to vector<1x1x1x8x128xf32>
    tpu.vector_store %arg5[%c0_521, %c1_522, %c0_523, %c0_524, %c0_525], %665 {strides = array<i32>} : memref<1x4x8x8x128xf32, #tpu.memory_space<vmem>>, vector<1x1x1x8x128xf32>,
    %cst_526 = arith.constant 0.000000e+00 : f32
    %666 = vector.broadcast %cst_526 : f32 to vector<8x128xf32>
    %cst_527 = arith.constant 0.000000e+00 : f32
    %667 = vector.broadcast %cst_527 : f32 to vector<8x128xf32>
    %c0_528 = arith.constant 0 : index
    %c0_529 = arith.constant 0 : index
    %c0_530 = arith.constant 0 : index
    %c0_531 = arith.constant 0 : index
    %c0_532 = arith.constant 0 : index
    %668 = vector.load %arg2[%c0_528, %c0_529, %c0_530, %c0_531, %c0_532] : memref<1x4x8x8x128xf32, #tpu.memory_space<vmem>>, vector<1x1x1x8x128xf32>
    %669 = vector.shape_cast %668 : vector<1x1x1x8x128xf32> to vector<8x128xf32>
    %670 = arith.mulf %669, %5 : vector<8x128xf32>
    %671 = arith.addf %666, %670 : vector<8x128xf32>
    %672 = arith.mulf %669, %9 : vector<8x128xf32>
    %673 = arith.addf %112, %672 : vector<8x128xf32>
    %674 = arith.mulf %669, %13 : vector<8x128xf32>
    %675 = arith.addf %667, %674 : vector<8x128xf32>
    %c0_533 = arith.constant 0 : index
    %c0_534 = arith.constant 0 : index
    %c1_535 = arith.constant 1 : index
    %c0_536 = arith.constant 0 : index
    %c0_537 = arith.constant 0 : index
    %676 = vector.load %arg2[%c0_533, %c0_534, %c1_535, %c0_536, %c0_537] : memref<1x4x8x8x128xf32, #tpu.memory_space<vmem>>, vector<1x1x1x8x128xf32>
    %677 = vector.shape_cast %676 : vector<1x1x1x8x128xf32> to vector<8x128xf32>
    %678 = arith.mulf %677, %17 : vector<8x128xf32>
    %679 = arith.addf %671, %678 : vector<8x128xf32>
    %680 = arith.mulf %677, %21 : vector<8x128xf32>
    %681 = arith.addf %673, %680 : vector<8x128xf32>
    %682 = arith.mulf %677, %25 : vector<8x128xf32>
    %683 = arith.addf %675, %682 : vector<8x128xf32>
    %c0_538 = arith.constant 0 : index
    %c0_539 = arith.constant 0 : index
    %c2_540 = arith.constant 2 : index
    %c0_541 = arith.constant 0 : index
    %c0_542 = arith.constant 0 : index
    %684 = vector.load %arg2[%c0_538, %c0_539, %c2_540, %c0_541, %c0_542] : memref<1x4x8x8x128xf32, #tpu.memory_space<vmem>>, vector<1x1x1x8x128xf32>
    %685 = vector.shape_cast %684 : vector<1x1x1x8x128xf32> to vector<8x128xf32>
    %686 = arith.mulf %685, %29 : vector<8x128xf32>
    %687 = arith.addf %679, %686 : vector<8x128xf32>
    %688 = arith.mulf %685, %33 : vector<8x128xf32>
    %689 = arith.addf %681, %688 : vector<8x128xf32>
    %690 = arith.mulf %685, %37 : vector<8x128xf32>
    %691 = arith.addf %683, %690 : vector<8x128xf32>
    %c0_543 = arith.constant 0 : index
    %c1_544 = arith.constant 1 : index
    %c0_545 = arith.constant 0 : index
    %c0_546 = arith.constant 0 : index
    %c0_547 = arith.constant 0 : index
    %692 = vector.load %arg2[%c0_543, %c1_544, %c0_545, %c0_546, %c0_547] : memref<1x4x8x8x128xf32, #tpu.memory_space<vmem>>, vector<1x1x1x8x128xf32>
    %693 = vector.shape_cast %692 : vector<1x1x1x8x128xf32> to vector<8x128xf32>
    %694 = arith.mulf %693, %41 : vector<8x128xf32>
    %695 = arith.addf %687, %694 : vector<8x128xf32>
    %696 = arith.mulf %693, %45 : vector<8x128xf32>
    %697 = arith.addf %689, %696 : vector<8x128xf32>
    %698 = arith.mulf %693, %49 : vector<8x128xf32>
    %699 = arith.addf %691, %698 : vector<8x128xf32>
    %c0_548 = arith.constant 0 : index
    %c1_549 = arith.constant 1 : index
    %c1_550 = arith.constant 1 : index
    %c0_551 = arith.constant 0 : index
    %c0_552 = arith.constant 0 : index
    %700 = vector.load %arg2[%c0_548, %c1_549, %c1_550, %c0_551, %c0_552] : memref<1x4x8x8x128xf32, #tpu.memory_space<vmem>>, vector<1x1x1x8x128xf32>
    %701 = vector.shape_cast %700 : vector<1x1x1x8x128xf32> to vector<8x128xf32>
    %702 = arith.mulf %701, %53 : vector<8x128xf32>
    %703 = arith.addf %695, %702 : vector<8x128xf32>
    %704 = arith.mulf %701, %57 : vector<8x128xf32>
    %705 = arith.addf %697, %704 : vector<8x128xf32>
    %706 = arith.mulf %701, %61 : vector<8x128xf32>
    %707 = arith.addf %699, %706 : vector<8x128xf32>
    %c0_553 = arith.constant 0 : index
    %c1_554 = arith.constant 1 : index
    %c2_555 = arith.constant 2 : index
    %c0_556 = arith.constant 0 : index
    %c0_557 = arith.constant 0 : index
    %708 = vector.load %arg2[%c0_553, %c1_554, %c2_555, %c0_556, %c0_557] : memref<1x4x8x8x128xf32, #tpu.memory_space<vmem>>, vector<1x1x1x8x128xf32>
    %709 = vector.shape_cast %708 : vector<1x1x1x8x128xf32> to vector<8x128xf32>
    %710 = arith.mulf %709, %65 : vector<8x128xf32>
    %711 = arith.addf %703, %710 : vector<8x128xf32>
    %712 = arith.mulf %709, %69 : vector<8x128xf32>
    %713 = arith.addf %705, %712 : vector<8x128xf32>
    %714 = arith.mulf %709, %73 : vector<8x128xf32>
    %715 = arith.addf %707, %714 : vector<8x128xf32>
    %c0_558 = arith.constant 0 : index
    %c2_559 = arith.constant 2 : index
    %c0_560 = arith.constant 0 : index
    %c0_561 = arith.constant 0 : index
    %c0_562 = arith.constant 0 : index
    %716 = vector.load %arg2[%c0_558, %c2_559, %c0_560, %c0_561, %c0_562] : memref<1x4x8x8x128xf32, #tpu.memory_space<vmem>>, vector<1x1x1x8x128xf32>
    %717 = vector.shape_cast %716 : vector<1x1x1x8x128xf32> to vector<8x128xf32>
    %718 = arith.mulf %717, %77 : vector<8x128xf32>
    %719 = arith.addf %711, %718 : vector<8x128xf32>
    %720 = arith.mulf %717, %81 : vector<8x128xf32>
    %721 = arith.addf %713, %720 : vector<8x128xf32>
    %722 = arith.mulf %717, %85 : vector<8x128xf32>
    %723 = arith.addf %715, %722 : vector<8x128xf32>
    %c0_563 = arith.constant 0 : index
    %c2_564 = arith.constant 2 : index
    %c1_565 = arith.constant 1 : index
    %c0_566 = arith.constant 0 : index
    %c0_567 = arith.constant 0 : index
    %724 = vector.load %arg2[%c0_563, %c2_564, %c1_565, %c0_566, %c0_567] : memref<1x4x8x8x128xf32, #tpu.memory_space<vmem>>, vector<1x1x1x8x128xf32>
    %725 = vector.shape_cast %724 : vector<1x1x1x8x128xf32> to vector<8x128xf32>
    %726 = arith.mulf %725, %89 : vector<8x128xf32>
    %727 = arith.addf %719, %726 : vector<8x128xf32>
    %728 = arith.mulf %725, %93 : vector<8x128xf32>
    %729 = arith.addf %721, %728 : vector<8x128xf32>
    %730 = arith.mulf %725, %97 : vector<8x128xf32>
    %731 = arith.addf %723, %730 : vector<8x128xf32>
    %c0_568 = arith.constant 0 : index
    %c2_569 = arith.constant 2 : index
    %c2_570 = arith.constant 2 : index
    %c0_571 = arith.constant 0 : index
    %c0_572 = arith.constant 0 : index
    %732 = vector.load %arg2[%c0_568, %c2_569, %c2_570, %c0_571, %c0_572] : memref<1x4x8x8x128xf32, #tpu.memory_space<vmem>>, vector<1x1x1x8x128xf32>
    %733 = vector.shape_cast %732 : vector<1x1x1x8x128xf32> to vector<8x128xf32>
    %734 = arith.mulf %733, %101 : vector<8x128xf32>
    %735 = arith.addf %727, %734 : vector<8x128xf32>
    %736 = arith.mulf %733, %105 : vector<8x128xf32>
    %737 = arith.addf %729, %736 : vector<8x128xf32>
    %738 = arith.mulf %733, %109 : vector<8x128xf32>
    %739 = arith.addf %731, %738 : vector<8x128xf32>
    %c0_573 = arith.constant 0 : index
    %c1_574 = arith.constant 1 : index
    %c0_575 = arith.constant 0 : index
    %740 = vector.load %arg6[%c0_573, %c1_574, %c0_575] : memref<2x16x128xf32, #tpu.memory_space<vmem>>, vector<1x8x128xf32>
    %741 = vector.shape_cast %740 : vector<1x8x128xf32> to vector<8x128xf32>
    %742 = vector.shape_cast %735 : vector<8x128xf32> to vector<1x8x128xf32>
    tpu.vector_store %arg6[%c0_573, %c1_574, %c0_575], %742 {strides = array<i32>} : memref<2x16x128xf32, #tpu.memory_space<vmem>>, vector<1x8x128xf32>,
    %c1_576 = arith.constant 1 : index
    %c0_577 = arith.constant 0 : index
    %c0_578 = arith.constant 0 : index
    %743 = vector.load %arg6[%c1_576, %c0_577, %c0_578] : memref<2x16x128xf32, #tpu.memory_space<vmem>>, vector<1x8x128xf32>
    %744 = vector.shape_cast %743 : vector<1x8x128xf32> to vector<8x128xf32>
    %745 = vector.shape_cast %739 : vector<8x128xf32> to vector<1x8x128xf32>
    tpu.vector_store %arg6[%c1_576, %c0_577, %c0_578], %745 {strides = array<i32>} : memref<2x16x128xf32, #tpu.memory_space<vmem>>, vector<1x8x128xf32>,
    %c0_579 = arith.constant 0 : index
    %c0_580 = arith.constant 0 : index
    %c0_581 = arith.constant 0 : index
    %746 = vector.load %arg6[%c0_579, %c0_580, %c0_581] : memref<2x16x128xf32, #tpu.memory_space<vmem>>, vector<1x8x128xf32>
    %747 = vector.shape_cast %746 : vector<1x8x128xf32> to vector<8x128xf32>
    %c1_582 = arith.constant 1 : index
    %c1_583 = arith.constant 1 : index
    %c0_584 = arith.constant 0 : index
    %748 = vector.load %arg6[%c1_582, %c1_583, %c0_584] : memref<2x16x128xf32, #tpu.memory_space<vmem>>, vector<1x8x128xf32>
    %749 = vector.shape_cast %748 : vector<1x8x128xf32> to vector<8x128xf32>
    %750 = arith.addf %737, %747 : vector<8x128xf32>
    %751 = arith.addf %750, %749 : vector<8x128xf32>
    %c0_585 = arith.constant 0 : index
    %c1_586 = arith.constant 1 : index
    %c1_587 = arith.constant 1 : index
    %c0_588 = arith.constant 0 : index
    %c0_589 = arith.constant 0 : index
    %752 = vector.load %arg5[%c0_585, %c1_586, %c1_587, %c0_588, %c0_589] : memref<1x4x8x8x128xf32, #tpu.memory_space<vmem>>, vector<1x1x1x8x128xf32>
    %753 = vector.shape_cast %752 : vector<1x1x1x8x128xf32> to vector<8x128xf32>
    %754 = vector.shape_cast %751 : vector<8x128xf32> to vector<1x1x1x8x128xf32>
    tpu.vector_store %arg5[%c0_585, %c1_586, %c1_587, %c0_588, %c0_589], %754 {strides = array<i32>} : memref<1x4x8x8x128xf32, #tpu.memory_space<vmem>>, vector<1x1x1x8x128xf32>,
    %cst_590 = arith.constant 0.000000e+00 : f32
    %755 = vector.broadcast %cst_590 : f32 to vector<8x128xf32>
    %cst_591 = arith.constant 0.000000e+00 : f32
    %756 = vector.broadcast %cst_591 : f32 to vector<8x128xf32>
    %c0_592 = arith.constant 0 : index
    %c0_593 = arith.constant 0 : index
    %c1_594 = arith.constant 1 : index
    %c0_595 = arith.constant 0 : index
    %c0_596 = arith.constant 0 : index
    %757 = vector.load %arg2[%c0_592, %c0_593, %c1_594, %c0_595, %c0_596] : memref<1x4x8x8x128xf32, #tpu.memory_space<vmem>>, vector<1x1x1x8x128xf32>
    %758 = vector.shape_cast %757 : vector<1x1x1x8x128xf32> to vector<8x128xf32>
    %759 = arith.mulf %758, %5 : vector<8x128xf32>
    %760 = arith.addf %755, %759 : vector<8x128xf32>
    %761 = arith.mulf %758, %9 : vector<8x128xf32>
    %762 = arith.addf %112, %761 : vector<8x128xf32>
    %763 = arith.mulf %758, %13 : vector<8x128xf32>
    %764 = arith.addf %756, %763 : vector<8x128xf32>
    %c0_597 = arith.constant 0 : index
    %c0_598 = arith.constant 0 : index
    %c2_599 = arith.constant 2 : index
    %c0_600 = arith.constant 0 : index
    %c0_601 = arith.constant 0 : index
    %765 = vector.load %arg2[%c0_597, %c0_598, %c2_599, %c0_600, %c0_601] : memref<1x4x8x8x128xf32, #tpu.memory_space<vmem>>, vector<1x1x1x8x128xf32>
    %766 = vector.shape_cast %765 : vector<1x1x1x8x128xf32> to vector<8x128xf32>
    %767 = arith.mulf %766, %17 : vector<8x128xf32>
    %768 = arith.addf %760, %767 : vector<8x128xf32>
    %769 = arith.mulf %766, %21 : vector<8x128xf32>
    %770 = arith.addf %762, %769 : vector<8x128xf32>
    %771 = arith.mulf %766, %25 : vector<8x128xf32>
    %772 = arith.addf %764, %771 : vector<8x128xf32>
    %c0_602 = arith.constant 0 : index
    %c0_603 = arith.constant 0 : index
    %c3_604 = arith.constant 3 : index
    %c0_605 = arith.constant 0 : index
    %c0_606 = arith.constant 0 : index
    %773 = vector.load %arg2[%c0_602, %c0_603, %c3_604, %c0_605, %c0_606] : memref<1x4x8x8x128xf32, #tpu.memory_space<vmem>>, vector<1x1x1x8x128xf32>
    %774 = vector.shape_cast %773 : vector<1x1x1x8x128xf32> to vector<8x128xf32>
    %775 = arith.mulf %774, %29 : vector<8x128xf32>
    %776 = arith.addf %768, %775 : vector<8x128xf32>
    %777 = arith.mulf %774, %33 : vector<8x128xf32>
    %778 = arith.addf %770, %777 : vector<8x128xf32>
    %779 = arith.mulf %774, %37 : vector<8x128xf32>
    %780 = arith.addf %772, %779 : vector<8x128xf32>
    %c0_607 = arith.constant 0 : index
    %c1_608 = arith.constant 1 : index
    %c1_609 = arith.constant 1 : index
    %c0_610 = arith.constant 0 : index
    %c0_611 = arith.constant 0 : index
    %781 = vector.load %arg2[%c0_607, %c1_608, %c1_609, %c0_610, %c0_611] : memref<1x4x8x8x128xf32, #tpu.memory_space<vmem>>, vector<1x1x1x8x128xf32>
    %782 = vector.shape_cast %781 : vector<1x1x1x8x128xf32> to vector<8x128xf32>
    %783 = arith.mulf %782, %41 : vector<8x128xf32>
    %784 = arith.addf %776, %783 : vector<8x128xf32>
    %785 = arith.mulf %782, %45 : vector<8x128xf32>
    %786 = arith.addf %778, %785 : vector<8x128xf32>
    %787 = arith.mulf %782, %49 : vector<8x128xf32>
    %788 = arith.addf %780, %787 : vector<8x128xf32>
    %c0_612 = arith.constant 0 : index
    %c1_613 = arith.constant 1 : index
    %c2_614 = arith.constant 2 : index
    %c0_615 = arith.constant 0 : index
    %c0_616 = arith.constant 0 : index
    %789 = vector.load %arg2[%c0_612, %c1_613, %c2_614, %c0_615, %c0_616] : memref<1x4x8x8x128xf32, #tpu.memory_space<vmem>>, vector<1x1x1x8x128xf32>
    %790 = vector.shape_cast %789 : vector<1x1x1x8x128xf32> to vector<8x128xf32>
    %791 = arith.mulf %790, %53 : vector<8x128xf32>
    %792 = arith.addf %784, %791 : vector<8x128xf32>
    %793 = arith.mulf %790, %57 : vector<8x128xf32>
    %794 = arith.addf %786, %793 : vector<8x128xf32>
    %795 = arith.mulf %790, %61 : vector<8x128xf32>
    %796 = arith.addf %788, %795 : vector<8x128xf32>
    %c0_617 = arith.constant 0 : index
    %c1_618 = arith.constant 1 : index
    %c3_619 = arith.constant 3 : index
    %c0_620 = arith.constant 0 : index
    %c0_621 = arith.constant 0 : index
    %797 = vector.load %arg2[%c0_617, %c1_618, %c3_619, %c0_620, %c0_621] : memref<1x4x8x8x128xf32, #tpu.memory_space<vmem>>, vector<1x1x1x8x128xf32>
    %798 = vector.shape_cast %797 : vector<1x1x1x8x128xf32> to vector<8x128xf32>
    %799 = arith.mulf %798, %65 : vector<8x128xf32>
    %800 = arith.addf %792, %799 : vector<8x128xf32>
    %801 = arith.mulf %798, %69 : vector<8x128xf32>
    %802 = arith.addf %794, %801 : vector<8x128xf32>
    %803 = arith.mulf %798, %73 : vector<8x128xf32>
    %804 = arith.addf %796, %803 : vector<8x128xf32>
    %c0_622 = arith.constant 0 : index
    %c2_623 = arith.constant 2 : index
    %c1_624 = arith.constant 1 : index
    %c0_625 = arith.constant 0 : index
    %c0_626 = arith.constant 0 : index
    %805 = vector.load %arg2[%c0_622, %c2_623, %c1_624, %c0_625, %c0_626] : memref<1x4x8x8x128xf32, #tpu.memory_space<vmem>>, vector<1x1x1x8x128xf32>
    %806 = vector.shape_cast %805 : vector<1x1x1x8x128xf32> to vector<8x128xf32>
    %807 = arith.mulf %806, %77 : vector<8x128xf32>
    %808 = arith.addf %800, %807 : vector<8x128xf32>
    %809 = arith.mulf %806, %81 : vector<8x128xf32>
    %810 = arith.addf %802, %809 : vector<8x128xf32>
    %811 = arith.mulf %806, %85 : vector<8x128xf32>
    %812 = arith.addf %804, %811 : vector<8x128xf32>
    %c0_627 = arith.constant 0 : index
    %c2_628 = arith.constant 2 : index
    %c2_629 = arith.constant 2 : index
    %c0_630 = arith.constant 0 : index
    %c0_631 = arith.constant 0 : index
    %813 = vector.load %arg2[%c0_627, %c2_628, %c2_629, %c0_630, %c0_631] : memref<1x4x8x8x128xf32, #tpu.memory_space<vmem>>, vector<1x1x1x8x128xf32>
    %814 = vector.shape_cast %813 : vector<1x1x1x8x128xf32> to vector<8x128xf32>
    %815 = arith.mulf %814, %89 : vector<8x128xf32>
    %816 = arith.addf %808, %815 : vector<8x128xf32>
    %817 = arith.mulf %814, %93 : vector<8x128xf32>
    %818 = arith.addf %810, %817 : vector<8x128xf32>
    %819 = arith.mulf %814, %97 : vector<8x128xf32>
    %820 = arith.addf %812, %819 : vector<8x128xf32>
    %c0_632 = arith.constant 0 : index
    %c2_633 = arith.constant 2 : index
    %c3_634 = arith.constant 3 : index
    %c0_635 = arith.constant 0 : index
    %c0_636 = arith.constant 0 : index
    %821 = vector.load %arg2[%c0_632, %c2_633, %c3_634, %c0_635, %c0_636] : memref<1x4x8x8x128xf32, #tpu.memory_space<vmem>>, vector<1x1x1x8x128xf32>
    %822 = vector.shape_cast %821 : vector<1x1x1x8x128xf32> to vector<8x128xf32>
    %823 = arith.mulf %822, %101 : vector<8x128xf32>
    %824 = arith.addf %816, %823 : vector<8x128xf32>
    %825 = arith.mulf %822, %105 : vector<8x128xf32>
    %826 = arith.addf %818, %825 : vector<8x128xf32>
    %827 = arith.mulf %822, %109 : vector<8x128xf32>
    %828 = arith.addf %820, %827 : vector<8x128xf32>
    %c0_637 = arith.constant 0 : index
    %c1_638 = arith.constant 1 : index
    %c0_639 = arith.constant 0 : index
    %829 = vector.load %arg6[%c0_637, %c1_638, %c0_639] : memref<2x16x128xf32, #tpu.memory_space<vmem>>, vector<1x8x128xf32>
    %830 = vector.shape_cast %829 : vector<1x8x128xf32> to vector<8x128xf32>
    %831 = vector.shape_cast %824 : vector<8x128xf32> to vector<1x8x128xf32>
    tpu.vector_store %arg6[%c0_637, %c1_638, %c0_639], %831 {strides = array<i32>} : memref<2x16x128xf32, #tpu.memory_space<vmem>>, vector<1x8x128xf32>,
    %c1_640 = arith.constant 1 : index
    %c0_641 = arith.constant 0 : index
    %c0_642 = arith.constant 0 : index
    %832 = vector.load %arg6[%c1_640, %c0_641, %c0_642] : memref<2x16x128xf32, #tpu.memory_space<vmem>>, vector<1x8x128xf32>
    %833 = vector.shape_cast %832 : vector<1x8x128xf32> to vector<8x128xf32>
    %834 = vector.shape_cast %828 : vector<8x128xf32> to vector<1x8x128xf32>
    tpu.vector_store %arg6[%c1_640, %c0_641, %c0_642], %834 {strides = array<i32>} : memref<2x16x128xf32, #tpu.memory_space<vmem>>, vector<1x8x128xf32>,
    %c0_643 = arith.constant 0 : index
    %c0_644 = arith.constant 0 : index
    %c0_645 = arith.constant 0 : index
    %835 = vector.load %arg6[%c0_643, %c0_644, %c0_645] : memref<2x16x128xf32, #tpu.memory_space<vmem>>, vector<1x8x128xf32>
    %836 = vector.shape_cast %835 : vector<1x8x128xf32> to vector<8x128xf32>
    %c1_646 = arith.constant 1 : index
    %c1_647 = arith.constant 1 : index
    %c0_648 = arith.constant 0 : index
    %837 = vector.load %arg6[%c1_646, %c1_647, %c0_648] : memref<2x16x128xf32, #tpu.memory_space<vmem>>, vector<1x8x128xf32>
    %838 = vector.shape_cast %837 : vector<1x8x128xf32> to vector<8x128xf32>
    %839 = arith.addf %826, %836 : vector<8x128xf32>
    %840 = arith.addf %839, %838 : vector<8x128xf32>
    %c0_649 = arith.constant 0 : index
    %c1_650 = arith.constant 1 : index
    %c2_651 = arith.constant 2 : index
    %c0_652 = arith.constant 0 : index
    %c0_653 = arith.constant 0 : index
    %841 = vector.load %arg5[%c0_649, %c1_650, %c2_651, %c0_652, %c0_653] : memref<1x4x8x8x128xf32, #tpu.memory_space<vmem>>, vector<1x1x1x8x128xf32>
    %842 = vector.shape_cast %841 : vector<1x1x1x8x128xf32> to vector<8x128xf32>
    %843 = vector.shape_cast %840 : vector<8x128xf32> to vector<1x1x1x8x128xf32>
    tpu.vector_store %arg5[%c0_649, %c1_650, %c2_651, %c0_652, %c0_653], %843 {strides = array<i32>} : memref<1x4x8x8x128xf32, #tpu.memory_space<vmem>>, vector<1x1x1x8x128xf32>,
    %cst_654 = arith.constant 0.000000e+00 : f32
    %844 = vector.broadcast %cst_654 : f32 to vector<8x128xf32>
    %cst_655 = arith.constant 0.000000e+00 : f32
    %845 = vector.broadcast %cst_655 : f32 to vector<8x128xf32>
    %c0_656 = arith.constant 0 : index
    %c0_657 = arith.constant 0 : index
    %c2_658 = arith.constant 2 : index
    %c0_659 = arith.constant 0 : index
    %c0_660 = arith.constant 0 : index
    %846 = vector.load %arg2[%c0_656, %c0_657, %c2_658, %c0_659, %c0_660] : memref<1x4x8x8x128xf32, #tpu.memory_space<vmem>>, vector<1x1x1x8x128xf32>
    %847 = vector.shape_cast %846 : vector<1x1x1x8x128xf32> to vector<8x128xf32>
    %848 = arith.mulf %847, %5 : vector<8x128xf32>
    %849 = arith.addf %844, %848 : vector<8x128xf32>
    %850 = arith.mulf %847, %9 : vector<8x128xf32>
    %851 = arith.addf %112, %850 : vector<8x128xf32>
    %852 = arith.mulf %847, %13 : vector<8x128xf32>
    %853 = arith.addf %845, %852 : vector<8x128xf32>
    %c0_661 = arith.constant 0 : index
    %c0_662 = arith.constant 0 : index
    %c3_663 = arith.constant 3 : index
    %c0_664 = arith.constant 0 : index
    %c0_665 = arith.constant 0 : index
    %854 = vector.load %arg2[%c0_661, %c0_662, %c3_663, %c0_664, %c0_665] : memref<1x4x8x8x128xf32, #tpu.memory_space<vmem>>, vector<1x1x1x8x128xf32>
    %855 = vector.shape_cast %854 : vector<1x1x1x8x128xf32> to vector<8x128xf32>
    %856 = arith.mulf %855, %17 : vector<8x128xf32>
    %857 = arith.addf %849, %856 : vector<8x128xf32>
    %858 = arith.mulf %855, %21 : vector<8x128xf32>
    %859 = arith.addf %851, %858 : vector<8x128xf32>
    %860 = arith.mulf %855, %25 : vector<8x128xf32>
    %861 = arith.addf %853, %860 : vector<8x128xf32>
    %c0_666 = arith.constant 0 : index
    %c0_667 = arith.constant 0 : index
    %c4_668 = arith.constant 4 : index
    %c0_669 = arith.constant 0 : index
    %c0_670 = arith.constant 0 : index
    %862 = vector.load %arg2[%c0_666, %c0_667, %c4_668, %c0_669, %c0_670] : memref<1x4x8x8x128xf32, #tpu.memory_space<vmem>>, vector<1x1x1x8x128xf32>
    %863 = vector.shape_cast %862 : vector<1x1x1x8x128xf32> to vector<8x128xf32>
    %864 = arith.mulf %863, %29 : vector<8x128xf32>
    %865 = arith.addf %857, %864 : vector<8x128xf32>
    %866 = arith.mulf %863, %33 : vector<8x128xf32>
    %867 = arith.addf %859, %866 : vector<8x128xf32>
    %868 = arith.mulf %863, %37 : vector<8x128xf32>
    %869 = arith.addf %861, %868 : vector<8x128xf32>
    %c0_671 = arith.constant 0 : index
    %c1_672 = arith.constant 1 : index
    %c2_673 = arith.constant 2 : index
    %c0_674 = arith.constant 0 : index
    %c0_675 = arith.constant 0 : index
    %870 = vector.load %arg2[%c0_671, %c1_672, %c2_673, %c0_674, %c0_675] : memref<1x4x8x8x128xf32, #tpu.memory_space<vmem>>, vector<1x1x1x8x128xf32>
    %871 = vector.shape_cast %870 : vector<1x1x1x8x128xf32> to vector<8x128xf32>
    %872 = arith.mulf %871, %41 : vector<8x128xf32>
    %873 = arith.addf %865, %872 : vector<8x128xf32>
    %874 = arith.mulf %871, %45 : vector<8x128xf32>
    %875 = arith.addf %867, %874 : vector<8x128xf32>
    %876 = arith.mulf %871, %49 : vector<8x128xf32>
    %877 = arith.addf %869, %876 : vector<8x128xf32>
    %c0_676 = arith.constant 0 : index
    %c1_677 = arith.constant 1 : index
    %c3_678 = arith.constant 3 : index
    %c0_679 = arith.constant 0 : index
    %c0_680 = arith.constant 0 : index
    %878 = vector.load %arg2[%c0_676, %c1_677, %c3_678, %c0_679, %c0_680] : memref<1x4x8x8x128xf32, #tpu.memory_space<vmem>>, vector<1x1x1x8x128xf32>
    %879 = vector.shape_cast %878 : vector<1x1x1x8x128xf32> to vector<8x128xf32>
    %880 = arith.mulf %879, %53 : vector<8x128xf32>
    %881 = arith.addf %873, %880 : vector<8x128xf32>
    %882 = arith.mulf %879, %57 : vector<8x128xf32>
    %883 = arith.addf %875, %882 : vector<8x128xf32>
    %884 = arith.mulf %879, %61 : vector<8x128xf32>
    %885 = arith.addf %877, %884 : vector<8x128xf32>
    %c0_681 = arith.constant 0 : index
    %c1_682 = arith.constant 1 : index
    %c4_683 = arith.constant 4 : index
    %c0_684 = arith.constant 0 : index
    %c0_685 = arith.constant 0 : index
    %886 = vector.load %arg2[%c0_681, %c1_682, %c4_683, %c0_684, %c0_685] : memref<1x4x8x8x128xf32, #tpu.memory_space<vmem>>, vector<1x1x1x8x128xf32>
    %887 = vector.shape_cast %886 : vector<1x1x1x8x128xf32> to vector<8x128xf32>
    %888 = arith.mulf %887, %65 : vector<8x128xf32>
    %889 = arith.addf %881, %888 : vector<8x128xf32>
    %890 = arith.mulf %887, %69 : vector<8x128xf32>
    %891 = arith.addf %883, %890 : vector<8x128xf32>
    %892 = arith.mulf %887, %73 : vector<8x128xf32>
    %893 = arith.addf %885, %892 : vector<8x128xf32>
    %c0_686 = arith.constant 0 : index
    %c2_687 = arith.constant 2 : index
    %c2_688 = arith.constant 2 : index
    %c0_689 = arith.constant 0 : index
    %c0_690 = arith.constant 0 : index
    %894 = vector.load %arg2[%c0_686, %c2_687, %c2_688, %c0_689, %c0_690] : memref<1x4x8x8x128xf32, #tpu.memory_space<vmem>>, vector<1x1x1x8x128xf32>
    %895 = vector.shape_cast %894 : vector<1x1x1x8x128xf32> to vector<8x128xf32>
    %896 = arith.mulf %895, %77 : vector<8x128xf32>
    %897 = arith.addf %889, %896 : vector<8x128xf32>
    %898 = arith.mulf %895, %81 : vector<8x128xf32>
    %899 = arith.addf %891, %898 : vector<8x128xf32>
    %900 = arith.mulf %895, %85 : vector<8x128xf32>
    %901 = arith.addf %893, %900 : vector<8x128xf32>
    %c0_691 = arith.constant 0 : index
    %c2_692 = arith.constant 2 : index
    %c3_693 = arith.constant 3 : index
    %c0_694 = arith.constant 0 : index
    %c0_695 = arith.constant 0 : index
    %902 = vector.load %arg2[%c0_691, %c2_692, %c3_693, %c0_694, %c0_695] : memref<1x4x8x8x128xf32, #tpu.memory_space<vmem>>, vector<1x1x1x8x128xf32>
    %903 = vector.shape_cast %902 : vector<1x1x1x8x128xf32> to vector<8x128xf32>
    %904 = arith.mulf %903, %89 : vector<8x128xf32>
    %905 = arith.addf %897, %904 : vector<8x128xf32>
    %906 = arith.mulf %903, %93 : vector<8x128xf32>
    %907 = arith.addf %899, %906 : vector<8x128xf32>
    %908 = arith.mulf %903, %97 : vector<8x128xf32>
    %909 = arith.addf %901, %908 : vector<8x128xf32>
    %c0_696 = arith.constant 0 : index
    %c2_697 = arith.constant 2 : index
    %c4_698 = arith.constant 4 : index
    %c0_699 = arith.constant 0 : index
    %c0_700 = arith.constant 0 : index
    %910 = vector.load %arg2[%c0_696, %c2_697, %c4_698, %c0_699, %c0_700] : memref<1x4x8x8x128xf32, #tpu.memory_space<vmem>>, vector<1x1x1x8x128xf32>
    %911 = vector.shape_cast %910 : vector<1x1x1x8x128xf32> to vector<8x128xf32>
    %912 = arith.mulf %911, %101 : vector<8x128xf32>
    %913 = arith.addf %905, %912 : vector<8x128xf32>
    %914 = arith.mulf %911, %105 : vector<8x128xf32>
    %915 = arith.addf %907, %914 : vector<8x128xf32>
    %916 = arith.mulf %911, %109 : vector<8x128xf32>
    %917 = arith.addf %909, %916 : vector<8x128xf32>
    %c0_701 = arith.constant 0 : index
    %c1_702 = arith.constant 1 : index
    %c0_703 = arith.constant 0 : index
    %918 = vector.load %arg6[%c0_701, %c1_702, %c0_703] : memref<2x16x128xf32, #tpu.memory_space<vmem>>, vector<1x8x128xf32>
    %919 = vector.shape_cast %918 : vector<1x8x128xf32> to vector<8x128xf32>
    %920 = vector.shape_cast %913 : vector<8x128xf32> to vector<1x8x128xf32>
    tpu.vector_store %arg6[%c0_701, %c1_702, %c0_703], %920 {strides = array<i32>} : memref<2x16x128xf32, #tpu.memory_space<vmem>>, vector<1x8x128xf32>,
    %c1_704 = arith.constant 1 : index
    %c0_705 = arith.constant 0 : index
    %c0_706 = arith.constant 0 : index
    %921 = vector.load %arg6[%c1_704, %c0_705, %c0_706] : memref<2x16x128xf32, #tpu.memory_space<vmem>>, vector<1x8x128xf32>
    %922 = vector.shape_cast %921 : vector<1x8x128xf32> to vector<8x128xf32>
    %923 = vector.shape_cast %917 : vector<8x128xf32> to vector<1x8x128xf32>
    tpu.vector_store %arg6[%c1_704, %c0_705, %c0_706], %923 {strides = array<i32>} : memref<2x16x128xf32, #tpu.memory_space<vmem>>, vector<1x8x128xf32>,
    %c0_707 = arith.constant 0 : index
    %c0_708 = arith.constant 0 : index
    %c0_709 = arith.constant 0 : index
    %924 = vector.load %arg6[%c0_707, %c0_708, %c0_709] : memref<2x16x128xf32, #tpu.memory_space<vmem>>, vector<1x8x128xf32>
    %925 = vector.shape_cast %924 : vector<1x8x128xf32> to vector<8x128xf32>
    %c1_710 = arith.constant 1 : index
    %c1_711 = arith.constant 1 : index
    %c0_712 = arith.constant 0 : index
    %926 = vector.load %arg6[%c1_710, %c1_711, %c0_712] : memref<2x16x128xf32, #tpu.memory_space<vmem>>, vector<1x8x128xf32>
    %927 = vector.shape_cast %926 : vector<1x8x128xf32> to vector<8x128xf32>
    %928 = arith.addf %915, %925 : vector<8x128xf32>
    %929 = arith.addf %928, %927 : vector<8x128xf32>
    %c0_713 = arith.constant 0 : index
    %c1_714 = arith.constant 1 : index
    %c3_715 = arith.constant 3 : index
    %c0_716 = arith.constant 0 : index
    %c0_717 = arith.constant 0 : index
    %930 = vector.load %arg5[%c0_713, %c1_714, %c3_715, %c0_716, %c0_717] : memref<1x4x8x8x128xf32, #tpu.memory_space<vmem>>, vector<1x1x1x8x128xf32>
    %931 = vector.shape_cast %930 : vector<1x1x1x8x128xf32> to vector<8x128xf32>
    %932 = vector.shape_cast %929 : vector<8x128xf32> to vector<1x1x1x8x128xf32>
    tpu.vector_store %arg5[%c0_713, %c1_714, %c3_715, %c0_716, %c0_717], %932 {strides = array<i32>} : memref<1x4x8x8x128xf32, #tpu.memory_space<vmem>>, vector<1x1x1x8x128xf32>,
    %cst_718 = arith.constant 0.000000e+00 : f32
    %933 = vector.broadcast %cst_718 : f32 to vector<8x128xf32>
    %cst_719 = arith.constant 0.000000e+00 : f32
    %934 = vector.broadcast %cst_719 : f32 to vector<8x128xf32>
    %c0_720 = arith.constant 0 : index
    %c0_721 = arith.constant 0 : index
    %c3_722 = arith.constant 3 : index
    %c0_723 = arith.constant 0 : index
    %c0_724 = arith.constant 0 : index
    %935 = vector.load %arg2[%c0_720, %c0_721, %c3_722, %c0_723, %c0_724] : memref<1x4x8x8x128xf32, #tpu.memory_space<vmem>>, vector<1x1x1x8x128xf32>
    %936 = vector.shape_cast %935 : vector<1x1x1x8x128xf32> to vector<8x128xf32>
    %937 = arith.mulf %936, %5 : vector<8x128xf32>
    %938 = arith.addf %933, %937 : vector<8x128xf32>
    %939 = arith.mulf %936, %9 : vector<8x128xf32>
    %940 = arith.addf %112, %939 : vector<8x128xf32>
    %941 = arith.mulf %936, %13 : vector<8x128xf32>
    %942 = arith.addf %934, %941 : vector<8x128xf32>
    %c0_725 = arith.constant 0 : index
    %c0_726 = arith.constant 0 : index
    %c4_727 = arith.constant 4 : index
    %c0_728 = arith.constant 0 : index
    %c0_729 = arith.constant 0 : index
    %943 = vector.load %arg2[%c0_725, %c0_726, %c4_727, %c0_728, %c0_729] : memref<1x4x8x8x128xf32, #tpu.memory_space<vmem>>, vector<1x1x1x8x128xf32>
    %944 = vector.shape_cast %943 : vector<1x1x1x8x128xf32> to vector<8x128xf32>
    %945 = arith.mulf %944, %17 : vector<8x128xf32>
    %946 = arith.addf %938, %945 : vector<8x128xf32>
    %947 = arith.mulf %944, %21 : vector<8x128xf32>
    %948 = arith.addf %940, %947 : vector<8x128xf32>
    %949 = arith.mulf %944, %25 : vector<8x128xf32>
    %950 = arith.addf %942, %949 : vector<8x128xf32>
    %c0_730 = arith.constant 0 : index
    %c0_731 = arith.constant 0 : index
    %c5_732 = arith.constant 5 : index
    %c0_733 = arith.constant 0 : index
    %c0_734 = arith.constant 0 : index
    %951 = vector.load %arg2[%c0_730, %c0_731, %c5_732, %c0_733, %c0_734] : memref<1x4x8x8x128xf32, #tpu.memory_space<vmem>>, vector<1x1x1x8x128xf32>
    %952 = vector.shape_cast %951 : vector<1x1x1x8x128xf32> to vector<8x128xf32>
    %953 = arith.mulf %952, %29 : vector<8x128xf32>
    %954 = arith.addf %946, %953 : vector<8x128xf32>
    %955 = arith.mulf %952, %33 : vector<8x128xf32>
    %956 = arith.addf %948, %955 : vector<8x128xf32>
    %957 = arith.mulf %952, %37 : vector<8x128xf32>
    %958 = arith.addf %950, %957 : vector<8x128xf32>
    %c0_735 = arith.constant 0 : index
    %c1_736 = arith.constant 1 : index
    %c3_737 = arith.constant 3 : index
    %c0_738 = arith.constant 0 : index
    %c0_739 = arith.constant 0 : index
    %959 = vector.load %arg2[%c0_735, %c1_736, %c3_737, %c0_738, %c0_739] : memref<1x4x8x8x128xf32, #tpu.memory_space<vmem>>, vector<1x1x1x8x128xf32>
    %960 = vector.shape_cast %959 : vector<1x1x1x8x128xf32> to vector<8x128xf32>
    %961 = arith.mulf %960, %41 : vector<8x128xf32>
    %962 = arith.addf %954, %961 : vector<8x128xf32>
    %963 = arith.mulf %960, %45 : vector<8x128xf32>
    %964 = arith.addf %956, %963 : vector<8x128xf32>
    %965 = arith.mulf %960, %49 : vector<8x128xf32>
    %966 = arith.addf %958, %965 : vector<8x128xf32>
    %c0_740 = arith.constant 0 : index
    %c1_741 = arith.constant 1 : index
    %c4_742 = arith.constant 4 : index
    %c0_743 = arith.constant 0 : index
    %c0_744 = arith.constant 0 : index
    %967 = vector.load %arg2[%c0_740, %c1_741, %c4_742, %c0_743, %c0_744] : memref<1x4x8x8x128xf32, #tpu.memory_space<vmem>>, vector<1x1x1x8x128xf32>
    %968 = vector.shape_cast %967 : vector<1x1x1x8x128xf32> to vector<8x128xf32>
    %969 = arith.mulf %968, %53 : vector<8x128xf32>
    %970 = arith.addf %962, %969 : vector<8x128xf32>
    %971 = arith.mulf %968, %57 : vector<8x128xf32>
    %972 = arith.addf %964, %971 : vector<8x128xf32>
    %973 = arith.mulf %968, %61 : vector<8x128xf32>
    %974 = arith.addf %966, %973 : vector<8x128xf32>
    %c0_745 = arith.constant 0 : index
    %c1_746 = arith.constant 1 : index
    %c5_747 = arith.constant 5 : index
    %c0_748 = arith.constant 0 : index
    %c0_749 = arith.constant 0 : index
    %975 = vector.load %arg2[%c0_745, %c1_746, %c5_747, %c0_748, %c0_749] : memref<1x4x8x8x128xf32, #tpu.memory_space<vmem>>, vector<1x1x1x8x128xf32>
    %976 = vector.shape_cast %975 : vector<1x1x1x8x128xf32> to vector<8x128xf32>
    %977 = arith.mulf %976, %65 : vector<8x128xf32>
    %978 = arith.addf %970, %977 : vector<8x128xf32>
    %979 = arith.mulf %976, %69 : vector<8x128xf32>
    %980 = arith.addf %972, %979 : vector<8x128xf32>
    %981 = arith.mulf %976, %73 : vector<8x128xf32>
    %982 = arith.addf %974, %981 : vector<8x128xf32>
    %c0_750 = arith.constant 0 : index
    %c2_751 = arith.constant 2 : index
    %c3_752 = arith.constant 3 : index
    %c0_753 = arith.constant 0 : index
    %c0_754 = arith.constant 0 : index
    %983 = vector.load %arg2[%c0_750, %c2_751, %c3_752, %c0_753, %c0_754] : memref<1x4x8x8x128xf32, #tpu.memory_space<vmem>>, vector<1x1x1x8x128xf32>
    %984 = vector.shape_cast %983 : vector<1x1x1x8x128xf32> to vector<8x128xf32>
    %985 = arith.mulf %984, %77 : vector<8x128xf32>
    %986 = arith.addf %978, %985 : vector<8x128xf32>
    %987 = arith.mulf %984, %81 : vector<8x128xf32>
    %988 = arith.addf %980, %987 : vector<8x128xf32>
    %989 = arith.mulf %984, %85 : vector<8x128xf32>
    %990 = arith.addf %982, %989 : vector<8x128xf32>
    %c0_755 = arith.constant 0 : index
    %c2_756 = arith.constant 2 : index
    %c4_757 = arith.constant 4 : index
    %c0_758 = arith.constant 0 : index
    %c0_759 = arith.constant 0 : index
    %991 = vector.load %arg2[%c0_755, %c2_756, %c4_757, %c0_758, %c0_759] : memref<1x4x8x8x128xf32, #tpu.memory_space<vmem>>, vector<1x1x1x8x128xf32>
    %992 = vector.shape_cast %991 : vector<1x1x1x8x128xf32> to vector<8x128xf32>
    %993 = arith.mulf %992, %89 : vector<8x128xf32>
    %994 = arith.addf %986, %993 : vector<8x128xf32>
    %995 = arith.mulf %992, %93 : vector<8x128xf32>
    %996 = arith.addf %988, %995 : vector<8x128xf32>
    %997 = arith.mulf %992, %97 : vector<8x128xf32>
    %998 = arith.addf %990, %997 : vector<8x128xf32>
    %c0_760 = arith.constant 0 : index
    %c2_761 = arith.constant 2 : index
    %c5_762 = arith.constant 5 : index
    %c0_763 = arith.constant 0 : index
    %c0_764 = arith.constant 0 : index
    %999 = vector.load %arg2[%c0_760, %c2_761, %c5_762, %c0_763, %c0_764] : memref<1x4x8x8x128xf32, #tpu.memory_space<vmem>>, vector<1x1x1x8x128xf32>
    %1000 = vector.shape_cast %999 : vector<1x1x1x8x128xf32> to vector<8x128xf32>
    %1001 = arith.mulf %1000, %101 : vector<8x128xf32>
    %1002 = arith.addf %994, %1001 : vector<8x128xf32>
    %1003 = arith.mulf %1000, %105 : vector<8x128xf32>
    %1004 = arith.addf %996, %1003 : vector<8x128xf32>
    %1005 = arith.mulf %1000, %109 : vector<8x128xf32>
    %1006 = arith.addf %998, %1005 : vector<8x128xf32>
    %c0_765 = arith.constant 0 : index
    %c1_766 = arith.constant 1 : index
    %c0_767 = arith.constant 0 : index
    %1007 = vector.load %arg6[%c0_765, %c1_766, %c0_767] : memref<2x16x128xf32, #tpu.memory_space<vmem>>, vector<1x8x128xf32>
    %1008 = vector.shape_cast %1007 : vector<1x8x128xf32> to vector<8x128xf32>
    %1009 = vector.shape_cast %1002 : vector<8x128xf32> to vector<1x8x128xf32>
    tpu.vector_store %arg6[%c0_765, %c1_766, %c0_767], %1009 {strides = array<i32>} : memref<2x16x128xf32, #tpu.memory_space<vmem>>, vector<1x8x128xf32>,
    %c1_768 = arith.constant 1 : index
    %c0_769 = arith.constant 0 : index
    %c0_770 = arith.constant 0 : index
    %1010 = vector.load %arg6[%c1_768, %c0_769, %c0_770] : memref<2x16x128xf32, #tpu.memory_space<vmem>>, vector<1x8x128xf32>
    %1011 = vector.shape_cast %1010 : vector<1x8x128xf32> to vector<8x128xf32>
    %1012 = vector.shape_cast %1006 : vector<8x128xf32> to vector<1x8x128xf32>
    tpu.vector_store %arg6[%c1_768, %c0_769, %c0_770], %1012 {strides = array<i32>} : memref<2x16x128xf32, #tpu.memory_space<vmem>>, vector<1x8x128xf32>,
    %c0_771 = arith.constant 0 : index
    %c0_772 = arith.constant 0 : index
    %c0_773 = arith.constant 0 : index
    %1013 = vector.load %arg6[%c0_771, %c0_772, %c0_773] : memref<2x16x128xf32, #tpu.memory_space<vmem>>, vector<1x8x128xf32>
    %1014 = vector.shape_cast %1013 : vector<1x8x128xf32> to vector<8x128xf32>
    %c1_774 = arith.constant 1 : index
    %c1_775 = arith.constant 1 : index
    %c0_776 = arith.constant 0 : index
    %1015 = vector.load %arg6[%c1_774, %c1_775, %c0_776] : memref<2x16x128xf32, #tpu.memory_space<vmem>>, vector<1x8x128xf32>
    %1016 = vector.shape_cast %1015 : vector<1x8x128xf32> to vector<8x128xf32>
    %1017 = arith.addf %1004, %1014 : vector<8x128xf32>
    %1018 = arith.addf %1017, %1016 : vector<8x128xf32>
    %c0_777 = arith.constant 0 : index
    %c1_778 = arith.constant 1 : index
    %c4_779 = arith.constant 4 : index
    %c0_780 = arith.constant 0 : index
    %c0_781 = arith.constant 0 : index
    %1019 = vector.load %arg5[%c0_777, %c1_778, %c4_779, %c0_780, %c0_781] : memref<1x4x8x8x128xf32, #tpu.memory_space<vmem>>, vector<1x1x1x8x128xf32>
    %1020 = vector.shape_cast %1019 : vector<1x1x1x8x128xf32> to vector<8x128xf32>
    %1021 = vector.shape_cast %1018 : vector<8x128xf32> to vector<1x1x1x8x128xf32>
    tpu.vector_store %arg5[%c0_777, %c1_778, %c4_779, %c0_780, %c0_781], %1021 {strides = array<i32>} : memref<1x4x8x8x128xf32, #tpu.memory_space<vmem>>, vector<1x1x1x8x128xf32>,
    %cst_782 = arith.constant 0.000000e+00 : f32
    %1022 = vector.broadcast %cst_782 : f32 to vector<8x128xf32>
    %cst_783 = arith.constant 0.000000e+00 : f32
    %1023 = vector.broadcast %cst_783 : f32 to vector<8x128xf32>
    %c0_784 = arith.constant 0 : index
    %c0_785 = arith.constant 0 : index
    %c4_786 = arith.constant 4 : index
    %c0_787 = arith.constant 0 : index
    %c0_788 = arith.constant 0 : index
    %1024 = vector.load %arg2[%c0_784, %c0_785, %c4_786, %c0_787, %c0_788] : memref<1x4x8x8x128xf32, #tpu.memory_space<vmem>>, vector<1x1x1x8x128xf32>
    %1025 = vector.shape_cast %1024 : vector<1x1x1x8x128xf32> to vector<8x128xf32>
    %1026 = arith.mulf %1025, %5 : vector<8x128xf32>
    %1027 = arith.addf %1022, %1026 : vector<8x128xf32>
    %1028 = arith.mulf %1025, %9 : vector<8x128xf32>
    %1029 = arith.addf %112, %1028 : vector<8x128xf32>
    %1030 = arith.mulf %1025, %13 : vector<8x128xf32>
    %1031 = arith.addf %1023, %1030 : vector<8x128xf32>
    %c0_789 = arith.constant 0 : index
    %c0_790 = arith.constant 0 : index
    %c5_791 = arith.constant 5 : index
    %c0_792 = arith.constant 0 : index
    %c0_793 = arith.constant 0 : index
    %1032 = vector.load %arg2[%c0_789, %c0_790, %c5_791, %c0_792, %c0_793] : memref<1x4x8x8x128xf32, #tpu.memory_space<vmem>>, vector<1x1x1x8x128xf32>
    %1033 = vector.shape_cast %1032 : vector<1x1x1x8x128xf32> to vector<8x128xf32>
    %1034 = arith.mulf %1033, %17 : vector<8x128xf32>
    %1035 = arith.addf %1027, %1034 : vector<8x128xf32>
    %1036 = arith.mulf %1033, %21 : vector<8x128xf32>
    %1037 = arith.addf %1029, %1036 : vector<8x128xf32>
    %1038 = arith.mulf %1033, %25 : vector<8x128xf32>
    %1039 = arith.addf %1031, %1038 : vector<8x128xf32>
    %c0_794 = arith.constant 0 : index
    %c0_795 = arith.constant 0 : index
    %c6_796 = arith.constant 6 : index
    %c0_797 = arith.constant 0 : index
    %c0_798 = arith.constant 0 : index
    %1040 = vector.load %arg2[%c0_794, %c0_795, %c6_796, %c0_797, %c0_798] : memref<1x4x8x8x128xf32, #tpu.memory_space<vmem>>, vector<1x1x1x8x128xf32>
    %1041 = vector.shape_cast %1040 : vector<1x1x1x8x128xf32> to vector<8x128xf32>
    %1042 = arith.mulf %1041, %29 : vector<8x128xf32>
    %1043 = arith.addf %1035, %1042 : vector<8x128xf32>
    %1044 = arith.mulf %1041, %33 : vector<8x128xf32>
    %1045 = arith.addf %1037, %1044 : vector<8x128xf32>
    %1046 = arith.mulf %1041, %37 : vector<8x128xf32>
    %1047 = arith.addf %1039, %1046 : vector<8x128xf32>
    %c0_799 = arith.constant 0 : index
    %c1_800 = arith.constant 1 : index
    %c4_801 = arith.constant 4 : index
    %c0_802 = arith.constant 0 : index
    %c0_803 = arith.constant 0 : index
    %1048 = vector.load %arg2[%c0_799, %c1_800, %c4_801, %c0_802, %c0_803] : memref<1x4x8x8x128xf32, #tpu.memory_space<vmem>>, vector<1x1x1x8x128xf32>
    %1049 = vector.shape_cast %1048 : vector<1x1x1x8x128xf32> to vector<8x128xf32>
    %1050 = arith.mulf %1049, %41 : vector<8x128xf32>
    %1051 = arith.addf %1043, %1050 : vector<8x128xf32>
    %1052 = arith.mulf %1049, %45 : vector<8x128xf32>
    %1053 = arith.addf %1045, %1052 : vector<8x128xf32>
    %1054 = arith.mulf %1049, %49 : vector<8x128xf32>
    %1055 = arith.addf %1047, %1054 : vector<8x128xf32>
    %c0_804 = arith.constant 0 : index
    %c1_805 = arith.constant 1 : index
    %c5_806 = arith.constant 5 : index
    %c0_807 = arith.constant 0 : index
    %c0_808 = arith.constant 0 : index
    %1056 = vector.load %arg2[%c0_804, %c1_805, %c5_806, %c0_807, %c0_808] : memref<1x4x8x8x128xf32, #tpu.memory_space<vmem>>, vector<1x1x1x8x128xf32>
    %1057 = vector.shape_cast %1056 : vector<1x1x1x8x128xf32> to vector<8x128xf32>
    %1058 = arith.mulf %1057, %53 : vector<8x128xf32>
    %1059 = arith.addf %1051, %1058 : vector<8x128xf32>
    %1060 = arith.mulf %1057, %57 : vector<8x128xf32>
    %1061 = arith.addf %1053, %1060 : vector<8x128xf32>
    %1062 = arith.mulf %1057, %61 : vector<8x128xf32>
    %1063 = arith.addf %1055, %1062 : vector<8x128xf32>
    %c0_809 = arith.constant 0 : index
    %c1_810 = arith.constant 1 : index
    %c6_811 = arith.constant 6 : index
    %c0_812 = arith.constant 0 : index
    %c0_813 = arith.constant 0 : index
    %1064 = vector.load %arg2[%c0_809, %c1_810, %c6_811, %c0_812, %c0_813] : memref<1x4x8x8x128xf32, #tpu.memory_space<vmem>>, vector<1x1x1x8x128xf32>
    %1065 = vector.shape_cast %1064 : vector<1x1x1x8x128xf32> to vector<8x128xf32>
    %1066 = arith.mulf %1065, %65 : vector<8x128xf32>
    %1067 = arith.addf %1059, %1066 : vector<8x128xf32>
    %1068 = arith.mulf %1065, %69 : vector<8x128xf32>
    %1069 = arith.addf %1061, %1068 : vector<8x128xf32>
    %1070 = arith.mulf %1065, %73 : vector<8x128xf32>
    %1071 = arith.addf %1063, %1070 : vector<8x128xf32>
    %c0_814 = arith.constant 0 : index
    %c2_815 = arith.constant 2 : index
    %c4_816 = arith.constant 4 : index
    %c0_817 = arith.constant 0 : index
    %c0_818 = arith.constant 0 : index
    %1072 = vector.load %arg2[%c0_814, %c2_815, %c4_816, %c0_817, %c0_818] : memref<1x4x8x8x128xf32, #tpu.memory_space<vmem>>, vector<1x1x1x8x128xf32>
    %1073 = vector.shape_cast %1072 : vector<1x1x1x8x128xf32> to vector<8x128xf32>
    %1074 = arith.mulf %1073, %77 : vector<8x128xf32>
    %1075 = arith.addf %1067, %1074 : vector<8x128xf32>
    %1076 = arith.mulf %1073, %81 : vector<8x128xf32>
    %1077 = arith.addf %1069, %1076 : vector<8x128xf32>
    %1078 = arith.mulf %1073, %85 : vector<8x128xf32>
    %1079 = arith.addf %1071, %1078 : vector<8x128xf32>
    %c0_819 = arith.constant 0 : index
    %c2_820 = arith.constant 2 : index
    %c5_821 = arith.constant 5 : index
    %c0_822 = arith.constant 0 : index
    %c0_823 = arith.constant 0 : index
    %1080 = vector.load %arg2[%c0_819, %c2_820, %c5_821, %c0_822, %c0_823] : memref<1x4x8x8x128xf32, #tpu.memory_space<vmem>>, vector<1x1x1x8x128xf32>
    %1081 = vector.shape_cast %1080 : vector<1x1x1x8x128xf32> to vector<8x128xf32>
    %1082 = arith.mulf %1081, %89 : vector<8x128xf32>
    %1083 = arith.addf %1075, %1082 : vector<8x128xf32>
    %1084 = arith.mulf %1081, %93 : vector<8x128xf32>
    %1085 = arith.addf %1077, %1084 : vector<8x128xf32>
    %1086 = arith.mulf %1081, %97 : vector<8x128xf32>
    %1087 = arith.addf %1079, %1086 : vector<8x128xf32>
    %c0_824 = arith.constant 0 : index
    %c2_825 = arith.constant 2 : index
    %c6_826 = arith.constant 6 : index
    %c0_827 = arith.constant 0 : index
    %c0_828 = arith.constant 0 : index
    %1088 = vector.load %arg2[%c0_824, %c2_825, %c6_826, %c0_827, %c0_828] : memref<1x4x8x8x128xf32, #tpu.memory_space<vmem>>, vector<1x1x1x8x128xf32>
    %1089 = vector.shape_cast %1088 : vector<1x1x1x8x128xf32> to vector<8x128xf32>
    %1090 = arith.mulf %1089, %101 : vector<8x128xf32>
    %1091 = arith.addf %1083, %1090 : vector<8x128xf32>
    %1092 = arith.mulf %1089, %105 : vector<8x128xf32>
    %1093 = arith.addf %1085, %1092 : vector<8x128xf32>
    %1094 = arith.mulf %1089, %109 : vector<8x128xf32>
    %1095 = arith.addf %1087, %1094 : vector<8x128xf32>
    %c0_829 = arith.constant 0 : index
    %c1_830 = arith.constant 1 : index
    %c0_831 = arith.constant 0 : index
    %1096 = vector.load %arg6[%c0_829, %c1_830, %c0_831] : memref<2x16x128xf32, #tpu.memory_space<vmem>>, vector<1x8x128xf32>
    %1097 = vector.shape_cast %1096 : vector<1x8x128xf32> to vector<8x128xf32>
    %1098 = vector.shape_cast %1091 : vector<8x128xf32> to vector<1x8x128xf32>
    tpu.vector_store %arg6[%c0_829, %c1_830, %c0_831], %1098 {strides = array<i32>} : memref<2x16x128xf32, #tpu.memory_space<vmem>>, vector<1x8x128xf32>,
    %c1_832 = arith.constant 1 : index
    %c0_833 = arith.constant 0 : index
    %c0_834 = arith.constant 0 : index
    %1099 = vector.load %arg6[%c1_832, %c0_833, %c0_834] : memref<2x16x128xf32, #tpu.memory_space<vmem>>, vector<1x8x128xf32>
    %1100 = vector.shape_cast %1099 : vector<1x8x128xf32> to vector<8x128xf32>
    %1101 = vector.shape_cast %1095 : vector<8x128xf32> to vector<1x8x128xf32>
    tpu.vector_store %arg6[%c1_832, %c0_833, %c0_834], %1101 {strides = array<i32>} : memref<2x16x128xf32, #tpu.memory_space<vmem>>, vector<1x8x128xf32>,
    %c0_835 = arith.constant 0 : index
    %c0_836 = arith.constant 0 : index
    %c0_837 = arith.constant 0 : index
    %1102 = vector.load %arg6[%c0_835, %c0_836, %c0_837] : memref<2x16x128xf32, #tpu.memory_space<vmem>>, vector<1x8x128xf32>
    %1103 = vector.shape_cast %1102 : vector<1x8x128xf32> to vector<8x128xf32>
    %c1_838 = arith.constant 1 : index
    %c1_839 = arith.constant 1 : index
    %c0_840 = arith.constant 0 : index
    %1104 = vector.load %arg6[%c1_838, %c1_839, %c0_840] : memref<2x16x128xf32, #tpu.memory_space<vmem>>, vector<1x8x128xf32>
    %1105 = vector.shape_cast %1104 : vector<1x8x128xf32> to vector<8x128xf32>
    %1106 = arith.addf %1093, %1103 : vector<8x128xf32>
    %1107 = arith.addf %1106, %1105 : vector<8x128xf32>
    %c0_841 = arith.constant 0 : index
    %c1_842 = arith.constant 1 : index
    %c5_843 = arith.constant 5 : index
    %c0_844 = arith.constant 0 : index
    %c0_845 = arith.constant 0 : index
    %1108 = vector.load %arg5[%c0_841, %c1_842, %c5_843, %c0_844, %c0_845] : memref<1x4x8x8x128xf32, #tpu.memory_space<vmem>>, vector<1x1x1x8x128xf32>
    %1109 = vector.shape_cast %1108 : vector<1x1x1x8x128xf32> to vector<8x128xf32>
    %1110 = vector.shape_cast %1107 : vector<8x128xf32> to vector<1x1x1x8x128xf32>
    tpu.vector_store %arg5[%c0_841, %c1_842, %c5_843, %c0_844, %c0_845], %1110 {strides = array<i32>} : memref<1x4x8x8x128xf32, #tpu.memory_space<vmem>>, vector<1x1x1x8x128xf32>,
    %cst_846 = arith.constant 0.000000e+00 : f32
    %1111 = vector.broadcast %cst_846 : f32 to vector<8x128xf32>
    %cst_847 = arith.constant 0.000000e+00 : f32
    %1112 = vector.broadcast %cst_847 : f32 to vector<8x128xf32>
    %c0_848 = arith.constant 0 : index
    %c0_849 = arith.constant 0 : index
    %c5_850 = arith.constant 5 : index
    %c0_851 = arith.constant 0 : index
    %c0_852 = arith.constant 0 : index
    %1113 = vector.load %arg2[%c0_848, %c0_849, %c5_850, %c0_851, %c0_852] : memref<1x4x8x8x128xf32, #tpu.memory_space<vmem>>, vector<1x1x1x8x128xf32>
    %1114 = vector.shape_cast %1113 : vector<1x1x1x8x128xf32> to vector<8x128xf32>
    %1115 = arith.mulf %1114, %5 : vector<8x128xf32>
    %1116 = arith.addf %1111, %1115 : vector<8x128xf32>
    %1117 = arith.mulf %1114, %9 : vector<8x128xf32>
    %1118 = arith.addf %112, %1117 : vector<8x128xf32>
    %1119 = arith.mulf %1114, %13 : vector<8x128xf32>
    %1120 = arith.addf %1112, %1119 : vector<8x128xf32>
    %c0_853 = arith.constant 0 : index
    %c0_854 = arith.constant 0 : index
    %c6_855 = arith.constant 6 : index
    %c0_856 = arith.constant 0 : index
    %c0_857 = arith.constant 0 : index
    %1121 = vector.load %arg2[%c0_853, %c0_854, %c6_855, %c0_856, %c0_857] : memref<1x4x8x8x128xf32, #tpu.memory_space<vmem>>, vector<1x1x1x8x128xf32>
    %1122 = vector.shape_cast %1121 : vector<1x1x1x8x128xf32> to vector<8x128xf32>
    %1123 = arith.mulf %1122, %17 : vector<8x128xf32>
    %1124 = arith.addf %1116, %1123 : vector<8x128xf32>
    %1125 = arith.mulf %1122, %21 : vector<8x128xf32>
    %1126 = arith.addf %1118, %1125 : vector<8x128xf32>
    %1127 = arith.mulf %1122, %25 : vector<8x128xf32>
    %1128 = arith.addf %1120, %1127 : vector<8x128xf32>
    %c0_858 = arith.constant 0 : index
    %c0_859 = arith.constant 0 : index
    %c7_860 = arith.constant 7 : index
    %c0_861 = arith.constant 0 : index
    %c0_862 = arith.constant 0 : index
    %1129 = vector.load %arg2[%c0_858, %c0_859, %c7_860, %c0_861, %c0_862] : memref<1x4x8x8x128xf32, #tpu.memory_space<vmem>>, vector<1x1x1x8x128xf32>
    %1130 = vector.shape_cast %1129 : vector<1x1x1x8x128xf32> to vector<8x128xf32>
    %1131 = arith.mulf %1130, %29 : vector<8x128xf32>
    %1132 = arith.addf %1124, %1131 : vector<8x128xf32>
    %1133 = arith.mulf %1130, %33 : vector<8x128xf32>
    %1134 = arith.addf %1126, %1133 : vector<8x128xf32>
    %1135 = arith.mulf %1130, %37 : vector<8x128xf32>
    %1136 = arith.addf %1128, %1135 : vector<8x128xf32>
    %c0_863 = arith.constant 0 : index
    %c1_864 = arith.constant 1 : index
    %c5_865 = arith.constant 5 : index
    %c0_866 = arith.constant 0 : index
    %c0_867 = arith.constant 0 : index
    %1137 = vector.load %arg2[%c0_863, %c1_864, %c5_865, %c0_866, %c0_867] : memref<1x4x8x8x128xf32, #tpu.memory_space<vmem>>, vector<1x1x1x8x128xf32>
    %1138 = vector.shape_cast %1137 : vector<1x1x1x8x128xf32> to vector<8x128xf32>
    %1139 = arith.mulf %1138, %41 : vector<8x128xf32>
    %1140 = arith.addf %1132, %1139 : vector<8x128xf32>
    %1141 = arith.mulf %1138, %45 : vector<8x128xf32>
    %1142 = arith.addf %1134, %1141 : vector<8x128xf32>
    %1143 = arith.mulf %1138, %49 : vector<8x128xf32>
    %1144 = arith.addf %1136, %1143 : vector<8x128xf32>
    %c0_868 = arith.constant 0 : index
    %c1_869 = arith.constant 1 : index
    %c6_870 = arith.constant 6 : index
    %c0_871 = arith.constant 0 : index
    %c0_872 = arith.constant 0 : index
    %1145 = vector.load %arg2[%c0_868, %c1_869, %c6_870, %c0_871, %c0_872] : memref<1x4x8x8x128xf32, #tpu.memory_space<vmem>>, vector<1x1x1x8x128xf32>
    %1146 = vector.shape_cast %1145 : vector<1x1x1x8x128xf32> to vector<8x128xf32>
    %1147 = arith.mulf %1146, %53 : vector<8x128xf32>
    %1148 = arith.addf %1140, %1147 : vector<8x128xf32>
    %1149 = arith.mulf %1146, %57 : vector<8x128xf32>
    %1150 = arith.addf %1142, %1149 : vector<8x128xf32>
    %1151 = arith.mulf %1146, %61 : vector<8x128xf32>
    %1152 = arith.addf %1144, %1151 : vector<8x128xf32>
    %c0_873 = arith.constant 0 : index
    %c1_874 = arith.constant 1 : index
    %c7_875 = arith.constant 7 : index
    %c0_876 = arith.constant 0 : index
    %c0_877 = arith.constant 0 : index
    %1153 = vector.load %arg2[%c0_873, %c1_874, %c7_875, %c0_876, %c0_877] : memref<1x4x8x8x128xf32, #tpu.memory_space<vmem>>, vector<1x1x1x8x128xf32>
    %1154 = vector.shape_cast %1153 : vector<1x1x1x8x128xf32> to vector<8x128xf32>
    %1155 = arith.mulf %1154, %65 : vector<8x128xf32>
    %1156 = arith.addf %1148, %1155 : vector<8x128xf32>
    %1157 = arith.mulf %1154, %69 : vector<8x128xf32>
    %1158 = arith.addf %1150, %1157 : vector<8x128xf32>
    %1159 = arith.mulf %1154, %73 : vector<8x128xf32>
    %1160 = arith.addf %1152, %1159 : vector<8x128xf32>
    %c0_878 = arith.constant 0 : index
    %c2_879 = arith.constant 2 : index
    %c5_880 = arith.constant 5 : index
    %c0_881 = arith.constant 0 : index
    %c0_882 = arith.constant 0 : index
    %1161 = vector.load %arg2[%c0_878, %c2_879, %c5_880, %c0_881, %c0_882] : memref<1x4x8x8x128xf32, #tpu.memory_space<vmem>>, vector<1x1x1x8x128xf32>
    %1162 = vector.shape_cast %1161 : vector<1x1x1x8x128xf32> to vector<8x128xf32>
    %1163 = arith.mulf %1162, %77 : vector<8x128xf32>
    %1164 = arith.addf %1156, %1163 : vector<8x128xf32>
    %1165 = arith.mulf %1162, %81 : vector<8x128xf32>
    %1166 = arith.addf %1158, %1165 : vector<8x128xf32>
    %1167 = arith.mulf %1162, %85 : vector<8x128xf32>
    %1168 = arith.addf %1160, %1167 : vector<8x128xf32>
    %c0_883 = arith.constant 0 : index
    %c2_884 = arith.constant 2 : index
    %c6_885 = arith.constant 6 : index
    %c0_886 = arith.constant 0 : index
    %c0_887 = arith.constant 0 : index
    %1169 = vector.load %arg2[%c0_883, %c2_884, %c6_885, %c0_886, %c0_887] : memref<1x4x8x8x128xf32, #tpu.memory_space<vmem>>, vector<1x1x1x8x128xf32>
    %1170 = vector.shape_cast %1169 : vector<1x1x1x8x128xf32> to vector<8x128xf32>
    %1171 = arith.mulf %1170, %89 : vector<8x128xf32>
    %1172 = arith.addf %1164, %1171 : vector<8x128xf32>
    %1173 = arith.mulf %1170, %93 : vector<8x128xf32>
    %1174 = arith.addf %1166, %1173 : vector<8x128xf32>
    %1175 = arith.mulf %1170, %97 : vector<8x128xf32>
    %1176 = arith.addf %1168, %1175 : vector<8x128xf32>
    %c0_888 = arith.constant 0 : index
    %c2_889 = arith.constant 2 : index
    %c7_890 = arith.constant 7 : index
    %c0_891 = arith.constant 0 : index
    %c0_892 = arith.constant 0 : index
    %1177 = vector.load %arg2[%c0_888, %c2_889, %c7_890, %c0_891, %c0_892] : memref<1x4x8x8x128xf32, #tpu.memory_space<vmem>>, vector<1x1x1x8x128xf32>
    %1178 = vector.shape_cast %1177 : vector<1x1x1x8x128xf32> to vector<8x128xf32>
    %1179 = arith.mulf %1178, %101 : vector<8x128xf32>
    %1180 = arith.addf %1172, %1179 : vector<8x128xf32>
    %1181 = arith.mulf %1178, %105 : vector<8x128xf32>
    %1182 = arith.addf %1174, %1181 : vector<8x128xf32>
    %1183 = arith.mulf %1178, %109 : vector<8x128xf32>
    %1184 = arith.addf %1176, %1183 : vector<8x128xf32>
    %c0_893 = arith.constant 0 : index
    %c1_894 = arith.constant 1 : index
    %c0_895 = arith.constant 0 : index
    %1185 = vector.load %arg6[%c0_893, %c1_894, %c0_895] : memref<2x16x128xf32, #tpu.memory_space<vmem>>, vector<1x8x128xf32>
    %1186 = vector.shape_cast %1185 : vector<1x8x128xf32> to vector<8x128xf32>
    %1187 = vector.shape_cast %1180 : vector<8x128xf32> to vector<1x8x128xf32>
    tpu.vector_store %arg6[%c0_893, %c1_894, %c0_895], %1187 {strides = array<i32>} : memref<2x16x128xf32, #tpu.memory_space<vmem>>, vector<1x8x128xf32>,
    %c1_896 = arith.constant 1 : index
    %c0_897 = arith.constant 0 : index
    %c0_898 = arith.constant 0 : index
    %1188 = vector.load %arg6[%c1_896, %c0_897, %c0_898] : memref<2x16x128xf32, #tpu.memory_space<vmem>>, vector<1x8x128xf32>
    %1189 = vector.shape_cast %1188 : vector<1x8x128xf32> to vector<8x128xf32>
    %1190 = vector.shape_cast %1184 : vector<8x128xf32> to vector<1x8x128xf32>
    tpu.vector_store %arg6[%c1_896, %c0_897, %c0_898], %1190 {strides = array<i32>} : memref<2x16x128xf32, #tpu.memory_space<vmem>>, vector<1x8x128xf32>,
    %c0_899 = arith.constant 0 : index
    %c0_900 = arith.constant 0 : index
    %c0_901 = arith.constant 0 : index
    %1191 = vector.load %arg6[%c0_899, %c0_900, %c0_901] : memref<2x16x128xf32, #tpu.memory_space<vmem>>, vector<1x8x128xf32>
    %1192 = vector.shape_cast %1191 : vector<1x8x128xf32> to vector<8x128xf32>
    %c1_902 = arith.constant 1 : index
    %c1_903 = arith.constant 1 : index
    %c0_904 = arith.constant 0 : index
    %1193 = vector.load %arg6[%c1_902, %c1_903, %c0_904] : memref<2x16x128xf32, #tpu.memory_space<vmem>>, vector<1x8x128xf32>
    %1194 = vector.shape_cast %1193 : vector<1x8x128xf32> to vector<8x128xf32>
    %1195 = arith.addf %1182, %1192 : vector<8x128xf32>
    %1196 = arith.addf %1195, %1194 : vector<8x128xf32>
    %c0_905 = arith.constant 0 : index
    %c1_906 = arith.constant 1 : index
    %c6_907 = arith.constant 6 : index
    %c0_908 = arith.constant 0 : index
    %c0_909 = arith.constant 0 : index
    %1197 = vector.load %arg5[%c0_905, %c1_906, %c6_907, %c0_908, %c0_909] : memref<1x4x8x8x128xf32, #tpu.memory_space<vmem>>, vector<1x1x1x8x128xf32>
    %1198 = vector.shape_cast %1197 : vector<1x1x1x8x128xf32> to vector<8x128xf32>
    %1199 = vector.shape_cast %1196 : vector<8x128xf32> to vector<1x1x1x8x128xf32>
    tpu.vector_store %arg5[%c0_905, %c1_906, %c6_907, %c0_908, %c0_909], %1199 {strides = array<i32>} : memref<1x4x8x8x128xf32, #tpu.memory_space<vmem>>, vector<1x1x1x8x128xf32>,
    %cst_910 = arith.constant 0.000000e+00 : f32
    %1200 = vector.broadcast %cst_910 : f32 to vector<8x128xf32>
    %cst_911 = arith.constant 0.000000e+00 : f32
    %1201 = vector.broadcast %cst_911 : f32 to vector<8x128xf32>
    %c0_912 = arith.constant 0 : index
    %c0_913 = arith.constant 0 : index
    %c6_914 = arith.constant 6 : index
    %c0_915 = arith.constant 0 : index
    %c0_916 = arith.constant 0 : index
    %1202 = vector.load %arg2[%c0_912, %c0_913, %c6_914, %c0_915, %c0_916] : memref<1x4x8x8x128xf32, #tpu.memory_space<vmem>>, vector<1x1x1x8x128xf32>
    %1203 = vector.shape_cast %1202 : vector<1x1x1x8x128xf32> to vector<8x128xf32>
    %1204 = arith.mulf %1203, %5 : vector<8x128xf32>
    %1205 = arith.addf %1200, %1204 : vector<8x128xf32>
    %1206 = arith.mulf %1203, %9 : vector<8x128xf32>
    %1207 = arith.addf %112, %1206 : vector<8x128xf32>
    %1208 = arith.mulf %1203, %13 : vector<8x128xf32>
    %1209 = arith.addf %1201, %1208 : vector<8x128xf32>
    %c0_917 = arith.constant 0 : index
    %c0_918 = arith.constant 0 : index
    %c7_919 = arith.constant 7 : index
    %c0_920 = arith.constant 0 : index
    %c0_921 = arith.constant 0 : index
    %1210 = vector.load %arg2[%c0_917, %c0_918, %c7_919, %c0_920, %c0_921] : memref<1x4x8x8x128xf32, #tpu.memory_space<vmem>>, vector<1x1x1x8x128xf32>
    %1211 = vector.shape_cast %1210 : vector<1x1x1x8x128xf32> to vector<8x128xf32>
    %1212 = arith.mulf %1211, %17 : vector<8x128xf32>
    %1213 = arith.addf %1205, %1212 : vector<8x128xf32>
    %1214 = arith.mulf %1211, %21 : vector<8x128xf32>
    %1215 = arith.addf %1207, %1214 : vector<8x128xf32>
    %1216 = arith.mulf %1211, %25 : vector<8x128xf32>
    %1217 = arith.addf %1209, %1216 : vector<8x128xf32>
    %c0_922 = arith.constant 0 : index
    %c1_923 = arith.constant 1 : index
    %c6_924 = arith.constant 6 : index
    %c0_925 = arith.constant 0 : index
    %c0_926 = arith.constant 0 : index
    %1218 = vector.load %arg2[%c0_922, %c1_923, %c6_924, %c0_925, %c0_926] : memref<1x4x8x8x128xf32, #tpu.memory_space<vmem>>, vector<1x1x1x8x128xf32>
    %1219 = vector.shape_cast %1218 : vector<1x1x1x8x128xf32> to vector<8x128xf32>
    %1220 = arith.mulf %1219, %41 : vector<8x128xf32>
    %1221 = arith.addf %1213, %1220 : vector<8x128xf32>
    %1222 = arith.mulf %1219, %45 : vector<8x128xf32>
    %1223 = arith.addf %1215, %1222 : vector<8x128xf32>
    %1224 = arith.mulf %1219, %49 : vector<8x128xf32>
    %1225 = arith.addf %1217, %1224 : vector<8x128xf32>
    %c0_927 = arith.constant 0 : index
    %c1_928 = arith.constant 1 : index
    %c7_929 = arith.constant 7 : index
    %c0_930 = arith.constant 0 : index
    %c0_931 = arith.constant 0 : index
    %1226 = vector.load %arg2[%c0_927, %c1_928, %c7_929, %c0_930, %c0_931] : memref<1x4x8x8x128xf32, #tpu.memory_space<vmem>>, vector<1x1x1x8x128xf32>
    %1227 = vector.shape_cast %1226 : vector<1x1x1x8x128xf32> to vector<8x128xf32>
    %1228 = arith.mulf %1227, %53 : vector<8x128xf32>
    %1229 = arith.addf %1221, %1228 : vector<8x128xf32>
    %1230 = arith.mulf %1227, %57 : vector<8x128xf32>
    %1231 = arith.addf %1223, %1230 : vector<8x128xf32>
    %1232 = arith.mulf %1227, %61 : vector<8x128xf32>
    %1233 = arith.addf %1225, %1232 : vector<8x128xf32>
    %c0_932 = arith.constant 0 : index
    %c2_933 = arith.constant 2 : index
    %c6_934 = arith.constant 6 : index
    %c0_935 = arith.constant 0 : index
    %c0_936 = arith.constant 0 : index
    %1234 = vector.load %arg2[%c0_932, %c2_933, %c6_934, %c0_935, %c0_936] : memref<1x4x8x8x128xf32, #tpu.memory_space<vmem>>, vector<1x1x1x8x128xf32>
    %1235 = vector.shape_cast %1234 : vector<1x1x1x8x128xf32> to vector<8x128xf32>
    %1236 = arith.mulf %1235, %77 : vector<8x128xf32>
    %1237 = arith.addf %1229, %1236 : vector<8x128xf32>
    %1238 = arith.mulf %1235, %81 : vector<8x128xf32>
    %1239 = arith.addf %1231, %1238 : vector<8x128xf32>
    %1240 = arith.mulf %1235, %85 : vector<8x128xf32>
    %1241 = arith.addf %1233, %1240 : vector<8x128xf32>
    %c0_937 = arith.constant 0 : index
    %c2_938 = arith.constant 2 : index
    %c7_939 = arith.constant 7 : index
    %c0_940 = arith.constant 0 : index
    %c0_941 = arith.constant 0 : index
    %1242 = vector.load %arg2[%c0_937, %c2_938, %c7_939, %c0_940, %c0_941] : memref<1x4x8x8x128xf32, #tpu.memory_space<vmem>>, vector<1x1x1x8x128xf32>
    %1243 = vector.shape_cast %1242 : vector<1x1x1x8x128xf32> to vector<8x128xf32>
    %1244 = arith.mulf %1243, %89 : vector<8x128xf32>
    %1245 = arith.addf %1237, %1244 : vector<8x128xf32>
    %1246 = arith.mulf %1243, %93 : vector<8x128xf32>
    %1247 = arith.addf %1239, %1246 : vector<8x128xf32>
    %1248 = arith.mulf %1243, %97 : vector<8x128xf32>
    %1249 = arith.addf %1241, %1248 : vector<8x128xf32>
    %c0_942 = arith.constant 0 : index
    %c1_943 = arith.constant 1 : index
    %c0_944 = arith.constant 0 : index
    %1250 = vector.load %arg6[%c0_942, %c1_943, %c0_944] : memref<2x16x128xf32, #tpu.memory_space<vmem>>, vector<1x8x128xf32>
    %1251 = vector.shape_cast %1250 : vector<1x8x128xf32> to vector<8x128xf32>
    %1252 = vector.shape_cast %1245 : vector<8x128xf32> to vector<1x8x128xf32>
    tpu.vector_store %arg6[%c0_942, %c1_943, %c0_944], %1252 {strides = array<i32>} : memref<2x16x128xf32, #tpu.memory_space<vmem>>, vector<1x8x128xf32>,
    %c1_945 = arith.constant 1 : index
    %c0_946 = arith.constant 0 : index
    %c0_947 = arith.constant 0 : index
    %1253 = vector.load %arg6[%c1_945, %c0_946, %c0_947] : memref<2x16x128xf32, #tpu.memory_space<vmem>>, vector<1x8x128xf32>
    %1254 = vector.shape_cast %1253 : vector<1x8x128xf32> to vector<8x128xf32>
    %1255 = vector.shape_cast %1249 : vector<8x128xf32> to vector<1x8x128xf32>
    tpu.vector_store %arg6[%c1_945, %c0_946, %c0_947], %1255 {strides = array<i32>} : memref<2x16x128xf32, #tpu.memory_space<vmem>>, vector<1x8x128xf32>,
    %c0_948 = arith.constant 0 : index
    %c0_949 = arith.constant 0 : index
    %c0_950 = arith.constant 0 : index
    %1256 = vector.load %arg6[%c0_948, %c0_949, %c0_950] : memref<2x16x128xf32, #tpu.memory_space<vmem>>, vector<1x8x128xf32>
    %1257 = vector.shape_cast %1256 : vector<1x8x128xf32> to vector<8x128xf32>
    %c1_951 = arith.constant 1 : index
    %c1_952 = arith.constant 1 : index
    %c0_953 = arith.constant 0 : index
    %1258 = vector.load %arg6[%c1_951, %c1_952, %c0_953] : memref<2x16x128xf32, #tpu.memory_space<vmem>>, vector<1x8x128xf32>
    %1259 = vector.shape_cast %1258 : vector<1x8x128xf32> to vector<8x128xf32>
    %1260 = arith.addf %1247, %1257 : vector<8x128xf32>
    %1261 = arith.addf %1260, %1259 : vector<8x128xf32>
    %c0_954 = arith.constant 0 : index
    %c1_955 = arith.constant 1 : index
    %c7_956 = arith.constant 7 : index
    %c0_957 = arith.constant 0 : index
    %c0_958 = arith.constant 0 : index
    %1262 = vector.load %arg5[%c0_954, %c1_955, %c7_956, %c0_957, %c0_958] : memref<1x4x8x8x128xf32, #tpu.memory_space<vmem>>, vector<1x1x1x8x128xf32>
    %1263 = vector.shape_cast %1262 : vector<1x1x1x8x128xf32> to vector<8x128xf32>
    %1264 = vector.shape_cast %1261 : vector<8x128xf32> to vector<1x1x1x8x128xf32>
    tpu.vector_store %arg5[%c0_954, %c1_955, %c7_956, %c0_957, %c0_958], %1264 {strides = array<i32>} : memref<1x4x8x8x128xf32, #tpu.memory_space<vmem>>, vector<1x1x1x8x128xf32>,
    %cst_959 = arith.constant 0.000000e+00 : f32
    %1265 = vector.broadcast %cst_959 : f32 to vector<8x128xf32>
    %cst_960 = arith.constant 0.000000e+00 : f32
    %1266 = vector.broadcast %cst_960 : f32 to vector<8x128xf32>
    %c0_961 = arith.constant 0 : index
    %c1_962 = arith.constant 1 : index
    %c0_963 = arith.constant 0 : index
    %c0_964 = arith.constant 0 : index
    %c0_965 = arith.constant 0 : index
    %1267 = vector.load %arg2[%c0_961, %c1_962, %c0_963, %c0_964, %c0_965] : memref<1x4x8x8x128xf32, #tpu.memory_space<vmem>>, vector<1x1x1x8x128xf32>
    %1268 = vector.shape_cast %1267 : vector<1x1x1x8x128xf32> to vector<8x128xf32>
    %1269 = arith.mulf %1268, %17 : vector<8x128xf32>
    %1270 = arith.addf %1265, %1269 : vector<8x128xf32>
    %1271 = arith.mulf %1268, %21 : vector<8x128xf32>
    %1272 = arith.addf %112, %1271 : vector<8x128xf32>
    %1273 = arith.mulf %1268, %25 : vector<8x128xf32>
    %1274 = arith.addf %1266, %1273 : vector<8x128xf32>
    %c0_966 = arith.constant 0 : index
    %c1_967 = arith.constant 1 : index
    %c1_968 = arith.constant 1 : index
    %c0_969 = arith.constant 0 : index
    %c0_970 = arith.constant 0 : index
    %1275 = vector.load %arg2[%c0_966, %c1_967, %c1_968, %c0_969, %c0_970] : memref<1x4x8x8x128xf32, #tpu.memory_space<vmem>>, vector<1x1x1x8x128xf32>
    %1276 = vector.shape_cast %1275 : vector<1x1x1x8x128xf32> to vector<8x128xf32>
    %1277 = arith.mulf %1276, %29 : vector<8x128xf32>
    %1278 = arith.addf %1270, %1277 : vector<8x128xf32>
    %1279 = arith.mulf %1276, %33 : vector<8x128xf32>
    %1280 = arith.addf %1272, %1279 : vector<8x128xf32>
    %1281 = arith.mulf %1276, %37 : vector<8x128xf32>
    %1282 = arith.addf %1274, %1281 : vector<8x128xf32>
    %c0_971 = arith.constant 0 : index
    %c2_972 = arith.constant 2 : index
    %c0_973 = arith.constant 0 : index
    %c0_974 = arith.constant 0 : index
    %c0_975 = arith.constant 0 : index
    %1283 = vector.load %arg2[%c0_971, %c2_972, %c0_973, %c0_974, %c0_975] : memref<1x4x8x8x128xf32, #tpu.memory_space<vmem>>, vector<1x1x1x8x128xf32>
    %1284 = vector.shape_cast %1283 : vector<1x1x1x8x128xf32> to vector<8x128xf32>
    %1285 = arith.mulf %1284, %53 : vector<8x128xf32>
    %1286 = arith.addf %1278, %1285 : vector<8x128xf32>
    %1287 = arith.mulf %1284, %57 : vector<8x128xf32>
    %1288 = arith.addf %1280, %1287 : vector<8x128xf32>
    %1289 = arith.mulf %1284, %61 : vector<8x128xf32>
    %1290 = arith.addf %1282, %1289 : vector<8x128xf32>
    %c0_976 = arith.constant 0 : index
    %c2_977 = arith.constant 2 : index
    %c1_978 = arith.constant 1 : index
    %c0_979 = arith.constant 0 : index
    %c0_980 = arith.constant 0 : index
    %1291 = vector.load %arg2[%c0_976, %c2_977, %c1_978, %c0_979, %c0_980] : memref<1x4x8x8x128xf32, #tpu.memory_space<vmem>>, vector<1x1x1x8x128xf32>
    %1292 = vector.shape_cast %1291 : vector<1x1x1x8x128xf32> to vector<8x128xf32>
    %1293 = arith.mulf %1292, %65 : vector<8x128xf32>
    %1294 = arith.addf %1286, %1293 : vector<8x128xf32>
    %1295 = arith.mulf %1292, %69 : vector<8x128xf32>
    %1296 = arith.addf %1288, %1295 : vector<8x128xf32>
    %1297 = arith.mulf %1292, %73 : vector<8x128xf32>
    %1298 = arith.addf %1290, %1297 : vector<8x128xf32>
    %c0_981 = arith.constant 0 : index
    %c3_982 = arith.constant 3 : index
    %c0_983 = arith.constant 0 : index
    %c0_984 = arith.constant 0 : index
    %c0_985 = arith.constant 0 : index
    %1299 = vector.load %arg2[%c0_981, %c3_982, %c0_983, %c0_984, %c0_985] : memref<1x4x8x8x128xf32, #tpu.memory_space<vmem>>, vector<1x1x1x8x128xf32>
    %1300 = vector.shape_cast %1299 : vector<1x1x1x8x128xf32> to vector<8x128xf32>
    %1301 = arith.mulf %1300, %89 : vector<8x128xf32>
    %1302 = arith.addf %1294, %1301 : vector<8x128xf32>
    %1303 = arith.mulf %1300, %93 : vector<8x128xf32>
    %1304 = arith.addf %1296, %1303 : vector<8x128xf32>
    %1305 = arith.mulf %1300, %97 : vector<8x128xf32>
    %1306 = arith.addf %1298, %1305 : vector<8x128xf32>
    %c0_986 = arith.constant 0 : index
    %c3_987 = arith.constant 3 : index
    %c1_988 = arith.constant 1 : index
    %c0_989 = arith.constant 0 : index
    %c0_990 = arith.constant 0 : index
    %1307 = vector.load %arg2[%c0_986, %c3_987, %c1_988, %c0_989, %c0_990] : memref<1x4x8x8x128xf32, #tpu.memory_space<vmem>>, vector<1x1x1x8x128xf32>
    %1308 = vector.shape_cast %1307 : vector<1x1x1x8x128xf32> to vector<8x128xf32>
    %1309 = arith.mulf %1308, %101 : vector<8x128xf32>
    %1310 = arith.addf %1302, %1309 : vector<8x128xf32>
    %1311 = arith.mulf %1308, %105 : vector<8x128xf32>
    %1312 = arith.addf %1304, %1311 : vector<8x128xf32>
    %1313 = arith.mulf %1308, %109 : vector<8x128xf32>
    %1314 = arith.addf %1306, %1313 : vector<8x128xf32>
    %c0_991 = arith.constant 0 : index
    %c1_992 = arith.constant 1 : index
    %c0_993 = arith.constant 0 : index
    %1315 = vector.load %arg6[%c0_991, %c1_992, %c0_993] : memref<2x16x128xf32, #tpu.memory_space<vmem>>, vector<1x8x128xf32>
    %1316 = vector.shape_cast %1315 : vector<1x8x128xf32> to vector<8x128xf32>
    %1317 = vector.shape_cast %1310 : vector<8x128xf32> to vector<1x8x128xf32>
    tpu.vector_store %arg6[%c0_991, %c1_992, %c0_993], %1317 {strides = array<i32>} : memref<2x16x128xf32, #tpu.memory_space<vmem>>, vector<1x8x128xf32>,
    %c1_994 = arith.constant 1 : index
    %c0_995 = arith.constant 0 : index
    %c0_996 = arith.constant 0 : index
    %1318 = vector.load %arg6[%c1_994, %c0_995, %c0_996] : memref<2x16x128xf32, #tpu.memory_space<vmem>>, vector<1x8x128xf32>
    %1319 = vector.shape_cast %1318 : vector<1x8x128xf32> to vector<8x128xf32>
    %1320 = vector.shape_cast %1314 : vector<8x128xf32> to vector<1x8x128xf32>
    tpu.vector_store %arg6[%c1_994, %c0_995, %c0_996], %1320 {strides = array<i32>} : memref<2x16x128xf32, #tpu.memory_space<vmem>>, vector<1x8x128xf32>,
    %c0_997 = arith.constant 0 : index
    %c0_998 = arith.constant 0 : index
    %c0_999 = arith.constant 0 : index
    %1321 = vector.load %arg6[%c0_997, %c0_998, %c0_999] : memref<2x16x128xf32, #tpu.memory_space<vmem>>, vector<1x8x128xf32>
    %1322 = vector.shape_cast %1321 : vector<1x8x128xf32> to vector<8x128xf32>
    %c1_1000 = arith.constant 1 : index
    %c1_1001 = arith.constant 1 : index
    %c0_1002 = arith.constant 0 : index
    %1323 = vector.load %arg6[%c1_1000, %c1_1001, %c0_1002] : memref<2x16x128xf32, #tpu.memory_space<vmem>>, vector<1x8x128xf32>
    %1324 = vector.shape_cast %1323 : vector<1x8x128xf32> to vector<8x128xf32>
    %1325 = arith.addf %1312, %1322 : vector<8x128xf32>
    %1326 = arith.addf %1325, %1324 : vector<8x128xf32>
    %c0_1003 = arith.constant 0 : index
    %c2_1004 = arith.constant 2 : index
    %c0_1005 = arith.constant 0 : index
    %c0_1006 = arith.constant 0 : index
    %c0_1007 = arith.constant 0 : index
    %1327 = vector.load %arg5[%c0_1003, %c2_1004, %c0_1005, %c0_1006, %c0_1007] : memref<1x4x8x8x128xf32, #tpu.memory_space<vmem>>, vector<1x1x1x8x128xf32>
    %1328 = vector.shape_cast %1327 : vector<1x1x1x8x128xf32> to vector<8x128xf32>
    %1329 = vector.shape_cast %1326 : vector<8x128xf32> to vector<1x1x1x8x128xf32>
    tpu.vector_store %arg5[%c0_1003, %c2_1004, %c0_1005, %c0_1006, %c0_1007], %1329 {strides = array<i32>} : memref<1x4x8x8x128xf32, #tpu.memory_space<vmem>>, vector<1x1x1x8x128xf32>,
    %cst_1008 = arith.constant 0.000000e+00 : f32
    %1330 = vector.broadcast %cst_1008 : f32 to vector<8x128xf32>
    %cst_1009 = arith.constant 0.000000e+00 : f32
    %1331 = vector.broadcast %cst_1009 : f32 to vector<8x128xf32>
    %c0_1010 = arith.constant 0 : index
    %c1_1011 = arith.constant 1 : index
    %c0_1012 = arith.constant 0 : index
    %c0_1013 = arith.constant 0 : index
    %c0_1014 = arith.constant 0 : index
    %1332 = vector.load %arg2[%c0_1010, %c1_1011, %c0_1012, %c0_1013, %c0_1014] : memref<1x4x8x8x128xf32, #tpu.memory_space<vmem>>, vector<1x1x1x8x128xf32>
    %1333 = vector.shape_cast %1332 : vector<1x1x1x8x128xf32> to vector<8x128xf32>
    %1334 = arith.mulf %1333, %5 : vector<8x128xf32>
    %1335 = arith.addf %1330, %1334 : vector<8x128xf32>
    %1336 = arith.mulf %1333, %9 : vector<8x128xf32>
    %1337 = arith.addf %112, %1336 : vector<8x128xf32>
    %1338 = arith.mulf %1333, %13 : vector<8x128xf32>
    %1339 = arith.addf %1331, %1338 : vector<8x128xf32>
    %c0_1015 = arith.constant 0 : index
    %c1_1016 = arith.constant 1 : index
    %c1_1017 = arith.constant 1 : index
    %c0_1018 = arith.constant 0 : index
    %c0_1019 = arith.constant 0 : index
    %1340 = vector.load %arg2[%c0_1015, %c1_1016, %c1_1017, %c0_1018, %c0_1019] : memref<1x4x8x8x128xf32, #tpu.memory_space<vmem>>, vector<1x1x1x8x128xf32>
    %1341 = vector.shape_cast %1340 : vector<1x1x1x8x128xf32> to vector<8x128xf32>
    %1342 = arith.mulf %1341, %17 : vector<8x128xf32>
    %1343 = arith.addf %1335, %1342 : vector<8x128xf32>
    %1344 = arith.mulf %1341, %21 : vector<8x128xf32>
    %1345 = arith.addf %1337, %1344 : vector<8x128xf32>
    %1346 = arith.mulf %1341, %25 : vector<8x128xf32>
    %1347 = arith.addf %1339, %1346 : vector<8x128xf32>
    %c0_1020 = arith.constant 0 : index
    %c1_1021 = arith.constant 1 : index
    %c2_1022 = arith.constant 2 : index
    %c0_1023 = arith.constant 0 : index
    %c0_1024 = arith.constant 0 : index
    %1348 = vector.load %arg2[%c0_1020, %c1_1021, %c2_1022, %c0_1023, %c0_1024] : memref<1x4x8x8x128xf32, #tpu.memory_space<vmem>>, vector<1x1x1x8x128xf32>
    %1349 = vector.shape_cast %1348 : vector<1x1x1x8x128xf32> to vector<8x128xf32>
    %1350 = arith.mulf %1349, %29 : vector<8x128xf32>
    %1351 = arith.addf %1343, %1350 : vector<8x128xf32>
    %1352 = arith.mulf %1349, %33 : vector<8x128xf32>
    %1353 = arith.addf %1345, %1352 : vector<8x128xf32>
    %1354 = arith.mulf %1349, %37 : vector<8x128xf32>
    %1355 = arith.addf %1347, %1354 : vector<8x128xf32>
    %c0_1025 = arith.constant 0 : index
    %c2_1026 = arith.constant 2 : index
    %c0_1027 = arith.constant 0 : index
    %c0_1028 = arith.constant 0 : index
    %c0_1029 = arith.constant 0 : index
    %1356 = vector.load %arg2[%c0_1025, %c2_1026, %c0_1027, %c0_1028, %c0_1029] : memref<1x4x8x8x128xf32, #tpu.memory_space<vmem>>, vector<1x1x1x8x128xf32>
    %1357 = vector.shape_cast %1356 : vector<1x1x1x8x128xf32> to vector<8x128xf32>
    %1358 = arith.mulf %1357, %41 : vector<8x128xf32>
    %1359 = arith.addf %1351, %1358 : vector<8x128xf32>
    %1360 = arith.mulf %1357, %45 : vector<8x128xf32>
    %1361 = arith.addf %1353, %1360 : vector<8x128xf32>
    %1362 = arith.mulf %1357, %49 : vector<8x128xf32>
    %1363 = arith.addf %1355, %1362 : vector<8x128xf32>
    %c0_1030 = arith.constant 0 : index
    %c2_1031 = arith.constant 2 : index
    %c1_1032 = arith.constant 1 : index
    %c0_1033 = arith.constant 0 : index
    %c0_1034 = arith.constant 0 : index
    %1364 = vector.load %arg2[%c0_1030, %c2_1031, %c1_1032, %c0_1033, %c0_1034] : memref<1x4x8x8x128xf32, #tpu.memory_space<vmem>>, vector<1x1x1x8x128xf32>
    %1365 = vector.shape_cast %1364 : vector<1x1x1x8x128xf32> to vector<8x128xf32>
    %1366 = arith.mulf %1365, %53 : vector<8x128xf32>
    %1367 = arith.addf %1359, %1366 : vector<8x128xf32>
    %1368 = arith.mulf %1365, %57 : vector<8x128xf32>
    %1369 = arith.addf %1361, %1368 : vector<8x128xf32>
    %1370 = arith.mulf %1365, %61 : vector<8x128xf32>
    %1371 = arith.addf %1363, %1370 : vector<8x128xf32>
    %c0_1035 = arith.constant 0 : index
    %c2_1036 = arith.constant 2 : index
    %c2_1037 = arith.constant 2 : index
    %c0_1038 = arith.constant 0 : index
    %c0_1039 = arith.constant 0 : index
    %1372 = vector.load %arg2[%c0_1035, %c2_1036, %c2_1037, %c0_1038, %c0_1039] : memref<1x4x8x8x128xf32, #tpu.memory_space<vmem>>, vector<1x1x1x8x128xf32>
    %1373 = vector.shape_cast %1372 : vector<1x1x1x8x128xf32> to vector<8x128xf32>
    %1374 = arith.mulf %1373, %65 : vector<8x128xf32>
    %1375 = arith.addf %1367, %1374 : vector<8x128xf32>
    %1376 = arith.mulf %1373, %69 : vector<8x128xf32>
    %1377 = arith.addf %1369, %1376 : vector<8x128xf32>
    %1378 = arith.mulf %1373, %73 : vector<8x128xf32>
    %1379 = arith.addf %1371, %1378 : vector<8x128xf32>
    %c0_1040 = arith.constant 0 : index
    %c3_1041 = arith.constant 3 : index
    %c0_1042 = arith.constant 0 : index
    %c0_1043 = arith.constant 0 : index
    %c0_1044 = arith.constant 0 : index
    %1380 = vector.load %arg2[%c0_1040, %c3_1041, %c0_1042, %c0_1043, %c0_1044] : memref<1x4x8x8x128xf32, #tpu.memory_space<vmem>>, vector<1x1x1x8x128xf32>
    %1381 = vector.shape_cast %1380 : vector<1x1x1x8x128xf32> to vector<8x128xf32>
    %1382 = arith.mulf %1381, %77 : vector<8x128xf32>
    %1383 = arith.addf %1375, %1382 : vector<8x128xf32>
    %1384 = arith.mulf %1381, %81 : vector<8x128xf32>
    %1385 = arith.addf %1377, %1384 : vector<8x128xf32>
    %1386 = arith.mulf %1381, %85 : vector<8x128xf32>
    %1387 = arith.addf %1379, %1386 : vector<8x128xf32>
    %c0_1045 = arith.constant 0 : index
    %c3_1046 = arith.constant 3 : index
    %c1_1047 = arith.constant 1 : index
    %c0_1048 = arith.constant 0 : index
    %c0_1049 = arith.constant 0 : index
    %1388 = vector.load %arg2[%c0_1045, %c3_1046, %c1_1047, %c0_1048, %c0_1049] : memref<1x4x8x8x128xf32, #tpu.memory_space<vmem>>, vector<1x1x1x8x128xf32>
    %1389 = vector.shape_cast %1388 : vector<1x1x1x8x128xf32> to vector<8x128xf32>
    %1390 = arith.mulf %1389, %89 : vector<8x128xf32>
    %1391 = arith.addf %1383, %1390 : vector<8x128xf32>
    %1392 = arith.mulf %1389, %93 : vector<8x128xf32>
    %1393 = arith.addf %1385, %1392 : vector<8x128xf32>
    %1394 = arith.mulf %1389, %97 : vector<8x128xf32>
    %1395 = arith.addf %1387, %1394 : vector<8x128xf32>
    %c0_1050 = arith.constant 0 : index
    %c3_1051 = arith.constant 3 : index
    %c2_1052 = arith.constant 2 : index
    %c0_1053 = arith.constant 0 : index
    %c0_1054 = arith.constant 0 : index
    %1396 = vector.load %arg2[%c0_1050, %c3_1051, %c2_1052, %c0_1053, %c0_1054] : memref<1x4x8x8x128xf32, #tpu.memory_space<vmem>>, vector<1x1x1x8x128xf32>
    %1397 = vector.shape_cast %1396 : vector<1x1x1x8x128xf32> to vector<8x128xf32>
    %1398 = arith.mulf %1397, %101 : vector<8x128xf32>
    %1399 = arith.addf %1391, %1398 : vector<8x128xf32>
    %1400 = arith.mulf %1397, %105 : vector<8x128xf32>
    %1401 = arith.addf %1393, %1400 : vector<8x128xf32>
    %1402 = arith.mulf %1397, %109 : vector<8x128xf32>
    %1403 = arith.addf %1395, %1402 : vector<8x128xf32>
    %c0_1055 = arith.constant 0 : index
    %c1_1056 = arith.constant 1 : index
    %c0_1057 = arith.constant 0 : index
    %1404 = vector.load %arg6[%c0_1055, %c1_1056, %c0_1057] : memref<2x16x128xf32, #tpu.memory_space<vmem>>, vector<1x8x128xf32>
    %1405 = vector.shape_cast %1404 : vector<1x8x128xf32> to vector<8x128xf32>
    %1406 = vector.shape_cast %1399 : vector<8x128xf32> to vector<1x8x128xf32>
    tpu.vector_store %arg6[%c0_1055, %c1_1056, %c0_1057], %1406 {strides = array<i32>} : memref<2x16x128xf32, #tpu.memory_space<vmem>>, vector<1x8x128xf32>,
    %c1_1058 = arith.constant 1 : index
    %c0_1059 = arith.constant 0 : index
    %c0_1060 = arith.constant 0 : index
    %1407 = vector.load %arg6[%c1_1058, %c0_1059, %c0_1060] : memref<2x16x128xf32, #tpu.memory_space<vmem>>, vector<1x8x128xf32>
    %1408 = vector.shape_cast %1407 : vector<1x8x128xf32> to vector<8x128xf32>
    %1409 = vector.shape_cast %1403 : vector<8x128xf32> to vector<1x8x128xf32>
    tpu.vector_store %arg6[%c1_1058, %c0_1059, %c0_1060], %1409 {strides = array<i32>} : memref<2x16x128xf32, #tpu.memory_space<vmem>>, vector<1x8x128xf32>,
    %c0_1061 = arith.constant 0 : index
    %c0_1062 = arith.constant 0 : index
    %c0_1063 = arith.constant 0 : index
    %1410 = vector.load %arg6[%c0_1061, %c0_1062, %c0_1063] : memref<2x16x128xf32, #tpu.memory_space<vmem>>, vector<1x8x128xf32>
    %1411 = vector.shape_cast %1410 : vector<1x8x128xf32> to vector<8x128xf32>
    %c1_1064 = arith.constant 1 : index
    %c1_1065 = arith.constant 1 : index
    %c0_1066 = arith.constant 0 : index
    %1412 = vector.load %arg6[%c1_1064, %c1_1065, %c0_1066] : memref<2x16x128xf32, #tpu.memory_space<vmem>>, vector<1x8x128xf32>
    %1413 = vector.shape_cast %1412 : vector<1x8x128xf32> to vector<8x128xf32>
    %1414 = arith.addf %1401, %1411 : vector<8x128xf32>
    %1415 = arith.addf %1414, %1413 : vector<8x128xf32>
    %c0_1067 = arith.constant 0 : index
    %c2_1068 = arith.constant 2 : index
    %c1_1069 = arith.constant 1 : index
    %c0_1070 = arith.constant 0 : index
    %c0_1071 = arith.constant 0 : index
    %1416 = vector.load %arg5[%c0_1067, %c2_1068, %c1_1069, %c0_1070, %c0_1071] : memref<1x4x8x8x128xf32, #tpu.memory_space<vmem>>, vector<1x1x1x8x128xf32>
    %1417 = vector.shape_cast %1416 : vector<1x1x1x8x128xf32> to vector<8x128xf32>
    %1418 = vector.shape_cast %1415 : vector<8x128xf32> to vector<1x1x1x8x128xf32>
    tpu.vector_store %arg5[%c0_1067, %c2_1068, %c1_1069, %c0_1070, %c0_1071], %1418 {strides = array<i32>} : memref<1x4x8x8x128xf32, #tpu.memory_space<vmem>>, vector<1x1x1x8x128xf32>,
    %cst_1072 = arith.constant 0.000000e+00 : f32
    %1419 = vector.broadcast %cst_1072 : f32 to vector<8x128xf32>
    %cst_1073 = arith.constant 0.000000e+00 : f32
    %1420 = vector.broadcast %cst_1073 : f32 to vector<8x128xf32>
    %c0_1074 = arith.constant 0 : index
    %c1_1075 = arith.constant 1 : index
    %c1_1076 = arith.constant 1 : index
    %c0_1077 = arith.constant 0 : index
    %c0_1078 = arith.constant 0 : index
    %1421 = vector.load %arg2[%c0_1074, %c1_1075, %c1_1076, %c0_1077, %c0_1078] : memref<1x4x8x8x128xf32, #tpu.memory_space<vmem>>, vector<1x1x1x8x128xf32>
    %1422 = vector.shape_cast %1421 : vector<1x1x1x8x128xf32> to vector<8x128xf32>
    %1423 = arith.mulf %1422, %5 : vector<8x128xf32>
    %1424 = arith.addf %1419, %1423 : vector<8x128xf32>
    %1425 = arith.mulf %1422, %9 : vector<8x128xf32>
    %1426 = arith.addf %112, %1425 : vector<8x128xf32>
    %1427 = arith.mulf %1422, %13 : vector<8x128xf32>
    %1428 = arith.addf %1420, %1427 : vector<8x128xf32>
    %c0_1079 = arith.constant 0 : index
    %c1_1080 = arith.constant 1 : index
    %c2_1081 = arith.constant 2 : index
    %c0_1082 = arith.constant 0 : index
    %c0_1083 = arith.constant 0 : index
    %1429 = vector.load %arg2[%c0_1079, %c1_1080, %c2_1081, %c0_1082, %c0_1083] : memref<1x4x8x8x128xf32, #tpu.memory_space<vmem>>, vector<1x1x1x8x128xf32>
    %1430 = vector.shape_cast %1429 : vector<1x1x1x8x128xf32> to vector<8x128xf32>
    %1431 = arith.mulf %1430, %17 : vector<8x128xf32>
    %1432 = arith.addf %1424, %1431 : vector<8x128xf32>
    %1433 = arith.mulf %1430, %21 : vector<8x128xf32>
    %1434 = arith.addf %1426, %1433 : vector<8x128xf32>
    %1435 = arith.mulf %1430, %25 : vector<8x128xf32>
    %1436 = arith.addf %1428, %1435 : vector<8x128xf32>
    %c0_1084 = arith.constant 0 : index
    %c1_1085 = arith.constant 1 : index
    %c3_1086 = arith.constant 3 : index
    %c0_1087 = arith.constant 0 : index
    %c0_1088 = arith.constant 0 : index
    %1437 = vector.load %arg2[%c0_1084, %c1_1085, %c3_1086, %c0_1087, %c0_1088] : memref<1x4x8x8x128xf32, #tpu.memory_space<vmem>>, vector<1x1x1x8x128xf32>
    %1438 = vector.shape_cast %1437 : vector<1x1x1x8x128xf32> to vector<8x128xf32>
    %1439 = arith.mulf %1438, %29 : vector<8x128xf32>
    %1440 = arith.addf %1432, %1439 : vector<8x128xf32>
    %1441 = arith.mulf %1438, %33 : vector<8x128xf32>
    %1442 = arith.addf %1434, %1441 : vector<8x128xf32>
    %1443 = arith.mulf %1438, %37 : vector<8x128xf32>
    %1444 = arith.addf %1436, %1443 : vector<8x128xf32>
    %c0_1089 = arith.constant 0 : index
    %c2_1090 = arith.constant 2 : index
    %c1_1091 = arith.constant 1 : index
    %c0_1092 = arith.constant 0 : index
    %c0_1093 = arith.constant 0 : index
    %1445 = vector.load %arg2[%c0_1089, %c2_1090, %c1_1091, %c0_1092, %c0_1093] : memref<1x4x8x8x128xf32, #tpu.memory_space<vmem>>, vector<1x1x1x8x128xf32>
    %1446 = vector.shape_cast %1445 : vector<1x1x1x8x128xf32> to vector<8x128xf32>
    %1447 = arith.mulf %1446, %41 : vector<8x128xf32>
    %1448 = arith.addf %1440, %1447 : vector<8x128xf32>
    %1449 = arith.mulf %1446, %45 : vector<8x128xf32>
    %1450 = arith.addf %1442, %1449 : vector<8x128xf32>
    %1451 = arith.mulf %1446, %49 : vector<8x128xf32>
    %1452 = arith.addf %1444, %1451 : vector<8x128xf32>
    %c0_1094 = arith.constant 0 : index
    %c2_1095 = arith.constant 2 : index
    %c2_1096 = arith.constant 2 : index
    %c0_1097 = arith.constant 0 : index
    %c0_1098 = arith.constant 0 : index
    %1453 = vector.load %arg2[%c0_1094, %c2_1095, %c2_1096, %c0_1097, %c0_1098] : memref<1x4x8x8x128xf32, #tpu.memory_space<vmem>>, vector<1x1x1x8x128xf32>
    %1454 = vector.shape_cast %1453 : vector<1x1x1x8x128xf32> to vector<8x128xf32>
    %1455 = arith.mulf %1454, %53 : vector<8x128xf32>
    %1456 = arith.addf %1448, %1455 : vector<8x128xf32>
    %1457 = arith.mulf %1454, %57 : vector<8x128xf32>
    %1458 = arith.addf %1450, %1457 : vector<8x128xf32>
    %1459 = arith.mulf %1454, %61 : vector<8x128xf32>
    %1460 = arith.addf %1452, %1459 : vector<8x128xf32>
    %c0_1099 = arith.constant 0 : index
    %c2_1100 = arith.constant 2 : index
    %c3_1101 = arith.constant 3 : index
    %c0_1102 = arith.constant 0 : index
    %c0_1103 = arith.constant 0 : index
    %1461 = vector.load %arg2[%c0_1099, %c2_1100, %c3_1101, %c0_1102, %c0_1103] : memref<1x4x8x8x128xf32, #tpu.memory_space<vmem>>, vector<1x1x1x8x128xf32>
    %1462 = vector.shape_cast %1461 : vector<1x1x1x8x128xf32> to vector<8x128xf32>
    %1463 = arith.mulf %1462, %65 : vector<8x128xf32>
    %1464 = arith.addf %1456, %1463 : vector<8x128xf32>
    %1465 = arith.mulf %1462, %69 : vector<8x128xf32>
    %1466 = arith.addf %1458, %1465 : vector<8x128xf32>
    %1467 = arith.mulf %1462, %73 : vector<8x128xf32>
    %1468 = arith.addf %1460, %1467 : vector<8x128xf32>
    %c0_1104 = arith.constant 0 : index
    %c3_1105 = arith.constant 3 : index
    %c1_1106 = arith.constant 1 : index
    %c0_1107 = arith.constant 0 : index
    %c0_1108 = arith.constant 0 : index
    %1469 = vector.load %arg2[%c0_1104, %c3_1105, %c1_1106, %c0_1107, %c0_1108] : memref<1x4x8x8x128xf32, #tpu.memory_space<vmem>>, vector<1x1x1x8x128xf32>
    %1470 = vector.shape_cast %1469 : vector<1x1x1x8x128xf32> to vector<8x128xf32>
    %1471 = arith.mulf %1470, %77 : vector<8x128xf32>
    %1472 = arith.addf %1464, %1471 : vector<8x128xf32>
    %1473 = arith.mulf %1470, %81 : vector<8x128xf32>
    %1474 = arith.addf %1466, %1473 : vector<8x128xf32>
    %1475 = arith.mulf %1470, %85 : vector<8x128xf32>
    %1476 = arith.addf %1468, %1475 : vector<8x128xf32>
    %c0_1109 = arith.constant 0 : index
    %c3_1110 = arith.constant 3 : index
    %c2_1111 = arith.constant 2 : index
    %c0_1112 = arith.constant 0 : index
    %c0_1113 = arith.constant 0 : index
    %1477 = vector.load %arg2[%c0_1109, %c3_1110, %c2_1111, %c0_1112, %c0_1113] : memref<1x4x8x8x128xf32, #tpu.memory_space<vmem>>, vector<1x1x1x8x128xf32>
    %1478 = vector.shape_cast %1477 : vector<1x1x1x8x128xf32> to vector<8x128xf32>
    %1479 = arith.mulf %1478, %89 : vector<8x128xf32>
    %1480 = arith.addf %1472, %1479 : vector<8x128xf32>
    %1481 = arith.mulf %1478, %93 : vector<8x128xf32>
    %1482 = arith.addf %1474, %1481 : vector<8x128xf32>
    %1483 = arith.mulf %1478, %97 : vector<8x128xf32>
    %1484 = arith.addf %1476, %1483 : vector<8x128xf32>
    %c0_1114 = arith.constant 0 : index
    %c3_1115 = arith.constant 3 : index
    %c3_1116 = arith.constant 3 : index
    %c0_1117 = arith.constant 0 : index
    %c0_1118 = arith.constant 0 : index
    %1485 = vector.load %arg2[%c0_1114, %c3_1115, %c3_1116, %c0_1117, %c0_1118] : memref<1x4x8x8x128xf32, #tpu.memory_space<vmem>>, vector<1x1x1x8x128xf32>
    %1486 = vector.shape_cast %1485 : vector<1x1x1x8x128xf32> to vector<8x128xf32>
    %1487 = arith.mulf %1486, %101 : vector<8x128xf32>
    %1488 = arith.addf %1480, %1487 : vector<8x128xf32>
    %1489 = arith.mulf %1486, %105 : vector<8x128xf32>
    %1490 = arith.addf %1482, %1489 : vector<8x128xf32>
    %1491 = arith.mulf %1486, %109 : vector<8x128xf32>
    %1492 = arith.addf %1484, %1491 : vector<8x128xf32>
    %c0_1119 = arith.constant 0 : index
    %c1_1120 = arith.constant 1 : index
    %c0_1121 = arith.constant 0 : index
    %1493 = vector.load %arg6[%c0_1119, %c1_1120, %c0_1121] : memref<2x16x128xf32, #tpu.memory_space<vmem>>, vector<1x8x128xf32>
    %1494 = vector.shape_cast %1493 : vector<1x8x128xf32> to vector<8x128xf32>
    %1495 = vector.shape_cast %1488 : vector<8x128xf32> to vector<1x8x128xf32>
    tpu.vector_store %arg6[%c0_1119, %c1_1120, %c0_1121], %1495 {strides = array<i32>} : memref<2x16x128xf32, #tpu.memory_space<vmem>>, vector<1x8x128xf32>,
    %c1_1122 = arith.constant 1 : index
    %c0_1123 = arith.constant 0 : index
    %c0_1124 = arith.constant 0 : index
    %1496 = vector.load %arg6[%c1_1122, %c0_1123, %c0_1124] : memref<2x16x128xf32, #tpu.memory_space<vmem>>, vector<1x8x128xf32>
    %1497 = vector.shape_cast %1496 : vector<1x8x128xf32> to vector<8x128xf32>
    %1498 = vector.shape_cast %1492 : vector<8x128xf32> to vector<1x8x128xf32>
    tpu.vector_store %arg6[%c1_1122, %c0_1123, %c0_1124], %1498 {strides = array<i32>} : memref<2x16x128xf32, #tpu.memory_space<vmem>>, vector<1x8x128xf32>,
    %c0_1125 = arith.constant 0 : index
    %c0_1126 = arith.constant 0 : index
    %c0_1127 = arith.constant 0 : index
    %1499 = vector.load %arg6[%c0_1125, %c0_1126, %c0_1127] : memref<2x16x128xf32, #tpu.memory_space<vmem>>, vector<1x8x128xf32>
    %1500 = vector.shape_cast %1499 : vector<1x8x128xf32> to vector<8x128xf32>
    %c1_1128 = arith.constant 1 : index
    %c1_1129 = arith.constant 1 : index
    %c0_1130 = arith.constant 0 : index
    %1501 = vector.load %arg6[%c1_1128, %c1_1129, %c0_1130] : memref<2x16x128xf32, #tpu.memory_space<vmem>>, vector<1x8x128xf32>
    %1502 = vector.shape_cast %1501 : vector<1x8x128xf32> to vector<8x128xf32>
    %1503 = arith.addf %1490, %1500 : vector<8x128xf32>
    %1504 = arith.addf %1503, %1502 : vector<8x128xf32>
    %c0_1131 = arith.constant 0 : index
    %c2_1132 = arith.constant 2 : index
    %c2_1133 = arith.constant 2 : index
    %c0_1134 = arith.constant 0 : index
    %c0_1135 = arith.constant 0 : index
    %1505 = vector.load %arg5[%c0_1131, %c2_1132, %c2_1133, %c0_1134, %c0_1135] : memref<1x4x8x8x128xf32, #tpu.memory_space<vmem>>, vector<1x1x1x8x128xf32>
    %1506 = vector.shape_cast %1505 : vector<1x1x1x8x128xf32> to vector<8x128xf32>
    %1507 = vector.shape_cast %1504 : vector<8x128xf32> to vector<1x1x1x8x128xf32>
    tpu.vector_store %arg5[%c0_1131, %c2_1132, %c2_1133, %c0_1134, %c0_1135], %1507 {strides = array<i32>} : memref<1x4x8x8x128xf32, #tpu.memory_space<vmem>>, vector<1x1x1x8x128xf32>,
    %cst_1136 = arith.constant 0.000000e+00 : f32
    %1508 = vector.broadcast %cst_1136 : f32 to vector<8x128xf32>
    %cst_1137 = arith.constant 0.000000e+00 : f32
    %1509 = vector.broadcast %cst_1137 : f32 to vector<8x128xf32>
    %c0_1138 = arith.constant 0 : index
    %c1_1139 = arith.constant 1 : index
    %c2_1140 = arith.constant 2 : index
    %c0_1141 = arith.constant 0 : index
    %c0_1142 = arith.constant 0 : index
    %1510 = vector.load %arg2[%c0_1138, %c1_1139, %c2_1140, %c0_1141, %c0_1142] : memref<1x4x8x8x128xf32, #tpu.memory_space<vmem>>, vector<1x1x1x8x128xf32>
    %1511 = vector.shape_cast %1510 : vector<1x1x1x8x128xf32> to vector<8x128xf32>
    %1512 = arith.mulf %1511, %5 : vector<8x128xf32>
    %1513 = arith.addf %1508, %1512 : vector<8x128xf32>
    %1514 = arith.mulf %1511, %9 : vector<8x128xf32>
    %1515 = arith.addf %112, %1514 : vector<8x128xf32>
    %1516 = arith.mulf %1511, %13 : vector<8x128xf32>
    %1517 = arith.addf %1509, %1516 : vector<8x128xf32>
    %c0_1143 = arith.constant 0 : index
    %c1_1144 = arith.constant 1 : index
    %c3_1145 = arith.constant 3 : index
    %c0_1146 = arith.constant 0 : index
    %c0_1147 = arith.constant 0 : index
    %1518 = vector.load %arg2[%c0_1143, %c1_1144, %c3_1145, %c0_1146, %c0_1147] : memref<1x4x8x8x128xf32, #tpu.memory_space<vmem>>, vector<1x1x1x8x128xf32>
    %1519 = vector.shape_cast %1518 : vector<1x1x1x8x128xf32> to vector<8x128xf32>
    %1520 = arith.mulf %1519, %17 : vector<8x128xf32>
    %1521 = arith.addf %1513, %1520 : vector<8x128xf32>
    %1522 = arith.mulf %1519, %21 : vector<8x128xf32>
    %1523 = arith.addf %1515, %1522 : vector<8x128xf32>
    %1524 = arith.mulf %1519, %25 : vector<8x128xf32>
    %1525 = arith.addf %1517, %1524 : vector<8x128xf32>
    %c0_1148 = arith.constant 0 : index
    %c1_1149 = arith.constant 1 : index
    %c4_1150 = arith.constant 4 : index
    %c0_1151 = arith.constant 0 : index
    %c0_1152 = arith.constant 0 : index
    %1526 = vector.load %arg2[%c0_1148, %c1_1149, %c4_1150, %c0_1151, %c0_1152] : memref<1x4x8x8x128xf32, #tpu.memory_space<vmem>>, vector<1x1x1x8x128xf32>
    %1527 = vector.shape_cast %1526 : vector<1x1x1x8x128xf32> to vector<8x128xf32>
    %1528 = arith.mulf %1527, %29 : vector<8x128xf32>
    %1529 = arith.addf %1521, %1528 : vector<8x128xf32>
    %1530 = arith.mulf %1527, %33 : vector<8x128xf32>
    %1531 = arith.addf %1523, %1530 : vector<8x128xf32>
    %1532 = arith.mulf %1527, %37 : vector<8x128xf32>
    %1533 = arith.addf %1525, %1532 : vector<8x128xf32>
    %c0_1153 = arith.constant 0 : index
    %c2_1154 = arith.constant 2 : index
    %c2_1155 = arith.constant 2 : index
    %c0_1156 = arith.constant 0 : index
    %c0_1157 = arith.constant 0 : index
    %1534 = vector.load %arg2[%c0_1153, %c2_1154, %c2_1155, %c0_1156, %c0_1157] : memref<1x4x8x8x128xf32, #tpu.memory_space<vmem>>, vector<1x1x1x8x128xf32>
    %1535 = vector.shape_cast %1534 : vector<1x1x1x8x128xf32> to vector<8x128xf32>
    %1536 = arith.mulf %1535, %41 : vector<8x128xf32>
    %1537 = arith.addf %1529, %1536 : vector<8x128xf32>
    %1538 = arith.mulf %1535, %45 : vector<8x128xf32>
    %1539 = arith.addf %1531, %1538 : vector<8x128xf32>
    %1540 = arith.mulf %1535, %49 : vector<8x128xf32>
    %1541 = arith.addf %1533, %1540 : vector<8x128xf32>
    %c0_1158 = arith.constant 0 : index
    %c2_1159 = arith.constant 2 : index
    %c3_1160 = arith.constant 3 : index
    %c0_1161 = arith.constant 0 : index
    %c0_1162 = arith.constant 0 : index
    %1542 = vector.load %arg2[%c0_1158, %c2_1159, %c3_1160, %c0_1161, %c0_1162] : memref<1x4x8x8x128xf32, #tpu.memory_space<vmem>>, vector<1x1x1x8x128xf32>
    %1543 = vector.shape_cast %1542 : vector<1x1x1x8x128xf32> to vector<8x128xf32>
    %1544 = arith.mulf %1543, %53 : vector<8x128xf32>
    %1545 = arith.addf %1537, %1544 : vector<8x128xf32>
    %1546 = arith.mulf %1543, %57 : vector<8x128xf32>
    %1547 = arith.addf %1539, %1546 : vector<8x128xf32>
    %1548 = arith.mulf %1543, %61 : vector<8x128xf32>
    %1549 = arith.addf %1541, %1548 : vector<8x128xf32>
    %c0_1163 = arith.constant 0 : index
    %c2_1164 = arith.constant 2 : index
    %c4_1165 = arith.constant 4 : index
    %c0_1166 = arith.constant 0 : index
    %c0_1167 = arith.constant 0 : index
    %1550 = vector.load %arg2[%c0_1163, %c2_1164, %c4_1165, %c0_1166, %c0_1167] : memref<1x4x8x8x128xf32, #tpu.memory_space<vmem>>, vector<1x1x1x8x128xf32>
    %1551 = vector.shape_cast %1550 : vector<1x1x1x8x128xf32> to vector<8x128xf32>
    %1552 = arith.mulf %1551, %65 : vector<8x128xf32>
    %1553 = arith.addf %1545, %1552 : vector<8x128xf32>
    %1554 = arith.mulf %1551, %69 : vector<8x128xf32>
    %1555 = arith.addf %1547, %1554 : vector<8x128xf32>
    %1556 = arith.mulf %1551, %73 : vector<8x128xf32>
    %1557 = arith.addf %1549, %1556 : vector<8x128xf32>
    %c0_1168 = arith.constant 0 : index
    %c3_1169 = arith.constant 3 : index
    %c2_1170 = arith.constant 2 : index
    %c0_1171 = arith.constant 0 : index
    %c0_1172 = arith.constant 0 : index
    %1558 = vector.load %arg2[%c0_1168, %c3_1169, %c2_1170, %c0_1171, %c0_1172] : memref<1x4x8x8x128xf32, #tpu.memory_space<vmem>>, vector<1x1x1x8x128xf32>
    %1559 = vector.shape_cast %1558 : vector<1x1x1x8x128xf32> to vector<8x128xf32>
    %1560 = arith.mulf %1559, %77 : vector<8x128xf32>
    %1561 = arith.addf %1553, %1560 : vector<8x128xf32>
    %1562 = arith.mulf %1559, %81 : vector<8x128xf32>
    %1563 = arith.addf %1555, %1562 : vector<8x128xf32>
    %1564 = arith.mulf %1559, %85 : vector<8x128xf32>
    %1565 = arith.addf %1557, %1564 : vector<8x128xf32>
    %c0_1173 = arith.constant 0 : index
    %c3_1174 = arith.constant 3 : index
    %c3_1175 = arith.constant 3 : index
    %c0_1176 = arith.constant 0 : index
    %c0_1177 = arith.constant 0 : index
    %1566 = vector.load %arg2[%c0_1173, %c3_1174, %c3_1175, %c0_1176, %c0_1177] : memref<1x4x8x8x128xf32, #tpu.memory_space<vmem>>, vector<1x1x1x8x128xf32>
    %1567 = vector.shape_cast %1566 : vector<1x1x1x8x128xf32> to vector<8x128xf32>
    %1568 = arith.mulf %1567, %89 : vector<8x128xf32>
    %1569 = arith.addf %1561, %1568 : vector<8x128xf32>
    %1570 = arith.mulf %1567, %93 : vector<8x128xf32>
    %1571 = arith.addf %1563, %1570 : vector<8x128xf32>
    %1572 = arith.mulf %1567, %97 : vector<8x128xf32>
    %1573 = arith.addf %1565, %1572 : vector<8x128xf32>
    %c0_1178 = arith.constant 0 : index
    %c3_1179 = arith.constant 3 : index
    %c4_1180 = arith.constant 4 : index
    %c0_1181 = arith.constant 0 : index
    %c0_1182 = arith.constant 0 : index
    %1574 = vector.load %arg2[%c0_1178, %c3_1179, %c4_1180, %c0_1181, %c0_1182] : memref<1x4x8x8x128xf32, #tpu.memory_space<vmem>>, vector<1x1x1x8x128xf32>
    %1575 = vector.shape_cast %1574 : vector<1x1x1x8x128xf32> to vector<8x128xf32>
    %1576 = arith.mulf %1575, %101 : vector<8x128xf32>
    %1577 = arith.addf %1569, %1576 : vector<8x128xf32>
    %1578 = arith.mulf %1575, %105 : vector<8x128xf32>
    %1579 = arith.addf %1571, %1578 : vector<8x128xf32>
    %1580 = arith.mulf %1575, %109 : vector<8x128xf32>
    %1581 = arith.addf %1573, %1580 : vector<8x128xf32>
    %c0_1183 = arith.constant 0 : index
    %c1_1184 = arith.constant 1 : index
    %c0_1185 = arith.constant 0 : index
    %1582 = vector.load %arg6[%c0_1183, %c1_1184, %c0_1185] : memref<2x16x128xf32, #tpu.memory_space<vmem>>, vector<1x8x128xf32>
    %1583 = vector.shape_cast %1582 : vector<1x8x128xf32> to vector<8x128xf32>
    %1584 = vector.shape_cast %1577 : vector<8x128xf32> to vector<1x8x128xf32>
    tpu.vector_store %arg6[%c0_1183, %c1_1184, %c0_1185], %1584 {strides = array<i32>} : memref<2x16x128xf32, #tpu.memory_space<vmem>>, vector<1x8x128xf32>,
    %c1_1186 = arith.constant 1 : index
    %c0_1187 = arith.constant 0 : index
    %c0_1188 = arith.constant 0 : index
    %1585 = vector.load %arg6[%c1_1186, %c0_1187, %c0_1188] : memref<2x16x128xf32, #tpu.memory_space<vmem>>, vector<1x8x128xf32>
    %1586 = vector.shape_cast %1585 : vector<1x8x128xf32> to vector<8x128xf32>
    %1587 = vector.shape_cast %1581 : vector<8x128xf32> to vector<1x8x128xf32>
    tpu.vector_store %arg6[%c1_1186, %c0_1187, %c0_1188], %1587 {strides = array<i32>} : memref<2x16x128xf32, #tpu.memory_space<vmem>>, vector<1x8x128xf32>,
    %c0_1189 = arith.constant 0 : index
    %c0_1190 = arith.constant 0 : index
    %c0_1191 = arith.constant 0 : index
    %1588 = vector.load %arg6[%c0_1189, %c0_1190, %c0_1191] : memref<2x16x128xf32, #tpu.memory_space<vmem>>, vector<1x8x128xf32>
    %1589 = vector.shape_cast %1588 : vector<1x8x128xf32> to vector<8x128xf32>
    %c1_1192 = arith.constant 1 : index
    %c1_1193 = arith.constant 1 : index
    %c0_1194 = arith.constant 0 : index
    %1590 = vector.load %arg6[%c1_1192, %c1_1193, %c0_1194] : memref<2x16x128xf32, #tpu.memory_space<vmem>>, vector<1x8x128xf32>
    %1591 = vector.shape_cast %1590 : vector<1x8x128xf32> to vector<8x128xf32>
    %1592 = arith.addf %1579, %1589 : vector<8x128xf32>
    %1593 = arith.addf %1592, %1591 : vector<8x128xf32>
    %c0_1195 = arith.constant 0 : index
    %c2_1196 = arith.constant 2 : index
    %c3_1197 = arith.constant 3 : index
    %c0_1198 = arith.constant 0 : index
    %c0_1199 = arith.constant 0 : index
    %1594 = vector.load %arg5[%c0_1195, %c2_1196, %c3_1197, %c0_1198, %c0_1199] : memref<1x4x8x8x128xf32, #tpu.memory_space<vmem>>, vector<1x1x1x8x128xf32>
    %1595 = vector.shape_cast %1594 : vector<1x1x1x8x128xf32> to vector<8x128xf32>
    %1596 = vector.shape_cast %1593 : vector<8x128xf32> to vector<1x1x1x8x128xf32>
    tpu.vector_store %arg5[%c0_1195, %c2_1196, %c3_1197, %c0_1198, %c0_1199], %1596 {strides = array<i32>} : memref<1x4x8x8x128xf32, #tpu.memory_space<vmem>>, vector<1x1x1x8x128xf32>,
    %cst_1200 = arith.constant 0.000000e+00 : f32
    %1597 = vector.broadcast %cst_1200 : f32 to vector<8x128xf32>
    %cst_1201 = arith.constant 0.000000e+00 : f32
    %1598 = vector.broadcast %cst_1201 : f32 to vector<8x128xf32>
    %c0_1202 = arith.constant 0 : index
    %c1_1203 = arith.constant 1 : index
    %c3_1204 = arith.constant 3 : index
    %c0_1205 = arith.constant 0 : index
    %c0_1206 = arith.constant 0 : index
    %1599 = vector.load %arg2[%c0_1202, %c1_1203, %c3_1204, %c0_1205, %c0_1206] : memref<1x4x8x8x128xf32, #tpu.memory_space<vmem>>, vector<1x1x1x8x128xf32>
    %1600 = vector.shape_cast %1599 : vector<1x1x1x8x128xf32> to vector<8x128xf32>
    %1601 = arith.mulf %1600, %5 : vector<8x128xf32>
    %1602 = arith.addf %1597, %1601 : vector<8x128xf32>
    %1603 = arith.mulf %1600, %9 : vector<8x128xf32>
    %1604 = arith.addf %112, %1603 : vector<8x128xf32>
    %1605 = arith.mulf %1600, %13 : vector<8x128xf32>
    %1606 = arith.addf %1598, %1605 : vector<8x128xf32>
    %c0_1207 = arith.constant 0 : index
    %c1_1208 = arith.constant 1 : index
    %c4_1209 = arith.constant 4 : index
    %c0_1210 = arith.constant 0 : index
    %c0_1211 = arith.constant 0 : index
    %1607 = vector.load %arg2[%c0_1207, %c1_1208, %c4_1209, %c0_1210, %c0_1211] : memref<1x4x8x8x128xf32, #tpu.memory_space<vmem>>, vector<1x1x1x8x128xf32>
    %1608 = vector.shape_cast %1607 : vector<1x1x1x8x128xf32> to vector<8x128xf32>
    %1609 = arith.mulf %1608, %17 : vector<8x128xf32>
    %1610 = arith.addf %1602, %1609 : vector<8x128xf32>
    %1611 = arith.mulf %1608, %21 : vector<8x128xf32>
    %1612 = arith.addf %1604, %1611 : vector<8x128xf32>
    %1613 = arith.mulf %1608, %25 : vector<8x128xf32>
    %1614 = arith.addf %1606, %1613 : vector<8x128xf32>
    %c0_1212 = arith.constant 0 : index
    %c1_1213 = arith.constant 1 : index
    %c5_1214 = arith.constant 5 : index
    %c0_1215 = arith.constant 0 : index
    %c0_1216 = arith.constant 0 : index
    %1615 = vector.load %arg2[%c0_1212, %c1_1213, %c5_1214, %c0_1215, %c0_1216] : memref<1x4x8x8x128xf32, #tpu.memory_space<vmem>>, vector<1x1x1x8x128xf32>
    %1616 = vector.shape_cast %1615 : vector<1x1x1x8x128xf32> to vector<8x128xf32>
    %1617 = arith.mulf %1616, %29 : vector<8x128xf32>
    %1618 = arith.addf %1610, %1617 : vector<8x128xf32>
    %1619 = arith.mulf %1616, %33 : vector<8x128xf32>
    %1620 = arith.addf %1612, %1619 : vector<8x128xf32>
    %1621 = arith.mulf %1616, %37 : vector<8x128xf32>
    %1622 = arith.addf %1614, %1621 : vector<8x128xf32>
    %c0_1217 = arith.constant 0 : index
    %c2_1218 = arith.constant 2 : index
    %c3_1219 = arith.constant 3 : index
    %c0_1220 = arith.constant 0 : index
    %c0_1221 = arith.constant 0 : index
    %1623 = vector.load %arg2[%c0_1217, %c2_1218, %c3_1219, %c0_1220, %c0_1221] : memref<1x4x8x8x128xf32, #tpu.memory_space<vmem>>, vector<1x1x1x8x128xf32>
    %1624 = vector.shape_cast %1623 : vector<1x1x1x8x128xf32> to vector<8x128xf32>
    %1625 = arith.mulf %1624, %41 : vector<8x128xf32>
    %1626 = arith.addf %1618, %1625 : vector<8x128xf32>
    %1627 = arith.mulf %1624, %45 : vector<8x128xf32>
    %1628 = arith.addf %1620, %1627 : vector<8x128xf32>
    %1629 = arith.mulf %1624, %49 : vector<8x128xf32>
    %1630 = arith.addf %1622, %1629 : vector<8x128xf32>
    %c0_1222 = arith.constant 0 : index
    %c2_1223 = arith.constant 2 : index
    %c4_1224 = arith.constant 4 : index
    %c0_1225 = arith.constant 0 : index
    %c0_1226 = arith.constant 0 : index
    %1631 = vector.load %arg2[%c0_1222, %c2_1223, %c4_1224, %c0_1225, %c0_1226] : memref<1x4x8x8x128xf32, #tpu.memory_space<vmem>>, vector<1x1x1x8x128xf32>
    %1632 = vector.shape_cast %1631 : vector<1x1x1x8x128xf32> to vector<8x128xf32>
    %1633 = arith.mulf %1632, %53 : vector<8x128xf32>
    %1634 = arith.addf %1626, %1633 : vector<8x128xf32>
    %1635 = arith.mulf %1632, %57 : vector<8x128xf32>
    %1636 = arith.addf %1628, %1635 : vector<8x128xf32>
    %1637 = arith.mulf %1632, %61 : vector<8x128xf32>
    %1638 = arith.addf %1630, %1637 : vector<8x128xf32>
    %c0_1227 = arith.constant 0 : index
    %c2_1228 = arith.constant 2 : index
    %c5_1229 = arith.constant 5 : index
    %c0_1230 = arith.constant 0 : index
    %c0_1231 = arith.constant 0 : index
    %1639 = vector.load %arg2[%c0_1227, %c2_1228, %c5_1229, %c0_1230, %c0_1231] : memref<1x4x8x8x128xf32, #tpu.memory_space<vmem>>, vector<1x1x1x8x128xf32>
    %1640 = vector.shape_cast %1639 : vector<1x1x1x8x128xf32> to vector<8x128xf32>
    %1641 = arith.mulf %1640, %65 : vector<8x128xf32>
    %1642 = arith.addf %1634, %1641 : vector<8x128xf32>
    %1643 = arith.mulf %1640, %69 : vector<8x128xf32>
    %1644 = arith.addf %1636, %1643 : vector<8x128xf32>
    %1645 = arith.mulf %1640, %73 : vector<8x128xf32>
    %1646 = arith.addf %1638, %1645 : vector<8x128xf32>
    %c0_1232 = arith.constant 0 : index
    %c3_1233 = arith.constant 3 : index
    %c3_1234 = arith.constant 3 : index
    %c0_1235 = arith.constant 0 : index
    %c0_1236 = arith.constant 0 : index
    %1647 = vector.load %arg2[%c0_1232, %c3_1233, %c3_1234, %c0_1235, %c0_1236] : memref<1x4x8x8x128xf32, #tpu.memory_space<vmem>>, vector<1x1x1x8x128xf32>
    %1648 = vector.shape_cast %1647 : vector<1x1x1x8x128xf32> to vector<8x128xf32>
    %1649 = arith.mulf %1648, %77 : vector<8x128xf32>
    %1650 = arith.addf %1642, %1649 : vector<8x128xf32>
    %1651 = arith.mulf %1648, %81 : vector<8x128xf32>
    %1652 = arith.addf %1644, %1651 : vector<8x128xf32>
    %1653 = arith.mulf %1648, %85 : vector<8x128xf32>
    %1654 = arith.addf %1646, %1653 : vector<8x128xf32>
    %c0_1237 = arith.constant 0 : index
    %c3_1238 = arith.constant 3 : index
    %c4_1239 = arith.constant 4 : index
    %c0_1240 = arith.constant 0 : index
    %c0_1241 = arith.constant 0 : index
    %1655 = vector.load %arg2[%c0_1237, %c3_1238, %c4_1239, %c0_1240, %c0_1241] : memref<1x4x8x8x128xf32, #tpu.memory_space<vmem>>, vector<1x1x1x8x128xf32>
    %1656 = vector.shape_cast %1655 : vector<1x1x1x8x128xf32> to vector<8x128xf32>
    %1657 = arith.mulf %1656, %89 : vector<8x128xf32>
    %1658 = arith.addf %1650, %1657 : vector<8x128xf32>
    %1659 = arith.mulf %1656, %93 : vector<8x128xf32>
    %1660 = arith.addf %1652, %1659 : vector<8x128xf32>
    %1661 = arith.mulf %1656, %97 : vector<8x128xf32>
    %1662 = arith.addf %1654, %1661 : vector<8x128xf32>
    %c0_1242 = arith.constant 0 : index
    %c3_1243 = arith.constant 3 : index
    %c5_1244 = arith.constant 5 : index
    %c0_1245 = arith.constant 0 : index
    %c0_1246 = arith.constant 0 : index
    %1663 = vector.load %arg2[%c0_1242, %c3_1243, %c5_1244, %c0_1245, %c0_1246] : memref<1x4x8x8x128xf32, #tpu.memory_space<vmem>>, vector<1x1x1x8x128xf32>
    %1664 = vector.shape_cast %1663 : vector<1x1x1x8x128xf32> to vector<8x128xf32>
    %1665 = arith.mulf %1664, %101 : vector<8x128xf32>
    %1666 = arith.addf %1658, %1665 : vector<8x128xf32>
    %1667 = arith.mulf %1664, %105 : vector<8x128xf32>
    %1668 = arith.addf %1660, %1667 : vector<8x128xf32>
    %1669 = arith.mulf %1664, %109 : vector<8x128xf32>
    %1670 = arith.addf %1662, %1669 : vector<8x128xf32>
    %c0_1247 = arith.constant 0 : index
    %c1_1248 = arith.constant 1 : index
    %c0_1249 = arith.constant 0 : index
    %1671 = vector.load %arg6[%c0_1247, %c1_1248, %c0_1249] : memref<2x16x128xf32, #tpu.memory_space<vmem>>, vector<1x8x128xf32>
    %1672 = vector.shape_cast %1671 : vector<1x8x128xf32> to vector<8x128xf32>
    %1673 = vector.shape_cast %1666 : vector<8x128xf32> to vector<1x8x128xf32>
    tpu.vector_store %arg6[%c0_1247, %c1_1248, %c0_1249], %1673 {strides = array<i32>} : memref<2x16x128xf32, #tpu.memory_space<vmem>>, vector<1x8x128xf32>,
    %c1_1250 = arith.constant 1 : index
    %c0_1251 = arith.constant 0 : index
    %c0_1252 = arith.constant 0 : index
    %1674 = vector.load %arg6[%c1_1250, %c0_1251, %c0_1252] : memref<2x16x128xf32, #tpu.memory_space<vmem>>, vector<1x8x128xf32>
    %1675 = vector.shape_cast %1674 : vector<1x8x128xf32> to vector<8x128xf32>
    %1676 = vector.shape_cast %1670 : vector<8x128xf32> to vector<1x8x128xf32>
    tpu.vector_store %arg6[%c1_1250, %c0_1251, %c0_1252], %1676 {strides = array<i32>} : memref<2x16x128xf32, #tpu.memory_space<vmem>>, vector<1x8x128xf32>,
    %c0_1253 = arith.constant 0 : index
    %c0_1254 = arith.constant 0 : index
    %c0_1255 = arith.constant 0 : index
    %1677 = vector.load %arg6[%c0_1253, %c0_1254, %c0_1255] : memref<2x16x128xf32, #tpu.memory_space<vmem>>, vector<1x8x128xf32>
    %1678 = vector.shape_cast %1677 : vector<1x8x128xf32> to vector<8x128xf32>
    %c1_1256 = arith.constant 1 : index
    %c1_1257 = arith.constant 1 : index
    %c0_1258 = arith.constant 0 : index
    %1679 = vector.load %arg6[%c1_1256, %c1_1257, %c0_1258] : memref<2x16x128xf32, #tpu.memory_space<vmem>>, vector<1x8x128xf32>
    %1680 = vector.shape_cast %1679 : vector<1x8x128xf32> to vector<8x128xf32>
    %1681 = arith.addf %1668, %1678 : vector<8x128xf32>
    %1682 = arith.addf %1681, %1680 : vector<8x128xf32>
    %c0_1259 = arith.constant 0 : index
    %c2_1260 = arith.constant 2 : index
    %c4_1261 = arith.constant 4 : index
    %c0_1262 = arith.constant 0 : index
    %c0_1263 = arith.constant 0 : index
    %1683 = vector.load %arg5[%c0_1259, %c2_1260, %c4_1261, %c0_1262, %c0_1263] : memref<1x4x8x8x128xf32, #tpu.memory_space<vmem>>, vector<1x1x1x8x128xf32>
    %1684 = vector.shape_cast %1683 : vector<1x1x1x8x128xf32> to vector<8x128xf32>
    %1685 = vector.shape_cast %1682 : vector<8x128xf32> to vector<1x1x1x8x128xf32>
    tpu.vector_store %arg5[%c0_1259, %c2_1260, %c4_1261, %c0_1262, %c0_1263], %1685 {strides = array<i32>} : memref<1x4x8x8x128xf32, #tpu.memory_space<vmem>>, vector<1x1x1x8x128xf32>,
    %cst_1264 = arith.constant 0.000000e+00 : f32
    %1686 = vector.broadcast %cst_1264 : f32 to vector<8x128xf32>
    %cst_1265 = arith.constant 0.000000e+00 : f32
    %1687 = vector.broadcast %cst_1265 : f32 to vector<8x128xf32>
    %c0_1266 = arith.constant 0 : index
    %c1_1267 = arith.constant 1 : index
    %c4_1268 = arith.constant 4 : index
    %c0_1269 = arith.constant 0 : index
    %c0_1270 = arith.constant 0 : index
    %1688 = vector.load %arg2[%c0_1266, %c1_1267, %c4_1268, %c0_1269, %c0_1270] : memref<1x4x8x8x128xf32, #tpu.memory_space<vmem>>, vector<1x1x1x8x128xf32>
    %1689 = vector.shape_cast %1688 : vector<1x1x1x8x128xf32> to vector<8x128xf32>
    %1690 = arith.mulf %1689, %5 : vector<8x128xf32>
    %1691 = arith.addf %1686, %1690 : vector<8x128xf32>
    %1692 = arith.mulf %1689, %9 : vector<8x128xf32>
    %1693 = arith.addf %112, %1692 : vector<8x128xf32>
    %1694 = arith.mulf %1689, %13 : vector<8x128xf32>
    %1695 = arith.addf %1687, %1694 : vector<8x128xf32>
    %c0_1271 = arith.constant 0 : index
    %c1_1272 = arith.constant 1 : index
    %c5_1273 = arith.constant 5 : index
    %c0_1274 = arith.constant 0 : index
    %c0_1275 = arith.constant 0 : index
    %1696 = vector.load %arg2[%c0_1271, %c1_1272, %c5_1273, %c0_1274, %c0_1275] : memref<1x4x8x8x128xf32, #tpu.memory_space<vmem>>, vector<1x1x1x8x128xf32>
    %1697 = vector.shape_cast %1696 : vector<1x1x1x8x128xf32> to vector<8x128xf32>
    %1698 = arith.mulf %1697, %17 : vector<8x128xf32>
    %1699 = arith.addf %1691, %1698 : vector<8x128xf32>
    %1700 = arith.mulf %1697, %21 : vector<8x128xf32>
    %1701 = arith.addf %1693, %1700 : vector<8x128xf32>
    %1702 = arith.mulf %1697, %25 : vector<8x128xf32>
    %1703 = arith.addf %1695, %1702 : vector<8x128xf32>
    %c0_1276 = arith.constant 0 : index
    %c1_1277 = arith.constant 1 : index
    %c6_1278 = arith.constant 6 : index
    %c0_1279 = arith.constant 0 : index
    %c0_1280 = arith.constant 0 : index
    %1704 = vector.load %arg2[%c0_1276, %c1_1277, %c6_1278, %c0_1279, %c0_1280] : memref<1x4x8x8x128xf32, #tpu.memory_space<vmem>>, vector<1x1x1x8x128xf32>
    %1705 = vector.shape_cast %1704 : vector<1x1x1x8x128xf32> to vector<8x128xf32>
    %1706 = arith.mulf %1705, %29 : vector<8x128xf32>
    %1707 = arith.addf %1699, %1706 : vector<8x128xf32>
    %1708 = arith.mulf %1705, %33 : vector<8x128xf32>
    %1709 = arith.addf %1701, %1708 : vector<8x128xf32>
    %1710 = arith.mulf %1705, %37 : vector<8x128xf32>
    %1711 = arith.addf %1703, %1710 : vector<8x128xf32>
    %c0_1281 = arith.constant 0 : index
    %c2_1282 = arith.constant 2 : index
    %c4_1283 = arith.constant 4 : index
    %c0_1284 = arith.constant 0 : index
    %c0_1285 = arith.constant 0 : index
    %1712 = vector.load %arg2[%c0_1281, %c2_1282, %c4_1283, %c0_1284, %c0_1285] : memref<1x4x8x8x128xf32, #tpu.memory_space<vmem>>, vector<1x1x1x8x128xf32>
    %1713 = vector.shape_cast %1712 : vector<1x1x1x8x128xf32> to vector<8x128xf32>
    %1714 = arith.mulf %1713, %41 : vector<8x128xf32>
    %1715 = arith.addf %1707, %1714 : vector<8x128xf32>
    %1716 = arith.mulf %1713, %45 : vector<8x128xf32>
    %1717 = arith.addf %1709, %1716 : vector<8x128xf32>
    %1718 = arith.mulf %1713, %49 : vector<8x128xf32>
    %1719 = arith.addf %1711, %1718 : vector<8x128xf32>
    %c0_1286 = arith.constant 0 : index
    %c2_1287 = arith.constant 2 : index
    %c5_1288 = arith.constant 5 : index
    %c0_1289 = arith.constant 0 : index
    %c0_1290 = arith.constant 0 : index
    %1720 = vector.load %arg2[%c0_1286, %c2_1287, %c5_1288, %c0_1289, %c0_1290] : memref<1x4x8x8x128xf32, #tpu.memory_space<vmem>>, vector<1x1x1x8x128xf32>
    %1721 = vector.shape_cast %1720 : vector<1x1x1x8x128xf32> to vector<8x128xf32>
    %1722 = arith.mulf %1721, %53 : vector<8x128xf32>
    %1723 = arith.addf %1715, %1722 : vector<8x128xf32>
    %1724 = arith.mulf %1721, %57 : vector<8x128xf32>
    %1725 = arith.addf %1717, %1724 : vector<8x128xf32>
    %1726 = arith.mulf %1721, %61 : vector<8x128xf32>
    %1727 = arith.addf %1719, %1726 : vector<8x128xf32>
    %c0_1291 = arith.constant 0 : index
    %c2_1292 = arith.constant 2 : index
    %c6_1293 = arith.constant 6 : index
    %c0_1294 = arith.constant 0 : index
    %c0_1295 = arith.constant 0 : index
    %1728 = vector.load %arg2[%c0_1291, %c2_1292, %c6_1293, %c0_1294, %c0_1295] : memref<1x4x8x8x128xf32, #tpu.memory_space<vmem>>, vector<1x1x1x8x128xf32>
    %1729 = vector.shape_cast %1728 : vector<1x1x1x8x128xf32> to vector<8x128xf32>
    %1730 = arith.mulf %1729, %65 : vector<8x128xf32>
    %1731 = arith.addf %1723, %1730 : vector<8x128xf32>
    %1732 = arith.mulf %1729, %69 : vector<8x128xf32>
    %1733 = arith.addf %1725, %1732 : vector<8x128xf32>
    %1734 = arith.mulf %1729, %73 : vector<8x128xf32>
    %1735 = arith.addf %1727, %1734 : vector<8x128xf32>
    %c0_1296 = arith.constant 0 : index
    %c3_1297 = arith.constant 3 : index
    %c4_1298 = arith.constant 4 : index
    %c0_1299 = arith.constant 0 : index
    %c0_1300 = arith.constant 0 : index
    %1736 = vector.load %arg2[%c0_1296, %c3_1297, %c4_1298, %c0_1299, %c0_1300] : memref<1x4x8x8x128xf32, #tpu.memory_space<vmem>>, vector<1x1x1x8x128xf32>
    %1737 = vector.shape_cast %1736 : vector<1x1x1x8x128xf32> to vector<8x128xf32>
    %1738 = arith.mulf %1737, %77 : vector<8x128xf32>
    %1739 = arith.addf %1731, %1738 : vector<8x128xf32>
    %1740 = arith.mulf %1737, %81 : vector<8x128xf32>
    %1741 = arith.addf %1733, %1740 : vector<8x128xf32>
    %1742 = arith.mulf %1737, %85 : vector<8x128xf32>
    %1743 = arith.addf %1735, %1742 : vector<8x128xf32>
    %c0_1301 = arith.constant 0 : index
    %c3_1302 = arith.constant 3 : index
    %c5_1303 = arith.constant 5 : index
    %c0_1304 = arith.constant 0 : index
    %c0_1305 = arith.constant 0 : index
    %1744 = vector.load %arg2[%c0_1301, %c3_1302, %c5_1303, %c0_1304, %c0_1305] : memref<1x4x8x8x128xf32, #tpu.memory_space<vmem>>, vector<1x1x1x8x128xf32>
    %1745 = vector.shape_cast %1744 : vector<1x1x1x8x128xf32> to vector<8x128xf32>
    %1746 = arith.mulf %1745, %89 : vector<8x128xf32>
    %1747 = arith.addf %1739, %1746 : vector<8x128xf32>
    %1748 = arith.mulf %1745, %93 : vector<8x128xf32>
    %1749 = arith.addf %1741, %1748 : vector<8x128xf32>
    %1750 = arith.mulf %1745, %97 : vector<8x128xf32>
    %1751 = arith.addf %1743, %1750 : vector<8x128xf32>
    %c0_1306 = arith.constant 0 : index
    %c3_1307 = arith.constant 3 : index
    %c6_1308 = arith.constant 6 : index
    %c0_1309 = arith.constant 0 : index
    %c0_1310 = arith.constant 0 : index
    %1752 = vector.load %arg2[%c0_1306, %c3_1307, %c6_1308, %c0_1309, %c0_1310] : memref<1x4x8x8x128xf32, #tpu.memory_space<vmem>>, vector<1x1x1x8x128xf32>
    %1753 = vector.shape_cast %1752 : vector<1x1x1x8x128xf32> to vector<8x128xf32>
    %1754 = arith.mulf %1753, %101 : vector<8x128xf32>
    %1755 = arith.addf %1747, %1754 : vector<8x128xf32>
    %1756 = arith.mulf %1753, %105 : vector<8x128xf32>
    %1757 = arith.addf %1749, %1756 : vector<8x128xf32>
    %1758 = arith.mulf %1753, %109 : vector<8x128xf32>
    %1759 = arith.addf %1751, %1758 : vector<8x128xf32>
    %c0_1311 = arith.constant 0 : index
    %c1_1312 = arith.constant 1 : index
    %c0_1313 = arith.constant 0 : index
    %1760 = vector.load %arg6[%c0_1311, %c1_1312, %c0_1313] : memref<2x16x128xf32, #tpu.memory_space<vmem>>, vector<1x8x128xf32>
    %1761 = vector.shape_cast %1760 : vector<1x8x128xf32> to vector<8x128xf32>
    %1762 = vector.shape_cast %1755 : vector<8x128xf32> to vector<1x8x128xf32>
    tpu.vector_store %arg6[%c0_1311, %c1_1312, %c0_1313], %1762 {strides = array<i32>} : memref<2x16x128xf32, #tpu.memory_space<vmem>>, vector<1x8x128xf32>,
    %c1_1314 = arith.constant 1 : index
    %c0_1315 = arith.constant 0 : index
    %c0_1316 = arith.constant 0 : index
    %1763 = vector.load %arg6[%c1_1314, %c0_1315, %c0_1316] : memref<2x16x128xf32, #tpu.memory_space<vmem>>, vector<1x8x128xf32>
    %1764 = vector.shape_cast %1763 : vector<1x8x128xf32> to vector<8x128xf32>
    %1765 = vector.shape_cast %1759 : vector<8x128xf32> to vector<1x8x128xf32>
    tpu.vector_store %arg6[%c1_1314, %c0_1315, %c0_1316], %1765 {strides = array<i32>} : memref<2x16x128xf32, #tpu.memory_space<vmem>>, vector<1x8x128xf32>,
    %c0_1317 = arith.constant 0 : index
    %c0_1318 = arith.constant 0 : index
    %c0_1319 = arith.constant 0 : index
    %1766 = vector.load %arg6[%c0_1317, %c0_1318, %c0_1319] : memref<2x16x128xf32, #tpu.memory_space<vmem>>, vector<1x8x128xf32>
    %1767 = vector.shape_cast %1766 : vector<1x8x128xf32> to vector<8x128xf32>
    %c1_1320 = arith.constant 1 : index
    %c1_1321 = arith.constant 1 : index
    %c0_1322 = arith.constant 0 : index
    %1768 = vector.load %arg6[%c1_1320, %c1_1321, %c0_1322] : memref<2x16x128xf32, #tpu.memory_space<vmem>>, vector<1x8x128xf32>
    %1769 = vector.shape_cast %1768 : vector<1x8x128xf32> to vector<8x128xf32>
    %1770 = arith.addf %1757, %1767 : vector<8x128xf32>
    %1771 = arith.addf %1770, %1769 : vector<8x128xf32>
    %c0_1323 = arith.constant 0 : index
    %c2_1324 = arith.constant 2 : index
    %c5_1325 = arith.constant 5 : index
    %c0_1326 = arith.constant 0 : index
    %c0_1327 = arith.constant 0 : index
    %1772 = vector.load %arg5[%c0_1323, %c2_1324, %c5_1325, %c0_1326, %c0_1327] : memref<1x4x8x8x128xf32, #tpu.memory_space<vmem>>, vector<1x1x1x8x128xf32>
    %1773 = vector.shape_cast %1772 : vector<1x1x1x8x128xf32> to vector<8x128xf32>
    %1774 = vector.shape_cast %1771 : vector<8x128xf32> to vector<1x1x1x8x128xf32>
    tpu.vector_store %arg5[%c0_1323, %c2_1324, %c5_1325, %c0_1326, %c0_1327], %1774 {strides = array<i32>} : memref<1x4x8x8x128xf32, #tpu.memory_space<vmem>>, vector<1x1x1x8x128xf32>,
    %cst_1328 = arith.constant 0.000000e+00 : f32
    %1775 = vector.broadcast %cst_1328 : f32 to vector<8x128xf32>
    %cst_1329 = arith.constant 0.000000e+00 : f32
    %1776 = vector.broadcast %cst_1329 : f32 to vector<8x128xf32>
    %c0_1330 = arith.constant 0 : index
    %c1_1331 = arith.constant 1 : index
    %c5_1332 = arith.constant 5 : index
    %c0_1333 = arith.constant 0 : index
    %c0_1334 = arith.constant 0 : index
    %1777 = vector.load %arg2[%c0_1330, %c1_1331, %c5_1332, %c0_1333, %c0_1334] : memref<1x4x8x8x128xf32, #tpu.memory_space<vmem>>, vector<1x1x1x8x128xf32>
    %1778 = vector.shape_cast %1777 : vector<1x1x1x8x128xf32> to vector<8x128xf32>
    %1779 = arith.mulf %1778, %5 : vector<8x128xf32>
    %1780 = arith.addf %1775, %1779 : vector<8x128xf32>
    %1781 = arith.mulf %1778, %9 : vector<8x128xf32>
    %1782 = arith.addf %112, %1781 : vector<8x128xf32>
    %1783 = arith.mulf %1778, %13 : vector<8x128xf32>
    %1784 = arith.addf %1776, %1783 : vector<8x128xf32>
    %c0_1335 = arith.constant 0 : index
    %c1_1336 = arith.constant 1 : index
    %c6_1337 = arith.constant 6 : index
    %c0_1338 = arith.constant 0 : index
    %c0_1339 = arith.constant 0 : index
    %1785 = vector.load %arg2[%c0_1335, %c1_1336, %c6_1337, %c0_1338, %c0_1339] : memref<1x4x8x8x128xf32, #tpu.memory_space<vmem>>, vector<1x1x1x8x128xf32>
    %1786 = vector.shape_cast %1785 : vector<1x1x1x8x128xf32> to vector<8x128xf32>
    %1787 = arith.mulf %1786, %17 : vector<8x128xf32>
    %1788 = arith.addf %1780, %1787 : vector<8x128xf32>
    %1789 = arith.mulf %1786, %21 : vector<8x128xf32>
    %1790 = arith.addf %1782, %1789 : vector<8x128xf32>
    %1791 = arith.mulf %1786, %25 : vector<8x128xf32>
    %1792 = arith.addf %1784, %1791 : vector<8x128xf32>
    %c0_1340 = arith.constant 0 : index
    %c1_1341 = arith.constant 1 : index
    %c7_1342 = arith.constant 7 : index
    %c0_1343 = arith.constant 0 : index
    %c0_1344 = arith.constant 0 : index
    %1793 = vector.load %arg2[%c0_1340, %c1_1341, %c7_1342, %c0_1343, %c0_1344] : memref<1x4x8x8x128xf32, #tpu.memory_space<vmem>>, vector<1x1x1x8x128xf32>
    %1794 = vector.shape_cast %1793 : vector<1x1x1x8x128xf32> to vector<8x128xf32>
    %1795 = arith.mulf %1794, %29 : vector<8x128xf32>
    %1796 = arith.addf %1788, %1795 : vector<8x128xf32>
    %1797 = arith.mulf %1794, %33 : vector<8x128xf32>
    %1798 = arith.addf %1790, %1797 : vector<8x128xf32>
    %1799 = arith.mulf %1794, %37 : vector<8x128xf32>
    %1800 = arith.addf %1792, %1799 : vector<8x128xf32>
    %c0_1345 = arith.constant 0 : index
    %c2_1346 = arith.constant 2 : index
    %c5_1347 = arith.constant 5 : index
    %c0_1348 = arith.constant 0 : index
    %c0_1349 = arith.constant 0 : index
    %1801 = vector.load %arg2[%c0_1345, %c2_1346, %c5_1347, %c0_1348, %c0_1349] : memref<1x4x8x8x128xf32, #tpu.memory_space<vmem>>, vector<1x1x1x8x128xf32>
    %1802 = vector.shape_cast %1801 : vector<1x1x1x8x128xf32> to vector<8x128xf32>
    %1803 = arith.mulf %1802, %41 : vector<8x128xf32>
    %1804 = arith.addf %1796, %1803 : vector<8x128xf32>
    %1805 = arith.mulf %1802, %45 : vector<8x128xf32>
    %1806 = arith.addf %1798, %1805 : vector<8x128xf32>
    %1807 = arith.mulf %1802, %49 : vector<8x128xf32>
    %1808 = arith.addf %1800, %1807 : vector<8x128xf32>
    %c0_1350 = arith.constant 0 : index
    %c2_1351 = arith.constant 2 : index
    %c6_1352 = arith.constant 6 : index
    %c0_1353 = arith.constant 0 : index
    %c0_1354 = arith.constant 0 : index
    %1809 = vector.load %arg2[%c0_1350, %c2_1351, %c6_1352, %c0_1353, %c0_1354] : memref<1x4x8x8x128xf32, #tpu.memory_space<vmem>>, vector<1x1x1x8x128xf32>
    %1810 = vector.shape_cast %1809 : vector<1x1x1x8x128xf32> to vector<8x128xf32>
    %1811 = arith.mulf %1810, %53 : vector<8x128xf32>
    %1812 = arith.addf %1804, %1811 : vector<8x128xf32>
    %1813 = arith.mulf %1810, %57 : vector<8x128xf32>
    %1814 = arith.addf %1806, %1813 : vector<8x128xf32>
    %1815 = arith.mulf %1810, %61 : vector<8x128xf32>
    %1816 = arith.addf %1808, %1815 : vector<8x128xf32>
    %c0_1355 = arith.constant 0 : index
    %c2_1356 = arith.constant 2 : index
    %c7_1357 = arith.constant 7 : index
    %c0_1358 = arith.constant 0 : index
    %c0_1359 = arith.constant 0 : index
    %1817 = vector.load %arg2[%c0_1355, %c2_1356, %c7_1357, %c0_1358, %c0_1359] : memref<1x4x8x8x128xf32, #tpu.memory_space<vmem>>, vector<1x1x1x8x128xf32>
    %1818 = vector.shape_cast %1817 : vector<1x1x1x8x128xf32> to vector<8x128xf32>
    %1819 = arith.mulf %1818, %65 : vector<8x128xf32>
    %1820 = arith.addf %1812, %1819 : vector<8x128xf32>
    %1821 = arith.mulf %1818, %69 : vector<8x128xf32>
    %1822 = arith.addf %1814, %1821 : vector<8x128xf32>
    %1823 = arith.mulf %1818, %73 : vector<8x128xf32>
    %1824 = arith.addf %1816, %1823 : vector<8x128xf32>
    %c0_1360 = arith.constant 0 : index
    %c3_1361 = arith.constant 3 : index
    %c5_1362 = arith.constant 5 : index
    %c0_1363 = arith.constant 0 : index
    %c0_1364 = arith.constant 0 : index
    %1825 = vector.load %arg2[%c0_1360, %c3_1361, %c5_1362, %c0_1363, %c0_1364] : memref<1x4x8x8x128xf32, #tpu.memory_space<vmem>>, vector<1x1x1x8x128xf32>
    %1826 = vector.shape_cast %1825 : vector<1x1x1x8x128xf32> to vector<8x128xf32>
    %1827 = arith.mulf %1826, %77 : vector<8x128xf32>
    %1828 = arith.addf %1820, %1827 : vector<8x128xf32>
    %1829 = arith.mulf %1826, %81 : vector<8x128xf32>
    %1830 = arith.addf %1822, %1829 : vector<8x128xf32>
    %1831 = arith.mulf %1826, %85 : vector<8x128xf32>
    %1832 = arith.addf %1824, %1831 : vector<8x128xf32>
    %c0_1365 = arith.constant 0 : index
    %c3_1366 = arith.constant 3 : index
    %c6_1367 = arith.constant 6 : index
    %c0_1368 = arith.constant 0 : index
    %c0_1369 = arith.constant 0 : index
    %1833 = vector.load %arg2[%c0_1365, %c3_1366, %c6_1367, %c0_1368, %c0_1369] : memref<1x4x8x8x128xf32, #tpu.memory_space<vmem>>, vector<1x1x1x8x128xf32>
    %1834 = vector.shape_cast %1833 : vector<1x1x1x8x128xf32> to vector<8x128xf32>
    %1835 = arith.mulf %1834, %89 : vector<8x128xf32>
    %1836 = arith.addf %1828, %1835 : vector<8x128xf32>
    %1837 = arith.mulf %1834, %93 : vector<8x128xf32>
    %1838 = arith.addf %1830, %1837 : vector<8x128xf32>
    %1839 = arith.mulf %1834, %97 : vector<8x128xf32>
    %1840 = arith.addf %1832, %1839 : vector<8x128xf32>
    %c0_1370 = arith.constant 0 : index
    %c3_1371 = arith.constant 3 : index
    %c7_1372 = arith.constant 7 : index
    %c0_1373 = arith.constant 0 : index
    %c0_1374 = arith.constant 0 : index
    %1841 = vector.load %arg2[%c0_1370, %c3_1371, %c7_1372, %c0_1373, %c0_1374] : memref<1x4x8x8x128xf32, #tpu.memory_space<vmem>>, vector<1x1x1x8x128xf32>
    %1842 = vector.shape_cast %1841 : vector<1x1x1x8x128xf32> to vector<8x128xf32>
    %1843 = arith.mulf %1842, %101 : vector<8x128xf32>
    %1844 = arith.addf %1836, %1843 : vector<8x128xf32>
    %1845 = arith.mulf %1842, %105 : vector<8x128xf32>
    %1846 = arith.addf %1838, %1845 : vector<8x128xf32>
    %1847 = arith.mulf %1842, %109 : vector<8x128xf32>
    %1848 = arith.addf %1840, %1847 : vector<8x128xf32>
    %c0_1375 = arith.constant 0 : index
    %c1_1376 = arith.constant 1 : index
    %c0_1377 = arith.constant 0 : index
    %1849 = vector.load %arg6[%c0_1375, %c1_1376, %c0_1377] : memref<2x16x128xf32, #tpu.memory_space<vmem>>, vector<1x8x128xf32>
    %1850 = vector.shape_cast %1849 : vector<1x8x128xf32> to vector<8x128xf32>
    %1851 = vector.shape_cast %1844 : vector<8x128xf32> to vector<1x8x128xf32>
    tpu.vector_store %arg6[%c0_1375, %c1_1376, %c0_1377], %1851 {strides = array<i32>} : memref<2x16x128xf32, #tpu.memory_space<vmem>>, vector<1x8x128xf32>,
    %c1_1378 = arith.constant 1 : index
    %c0_1379 = arith.constant 0 : index
    %c0_1380 = arith.constant 0 : index
    %1852 = vector.load %arg6[%c1_1378, %c0_1379, %c0_1380] : memref<2x16x128xf32, #tpu.memory_space<vmem>>, vector<1x8x128xf32>
    %1853 = vector.shape_cast %1852 : vector<1x8x128xf32> to vector<8x128xf32>
    %1854 = vector.shape_cast %1848 : vector<8x128xf32> to vector<1x8x128xf32>
    tpu.vector_store %arg6[%c1_1378, %c0_1379, %c0_1380], %1854 {strides = array<i32>} : memref<2x16x128xf32, #tpu.memory_space<vmem>>, vector<1x8x128xf32>,
    %c0_1381 = arith.constant 0 : index
    %c0_1382 = arith.constant 0 : index
    %c0_1383 = arith.constant 0 : index
    %1855 = vector.load %arg6[%c0_1381, %c0_1382, %c0_1383] : memref<2x16x128xf32, #tpu.memory_space<vmem>>, vector<1x8x128xf32>
    %1856 = vector.shape_cast %1855 : vector<1x8x128xf32> to vector<8x128xf32>
    %c1_1384 = arith.constant 1 : index
    %c1_1385 = arith.constant 1 : index
    %c0_1386 = arith.constant 0 : index
    %1857 = vector.load %arg6[%c1_1384, %c1_1385, %c0_1386] : memref<2x16x128xf32, #tpu.memory_space<vmem>>, vector<1x8x128xf32>
    %1858 = vector.shape_cast %1857 : vector<1x8x128xf32> to vector<8x128xf32>
    %1859 = arith.addf %1846, %1856 : vector<8x128xf32>
    %1860 = arith.addf %1859, %1858 : vector<8x128xf32>
    %c0_1387 = arith.constant 0 : index
    %c2_1388 = arith.constant 2 : index
    %c6_1389 = arith.constant 6 : index
    %c0_1390 = arith.constant 0 : index
    %c0_1391 = arith.constant 0 : index
    %1861 = vector.load %arg5[%c0_1387, %c2_1388, %c6_1389, %c0_1390, %c0_1391] : memref<1x4x8x8x128xf32, #tpu.memory_space<vmem>>, vector<1x1x1x8x128xf32>
    %1862 = vector.shape_cast %1861 : vector<1x1x1x8x128xf32> to vector<8x128xf32>
    %1863 = vector.shape_cast %1860 : vector<8x128xf32> to vector<1x1x1x8x128xf32>
    tpu.vector_store %arg5[%c0_1387, %c2_1388, %c6_1389, %c0_1390, %c0_1391], %1863 {strides = array<i32>} : memref<1x4x8x8x128xf32, #tpu.memory_space<vmem>>, vector<1x1x1x8x128xf32>,
    %cst_1392 = arith.constant 0.000000e+00 : f32
    %1864 = vector.broadcast %cst_1392 : f32 to vector<8x128xf32>
    %cst_1393 = arith.constant 0.000000e+00 : f32
    %1865 = vector.broadcast %cst_1393 : f32 to vector<8x128xf32>
    %c0_1394 = arith.constant 0 : index
    %c1_1395 = arith.constant 1 : index
    %c6_1396 = arith.constant 6 : index
    %c0_1397 = arith.constant 0 : index
    %c0_1398 = arith.constant 0 : index
    %1866 = vector.load %arg2[%c0_1394, %c1_1395, %c6_1396, %c0_1397, %c0_1398] : memref<1x4x8x8x128xf32, #tpu.memory_space<vmem>>, vector<1x1x1x8x128xf32>
    %1867 = vector.shape_cast %1866 : vector<1x1x1x8x128xf32> to vector<8x128xf32>
    %1868 = arith.mulf %1867, %5 : vector<8x128xf32>
    %1869 = arith.addf %1864, %1868 : vector<8x128xf32>
    %1870 = arith.mulf %1867, %9 : vector<8x128xf32>
    %1871 = arith.addf %112, %1870 : vector<8x128xf32>
    %1872 = arith.mulf %1867, %13 : vector<8x128xf32>
    %1873 = arith.addf %1865, %1872 : vector<8x128xf32>
    %c0_1399 = arith.constant 0 : index
    %c1_1400 = arith.constant 1 : index
    %c7_1401 = arith.constant 7 : index
    %c0_1402 = arith.constant 0 : index
    %c0_1403 = arith.constant 0 : index
    %1874 = vector.load %arg2[%c0_1399, %c1_1400, %c7_1401, %c0_1402, %c0_1403] : memref<1x4x8x8x128xf32, #tpu.memory_space<vmem>>, vector<1x1x1x8x128xf32>
    %1875 = vector.shape_cast %1874 : vector<1x1x1x8x128xf32> to vector<8x128xf32>
    %1876 = arith.mulf %1875, %17 : vector<8x128xf32>
    %1877 = arith.addf %1869, %1876 : vector<8x128xf32>
    %1878 = arith.mulf %1875, %21 : vector<8x128xf32>
    %1879 = arith.addf %1871, %1878 : vector<8x128xf32>
    %1880 = arith.mulf %1875, %25 : vector<8x128xf32>
    %1881 = arith.addf %1873, %1880 : vector<8x128xf32>
    %c0_1404 = arith.constant 0 : index
    %c2_1405 = arith.constant 2 : index
    %c6_1406 = arith.constant 6 : index
    %c0_1407 = arith.constant 0 : index
    %c0_1408 = arith.constant 0 : index
    %1882 = vector.load %arg2[%c0_1404, %c2_1405, %c6_1406, %c0_1407, %c0_1408] : memref<1x4x8x8x128xf32, #tpu.memory_space<vmem>>, vector<1x1x1x8x128xf32>
    %1883 = vector.shape_cast %1882 : vector<1x1x1x8x128xf32> to vector<8x128xf32>
    %1884 = arith.mulf %1883, %41 : vector<8x128xf32>
    %1885 = arith.addf %1877, %1884 : vector<8x128xf32>
    %1886 = arith.mulf %1883, %45 : vector<8x128xf32>
    %1887 = arith.addf %1879, %1886 : vector<8x128xf32>
    %1888 = arith.mulf %1883, %49 : vector<8x128xf32>
    %1889 = arith.addf %1881, %1888 : vector<8x128xf32>
    %c0_1409 = arith.constant 0 : index
    %c2_1410 = arith.constant 2 : index
    %c7_1411 = arith.constant 7 : index
    %c0_1412 = arith.constant 0 : index
    %c0_1413 = arith.constant 0 : index
    %1890 = vector.load %arg2[%c0_1409, %c2_1410, %c7_1411, %c0_1412, %c0_1413] : memref<1x4x8x8x128xf32, #tpu.memory_space<vmem>>, vector<1x1x1x8x128xf32>
    %1891 = vector.shape_cast %1890 : vector<1x1x1x8x128xf32> to vector<8x128xf32>
    %1892 = arith.mulf %1891, %53 : vector<8x128xf32>
    %1893 = arith.addf %1885, %1892 : vector<8x128xf32>
    %1894 = arith.mulf %1891, %57 : vector<8x128xf32>
    %1895 = arith.addf %1887, %1894 : vector<8x128xf32>
    %1896 = arith.mulf %1891, %61 : vector<8x128xf32>
    %1897 = arith.addf %1889, %1896 : vector<8x128xf32>
    %c0_1414 = arith.constant 0 : index
    %c3_1415 = arith.constant 3 : index
    %c6_1416 = arith.constant 6 : index
    %c0_1417 = arith.constant 0 : index
    %c0_1418 = arith.constant 0 : index
    %1898 = vector.load %arg2[%c0_1414, %c3_1415, %c6_1416, %c0_1417, %c0_1418] : memref<1x4x8x8x128xf32, #tpu.memory_space<vmem>>, vector<1x1x1x8x128xf32>
    %1899 = vector.shape_cast %1898 : vector<1x1x1x8x128xf32> to vector<8x128xf32>
    %1900 = arith.mulf %1899, %77 : vector<8x128xf32>
    %1901 = arith.addf %1893, %1900 : vector<8x128xf32>
    %1902 = arith.mulf %1899, %81 : vector<8x128xf32>
    %1903 = arith.addf %1895, %1902 : vector<8x128xf32>
    %1904 = arith.mulf %1899, %85 : vector<8x128xf32>
    %1905 = arith.addf %1897, %1904 : vector<8x128xf32>
    %c0_1419 = arith.constant 0 : index
    %c3_1420 = arith.constant 3 : index
    %c7_1421 = arith.constant 7 : index
    %c0_1422 = arith.constant 0 : index
    %c0_1423 = arith.constant 0 : index
    %1906 = vector.load %arg2[%c0_1419, %c3_1420, %c7_1421, %c0_1422, %c0_1423] : memref<1x4x8x8x128xf32, #tpu.memory_space<vmem>>, vector<1x1x1x8x128xf32>
    %1907 = vector.shape_cast %1906 : vector<1x1x1x8x128xf32> to vector<8x128xf32>
    %1908 = arith.mulf %1907, %89 : vector<8x128xf32>
    %1909 = arith.addf %1901, %1908 : vector<8x128xf32>
    %1910 = arith.mulf %1907, %93 : vector<8x128xf32>
    %1911 = arith.addf %1903, %1910 : vector<8x128xf32>
    %1912 = arith.mulf %1907, %97 : vector<8x128xf32>
    %1913 = arith.addf %1905, %1912 : vector<8x128xf32>
    %c0_1424 = arith.constant 0 : index
    %c1_1425 = arith.constant 1 : index
    %c0_1426 = arith.constant 0 : index
    %1914 = vector.load %arg6[%c0_1424, %c1_1425, %c0_1426] : memref<2x16x128xf32, #tpu.memory_space<vmem>>, vector<1x8x128xf32>
    %1915 = vector.shape_cast %1914 : vector<1x8x128xf32> to vector<8x128xf32>
    %1916 = vector.shape_cast %1909 : vector<8x128xf32> to vector<1x8x128xf32>
    tpu.vector_store %arg6[%c0_1424, %c1_1425, %c0_1426], %1916 {strides = array<i32>} : memref<2x16x128xf32, #tpu.memory_space<vmem>>, vector<1x8x128xf32>,
    %c1_1427 = arith.constant 1 : index
    %c0_1428 = arith.constant 0 : index
    %c0_1429 = arith.constant 0 : index
    %1917 = vector.load %arg6[%c1_1427, %c0_1428, %c0_1429] : memref<2x16x128xf32, #tpu.memory_space<vmem>>, vector<1x8x128xf32>
    %1918 = vector.shape_cast %1917 : vector<1x8x128xf32> to vector<8x128xf32>
    %1919 = vector.shape_cast %1913 : vector<8x128xf32> to vector<1x8x128xf32>
    tpu.vector_store %arg6[%c1_1427, %c0_1428, %c0_1429], %1919 {strides = array<i32>} : memref<2x16x128xf32, #tpu.memory_space<vmem>>, vector<1x8x128xf32>,
    %c0_1430 = arith.constant 0 : index
    %c0_1431 = arith.constant 0 : index
    %c0_1432 = arith.constant 0 : index
    %1920 = vector.load %arg6[%c0_1430, %c0_1431, %c0_1432] : memref<2x16x128xf32, #tpu.memory_space<vmem>>, vector<1x8x128xf32>
    %1921 = vector.shape_cast %1920 : vector<1x8x128xf32> to vector<8x128xf32>
    %c1_1433 = arith.constant 1 : index
    %c1_1434 = arith.constant 1 : index
    %c0_1435 = arith.constant 0 : index
    %1922 = vector.load %arg6[%c1_1433, %c1_1434, %c0_1435] : memref<2x16x128xf32, #tpu.memory_space<vmem>>, vector<1x8x128xf32>
    %1923 = vector.shape_cast %1922 : vector<1x8x128xf32> to vector<8x128xf32>
    %1924 = arith.addf %1911, %1921 : vector<8x128xf32>
    %1925 = arith.addf %1924, %1923 : vector<8x128xf32>
    %c0_1436 = arith.constant 0 : index
    %c2_1437 = arith.constant 2 : index
    %c7_1438 = arith.constant 7 : index
    %c0_1439 = arith.constant 0 : index
    %c0_1440 = arith.constant 0 : index
    %1926 = vector.load %arg5[%c0_1436, %c2_1437, %c7_1438, %c0_1439, %c0_1440] : memref<1x4x8x8x128xf32, #tpu.memory_space<vmem>>, vector<1x1x1x8x128xf32>
    %1927 = vector.shape_cast %1926 : vector<1x1x1x8x128xf32> to vector<8x128xf32>
    %1928 = vector.shape_cast %1925 : vector<8x128xf32> to vector<1x1x1x8x128xf32>
    tpu.vector_store %arg5[%c0_1436, %c2_1437, %c7_1438, %c0_1439, %c0_1440], %1928 {strides = array<i32>} : memref<1x4x8x8x128xf32, #tpu.memory_space<vmem>>, vector<1x1x1x8x128xf32>,
    %cst_1441 = arith.constant 0.000000e+00 : f32
    %1929 = vector.broadcast %cst_1441 : f32 to vector<8x128xf32>
    %cst_1442 = arith.constant 0.000000e+00 : f32
    %1930 = vector.broadcast %cst_1442 : f32 to vector<8x128xf32>
    %c0_1443 = arith.constant 0 : index
    %c2_1444 = arith.constant 2 : index
    %c0_1445 = arith.constant 0 : index
    %c0_1446 = arith.constant 0 : index
    %c0_1447 = arith.constant 0 : index
    %1931 = vector.load %arg2[%c0_1443, %c2_1444, %c0_1445, %c0_1446, %c0_1447] : memref<1x4x8x8x128xf32, #tpu.memory_space<vmem>>, vector<1x1x1x8x128xf32>
    %1932 = vector.shape_cast %1931 : vector<1x1x1x8x128xf32> to vector<8x128xf32>
    %1933 = arith.mulf %1932, %17 : vector<8x128xf32>
    %1934 = arith.addf %1929, %1933 : vector<8x128xf32>
    %1935 = arith.mulf %1932, %21 : vector<8x128xf32>
    %1936 = arith.addf %112, %1935 : vector<8x128xf32>
    %1937 = arith.mulf %1932, %25 : vector<8x128xf32>
    %1938 = arith.addf %1930, %1937 : vector<8x128xf32>
    %c0_1448 = arith.constant 0 : index
    %c2_1449 = arith.constant 2 : index
    %c1_1450 = arith.constant 1 : index
    %c0_1451 = arith.constant 0 : index
    %c0_1452 = arith.constant 0 : index
    %1939 = vector.load %arg2[%c0_1448, %c2_1449, %c1_1450, %c0_1451, %c0_1452] : memref<1x4x8x8x128xf32, #tpu.memory_space<vmem>>, vector<1x1x1x8x128xf32>
    %1940 = vector.shape_cast %1939 : vector<1x1x1x8x128xf32> to vector<8x128xf32>
    %1941 = arith.mulf %1940, %29 : vector<8x128xf32>
    %1942 = arith.addf %1934, %1941 : vector<8x128xf32>
    %1943 = arith.mulf %1940, %33 : vector<8x128xf32>
    %1944 = arith.addf %1936, %1943 : vector<8x128xf32>
    %1945 = arith.mulf %1940, %37 : vector<8x128xf32>
    %1946 = arith.addf %1938, %1945 : vector<8x128xf32>
    %c0_1453 = arith.constant 0 : index
    %c3_1454 = arith.constant 3 : index
    %c0_1455 = arith.constant 0 : index
    %c0_1456 = arith.constant 0 : index
    %c0_1457 = arith.constant 0 : index
    %1947 = vector.load %arg2[%c0_1453, %c3_1454, %c0_1455, %c0_1456, %c0_1457] : memref<1x4x8x8x128xf32, #tpu.memory_space<vmem>>, vector<1x1x1x8x128xf32>
    %1948 = vector.shape_cast %1947 : vector<1x1x1x8x128xf32> to vector<8x128xf32>
    %1949 = arith.mulf %1948, %53 : vector<8x128xf32>
    %1950 = arith.addf %1942, %1949 : vector<8x128xf32>
    %1951 = arith.mulf %1948, %57 : vector<8x128xf32>
    %1952 = arith.addf %1944, %1951 : vector<8x128xf32>
    %1953 = arith.mulf %1948, %61 : vector<8x128xf32>
    %1954 = arith.addf %1946, %1953 : vector<8x128xf32>
    %c0_1458 = arith.constant 0 : index
    %c3_1459 = arith.constant 3 : index
    %c1_1460 = arith.constant 1 : index
    %c0_1461 = arith.constant 0 : index
    %c0_1462 = arith.constant 0 : index
    %1955 = vector.load %arg2[%c0_1458, %c3_1459, %c1_1460, %c0_1461, %c0_1462] : memref<1x4x8x8x128xf32, #tpu.memory_space<vmem>>, vector<1x1x1x8x128xf32>
    %1956 = vector.shape_cast %1955 : vector<1x1x1x8x128xf32> to vector<8x128xf32>
    %1957 = arith.mulf %1956, %65 : vector<8x128xf32>
    %1958 = arith.addf %1950, %1957 : vector<8x128xf32>
    %1959 = arith.mulf %1956, %69 : vector<8x128xf32>
    %1960 = arith.addf %1952, %1959 : vector<8x128xf32>
    %1961 = arith.mulf %1956, %73 : vector<8x128xf32>
    %1962 = arith.addf %1954, %1961 : vector<8x128xf32>
    %c0_1463 = arith.constant 0 : index
    %c1_1464 = arith.constant 1 : index
    %c0_1465 = arith.constant 0 : index
    %1963 = vector.load %arg6[%c0_1463, %c1_1464, %c0_1465] : memref<2x16x128xf32, #tpu.memory_space<vmem>>, vector<1x8x128xf32>
    %1964 = vector.shape_cast %1963 : vector<1x8x128xf32> to vector<8x128xf32>
    %1965 = vector.shape_cast %1958 : vector<8x128xf32> to vector<1x8x128xf32>
    tpu.vector_store %arg6[%c0_1463, %c1_1464, %c0_1465], %1965 {strides = array<i32>} : memref<2x16x128xf32, #tpu.memory_space<vmem>>, vector<1x8x128xf32>,
    %c1_1466 = arith.constant 1 : index
    %c0_1467 = arith.constant 0 : index
    %c0_1468 = arith.constant 0 : index
    %1966 = vector.load %arg6[%c1_1466, %c0_1467, %c0_1468] : memref<2x16x128xf32, #tpu.memory_space<vmem>>, vector<1x8x128xf32>
    %1967 = vector.shape_cast %1966 : vector<1x8x128xf32> to vector<8x128xf32>
    %1968 = vector.shape_cast %1962 : vector<8x128xf32> to vector<1x8x128xf32>
    tpu.vector_store %arg6[%c1_1466, %c0_1467, %c0_1468], %1968 {strides = array<i32>} : memref<2x16x128xf32, #tpu.memory_space<vmem>>, vector<1x8x128xf32>,
    %c0_1469 = arith.constant 0 : index
    %c0_1470 = arith.constant 0 : index
    %c0_1471 = arith.constant 0 : index
    %1969 = vector.load %arg6[%c0_1469, %c0_1470, %c0_1471] : memref<2x16x128xf32, #tpu.memory_space<vmem>>, vector<1x8x128xf32>
    %1970 = vector.shape_cast %1969 : vector<1x8x128xf32> to vector<8x128xf32>
    %c1_1472 = arith.constant 1 : index
    %c1_1473 = arith.constant 1 : index
    %c0_1474 = arith.constant 0 : index
    %1971 = vector.load %arg6[%c1_1472, %c1_1473, %c0_1474] : memref<2x16x128xf32, #tpu.memory_space<vmem>>, vector<1x8x128xf32>
    %1972 = vector.shape_cast %1971 : vector<1x8x128xf32> to vector<8x128xf32>
    %1973 = arith.addf %1960, %1970 : vector<8x128xf32>
    %1974 = arith.addf %1973, %1972 : vector<8x128xf32>
    %c0_1475 = arith.constant 0 : index
    %c3_1476 = arith.constant 3 : index
    %c0_1477 = arith.constant 0 : index
    %c0_1478 = arith.constant 0 : index
    %c0_1479 = arith.constant 0 : index
    %1975 = vector.load %arg5[%c0_1475, %c3_1476, %c0_1477, %c0_1478, %c0_1479] : memref<1x4x8x8x128xf32, #tpu.memory_space<vmem>>, vector<1x1x1x8x128xf32>
    %1976 = vector.shape_cast %1975 : vector<1x1x1x8x128xf32> to vector<8x128xf32>
    %1977 = vector.shape_cast %1974 : vector<8x128xf32> to vector<1x1x1x8x128xf32>
    tpu.vector_store %arg5[%c0_1475, %c3_1476, %c0_1477, %c0_1478, %c0_1479], %1977 {strides = array<i32>} : memref<1x4x8x8x128xf32, #tpu.memory_space<vmem>>, vector<1x1x1x8x128xf32>,
    %cst_1480 = arith.constant 0.000000e+00 : f32
    %1978 = vector.broadcast %cst_1480 : f32 to vector<8x128xf32>
    %cst_1481 = arith.constant 0.000000e+00 : f32
    %1979 = vector.broadcast %cst_1481 : f32 to vector<8x128xf32>
    %c0_1482 = arith.constant 0 : index
    %c2_1483 = arith.constant 2 : index
    %c0_1484 = arith.constant 0 : index
    %c0_1485 = arith.constant 0 : index
    %c0_1486 = arith.constant 0 : index
    %1980 = vector.load %arg2[%c0_1482, %c2_1483, %c0_1484, %c0_1485, %c0_1486] : memref<1x4x8x8x128xf32, #tpu.memory_space<vmem>>, vector<1x1x1x8x128xf32>
    %1981 = vector.shape_cast %1980 : vector<1x1x1x8x128xf32> to vector<8x128xf32>
    %1982 = arith.mulf %1981, %5 : vector<8x128xf32>
    %1983 = arith.addf %1978, %1982 : vector<8x128xf32>
    %1984 = arith.mulf %1981, %9 : vector<8x128xf32>
    %1985 = arith.addf %112, %1984 : vector<8x128xf32>
    %1986 = arith.mulf %1981, %13 : vector<8x128xf32>
    %1987 = arith.addf %1979, %1986 : vector<8x128xf32>
    %c0_1487 = arith.constant 0 : index
    %c2_1488 = arith.constant 2 : index
    %c1_1489 = arith.constant 1 : index
    %c0_1490 = arith.constant 0 : index
    %c0_1491 = arith.constant 0 : index
    %1988 = vector.load %arg2[%c0_1487, %c2_1488, %c1_1489, %c0_1490, %c0_1491] : memref<1x4x8x8x128xf32, #tpu.memory_space<vmem>>, vector<1x1x1x8x128xf32>
    %1989 = vector.shape_cast %1988 : vector<1x1x1x8x128xf32> to vector<8x128xf32>
    %1990 = arith.mulf %1989, %17 : vector<8x128xf32>
    %1991 = arith.addf %1983, %1990 : vector<8x128xf32>
    %1992 = arith.mulf %1989, %21 : vector<8x128xf32>
    %1993 = arith.addf %1985, %1992 : vector<8x128xf32>
    %1994 = arith.mulf %1989, %25 : vector<8x128xf32>
    %1995 = arith.addf %1987, %1994 : vector<8x128xf32>
    %c0_1492 = arith.constant 0 : index
    %c2_1493 = arith.constant 2 : index
    %c2_1494 = arith.constant 2 : index
    %c0_1495 = arith.constant 0 : index
    %c0_1496 = arith.constant 0 : index
    %1996 = vector.load %arg2[%c0_1492, %c2_1493, %c2_1494, %c0_1495, %c0_1496] : memref<1x4x8x8x128xf32, #tpu.memory_space<vmem>>, vector<1x1x1x8x128xf32>
    %1997 = vector.shape_cast %1996 : vector<1x1x1x8x128xf32> to vector<8x128xf32>
    %1998 = arith.mulf %1997, %29 : vector<8x128xf32>
    %1999 = arith.addf %1991, %1998 : vector<8x128xf32>
    %2000 = arith.mulf %1997, %33 : vector<8x128xf32>
    %2001 = arith.addf %1993, %2000 : vector<8x128xf32>
    %2002 = arith.mulf %1997, %37 : vector<8x128xf32>
    %2003 = arith.addf %1995, %2002 : vector<8x128xf32>
    %c0_1497 = arith.constant 0 : index
    %c3_1498 = arith.constant 3 : index
    %c0_1499 = arith.constant 0 : index
    %c0_1500 = arith.constant 0 : index
    %c0_1501 = arith.constant 0 : index
    %2004 = vector.load %arg2[%c0_1497, %c3_1498, %c0_1499, %c0_1500, %c0_1501] : memref<1x4x8x8x128xf32, #tpu.memory_space<vmem>>, vector<1x1x1x8x128xf32>
    %2005 = vector.shape_cast %2004 : vector<1x1x1x8x128xf32> to vector<8x128xf32>
    %2006 = arith.mulf %2005, %41 : vector<8x128xf32>
    %2007 = arith.addf %1999, %2006 : vector<8x128xf32>
    %2008 = arith.mulf %2005, %45 : vector<8x128xf32>
    %2009 = arith.addf %2001, %2008 : vector<8x128xf32>
    %2010 = arith.mulf %2005, %49 : vector<8x128xf32>
    %2011 = arith.addf %2003, %2010 : vector<8x128xf32>
    %c0_1502 = arith.constant 0 : index
    %c3_1503 = arith.constant 3 : index
    %c1_1504 = arith.constant 1 : index
    %c0_1505 = arith.constant 0 : index
    %c0_1506 = arith.constant 0 : index
    %2012 = vector.load %arg2[%c0_1502, %c3_1503, %c1_1504, %c0_1505, %c0_1506] : memref<1x4x8x8x128xf32, #tpu.memory_space<vmem>>, vector<1x1x1x8x128xf32>
    %2013 = vector.shape_cast %2012 : vector<1x1x1x8x128xf32> to vector<8x128xf32>
    %2014 = arith.mulf %2013, %53 : vector<8x128xf32>
    %2015 = arith.addf %2007, %2014 : vector<8x128xf32>
    %2016 = arith.mulf %2013, %57 : vector<8x128xf32>
    %2017 = arith.addf %2009, %2016 : vector<8x128xf32>
    %2018 = arith.mulf %2013, %61 : vector<8x128xf32>
    %2019 = arith.addf %2011, %2018 : vector<8x128xf32>
    %c0_1507 = arith.constant 0 : index
    %c3_1508 = arith.constant 3 : index
    %c2_1509 = arith.constant 2 : index
    %c0_1510 = arith.constant 0 : index
    %c0_1511 = arith.constant 0 : index
    %2020 = vector.load %arg2[%c0_1507, %c3_1508, %c2_1509, %c0_1510, %c0_1511] : memref<1x4x8x8x128xf32, #tpu.memory_space<vmem>>, vector<1x1x1x8x128xf32>
    %2021 = vector.shape_cast %2020 : vector<1x1x1x8x128xf32> to vector<8x128xf32>
    %2022 = arith.mulf %2021, %65 : vector<8x128xf32>
    %2023 = arith.addf %2015, %2022 : vector<8x128xf32>
    %2024 = arith.mulf %2021, %69 : vector<8x128xf32>
    %2025 = arith.addf %2017, %2024 : vector<8x128xf32>
    %2026 = arith.mulf %2021, %73 : vector<8x128xf32>
    %2027 = arith.addf %2019, %2026 : vector<8x128xf32>
    %c0_1512 = arith.constant 0 : index
    %c1_1513 = arith.constant 1 : index
    %c0_1514 = arith.constant 0 : index
    %2028 = vector.load %arg6[%c0_1512, %c1_1513, %c0_1514] : memref<2x16x128xf32, #tpu.memory_space<vmem>>, vector<1x8x128xf32>
    %2029 = vector.shape_cast %2028 : vector<1x8x128xf32> to vector<8x128xf32>
    %2030 = vector.shape_cast %2023 : vector<8x128xf32> to vector<1x8x128xf32>
    tpu.vector_store %arg6[%c0_1512, %c1_1513, %c0_1514], %2030 {strides = array<i32>} : memref<2x16x128xf32, #tpu.memory_space<vmem>>, vector<1x8x128xf32>,
    %c1_1515 = arith.constant 1 : index
    %c0_1516 = arith.constant 0 : index
    %c0_1517 = arith.constant 0 : index
    %2031 = vector.load %arg6[%c1_1515, %c0_1516, %c0_1517] : memref<2x16x128xf32, #tpu.memory_space<vmem>>, vector<1x8x128xf32>
    %2032 = vector.shape_cast %2031 : vector<1x8x128xf32> to vector<8x128xf32>
    %2033 = vector.shape_cast %2027 : vector<8x128xf32> to vector<1x8x128xf32>
    tpu.vector_store %arg6[%c1_1515, %c0_1516, %c0_1517], %2033 {strides = array<i32>} : memref<2x16x128xf32, #tpu.memory_space<vmem>>, vector<1x8x128xf32>,
    %c0_1518 = arith.constant 0 : index
    %c0_1519 = arith.constant 0 : index
    %c0_1520 = arith.constant 0 : index
    %2034 = vector.load %arg6[%c0_1518, %c0_1519, %c0_1520] : memref<2x16x128xf32, #tpu.memory_space<vmem>>, vector<1x8x128xf32>
    %2035 = vector.shape_cast %2034 : vector<1x8x128xf32> to vector<8x128xf32>
    %c1_1521 = arith.constant 1 : index
    %c1_1522 = arith.constant 1 : index
    %c0_1523 = arith.constant 0 : index
    %2036 = vector.load %arg6[%c1_1521, %c1_1522, %c0_1523] : memref<2x16x128xf32, #tpu.memory_space<vmem>>, vector<1x8x128xf32>
    %2037 = vector.shape_cast %2036 : vector<1x8x128xf32> to vector<8x128xf32>
    %2038 = arith.addf %2025, %2035 : vector<8x128xf32>
    %2039 = arith.addf %2038, %2037 : vector<8x128xf32>
    %c0_1524 = arith.constant 0 : index
    %c3_1525 = arith.constant 3 : index
    %c1_1526 = arith.constant 1 : index
    %c0_1527 = arith.constant 0 : index
    %c0_1528 = arith.constant 0 : index
    %2040 = vector.load %arg5[%c0_1524, %c3_1525, %c1_1526, %c0_1527, %c0_1528] : memref<1x4x8x8x128xf32, #tpu.memory_space<vmem>>, vector<1x1x1x8x128xf32>
    %2041 = vector.shape_cast %2040 : vector<1x1x1x8x128xf32> to vector<8x128xf32>
    %2042 = vector.shape_cast %2039 : vector<8x128xf32> to vector<1x1x1x8x128xf32>
    tpu.vector_store %arg5[%c0_1524, %c3_1525, %c1_1526, %c0_1527, %c0_1528], %2042 {strides = array<i32>} : memref<1x4x8x8x128xf32, #tpu.memory_space<vmem>>, vector<1x1x1x8x128xf32>,
    %cst_1529 = arith.constant 0.000000e+00 : f32
    %2043 = vector.broadcast %cst_1529 : f32 to vector<8x128xf32>
    %cst_1530 = arith.constant 0.000000e+00 : f32
    %2044 = vector.broadcast %cst_1530 : f32 to vector<8x128xf32>
    %c0_1531 = arith.constant 0 : index
    %c2_1532 = arith.constant 2 : index
    %c1_1533 = arith.constant 1 : index
    %c0_1534 = arith.constant 0 : index
    %c0_1535 = arith.constant 0 : index
    %2045 = vector.load %arg2[%c0_1531, %c2_1532, %c1_1533, %c0_1534, %c0_1535] : memref<1x4x8x8x128xf32, #tpu.memory_space<vmem>>, vector<1x1x1x8x128xf32>
    %2046 = vector.shape_cast %2045 : vector<1x1x1x8x128xf32> to vector<8x128xf32>
    %2047 = arith.mulf %2046, %5 : vector<8x128xf32>
    %2048 = arith.addf %2043, %2047 : vector<8x128xf32>
    %2049 = arith.mulf %2046, %9 : vector<8x128xf32>
    %2050 = arith.addf %112, %2049 : vector<8x128xf32>
    %2051 = arith.mulf %2046, %13 : vector<8x128xf32>
    %2052 = arith.addf %2044, %2051 : vector<8x128xf32>
    %c0_1536 = arith.constant 0 : index
    %c2_1537 = arith.constant 2 : index
    %c2_1538 = arith.constant 2 : index
    %c0_1539 = arith.constant 0 : index
    %c0_1540 = arith.constant 0 : index
    %2053 = vector.load %arg2[%c0_1536, %c2_1537, %c2_1538, %c0_1539, %c0_1540] : memref<1x4x8x8x128xf32, #tpu.memory_space<vmem>>, vector<1x1x1x8x128xf32>
    %2054 = vector.shape_cast %2053 : vector<1x1x1x8x128xf32> to vector<8x128xf32>
    %2055 = arith.mulf %2054, %17 : vector<8x128xf32>
    %2056 = arith.addf %2048, %2055 : vector<8x128xf32>
    %2057 = arith.mulf %2054, %21 : vector<8x128xf32>
    %2058 = arith.addf %2050, %2057 : vector<8x128xf32>
    %2059 = arith.mulf %2054, %25 : vector<8x128xf32>
    %2060 = arith.addf %2052, %2059 : vector<8x128xf32>
    %c0_1541 = arith.constant 0 : index
    %c2_1542 = arith.constant 2 : index
    %c3_1543 = arith.constant 3 : index
    %c0_1544 = arith.constant 0 : index
    %c0_1545 = arith.constant 0 : index
    %2061 = vector.load %arg2[%c0_1541, %c2_1542, %c3_1543, %c0_1544, %c0_1545] : memref<1x4x8x8x128xf32, #tpu.memory_space<vmem>>, vector<1x1x1x8x128xf32>
    %2062 = vector.shape_cast %2061 : vector<1x1x1x8x128xf32> to vector<8x128xf32>
    %2063 = arith.mulf %2062, %29 : vector<8x128xf32>
    %2064 = arith.addf %2056, %2063 : vector<8x128xf32>
    %2065 = arith.mulf %2062, %33 : vector<8x128xf32>
    %2066 = arith.addf %2058, %2065 : vector<8x128xf32>
    %2067 = arith.mulf %2062, %37 : vector<8x128xf32>
    %2068 = arith.addf %2060, %2067 : vector<8x128xf32>
    %c0_1546 = arith.constant 0 : index
    %c3_1547 = arith.constant 3 : index
    %c1_1548 = arith.constant 1 : index
    %c0_1549 = arith.constant 0 : index
    %c0_1550 = arith.constant 0 : index
    %2069 = vector.load %arg2[%c0_1546, %c3_1547, %c1_1548, %c0_1549, %c0_1550] : memref<1x4x8x8x128xf32, #tpu.memory_space<vmem>>, vector<1x1x1x8x128xf32>
    %2070 = vector.shape_cast %2069 : vector<1x1x1x8x128xf32> to vector<8x128xf32>
    %2071 = arith.mulf %2070, %41 : vector<8x128xf32>
    %2072 = arith.addf %2064, %2071 : vector<8x128xf32>
    %2073 = arith.mulf %2070, %45 : vector<8x128xf32>
    %2074 = arith.addf %2066, %2073 : vector<8x128xf32>
    %2075 = arith.mulf %2070, %49 : vector<8x128xf32>
    %2076 = arith.addf %2068, %2075 : vector<8x128xf32>
    %c0_1551 = arith.constant 0 : index
    %c3_1552 = arith.constant 3 : index
    %c2_1553 = arith.constant 2 : index
    %c0_1554 = arith.constant 0 : index
    %c0_1555 = arith.constant 0 : index
    %2077 = vector.load %arg2[%c0_1551, %c3_1552, %c2_1553, %c0_1554, %c0_1555] : memref<1x4x8x8x128xf32, #tpu.memory_space<vmem>>, vector<1x1x1x8x128xf32>
    %2078 = vector.shape_cast %2077 : vector<1x1x1x8x128xf32> to vector<8x128xf32>
    %2079 = arith.mulf %2078, %53 : vector<8x128xf32>
    %2080 = arith.addf %2072, %2079 : vector<8x128xf32>
    %2081 = arith.mulf %2078, %57 : vector<8x128xf32>
    %2082 = arith.addf %2074, %2081 : vector<8x128xf32>
    %2083 = arith.mulf %2078, %61 : vector<8x128xf32>
    %2084 = arith.addf %2076, %2083 : vector<8x128xf32>
    %c0_1556 = arith.constant 0 : index
    %c3_1557 = arith.constant 3 : index
    %c3_1558 = arith.constant 3 : index
    %c0_1559 = arith.constant 0 : index
    %c0_1560 = arith.constant 0 : index
    %2085 = vector.load %arg2[%c0_1556, %c3_1557, %c3_1558, %c0_1559, %c0_1560] : memref<1x4x8x8x128xf32, #tpu.memory_space<vmem>>, vector<1x1x1x8x128xf32>
    %2086 = vector.shape_cast %2085 : vector<1x1x1x8x128xf32> to vector<8x128xf32>
    %2087 = arith.mulf %2086, %65 : vector<8x128xf32>
    %2088 = arith.addf %2080, %2087 : vector<8x128xf32>
    %2089 = arith.mulf %2086, %69 : vector<8x128xf32>
    %2090 = arith.addf %2082, %2089 : vector<8x128xf32>
    %2091 = arith.mulf %2086, %73 : vector<8x128xf32>
    %2092 = arith.addf %2084, %2091 : vector<8x128xf32>
    %c0_1561 = arith.constant 0 : index
    %c1_1562 = arith.constant 1 : index
    %c0_1563 = arith.constant 0 : index
    %2093 = vector.load %arg6[%c0_1561, %c1_1562, %c0_1563] : memref<2x16x128xf32, #tpu.memory_space<vmem>>, vector<1x8x128xf32>
    %2094 = vector.shape_cast %2093 : vector<1x8x128xf32> to vector<8x128xf32>
    %2095 = vector.shape_cast %2088 : vector<8x128xf32> to vector<1x8x128xf32>
    tpu.vector_store %arg6[%c0_1561, %c1_1562, %c0_1563], %2095 {strides = array<i32>} : memref<2x16x128xf32, #tpu.memory_space<vmem>>, vector<1x8x128xf32>,
    %c1_1564 = arith.constant 1 : index
    %c0_1565 = arith.constant 0 : index
    %c0_1566 = arith.constant 0 : index
    %2096 = vector.load %arg6[%c1_1564, %c0_1565, %c0_1566] : memref<2x16x128xf32, #tpu.memory_space<vmem>>, vector<1x8x128xf32>
    %2097 = vector.shape_cast %2096 : vector<1x8x128xf32> to vector<8x128xf32>
    %2098 = vector.shape_cast %2092 : vector<8x128xf32> to vector<1x8x128xf32>
    tpu.vector_store %arg6[%c1_1564, %c0_1565, %c0_1566], %2098 {strides = array<i32>} : memref<2x16x128xf32, #tpu.memory_space<vmem>>, vector<1x8x128xf32>,
    %c0_1567 = arith.constant 0 : index
    %c0_1568 = arith.constant 0 : index
    %c0_1569 = arith.constant 0 : index
    %2099 = vector.load %arg6[%c0_1567, %c0_1568, %c0_1569] : memref<2x16x128xf32, #tpu.memory_space<vmem>>, vector<1x8x128xf32>
    %2100 = vector.shape_cast %2099 : vector<1x8x128xf32> to vector<8x128xf32>
    %c1_1570 = arith.constant 1 : index
    %c1_1571 = arith.constant 1 : index
    %c0_1572 = arith.constant 0 : index
    %2101 = vector.load %arg6[%c1_1570, %c1_1571, %c0_1572] : memref<2x16x128xf32, #tpu.memory_space<vmem>>, vector<1x8x128xf32>
    %2102 = vector.shape_cast %2101 : vector<1x8x128xf32> to vector<8x128xf32>
    %2103 = arith.addf %2090, %2100 : vector<8x128xf32>
    %2104 = arith.addf %2103, %2102 : vector<8x128xf32>
    %c0_1573 = arith.constant 0 : index
    %c3_1574 = arith.constant 3 : index
    %c2_1575 = arith.constant 2 : index
    %c0_1576 = arith.constant 0 : index
    %c0_1577 = arith.constant 0 : index
    %2105 = vector.load %arg5[%c0_1573, %c3_1574, %c2_1575, %c0_1576, %c0_1577] : memref<1x4x8x8x128xf32, #tpu.memory_space<vmem>>, vector<1x1x1x8x128xf32>
    %2106 = vector.shape_cast %2105 : vector<1x1x1x8x128xf32> to vector<8x128xf32>
    %2107 = vector.shape_cast %2104 : vector<8x128xf32> to vector<1x1x1x8x128xf32>
    tpu.vector_store %arg5[%c0_1573, %c3_1574, %c2_1575, %c0_1576, %c0_1577], %2107 {strides = array<i32>} : memref<1x4x8x8x128xf32, #tpu.memory_space<vmem>>, vector<1x1x1x8x128xf32>,
    %cst_1578 = arith.constant 0.000000e+00 : f32
    %2108 = vector.broadcast %cst_1578 : f32 to vector<8x128xf32>
    %cst_1579 = arith.constant 0.000000e+00 : f32
    %2109 = vector.broadcast %cst_1579 : f32 to vector<8x128xf32>
    %c0_1580 = arith.constant 0 : index
    %c2_1581 = arith.constant 2 : index
    %c2_1582 = arith.constant 2 : index
    %c0_1583 = arith.constant 0 : index
    %c0_1584 = arith.constant 0 : index
    %2110 = vector.load %arg2[%c0_1580, %c2_1581, %c2_1582, %c0_1583, %c0_1584] : memref<1x4x8x8x128xf32, #tpu.memory_space<vmem>>, vector<1x1x1x8x128xf32>
    %2111 = vector.shape_cast %2110 : vector<1x1x1x8x128xf32> to vector<8x128xf32>
    %2112 = arith.mulf %2111, %5 : vector<8x128xf32>
    %2113 = arith.addf %2108, %2112 : vector<8x128xf32>
    %2114 = arith.mulf %2111, %9 : vector<8x128xf32>
    %2115 = arith.addf %112, %2114 : vector<8x128xf32>
    %2116 = arith.mulf %2111, %13 : vector<8x128xf32>
    %2117 = arith.addf %2109, %2116 : vector<8x128xf32>
    %c0_1585 = arith.constant 0 : index
    %c2_1586 = arith.constant 2 : index
    %c3_1587 = arith.constant 3 : index
    %c0_1588 = arith.constant 0 : index
    %c0_1589 = arith.constant 0 : index
    %2118 = vector.load %arg2[%c0_1585, %c2_1586, %c3_1587, %c0_1588, %c0_1589] : memref<1x4x8x8x128xf32, #tpu.memory_space<vmem>>, vector<1x1x1x8x128xf32>
    %2119 = vector.shape_cast %2118 : vector<1x1x1x8x128xf32> to vector<8x128xf32>
    %2120 = arith.mulf %2119, %17 : vector<8x128xf32>
    %2121 = arith.addf %2113, %2120 : vector<8x128xf32>
    %2122 = arith.mulf %2119, %21 : vector<8x128xf32>
    %2123 = arith.addf %2115, %2122 : vector<8x128xf32>
    %2124 = arith.mulf %2119, %25 : vector<8x128xf32>
    %2125 = arith.addf %2117, %2124 : vector<8x128xf32>
    %c0_1590 = arith.constant 0 : index
    %c2_1591 = arith.constant 2 : index
    %c4_1592 = arith.constant 4 : index
    %c0_1593 = arith.constant 0 : index
    %c0_1594 = arith.constant 0 : index
    %2126 = vector.load %arg2[%c0_1590, %c2_1591, %c4_1592, %c0_1593, %c0_1594] : memref<1x4x8x8x128xf32, #tpu.memory_space<vmem>>, vector<1x1x1x8x128xf32>
    %2127 = vector.shape_cast %2126 : vector<1x1x1x8x128xf32> to vector<8x128xf32>
    %2128 = arith.mulf %2127, %29 : vector<8x128xf32>
    %2129 = arith.addf %2121, %2128 : vector<8x128xf32>
    %2130 = arith.mulf %2127, %33 : vector<8x128xf32>
    %2131 = arith.addf %2123, %2130 : vector<8x128xf32>
    %2132 = arith.mulf %2127, %37 : vector<8x128xf32>
    %2133 = arith.addf %2125, %2132 : vector<8x128xf32>
    %c0_1595 = arith.constant 0 : index
    %c3_1596 = arith.constant 3 : index
    %c2_1597 = arith.constant 2 : index
    %c0_1598 = arith.constant 0 : index
    %c0_1599 = arith.constant 0 : index
    %2134 = vector.load %arg2[%c0_1595, %c3_1596, %c2_1597, %c0_1598, %c0_1599] : memref<1x4x8x8x128xf32, #tpu.memory_space<vmem>>, vector<1x1x1x8x128xf32>
    %2135 = vector.shape_cast %2134 : vector<1x1x1x8x128xf32> to vector<8x128xf32>
    %2136 = arith.mulf %2135, %41 : vector<8x128xf32>
    %2137 = arith.addf %2129, %2136 : vector<8x128xf32>
    %2138 = arith.mulf %2135, %45 : vector<8x128xf32>
    %2139 = arith.addf %2131, %2138 : vector<8x128xf32>
    %2140 = arith.mulf %2135, %49 : vector<8x128xf32>
    %2141 = arith.addf %2133, %2140 : vector<8x128xf32>
    %c0_1600 = arith.constant 0 : index
    %c3_1601 = arith.constant 3 : index
    %c3_1602 = arith.constant 3 : index
    %c0_1603 = arith.constant 0 : index
    %c0_1604 = arith.constant 0 : index
    %2142 = vector.load %arg2[%c0_1600, %c3_1601, %c3_1602, %c0_1603, %c0_1604] : memref<1x4x8x8x128xf32, #tpu.memory_space<vmem>>, vector<1x1x1x8x128xf32>
    %2143 = vector.shape_cast %2142 : vector<1x1x1x8x128xf32> to vector<8x128xf32>
    %2144 = arith.mulf %2143, %53 : vector<8x128xf32>
    %2145 = arith.addf %2137, %2144 : vector<8x128xf32>
    %2146 = arith.mulf %2143, %57 : vector<8x128xf32>
    %2147 = arith.addf %2139, %2146 : vector<8x128xf32>
    %2148 = arith.mulf %2143, %61 : vector<8x128xf32>
    %2149 = arith.addf %2141, %2148 : vector<8x128xf32>
    %c0_1605 = arith.constant 0 : index
    %c3_1606 = arith.constant 3 : index
    %c4_1607 = arith.constant 4 : index
    %c0_1608 = arith.constant 0 : index
    %c0_1609 = arith.constant 0 : index
    %2150 = vector.load %arg2[%c0_1605, %c3_1606, %c4_1607, %c0_1608, %c0_1609] : memref<1x4x8x8x128xf32, #tpu.memory_space<vmem>>, vector<1x1x1x8x128xf32>
    %2151 = vector.shape_cast %2150 : vector<1x1x1x8x128xf32> to vector<8x128xf32>
    %2152 = arith.mulf %2151, %65 : vector<8x128xf32>
    %2153 = arith.addf %2145, %2152 : vector<8x128xf32>
    %2154 = arith.mulf %2151, %69 : vector<8x128xf32>
    %2155 = arith.addf %2147, %2154 : vector<8x128xf32>
    %2156 = arith.mulf %2151, %73 : vector<8x128xf32>
    %2157 = arith.addf %2149, %2156 : vector<8x128xf32>
    %c0_1610 = arith.constant 0 : index
    %c1_1611 = arith.constant 1 : index
    %c0_1612 = arith.constant 0 : index
    %2158 = vector.load %arg6[%c0_1610, %c1_1611, %c0_1612] : memref<2x16x128xf32, #tpu.memory_space<vmem>>, vector<1x8x128xf32>
    %2159 = vector.shape_cast %2158 : vector<1x8x128xf32> to vector<8x128xf32>
    %2160 = vector.shape_cast %2153 : vector<8x128xf32> to vector<1x8x128xf32>
    tpu.vector_store %arg6[%c0_1610, %c1_1611, %c0_1612], %2160 {strides = array<i32>} : memref<2x16x128xf32, #tpu.memory_space<vmem>>, vector<1x8x128xf32>,
    %c1_1613 = arith.constant 1 : index
    %c0_1614 = arith.constant 0 : index
    %c0_1615 = arith.constant 0 : index
    %2161 = vector.load %arg6[%c1_1613, %c0_1614, %c0_1615] : memref<2x16x128xf32, #tpu.memory_space<vmem>>, vector<1x8x128xf32>
    %2162 = vector.shape_cast %2161 : vector<1x8x128xf32> to vector<8x128xf32>
    %2163 = vector.shape_cast %2157 : vector<8x128xf32> to vector<1x8x128xf32>
    tpu.vector_store %arg6[%c1_1613, %c0_1614, %c0_1615], %2163 {strides = array<i32>} : memref<2x16x128xf32, #tpu.memory_space<vmem>>, vector<1x8x128xf32>,
    %c0_1616 = arith.constant 0 : index
    %c0_1617 = arith.constant 0 : index
    %c0_1618 = arith.constant 0 : index
    %2164 = vector.load %arg6[%c0_1616, %c0_1617, %c0_1618] : memref<2x16x128xf32, #tpu.memory_space<vmem>>, vector<1x8x128xf32>
    %2165 = vector.shape_cast %2164 : vector<1x8x128xf32> to vector<8x128xf32>
    %c1_1619 = arith.constant 1 : index
    %c1_1620 = arith.constant 1 : index
    %c0_1621 = arith.constant 0 : index
    %2166 = vector.load %arg6[%c1_1619, %c1_1620, %c0_1621] : memref<2x16x128xf32, #tpu.memory_space<vmem>>, vector<1x8x128xf32>
    %2167 = vector.shape_cast %2166 : vector<1x8x128xf32> to vector<8x128xf32>
    %2168 = arith.addf %2155, %2165 : vector<8x128xf32>
    %2169 = arith.addf %2168, %2167 : vector<8x128xf32>
    %c0_1622 = arith.constant 0 : index
    %c3_1623 = arith.constant 3 : index
    %c3_1624 = arith.constant 3 : index
    %c0_1625 = arith.constant 0 : index
    %c0_1626 = arith.constant 0 : index
    %2170 = vector.load %arg5[%c0_1622, %c3_1623, %c3_1624, %c0_1625, %c0_1626] : memref<1x4x8x8x128xf32, #tpu.memory_space<vmem>>, vector<1x1x1x8x128xf32>
    %2171 = vector.shape_cast %2170 : vector<1x1x1x8x128xf32> to vector<8x128xf32>
    %2172 = vector.shape_cast %2169 : vector<8x128xf32> to vector<1x1x1x8x128xf32>
    tpu.vector_store %arg5[%c0_1622, %c3_1623, %c3_1624, %c0_1625, %c0_1626], %2172 {strides = array<i32>} : memref<1x4x8x8x128xf32, #tpu.memory_space<vmem>>, vector<1x1x1x8x128xf32>,
    %cst_1627 = arith.constant 0.000000e+00 : f32
    %2173 = vector.broadcast %cst_1627 : f32 to vector<8x128xf32>
    %cst_1628 = arith.constant 0.000000e+00 : f32
    %2174 = vector.broadcast %cst_1628 : f32 to vector<8x128xf32>
    %c0_1629 = arith.constant 0 : index
    %c2_1630 = arith.constant 2 : index
    %c3_1631 = arith.constant 3 : index
    %c0_1632 = arith.constant 0 : index
    %c0_1633 = arith.constant 0 : index
    %2175 = vector.load %arg2[%c0_1629, %c2_1630, %c3_1631, %c0_1632, %c0_1633] : memref<1x4x8x8x128xf32, #tpu.memory_space<vmem>>, vector<1x1x1x8x128xf32>
    %2176 = vector.shape_cast %2175 : vector<1x1x1x8x128xf32> to vector<8x128xf32>
    %2177 = arith.mulf %2176, %5 : vector<8x128xf32>
    %2178 = arith.addf %2173, %2177 : vector<8x128xf32>
    %2179 = arith.mulf %2176, %9 : vector<8x128xf32>
    %2180 = arith.addf %112, %2179 : vector<8x128xf32>
    %2181 = arith.mulf %2176, %13 : vector<8x128xf32>
    %2182 = arith.addf %2174, %2181 : vector<8x128xf32>
    %c0_1634 = arith.constant 0 : index
    %c2_1635 = arith.constant 2 : index
    %c4_1636 = arith.constant 4 : index
    %c0_1637 = arith.constant 0 : index
    %c0_1638 = arith.constant 0 : index
    %2183 = vector.load %arg2[%c0_1634, %c2_1635, %c4_1636, %c0_1637, %c0_1638] : memref<1x4x8x8x128xf32, #tpu.memory_space<vmem>>, vector<1x1x1x8x128xf32>
    %2184 = vector.shape_cast %2183 : vector<1x1x1x8x128xf32> to vector<8x128xf32>
    %2185 = arith.mulf %2184, %17 : vector<8x128xf32>
    %2186 = arith.addf %2178, %2185 : vector<8x128xf32>
    %2187 = arith.mulf %2184, %21 : vector<8x128xf32>
    %2188 = arith.addf %2180, %2187 : vector<8x128xf32>
    %2189 = arith.mulf %2184, %25 : vector<8x128xf32>
    %2190 = arith.addf %2182, %2189 : vector<8x128xf32>
    %c0_1639 = arith.constant 0 : index
    %c2_1640 = arith.constant 2 : index
    %c5_1641 = arith.constant 5 : index
    %c0_1642 = arith.constant 0 : index
    %c0_1643 = arith.constant 0 : index
    %2191 = vector.load %arg2[%c0_1639, %c2_1640, %c5_1641, %c0_1642, %c0_1643] : memref<1x4x8x8x128xf32, #tpu.memory_space<vmem>>, vector<1x1x1x8x128xf32>
    %2192 = vector.shape_cast %2191 : vector<1x1x1x8x128xf32> to vector<8x128xf32>
    %2193 = arith.mulf %2192, %29 : vector<8x128xf32>
    %2194 = arith.addf %2186, %2193 : vector<8x128xf32>
    %2195 = arith.mulf %2192, %33 : vector<8x128xf32>
    %2196 = arith.addf %2188, %2195 : vector<8x128xf32>
    %2197 = arith.mulf %2192, %37 : vector<8x128xf32>
    %2198 = arith.addf %2190, %2197 : vector<8x128xf32>
    %c0_1644 = arith.constant 0 : index
    %c3_1645 = arith.constant 3 : index
    %c3_1646 = arith.constant 3 : index
    %c0_1647 = arith.constant 0 : index
    %c0_1648 = arith.constant 0 : index
    %2199 = vector.load %arg2[%c0_1644, %c3_1645, %c3_1646, %c0_1647, %c0_1648] : memref<1x4x8x8x128xf32, #tpu.memory_space<vmem>>, vector<1x1x1x8x128xf32>
    %2200 = vector.shape_cast %2199 : vector<1x1x1x8x128xf32> to vector<8x128xf32>
    %2201 = arith.mulf %2200, %41 : vector<8x128xf32>
    %2202 = arith.addf %2194, %2201 : vector<8x128xf32>
    %2203 = arith.mulf %2200, %45 : vector<8x128xf32>
    %2204 = arith.addf %2196, %2203 : vector<8x128xf32>
    %2205 = arith.mulf %2200, %49 : vector<8x128xf32>
    %2206 = arith.addf %2198, %2205 : vector<8x128xf32>
    %c0_1649 = arith.constant 0 : index
    %c3_1650 = arith.constant 3 : index
    %c4_1651 = arith.constant 4 : index
    %c0_1652 = arith.constant 0 : index
    %c0_1653 = arith.constant 0 : index
    %2207 = vector.load %arg2[%c0_1649, %c3_1650, %c4_1651, %c0_1652, %c0_1653] : memref<1x4x8x8x128xf32, #tpu.memory_space<vmem>>, vector<1x1x1x8x128xf32>
    %2208 = vector.shape_cast %2207 : vector<1x1x1x8x128xf32> to vector<8x128xf32>
    %2209 = arith.mulf %2208, %53 : vector<8x128xf32>
    %2210 = arith.addf %2202, %2209 : vector<8x128xf32>
    %2211 = arith.mulf %2208, %57 : vector<8x128xf32>
    %2212 = arith.addf %2204, %2211 : vector<8x128xf32>
    %2213 = arith.mulf %2208, %61 : vector<8x128xf32>
    %2214 = arith.addf %2206, %2213 : vector<8x128xf32>
    %c0_1654 = arith.constant 0 : index
    %c3_1655 = arith.constant 3 : index
    %c5_1656 = arith.constant 5 : index
    %c0_1657 = arith.constant 0 : index
    %c0_1658 = arith.constant 0 : index
    %2215 = vector.load %arg2[%c0_1654, %c3_1655, %c5_1656, %c0_1657, %c0_1658] : memref<1x4x8x8x128xf32, #tpu.memory_space<vmem>>, vector<1x1x1x8x128xf32>
    %2216 = vector.shape_cast %2215 : vector<1x1x1x8x128xf32> to vector<8x128xf32>
    %2217 = arith.mulf %2216, %65 : vector<8x128xf32>
    %2218 = arith.addf %2210, %2217 : vector<8x128xf32>
    %2219 = arith.mulf %2216, %69 : vector<8x128xf32>
    %2220 = arith.addf %2212, %2219 : vector<8x128xf32>
    %2221 = arith.mulf %2216, %73 : vector<8x128xf32>
    %2222 = arith.addf %2214, %2221 : vector<8x128xf32>
    %c0_1659 = arith.constant 0 : index
    %c1_1660 = arith.constant 1 : index
    %c0_1661 = arith.constant 0 : index
    %2223 = vector.load %arg6[%c0_1659, %c1_1660, %c0_1661] : memref<2x16x128xf32, #tpu.memory_space<vmem>>, vector<1x8x128xf32>
    %2224 = vector.shape_cast %2223 : vector<1x8x128xf32> to vector<8x128xf32>
    %2225 = vector.shape_cast %2218 : vector<8x128xf32> to vector<1x8x128xf32>
    tpu.vector_store %arg6[%c0_1659, %c1_1660, %c0_1661], %2225 {strides = array<i32>} : memref<2x16x128xf32, #tpu.memory_space<vmem>>, vector<1x8x128xf32>,
    %c1_1662 = arith.constant 1 : index
    %c0_1663 = arith.constant 0 : index
    %c0_1664 = arith.constant 0 : index
    %2226 = vector.load %arg6[%c1_1662, %c0_1663, %c0_1664] : memref<2x16x128xf32, #tpu.memory_space<vmem>>, vector<1x8x128xf32>
    %2227 = vector.shape_cast %2226 : vector<1x8x128xf32> to vector<8x128xf32>
    %2228 = vector.shape_cast %2222 : vector<8x128xf32> to vector<1x8x128xf32>
    tpu.vector_store %arg6[%c1_1662, %c0_1663, %c0_1664], %2228 {strides = array<i32>} : memref<2x16x128xf32, #tpu.memory_space<vmem>>, vector<1x8x128xf32>,
    %c0_1665 = arith.constant 0 : index
    %c0_1666 = arith.constant 0 : index
    %c0_1667 = arith.constant 0 : index
    %2229 = vector.load %arg6[%c0_1665, %c0_1666, %c0_1667] : memref<2x16x128xf32, #tpu.memory_space<vmem>>, vector<1x8x128xf32>
    %2230 = vector.shape_cast %2229 : vector<1x8x128xf32> to vector<8x128xf32>
    %c1_1668 = arith.constant 1 : index
    %c1_1669 = arith.constant 1 : index
    %c0_1670 = arith.constant 0 : index
    %2231 = vector.load %arg6[%c1_1668, %c1_1669, %c0_1670] : memref<2x16x128xf32, #tpu.memory_space<vmem>>, vector<1x8x128xf32>
    %2232 = vector.shape_cast %2231 : vector<1x8x128xf32> to vector<8x128xf32>
    %2233 = arith.addf %2220, %2230 : vector<8x128xf32>
    %2234 = arith.addf %2233, %2232 : vector<8x128xf32>
    %c0_1671 = arith.constant 0 : index
    %c3_1672 = arith.constant 3 : index
    %c4_1673 = arith.constant 4 : index
    %c0_1674 = arith.constant 0 : index
    %c0_1675 = arith.constant 0 : index
    %2235 = vector.load %arg5[%c0_1671, %c3_1672, %c4_1673, %c0_1674, %c0_1675] : memref<1x4x8x8x128xf32, #tpu.memory_space<vmem>>, vector<1x1x1x8x128xf32>
    %2236 = vector.shape_cast %2235 : vector<1x1x1x8x128xf32> to vector<8x128xf32>
    %2237 = vector.shape_cast %2234 : vector<8x128xf32> to vector<1x1x1x8x128xf32>
    tpu.vector_store %arg5[%c0_1671, %c3_1672, %c4_1673, %c0_1674, %c0_1675], %2237 {strides = array<i32>} : memref<1x4x8x8x128xf32, #tpu.memory_space<vmem>>, vector<1x1x1x8x128xf32>,
    %cst_1676 = arith.constant 0.000000e+00 : f32
    %2238 = vector.broadcast %cst_1676 : f32 to vector<8x128xf32>
    %cst_1677 = arith.constant 0.000000e+00 : f32
    %2239 = vector.broadcast %cst_1677 : f32 to vector<8x128xf32>
    %c0_1678 = arith.constant 0 : index
    %c2_1679 = arith.constant 2 : index
    %c4_1680 = arith.constant 4 : index
    %c0_1681 = arith.constant 0 : index
    %c0_1682 = arith.constant 0 : index
    %2240 = vector.load %arg2[%c0_1678, %c2_1679, %c4_1680, %c0_1681, %c0_1682] : memref<1x4x8x8x128xf32, #tpu.memory_space<vmem>>, vector<1x1x1x8x128xf32>
    %2241 = vector.shape_cast %2240 : vector<1x1x1x8x128xf32> to vector<8x128xf32>
    %2242 = arith.mulf %2241, %5 : vector<8x128xf32>
    %2243 = arith.addf %2238, %2242 : vector<8x128xf32>
    %2244 = arith.mulf %2241, %9 : vector<8x128xf32>
    %2245 = arith.addf %112, %2244 : vector<8x128xf32>
    %2246 = arith.mulf %2241, %13 : vector<8x128xf32>
    %2247 = arith.addf %2239, %2246 : vector<8x128xf32>
    %c0_1683 = arith.constant 0 : index
    %c2_1684 = arith.constant 2 : index
    %c5_1685 = arith.constant 5 : index
    %c0_1686 = arith.constant 0 : index
    %c0_1687 = arith.constant 0 : index
    %2248 = vector.load %arg2[%c0_1683, %c2_1684, %c5_1685, %c0_1686, %c0_1687] : memref<1x4x8x8x128xf32, #tpu.memory_space<vmem>>, vector<1x1x1x8x128xf32>
    %2249 = vector.shape_cast %2248 : vector<1x1x1x8x128xf32> to vector<8x128xf32>
    %2250 = arith.mulf %2249, %17 : vector<8x128xf32>
    %2251 = arith.addf %2243, %2250 : vector<8x128xf32>
    %2252 = arith.mulf %2249, %21 : vector<8x128xf32>
    %2253 = arith.addf %2245, %2252 : vector<8x128xf32>
    %2254 = arith.mulf %2249, %25 : vector<8x128xf32>
    %2255 = arith.addf %2247, %2254 : vector<8x128xf32>
    %c0_1688 = arith.constant 0 : index
    %c2_1689 = arith.constant 2 : index
    %c6_1690 = arith.constant 6 : index
    %c0_1691 = arith.constant 0 : index
    %c0_1692 = arith.constant 0 : index
    %2256 = vector.load %arg2[%c0_1688, %c2_1689, %c6_1690, %c0_1691, %c0_1692] : memref<1x4x8x8x128xf32, #tpu.memory_space<vmem>>, vector<1x1x1x8x128xf32>
    %2257 = vector.shape_cast %2256 : vector<1x1x1x8x128xf32> to vector<8x128xf32>
    %2258 = arith.mulf %2257, %29 : vector<8x128xf32>
    %2259 = arith.addf %2251, %2258 : vector<8x128xf32>
    %2260 = arith.mulf %2257, %33 : vector<8x128xf32>
    %2261 = arith.addf %2253, %2260 : vector<8x128xf32>
    %2262 = arith.mulf %2257, %37 : vector<8x128xf32>
    %2263 = arith.addf %2255, %2262 : vector<8x128xf32>
    %c0_1693 = arith.constant 0 : index
    %c3_1694 = arith.constant 3 : index
    %c4_1695 = arith.constant 4 : index
    %c0_1696 = arith.constant 0 : index
    %c0_1697 = arith.constant 0 : index
    %2264 = vector.load %arg2[%c0_1693, %c3_1694, %c4_1695, %c0_1696, %c0_1697] : memref<1x4x8x8x128xf32, #tpu.memory_space<vmem>>, vector<1x1x1x8x128xf32>
    %2265 = vector.shape_cast %2264 : vector<1x1x1x8x128xf32> to vector<8x128xf32>
    %2266 = arith.mulf %2265, %41 : vector<8x128xf32>
    %2267 = arith.addf %2259, %2266 : vector<8x128xf32>
    %2268 = arith.mulf %2265, %45 : vector<8x128xf32>
    %2269 = arith.addf %2261, %2268 : vector<8x128xf32>
    %2270 = arith.mulf %2265, %49 : vector<8x128xf32>
    %2271 = arith.addf %2263, %2270 : vector<8x128xf32>
    %c0_1698 = arith.constant 0 : index
    %c3_1699 = arith.constant 3 : index
    %c5_1700 = arith.constant 5 : index
    %c0_1701 = arith.constant 0 : index
    %c0_1702 = arith.constant 0 : index
    %2272 = vector.load %arg2[%c0_1698, %c3_1699, %c5_1700, %c0_1701, %c0_1702] : memref<1x4x8x8x128xf32, #tpu.memory_space<vmem>>, vector<1x1x1x8x128xf32>
    %2273 = vector.shape_cast %2272 : vector<1x1x1x8x128xf32> to vector<8x128xf32>
    %2274 = arith.mulf %2273, %53 : vector<8x128xf32>
    %2275 = arith.addf %2267, %2274 : vector<8x128xf32>
    %2276 = arith.mulf %2273, %57 : vector<8x128xf32>
    %2277 = arith.addf %2269, %2276 : vector<8x128xf32>
    %2278 = arith.mulf %2273, %61 : vector<8x128xf32>
    %2279 = arith.addf %2271, %2278 : vector<8x128xf32>
    %c0_1703 = arith.constant 0 : index
    %c3_1704 = arith.constant 3 : index
    %c6_1705 = arith.constant 6 : index
    %c0_1706 = arith.constant 0 : index
    %c0_1707 = arith.constant 0 : index
    %2280 = vector.load %arg2[%c0_1703, %c3_1704, %c6_1705, %c0_1706, %c0_1707] : memref<1x4x8x8x128xf32, #tpu.memory_space<vmem>>, vector<1x1x1x8x128xf32>
    %2281 = vector.shape_cast %2280 : vector<1x1x1x8x128xf32> to vector<8x128xf32>
    %2282 = arith.mulf %2281, %65 : vector<8x128xf32>
    %2283 = arith.addf %2275, %2282 : vector<8x128xf32>
    %2284 = arith.mulf %2281, %69 : vector<8x128xf32>
    %2285 = arith.addf %2277, %2284 : vector<8x128xf32>
    %2286 = arith.mulf %2281, %73 : vector<8x128xf32>
    %2287 = arith.addf %2279, %2286 : vector<8x128xf32>
    %c0_1708 = arith.constant 0 : index
    %c1_1709 = arith.constant 1 : index
    %c0_1710 = arith.constant 0 : index
    %2288 = vector.load %arg6[%c0_1708, %c1_1709, %c0_1710] : memref<2x16x128xf32, #tpu.memory_space<vmem>>, vector<1x8x128xf32>
    %2289 = vector.shape_cast %2288 : vector<1x8x128xf32> to vector<8x128xf32>
    %2290 = vector.shape_cast %2283 : vector<8x128xf32> to vector<1x8x128xf32>
    tpu.vector_store %arg6[%c0_1708, %c1_1709, %c0_1710], %2290 {strides = array<i32>} : memref<2x16x128xf32, #tpu.memory_space<vmem>>, vector<1x8x128xf32>,
    %c1_1711 = arith.constant 1 : index
    %c0_1712 = arith.constant 0 : index
    %c0_1713 = arith.constant 0 : index
    %2291 = vector.load %arg6[%c1_1711, %c0_1712, %c0_1713] : memref<2x16x128xf32, #tpu.memory_space<vmem>>, vector<1x8x128xf32>
    %2292 = vector.shape_cast %2291 : vector<1x8x128xf32> to vector<8x128xf32>
    %2293 = vector.shape_cast %2287 : vector<8x128xf32> to vector<1x8x128xf32>
    tpu.vector_store %arg6[%c1_1711, %c0_1712, %c0_1713], %2293 {strides = array<i32>} : memref<2x16x128xf32, #tpu.memory_space<vmem>>, vector<1x8x128xf32>,
    %c0_1714 = arith.constant 0 : index
    %c0_1715 = arith.constant 0 : index
    %c0_1716 = arith.constant 0 : index
    %2294 = vector.load %arg6[%c0_1714, %c0_1715, %c0_1716] : memref<2x16x128xf32, #tpu.memory_space<vmem>>, vector<1x8x128xf32>
    %2295 = vector.shape_cast %2294 : vector<1x8x128xf32> to vector<8x128xf32>
    %c1_1717 = arith.constant 1 : index
    %c1_1718 = arith.constant 1 : index
    %c0_1719 = arith.constant 0 : index
    %2296 = vector.load %arg6[%c1_1717, %c1_1718, %c0_1719] : memref<2x16x128xf32, #tpu.memory_space<vmem>>, vector<1x8x128xf32>
    %2297 = vector.shape_cast %2296 : vector<1x8x128xf32> to vector<8x128xf32>
    %2298 = arith.addf %2285, %2295 : vector<8x128xf32>
    %2299 = arith.addf %2298, %2297 : vector<8x128xf32>
    %c0_1720 = arith.constant 0 : index
    %c3_1721 = arith.constant 3 : index
    %c5_1722 = arith.constant 5 : index
    %c0_1723 = arith.constant 0 : index
    %c0_1724 = arith.constant 0 : index
    %2300 = vector.load %arg5[%c0_1720, %c3_1721, %c5_1722, %c0_1723, %c0_1724] : memref<1x4x8x8x128xf32, #tpu.memory_space<vmem>>, vector<1x1x1x8x128xf32>
    %2301 = vector.shape_cast %2300 : vector<1x1x1x8x128xf32> to vector<8x128xf32>
    %2302 = vector.shape_cast %2299 : vector<8x128xf32> to vector<1x1x1x8x128xf32>
    tpu.vector_store %arg5[%c0_1720, %c3_1721, %c5_1722, %c0_1723, %c0_1724], %2302 {strides = array<i32>} : memref<1x4x8x8x128xf32, #tpu.memory_space<vmem>>, vector<1x1x1x8x128xf32>,
    %cst_1725 = arith.constant 0.000000e+00 : f32
    %2303 = vector.broadcast %cst_1725 : f32 to vector<8x128xf32>
    %cst_1726 = arith.constant 0.000000e+00 : f32
    %2304 = vector.broadcast %cst_1726 : f32 to vector<8x128xf32>
    %c0_1727 = arith.constant 0 : index
    %c2_1728 = arith.constant 2 : index
    %c5_1729 = arith.constant 5 : index
    %c0_1730 = arith.constant 0 : index
    %c0_1731 = arith.constant 0 : index
    %2305 = vector.load %arg2[%c0_1727, %c2_1728, %c5_1729, %c0_1730, %c0_1731] : memref<1x4x8x8x128xf32, #tpu.memory_space<vmem>>, vector<1x1x1x8x128xf32>
    %2306 = vector.shape_cast %2305 : vector<1x1x1x8x128xf32> to vector<8x128xf32>
    %2307 = arith.mulf %2306, %5 : vector<8x128xf32>
    %2308 = arith.addf %2303, %2307 : vector<8x128xf32>
    %2309 = arith.mulf %2306, %9 : vector<8x128xf32>
    %2310 = arith.addf %112, %2309 : vector<8x128xf32>
    %2311 = arith.mulf %2306, %13 : vector<8x128xf32>
    %2312 = arith.addf %2304, %2311 : vector<8x128xf32>
    %c0_1732 = arith.constant 0 : index
    %c2_1733 = arith.constant 2 : index
    %c6_1734 = arith.constant 6 : index
    %c0_1735 = arith.constant 0 : index
    %c0_1736 = arith.constant 0 : index
    %2313 = vector.load %arg2[%c0_1732, %c2_1733, %c6_1734, %c0_1735, %c0_1736] : memref<1x4x8x8x128xf32, #tpu.memory_space<vmem>>, vector<1x1x1x8x128xf32>
    %2314 = vector.shape_cast %2313 : vector<1x1x1x8x128xf32> to vector<8x128xf32>
    %2315 = arith.mulf %2314, %17 : vector<8x128xf32>
    %2316 = arith.addf %2308, %2315 : vector<8x128xf32>
    %2317 = arith.mulf %2314, %21 : vector<8x128xf32>
    %2318 = arith.addf %2310, %2317 : vector<8x128xf32>
    %2319 = arith.mulf %2314, %25 : vector<8x128xf32>
    %2320 = arith.addf %2312, %2319 : vector<8x128xf32>
    %c0_1737 = arith.constant 0 : index
    %c2_1738 = arith.constant 2 : index
    %c7_1739 = arith.constant 7 : index
    %c0_1740 = arith.constant 0 : index
    %c0_1741 = arith.constant 0 : index
    %2321 = vector.load %arg2[%c0_1737, %c2_1738, %c7_1739, %c0_1740, %c0_1741] : memref<1x4x8x8x128xf32, #tpu.memory_space<vmem>>, vector<1x1x1x8x128xf32>
    %2322 = vector.shape_cast %2321 : vector<1x1x1x8x128xf32> to vector<8x128xf32>
    %2323 = arith.mulf %2322, %29 : vector<8x128xf32>
    %2324 = arith.addf %2316, %2323 : vector<8x128xf32>
    %2325 = arith.mulf %2322, %33 : vector<8x128xf32>
    %2326 = arith.addf %2318, %2325 : vector<8x128xf32>
    %2327 = arith.mulf %2322, %37 : vector<8x128xf32>
    %2328 = arith.addf %2320, %2327 : vector<8x128xf32>
    %c0_1742 = arith.constant 0 : index
    %c3_1743 = arith.constant 3 : index
    %c5_1744 = arith.constant 5 : index
    %c0_1745 = arith.constant 0 : index
    %c0_1746 = arith.constant 0 : index
    %2329 = vector.load %arg2[%c0_1742, %c3_1743, %c5_1744, %c0_1745, %c0_1746] : memref<1x4x8x8x128xf32, #tpu.memory_space<vmem>>, vector<1x1x1x8x128xf32>
    %2330 = vector.shape_cast %2329 : vector<1x1x1x8x128xf32> to vector<8x128xf32>
    %2331 = arith.mulf %2330, %41 : vector<8x128xf32>
    %2332 = arith.addf %2324, %2331 : vector<8x128xf32>
    %2333 = arith.mulf %2330, %45 : vector<8x128xf32>
    %2334 = arith.addf %2326, %2333 : vector<8x128xf32>
    %2335 = arith.mulf %2330, %49 : vector<8x128xf32>
    %2336 = arith.addf %2328, %2335 : vector<8x128xf32>
    %c0_1747 = arith.constant 0 : index
    %c3_1748 = arith.constant 3 : index
    %c6_1749 = arith.constant 6 : index
    %c0_1750 = arith.constant 0 : index
    %c0_1751 = arith.constant 0 : index
    %2337 = vector.load %arg2[%c0_1747, %c3_1748, %c6_1749, %c0_1750, %c0_1751] : memref<1x4x8x8x128xf32, #tpu.memory_space<vmem>>, vector<1x1x1x8x128xf32>
    %2338 = vector.shape_cast %2337 : vector<1x1x1x8x128xf32> to vector<8x128xf32>
    %2339 = arith.mulf %2338, %53 : vector<8x128xf32>
    %2340 = arith.addf %2332, %2339 : vector<8x128xf32>
    %2341 = arith.mulf %2338, %57 : vector<8x128xf32>
    %2342 = arith.addf %2334, %2341 : vector<8x128xf32>
    %2343 = arith.mulf %2338, %61 : vector<8x128xf32>
    %2344 = arith.addf %2336, %2343 : vector<8x128xf32>
    %c0_1752 = arith.constant 0 : index
    %c3_1753 = arith.constant 3 : index
    %c7_1754 = arith.constant 7 : index
    %c0_1755 = arith.constant 0 : index
    %c0_1756 = arith.constant 0 : index
    %2345 = vector.load %arg2[%c0_1752, %c3_1753, %c7_1754, %c0_1755, %c0_1756] : memref<1x4x8x8x128xf32, #tpu.memory_space<vmem>>, vector<1x1x1x8x128xf32>
    %2346 = vector.shape_cast %2345 : vector<1x1x1x8x128xf32> to vector<8x128xf32>
    %2347 = arith.mulf %2346, %65 : vector<8x128xf32>
    %2348 = arith.addf %2340, %2347 : vector<8x128xf32>
    %2349 = arith.mulf %2346, %69 : vector<8x128xf32>
    %2350 = arith.addf %2342, %2349 : vector<8x128xf32>
    %2351 = arith.mulf %2346, %73 : vector<8x128xf32>
    %2352 = arith.addf %2344, %2351 : vector<8x128xf32>
    %c0_1757 = arith.constant 0 : index
    %c1_1758 = arith.constant 1 : index
    %c0_1759 = arith.constant 0 : index
    %2353 = vector.load %arg6[%c0_1757, %c1_1758, %c0_1759] : memref<2x16x128xf32, #tpu.memory_space<vmem>>, vector<1x8x128xf32>
    %2354 = vector.shape_cast %2353 : vector<1x8x128xf32> to vector<8x128xf32>
    %2355 = vector.shape_cast %2348 : vector<8x128xf32> to vector<1x8x128xf32>
    tpu.vector_store %arg6[%c0_1757, %c1_1758, %c0_1759], %2355 {strides = array<i32>} : memref<2x16x128xf32, #tpu.memory_space<vmem>>, vector<1x8x128xf32>,
    %c1_1760 = arith.constant 1 : index
    %c0_1761 = arith.constant 0 : index
    %c0_1762 = arith.constant 0 : index
    %2356 = vector.load %arg6[%c1_1760, %c0_1761, %c0_1762] : memref<2x16x128xf32, #tpu.memory_space<vmem>>, vector<1x8x128xf32>
    %2357 = vector.shape_cast %2356 : vector<1x8x128xf32> to vector<8x128xf32>
    %2358 = vector.shape_cast %2352 : vector<8x128xf32> to vector<1x8x128xf32>
    tpu.vector_store %arg6[%c1_1760, %c0_1761, %c0_1762], %2358 {strides = array<i32>} : memref<2x16x128xf32, #tpu.memory_space<vmem>>, vector<1x8x128xf32>,
    %c0_1763 = arith.constant 0 : index
    %c0_1764 = arith.constant 0 : index
    %c0_1765 = arith.constant 0 : index
    %2359 = vector.load %arg6[%c0_1763, %c0_1764, %c0_1765] : memref<2x16x128xf32, #tpu.memory_space<vmem>>, vector<1x8x128xf32>
    %2360 = vector.shape_cast %2359 : vector<1x8x128xf32> to vector<8x128xf32>
    %c1_1766 = arith.constant 1 : index
    %c1_1767 = arith.constant 1 : index
    %c0_1768 = arith.constant 0 : index
    %2361 = vector.load %arg6[%c1_1766, %c1_1767, %c0_1768] : memref<2x16x128xf32, #tpu.memory_space<vmem>>, vector<1x8x128xf32>
    %2362 = vector.shape_cast %2361 : vector<1x8x128xf32> to vector<8x128xf32>
    %2363 = arith.addf %2350, %2360 : vector<8x128xf32>
    %2364 = arith.addf %2363, %2362 : vector<8x128xf32>
    %c0_1769 = arith.constant 0 : index
    %c3_1770 = arith.constant 3 : index
    %c6_1771 = arith.constant 6 : index
    %c0_1772 = arith.constant 0 : index
    %c0_1773 = arith.constant 0 : index
    %2365 = vector.load %arg5[%c0_1769, %c3_1770, %c6_1771, %c0_1772, %c0_1773] : memref<1x4x8x8x128xf32, #tpu.memory_space<vmem>>, vector<1x1x1x8x128xf32>
    %2366 = vector.shape_cast %2365 : vector<1x1x1x8x128xf32> to vector<8x128xf32>
    %2367 = vector.shape_cast %2364 : vector<8x128xf32> to vector<1x1x1x8x128xf32>
    tpu.vector_store %arg5[%c0_1769, %c3_1770, %c6_1771, %c0_1772, %c0_1773], %2367 {strides = array<i32>} : memref<1x4x8x8x128xf32, #tpu.memory_space<vmem>>, vector<1x1x1x8x128xf32>,
    %cst_1774 = arith.constant 0.000000e+00 : f32
    %2368 = vector.broadcast %cst_1774 : f32 to vector<8x128xf32>
    %cst_1775 = arith.constant 0.000000e+00 : f32
    %2369 = vector.broadcast %cst_1775 : f32 to vector<8x128xf32>
    %c0_1776 = arith.constant 0 : index
    %c2_1777 = arith.constant 2 : index
    %c6_1778 = arith.constant 6 : index
    %c0_1779 = arith.constant 0 : index
    %c0_1780 = arith.constant 0 : index
    %2370 = vector.load %arg2[%c0_1776, %c2_1777, %c6_1778, %c0_1779, %c0_1780] : memref<1x4x8x8x128xf32, #tpu.memory_space<vmem>>, vector<1x1x1x8x128xf32>
    %2371 = vector.shape_cast %2370 : vector<1x1x1x8x128xf32> to vector<8x128xf32>
    %2372 = arith.mulf %2371, %5 : vector<8x128xf32>
    %2373 = arith.addf %2368, %2372 : vector<8x128xf32>
    %2374 = arith.mulf %2371, %9 : vector<8x128xf32>
    %2375 = arith.addf %112, %2374 : vector<8x128xf32>
    %2376 = arith.mulf %2371, %13 : vector<8x128xf32>
    %2377 = arith.addf %2369, %2376 : vector<8x128xf32>
    %c0_1781 = arith.constant 0 : index
    %c2_1782 = arith.constant 2 : index
    %c7_1783 = arith.constant 7 : index
    %c0_1784 = arith.constant 0 : index
    %c0_1785 = arith.constant 0 : index
    %2378 = vector.load %arg2[%c0_1781, %c2_1782, %c7_1783, %c0_1784, %c0_1785] : memref<1x4x8x8x128xf32, #tpu.memory_space<vmem>>, vector<1x1x1x8x128xf32>
    %2379 = vector.shape_cast %2378 : vector<1x1x1x8x128xf32> to vector<8x128xf32>
    %2380 = arith.mulf %2379, %17 : vector<8x128xf32>
    %2381 = arith.addf %2373, %2380 : vector<8x128xf32>
    %2382 = arith.mulf %2379, %21 : vector<8x128xf32>
    %2383 = arith.addf %2375, %2382 : vector<8x128xf32>
    %2384 = arith.mulf %2379, %25 : vector<8x128xf32>
    %2385 = arith.addf %2377, %2384 : vector<8x128xf32>
    %c0_1786 = arith.constant 0 : index
    %c3_1787 = arith.constant 3 : index
    %c6_1788 = arith.constant 6 : index
    %c0_1789 = arith.constant 0 : index
    %c0_1790 = arith.constant 0 : index
    %2386 = vector.load %arg2[%c0_1786, %c3_1787, %c6_1788, %c0_1789, %c0_1790] : memref<1x4x8x8x128xf32, #tpu.memory_space<vmem>>, vector<1x1x1x8x128xf32>
    %2387 = vector.shape_cast %2386 : vector<1x1x1x8x128xf32> to vector<8x128xf32>
    %2388 = arith.mulf %2387, %41 : vector<8x128xf32>
    %2389 = arith.addf %2381, %2388 : vector<8x128xf32>
    %2390 = arith.mulf %2387, %45 : vector<8x128xf32>
    %2391 = arith.addf %2383, %2390 : vector<8x128xf32>
    %2392 = arith.mulf %2387, %49 : vector<8x128xf32>
    %2393 = arith.addf %2385, %2392 : vector<8x128xf32>
    %c0_1791 = arith.constant 0 : index
    %c3_1792 = arith.constant 3 : index
    %c7_1793 = arith.constant 7 : index
    %c0_1794 = arith.constant 0 : index
    %c0_1795 = arith.constant 0 : index
    %2394 = vector.load %arg2[%c0_1791, %c3_1792, %c7_1793, %c0_1794, %c0_1795] : memref<1x4x8x8x128xf32, #tpu.memory_space<vmem>>, vector<1x1x1x8x128xf32>
    %2395 = vector.shape_cast %2394 : vector<1x1x1x8x128xf32> to vector<8x128xf32>
    %2396 = arith.mulf %2395, %53 : vector<8x128xf32>
    %2397 = arith.addf %2389, %2396 : vector<8x128xf32>
    %2398 = arith.mulf %2395, %57 : vector<8x128xf32>
    %2399 = arith.addf %2391, %2398 : vector<8x128xf32>
    %2400 = arith.mulf %2395, %61 : vector<8x128xf32>
    %2401 = arith.addf %2393, %2400 : vector<8x128xf32>
    %c0_1796 = arith.constant 0 : index
    %c1_1797 = arith.constant 1 : index
    %c0_1798 = arith.constant 0 : index
    %2402 = vector.load %arg6[%c0_1796, %c1_1797, %c0_1798] : memref<2x16x128xf32, #tpu.memory_space<vmem>>, vector<1x8x128xf32>
    %2403 = vector.shape_cast %2402 : vector<1x8x128xf32> to vector<8x128xf32>
    %2404 = vector.shape_cast %2397 : vector<8x128xf32> to vector<1x8x128xf32>
    tpu.vector_store %arg6[%c0_1796, %c1_1797, %c0_1798], %2404 {strides = array<i32>} : memref<2x16x128xf32, #tpu.memory_space<vmem>>, vector<1x8x128xf32>,
    %c1_1799 = arith.constant 1 : index
    %c0_1800 = arith.constant 0 : index
    %c0_1801 = arith.constant 0 : index
    %2405 = vector.load %arg6[%c1_1799, %c0_1800, %c0_1801] : memref<2x16x128xf32, #tpu.memory_space<vmem>>, vector<1x8x128xf32>
    %2406 = vector.shape_cast %2405 : vector<1x8x128xf32> to vector<8x128xf32>
    %2407 = vector.shape_cast %2401 : vector<8x128xf32> to vector<1x8x128xf32>
    tpu.vector_store %arg6[%c1_1799, %c0_1800, %c0_1801], %2407 {strides = array<i32>} : memref<2x16x128xf32, #tpu.memory_space<vmem>>, vector<1x8x128xf32>,
    %c0_1802 = arith.constant 0 : index
    %c0_1803 = arith.constant 0 : index
    %c0_1804 = arith.constant 0 : index
    %2408 = vector.load %arg6[%c0_1802, %c0_1803, %c0_1804] : memref<2x16x128xf32, #tpu.memory_space<vmem>>, vector<1x8x128xf32>
    %2409 = vector.shape_cast %2408 : vector<1x8x128xf32> to vector<8x128xf32>
    %c1_1805 = arith.constant 1 : index
    %c1_1806 = arith.constant 1 : index
    %c0_1807 = arith.constant 0 : index
    %2410 = vector.load %arg6[%c1_1805, %c1_1806, %c0_1807] : memref<2x16x128xf32, #tpu.memory_space<vmem>>, vector<1x8x128xf32>
    %2411 = vector.shape_cast %2410 : vector<1x8x128xf32> to vector<8x128xf32>
    %2412 = arith.addf %2399, %2409 : vector<8x128xf32>
    %2413 = arith.addf %2412, %2411 : vector<8x128xf32>
    %c0_1808 = arith.constant 0 : index
    %c3_1809 = arith.constant 3 : index
    %c7_1810 = arith.constant 7 : index
    %c0_1811 = arith.constant 0 : index
    %c0_1812 = arith.constant 0 : index
    %2414 = vector.load %arg5[%c0_1808, %c3_1809, %c7_1810, %c0_1811, %c0_1812] : memref<1x4x8x8x128xf32, #tpu.memory_space<vmem>>, vector<1x1x1x8x128xf32>
    %2415 = vector.shape_cast %2414 : vector<1x1x1x8x128xf32> to vector<8x128xf32>
    %2416 = vector.shape_cast %2413 : vector<8x128xf32> to vector<1x1x1x8x128xf32>
    tpu.vector_store %arg5[%c0_1808, %c3_1809, %c7_1810, %c0_1811, %c0_1812], %2416 {strides = array<i32>} : memref<1x4x8x8x128xf32, #tpu.memory_space<vmem>>, vector<1x1x1x8x128xf32>,
    return
  }
  func.func @transform_0(%arg0: i32, %arg1: i32) -> (i32, i32, i32, i32, i32) {
    %c0_i32 = arith.constant 0 : i32
    %c0_i32_0 = arith.constant 0 : i32
    %c0_i32_1 = arith.constant 0 : i32
    %c0_i32_2 = arith.constant 0 : i32
    return %arg1, %c0_i32, %c0_i32_0, %c0_i32_1, %arg0 : i32, i32, i32, i32, i32
  }
  func.func @transform_1(%arg0: i32, %arg1: i32) -> (i32, i32, i32, i32) {
    %c0_i32 = arith.constant 0 : i32
    %c0_i32_0 = arith.constant 0 : i32
    %c0_i32_1 = arith.constant 0 : i32
    %c0_i32_2 = arith.constant 0 : i32
    return %c0_i32, %c0_i32_0, %c0_i32_1, %arg0 : i32, i32, i32, i32
  }
  func.func @transform_2(%arg0: i32, %arg1: i32) -> (i32, i32) {
    %c0_i32 = arith.constant 0 : i32
    %c0_i32_0 = arith.constant 0 : i32
    return %c0_i32, %arg0 : i32, i32
  }
  func.func @transform_3(%arg0: i32, %arg1: i32) -> (i32, i32, i32, i32, i32) {
    %c0_i32 = arith.constant 0 : i32
    %c0_i32_0 = arith.constant 0 : i32
    %c0_i32_1 = arith.constant 0 : i32
    %c0_i32_2 = arith.constant 0 : i32
    return %arg1, %c0_i32, %c0_i32_0, %c0_i32_1, %arg0 : i32, i32, i32, i32, i32
  }
}

</mosaic_0001>

<bundles_post_ra>
// kernel: dwconv_pallas.1
= control target key start
LH: loop header
LB: loop body
LE: loop exit
PB: predicated region body
PF: predicated region fallthrough
CT: control target
= control target key end

     0   :  { %s3265_s12 = smov 0   ;;  %s3267_s13 = smov 0   ;;  %s5556_s0 = inlined_call_operand.vmem [shape: f32[2,4,8,8,256], index: 0, kind: input, shape index: {}]   ;;  %s5557_s1 = inlined_call_operand.vmem [shape: f32[3,3,3,256], index: 1, kind: input, shape index: {}]   ;;  %s5558_s2 = inlined_call_operand.vmem [shape: f32[1,256], index: 2, kind: input, shape index: {}]   ;;  %s5559_s3 = inlined_call_operand.vmem [shape: f32[2,4,8,8,256], index: 3, kind: output, shape index: {}]  }
   0x1   :  { %s3269_s14 = smov 0   ;;  %s3271_s15 = smov 0  }
   0x2   :  { %s3273_s16 = smov 0   ;;  %s3275_s17 = smov 0  }
   0x3   :  { %s3277_s18 = smov 0   ;;  %s3279_s19 = smov 0  }
   0x4   :  { %s3281_s20 = smov 0  }
   0x5 LB: > { %s22_s21 = sadd.s32 1, %s3234_s18  ;;  %s25_s22 = sadd.s32 1, %s3238_s19  ;;  %s3242_s20 = sphi %s3281_s20, %s13_s20   ;;  %s3238_s19 = sphi %s3279_s19, %s5752_s19   ;;  %s3234_s18 = sphi %s3277_s18, %s5751_s18   ;;  %s3230_s17 = sphi %s3275_s17, %s5750_s17   ;;  %s3226_s16 = sphi %s3273_s16, %s5749_s16   ;;  %s3222_s15 = sphi %s3271_s15, %s5748_s15   ;;  %s3218_s14 = sphi %s3269_s14, %s5747_s14   ;;  %s3214_s13 = sphi %s3267_s13, %s5746_s13   ;;  %s3210_s12 = sphi %s3265_s12, %s5745_s12  }
   0x6   : > { %p23_p0 = scmp.ge.s32.totalorder %s22_s21, 2  ;;  %s2695_s23 = sadd.s32 4294967295, %s3242_s20  }
   0x7   : > { %p41_p1 = scmp.ne.s32.totalorder %s3222_s15, %s3218_s14  ;;  %s34_s24 = sadd.s32 1, %s3222_s15 }
   0x8   : > { %s5754_s21 = smov (%p23_p0, %s22_s21), 0  ;;  %s5756_s22 = smov (!%p23_p0, %s25_s22), %s3238_s19 }
   0x9   : > { %p42_p2 = scmp.eq.s32.totalorder %s3242_s20, 0  ;;  %p27_p3 = scmp.ge.s32.totalorder %s5756_s22, 2 }
   0xa   : > { %s29_s25 = ssub.s32 %s3234_s18, %s5754_s21  ;;  %p67_p5 = scmp.ne.s32.totalorder %s3214_s13, %s3210_s12 }
   0xb   : > { %p3325_p4 = por %p42_p2, %p41_p1  ;;  %s5758_s22 = smov (%p27_p3, %s5756_s22), 0 }
   0xc   : > { %p3333_p6 = por %p67_p5, %p42_p2  ;;  %p125_p7 = scmp.eq.s32.totalorder %s2695_s23, 3 }
   0xd   : > { %s30_s28 = ssub.s32 %s3238_s19, %s5758_s22  ;;  %s60_s29 = sadd.s32 1, %s3214_s13 }
   0xe   : > { %s31_s30 = sor.u32 %s30_s28, %s29_s25  ;;  %p58_p8 = scmp.eq.s32.totalorder %s30_s28, 0 }
   0xf   : > { %p32_p9 = scmp.eq.s32.totalorder %s31_s30, 0  ;;  %p3343_p10 = por %p125_p7, %p41_p1 }
  0x10   : > { %s3348_s5 = scalar_select %p58_p8, %s3214_s13, %s60_s29  }
  0x11   : > { %s3351_s6 = scalar_select %p32_p9, %s3222_s15, %s34_s24  }
  0x12   : > { %p2698_p11 = scmp.ge.s32.totalorder %s3242_s20, 4 }
  0x14   : > { %147 = sbr.rel (%p2698_p11) target bundleno = 59 (0x3b), region = 16 }
  0x1b   : > { %150 = sbr.rel (!%p3325_p4) target bundleno = 49 (0x31), region = 20  ;;  %s152_s7 = sand.u32 (%p3325_p4), 1, %s3222_s15  }
  0x1c   : > { %s2700_s8 = sshll.u32 (%p3325_p4), %s3234_s18, 6  ;;  %s2699_s9 = sshll.u32 (%p3325_p4), %s152_s7, 8 }
  0x1d   : > { %s156_s10 = sadd.s32 (%p3325_p4), %s3238_s19, %s2700_s8  ;;  %s3367_s24 = scalar_lea.vmem (%p3325_p4), [#allocation3], %s2699_s9 }
  0x1e   : > { %s2701_s11 = sshll.u32 (%p3325_p4), %s156_s10, 3 }
  0x1f   : > { %s3362_s28 = scalar_lea.vmem (%p3325_p4), %s5556_s0, %s2701_s11 }
  0x20   : > { %v248_v0 = vld [vmem:[%s3362_s28] sm:$0xff] (%p3325_p4)  ;;  %v250_v1 = vld [vmem:[%s3362_s28 + $0x10] sm:$0xff] (%p3325_p4) }
  0x21   : > { %v252_v2 = vld [vmem:[%s3362_s28 + $0x20] sm:$0xff] (%p3325_p4)  ;;  %249 = vst [vmem:[%s3367_s24] sm:$0xff] (%p3325_p4), %v248_v0  ;;  %251 = vst [vmem:[%s3367_s24 + $0x8] sm:$0xff] (%p3325_p4), %v250_v1  ;;  %v254_v3 = vld [vmem:[%s3362_s28 + $0x30] sm:$0xff] (%p3325_p4) }
  0x22   : > { %253 = vst [vmem:[%s3367_s24 + $0x10] sm:$0xff] %v252_v2  ;;  %v256_v4 = vld [vmem:[%s3362_s28 + $0x40] sm:$0xff]  ;;  %v258_v5 = vld [vmem:[%s3362_s28 + $0x50] sm:$0xff]  ;;  %255 = vst [vmem:[%s3367_s24 + $0x18] sm:$0xff] %v254_v3 }
  0x23   : > { %257 = vst [vmem:[%s3367_s24 + $0x20] sm:$0xff] %v256_v4  ;;  %259 = vst [vmem:[%s3367_s24 + $0x28] sm:$0xff] %v258_v5  ;;  %v260_v6 = vld [vmem:[%s3362_s28 + $0x60] sm:$0xff]  ;;  %v262_v7 = vld [vmem:[%s3362_s28 + $0x70] sm:$0xff] }
  0x24   : > { %v264_v8 = vld [vmem:[%s3362_s28 + $0x80] sm:$0xff]  ;;  %261 = vst [vmem:[%s3367_s24 + $0x30] sm:$0xff] %v260_v6  ;;  %263 = vst [vmem:[%s3367_s24 + $0x38] sm:$0xff] %v262_v7  ;;  %v266_v9 = vld [vmem:[%s3362_s28 + $0x90] sm:$0xff] }
  0x25   : > { %265 = vst [vmem:[%s3367_s24 + $0x40] sm:$0xff] %v264_v8  ;;  %v268_v10 = vld [vmem:[%s3362_s28 + $0xa0] sm:$0xff]  ;;  %v270_v11 = vld [vmem:[%s3362_s28 + $0xb0] sm:$0xff]  ;;  %267 = vst [vmem:[%s3367_s24 + $0x48] sm:$0xff] %v266_v9 }
  0x26   : > { %269 = vst [vmem:[%s3367_s24 + $0x50] sm:$0xff] %v268_v10  ;;  %271 = vst [vmem:[%s3367_s24 + $0x58] sm:$0xff] %v270_v11  ;;  %v272_v12 = vld [vmem:[%s3362_s28 + $0xc0] sm:$0xff]  ;;  %v274_v13 = vld [vmem:[%s3362_s28 + $0xd0] sm:$0xff] }
  0x27   : > { %v276_v14 = vld [vmem:[%s3362_s28 + $0xe0] sm:$0xff]  ;;  %273 = vst [vmem:[%s3367_s24 + $0x60] sm:$0xff] %v272_v12  ;;  %275 = vst [vmem:[%s3367_s24 + $0x68] sm:$0xff] %v274_v13  ;;  %v278_v15 = vld [vmem:[%s3362_s28 + $0xf0] sm:$0xff] }
  0x28   : > { %277 = vst [vmem:[%s3367_s24 + $0x70] sm:$0xff] %v276_v14  ;;  %v280_v16 = vld [vmem:[%s3362_s28 + $0x100] sm:$0xff]  ;;  %v282_v17 = vld [vmem:[%s3362_s28 + $0x110] sm:$0xff]  ;;  %279 = vst [vmem:[%s3367_s24 + $0x78] sm:$0xff] %v278_v15 }
  0x29   : > { %281 = vst [vmem:[%s3367_s24 + $0x80] sm:$0xff] %v280_v16  ;;  %283 = vst [vmem:[%s3367_s24 + $0x88] sm:$0xff] %v282_v17  ;;  %v284_v18 = vld [vmem:[%s3362_s28 + $0x120] sm:$0xff]  ;;  %v286_v19 = vld [vmem:[%s3362_s28 + $0x130] sm:$0xff] }
  0x2a   : > { %v288_v20 = vld [vmem:[%s3362_s28 + $0x140] sm:$0xff]  ;;  %285 = vst [vmem:[%s3367_s24 + $0x90] sm:$0xff] %v284_v18  ;;  %287 = vst [vmem:[%s3367_s24 + $0x98] sm:$0xff] %v286_v19  ;;  %v290_v21 = vld [vmem:[%s3362_s28 + $0x150] sm:$0xff] }
  0x2b   : > { %289 = vst [vmem:[%s3367_s24 + $0xa0] sm:$0xff] %v288_v20  ;;  %v292_v22 = vld [vmem:[%s3362_s28 + $0x160] sm:$0xff]  ;;  %v294_v23 = vld [vmem:[%s3362_s28 + $0x170] sm:$0xff]  ;;  %291 = vst [vmem:[%s3367_s24 + $0xa8] sm:$0xff] %v290_v21 }
  0x2c   : > { %293 = vst [vmem:[%s3367_s24 + $0xb0] sm:$0xff] %v292_v22  ;;  %295 = vst [vmem:[%s3367_s24 + $0xb8] sm:$0xff] %v294_v23  ;;  %v296_v24 = vld [vmem:[%s3362_s28 + $0x180] sm:$0xff]  ;;  %v298_v25 = vld [vmem:[%s3362_s28 + $0x190] sm:$0xff] }
  0x2d   : > { %v300_v26 = vld [vmem:[%s3362_s28 + $0x1a0] sm:$0xff]  ;;  %297 = vst [vmem:[%s3367_s24 + $0xc0] sm:$0xff] %v296_v24  ;;  %299 = vst [vmem:[%s3367_s24 + $0xc8] sm:$0xff] %v298_v25  ;;  %v302_v27 = vld [vmem:[%s3362_s28 + $0x1b0] sm:$0xff] }
  0x2e   : > { %301 = vst [vmem:[%s3367_s24 + $0xd0] sm:$0xff] %v300_v26  ;;  %v304_v28 = vld [vmem:[%s3362_s28 + $0x1c0] sm:$0xff]  ;;  %v306_v29 = vld [vmem:[%s3362_s28 + $0x1d0] sm:$0xff]  ;;  %303 = vst [vmem:[%s3367_s24 + $0xd8] sm:$0xff] %v302_v27 }
  0x2f   : > { %305 = vst [vmem:[%s3367_s24 + $0xe0] sm:$0xff] %v304_v28  ;;  %307 = vst [vmem:[%s3367_s24 + $0xe8] sm:$0xff] %v306_v29  ;;  %v308_v30 = vld [vmem:[%s3362_s28 + $0x1e0] sm:$0xff]  ;;  %v310_v31 = vld [vmem:[%s3362_s28 + $0x1f0] sm:$0xff] }
  0x30   : > { %309 = vst [vmem:[%s3367_s24 + $0xf0] sm:$0xff] %v308_v30  ;;  %311 = vst [vmem:[%s3367_s24 + $0xf8] sm:$0xff] %v310_v31 }
  0x31 PF: > { %317 = sbr.rel (!%p3333_p6) target bundleno = 59 (0x3b), region = 58  ;;  %s319_s26 = sand.u32 (%p3333_p6), 1, %s3214_s13  }
  0x32   : > { %s2702_s29 = sshll.u32 (%p3333_p6), %s3238_s19, 2  ;;  %s3010_s30 = smul.u32 (%p3333_p6), 36, %s319_s26 }
  0x33   : > { %s323_s9 = scalar_lea.vmem (%p3333_p6), %s5557_s1, %s2702_s29 }
  0x34   : > { %v339_v32 = vld [vmem:[%s323_s9] sm:$0xf] (%p3333_p6)  ;;  %v341_v33 = vld [vmem:[%s323_s9 + $0x8] sm:$0xf] (%p3333_p6)  ;;  %v343_v34 = vld [vmem:[%s323_s9 + $0x10] sm:$0xf] (%p3333_p6) }
  0x35   : > { %v345_v35 = vld [vmem:[%s323_s9 + $0x18] sm:$0xf] (%p3333_p6)  ;;  %v347_v36 = vld [vmem:[%s323_s9 + $0x20] sm:$0xf] (%p3333_p6)  ;;  %s321_s10 = scalar_lea.vmem (%p3333_p6), [#allocation4], %s3010_s30 }
  0x36   : > { %340 = vst [vmem:[%s321_s10] sm:$0xf] (%p3333_p6), %v339_v32  ;;  %342 = vst [vmem:[%s321_s10 + $0x4] sm:$0xf] (%p3333_p6), %v341_v33  ;;  %v349_v37 = vld [vmem:[%s323_s9 + $0x28] sm:$0xf] (%p3333_p6) }
  0x37   : > { %344 = vst [vmem:[%s321_s10 + $0x8] sm:$0xf] (%p3333_p6), %v343_v34  ;;  %346 = vst [vmem:[%s321_s10 + $0xc] sm:$0xf] (%p3333_p6), %v345_v35  ;;  %v351_v38 = vld [vmem:[%s323_s9 + $0x30] sm:$0xf] (%p3333_p6) }
  0x38   : > { %348 = vst [vmem:[%s321_s10 + $0x10] sm:$0xf] %v347_v36  ;;  %v353_v39 = vld [vmem:[%s323_s9 + $0x38] sm:$0xf]  ;;  %350 = vst [vmem:[%s321_s10 + $0x14] sm:$0xf] %v349_v37 }
  0x39   : > { %352 = vst [vmem:[%s321_s10 + $0x18] sm:$0xf] %v351_v38  ;;  %354 = vst [vmem:[%s321_s10 + $0x1c] sm:$0xf] %v353_v39  ;;  %v355_v40 = vld [vmem:[%s323_s9 + $0x40] sm:$0xf] }
  0x3a   : > { %356 = vst [vmem:[%s321_s10 + $0x20] sm:$0xf] %v355_v40 }
  0x3b PF: > { %p2703_p12 = scmp.ge.s32.totalorder %s3242_s20, 1  ;;  %p402_p13 = scmp.lt.s32.totalorder %s3242_s20, 5 }
  0x3d   : > { %p403_p0 = pnand %p2703_p12, %p402_p13 }
  0x3f   : > { %406 = sbr.rel (%p403_p0) target bundleno = 445 (0x1bd), region = 103 }
  0x46   : > { %s409_s27 = sand.u32 1, %s3218_s14   ;;  %s416_s11 = sand.u32 1, %s3210_s12   ;;  %v3244_v41 = vmov 0.0  }
  0x47   : > { %448 = vst [vmem:[#allocation2] sm:$0xff] %v3244_v41  ;;  %451 = vst [vmem:[#allocation2 + $0x18] sm:$0xff] %v3244_v41  ;;  %s3441_s23 = sshll.u32 %s409_s27, 8  ;;  %s3011_s25 = smul.u32 36, %s416_s11 }
  0x48   : > { %s3444_s28 = scalar_lea.vmem [#allocation3], %s3441_s23  ;;  %p445_p1 = scmp.lt.s32.totalorder %s3230_s17, 1 }
  0x49   : > { %v3447_v42 = vld [vmem:[%s3444_s28] sm:$0xff]  ;;  %v3450_v43 = vld [vmem:[%s3444_s28 + $0x8] sm:$0xff]  ;;  %s3456_s12 = scalar_lea.vmem [#allocation4], %s3011_s25  ;;  %v3505_v0 = vld [vmem:[%s3444_s28 + $0x10] sm:$0xff]  ;;  %s3641_s30 = scalar_lea.vmem [#allocation5], %s3441_s23 }
  0x4a   : > { %v3453_v44 = vld [vmem:[%s3444_s28 + $0x40] sm:$0xff]  ;;  %v3459_v45 = vld [vmem:[%s3456_s12 + $0x10] ss:$0 sm:$0xff]  ;;  %v3462_v46 = vld [vmem:[%s3456_s12 + $0x14] ss:$0 sm:$0xff]  ;;  %s446_s14 = scalar_select %p445_p1, %s3230_s17, 1 }
  0x4b   : > { %v3465_v47 = vld [vmem:[%s3456_s12 + $0x1c] ss:$0 sm:$0xff]  ;;  %v3468_v48 = vld [vmem:[%s3456_s12 + $0x20] ss:$0 sm:$0xff]  ;;  %v603_v49 = vmul.f32 %v3459_v45, %v3447_v42  ;;  %v611_v50 = vmul.f32 %v3450_v43, %v3462_v46  ;;  %v3477_v52 = vld [vmem:[%s3444_s28 + $0x48] sm:$0xff]  ;;  %v649_v63 = vmul.f32 %v3450_v43, %v3459_v45  ;;  %v657_v6 = vmul.f32 %v3505_v0, %v3462_v46  ;;  %s3006_s7 = sshll.u32 (%p3343_p10), %s3226_s16, 6 }
  0x4c   : > { %v619_v51 = vmul.f32 %v3453_v44, %v3465_v47  ;;  %v3480_v53 = vld [vmem:[%s3456_s12 + $0x12] ss:$0 sm:$0xff]  ;;  %v3483_v54 = vld [vmem:[%s3456_s12 + $0x16] ss:$0 sm:$0xff]  ;;  %v3486_v55 = vld [vmem:[%s3456_s12 + $0x1e] ss:$0 sm:$0xff]  ;;  %v627_v59 = vmul.f32 %v3477_v52, %v3468_v48  ;;  %s3532_s29 = scalar_lea.vmem %s5558_s2, %s446_s14  ;;  %v671_v21 = vmul.f32 %v3477_v52, %v3465_v47  ;;  %v701_v38 = vmul.f32 %v3505_v0, %v3459_v45  ;;  %s2437_s4 = sadd.s32 (%p3343_p10), %s3230_s17, %s3006_s7 }
  0x4d   : > { %v3489_v56 = vld [vmem:[%s3456_s12 + $0x22] ss:$0 sm:$0xff]  ;;  %v607_v57 = vmul.f32 %v3480_v53, %v3447_v42  ;;  %v612_v58 = vadd.f32 %v611_v50, %v603_v49  ;;  %v615_v60 = vmul.f32 %v3450_v43, %v3483_v54  ;;  %v623_v61 = vmul.f32 %v3453_v44, %v3486_v55  ;;  %v3500_v62 = vld [vmem:[%s3456_s12 + $0xc] ss:$0 sm:$0xff]  ;;  %v3513_v4 = vld [vmem:[%s3456_s12 + $0x18] ss:$0 sm:$0xff] }
  0x4e   : > { %v631_v3 = vmul.f32 %v3477_v52, %v3489_v56  ;;  %v642_v5 = vmul.f32 %v3500_v62, %v3447_v42  ;;  %v3520_v7 = vld [vmem:[%s3456_s12 + $0xe] ss:$0 sm:$0xff]  ;;  %v653_v10 = vmul.f32 %v3450_v43, %v3480_v53  ;;  %v664_v12 = vmul.f32 %v3453_v44, %v3513_v4  ;;  %v3527_v13 = vld [vmem:[%s3456_s12 + $0x1a] ss:$0 sm:$0xff]  ;;  %v3542_v18 = vld [vmem:[%s3456_s12 + $0x11] ss:$0 sm:$0xff] }
  0x4f   : > { %v620_v1 = vadd.f32 %v619_v51, %v612_v58  ;;  %v616_v2 = vadd.f32 %v615_v60, %v607_v57  ;;  %v3535_v15 = vld [vmem:[%s3444_s28 + $0x50] sm:$0xff]  ;;  %v646_v16 = vmul.f32 %v3520_v7, %v3447_v42  ;;  %v661_v17 = vmul.f32 %v3505_v0, %v3483_v54  ;;  %v3550_v22 = vld [vmem:[%s3456_s12 + $0x1d] ss:$0 sm:$0xff]  ;;  %v3555_v25 = vld [vmem:[%s3532_s29] ss:$0 sm:$0xff]  ;;  %s3007_s8 = sshll.u32 (%p3343_p10), %s2437_s4, 3 }
  0x50   : > { %v650_v11 = vadd.f32 %v649_v63, %v642_v5  ;;  %v3545_v19 = vld [vmem:[%s3456_s12 + $0x15] ss:$0 sm:$0xff]  ;;  %v668_v24 = vmul.f32 %v3453_v44, %v3527_v13  ;;  %v679_v28 = vmul.f32 %v3535_v15, %v3468_v48  ;;  %v3563_v29 = vld [vmem:[%s3456_s12 + $0x21] ss:$0 sm:$0xff]  ;;  %v605_v30 = vmul.f32 %v3542_v18, %v3447_v42  ;;  %v3592_v63 = vld [vmem:[%s3456_s12 + $0xd] ss:$0 sm:$0xff]  ;;  %s5472_s27 = scalar_lea.vmem (%p3343_p10), %s5559_s3, %s3007_s8 }
  0x51   : > { %v628_v8 = vadd.f32 %v627_v59, %v620_v1  ;;  %v624_v9 = vadd.f32 %v623_v61, %v616_v2  ;;  %v654_v23 = vadd.f32 %v653_v10, %v646_v16  ;;  %v3558_v26 = vld [vmem:[%s3444_s28 + $0x18] sm:$0xff]  ;;  %v613_v31 = vmul.f32 %v3450_v43, %v3545_v19 }
  0x52   : > { %v658_v20 = vadd.f32 %v657_v6, %v650_v11  ;;  %v675_v33 = vmul.f32 %v3477_v52, %v3486_v55  ;;  %v621_v34 = vmul.f32 %v3453_v44, %v3550_v22  ;;  %v694_v35 = vmul.f32 %v3450_v43, %v3500_v62  ;;  %v3587_v51 = vld [vmem:[%s3444_s28 + $0x58] sm:$0xff] }
  0x53   : > { %633 = vst [vmem:[#allocation2 + $0x1] sm:$0xff] %v628_v8  ;;  %v632_v14 = vadd.f32 %v631_v3, %v624_v9  ;;  %v662_v32 = vadd.f32 %v661_v17, %v654_v23  ;;  %v606_v37 = vadd.f32 %v3555_v25, %v605_v30  ;;  %v709_v39 = vmul.f32 %v3558_v26, %v3462_v46 }
  0x54   : > { %v665_v27 = vadd.f32 %v664_v12, %v658_v20  ;;  %v683_v41 = vmul.f32 %v3535_v15, %v3489_v56  ;;  %v629_v49 = vmul.f32 %v3477_v52, %v3563_v29  ;;  %v716_v50 = vmul.f32 %v3477_v52, %v3513_v4  ;;  %v3605_v12 = vld [vmem:[%s3456_s12 + $0x19] ss:$0 sm:$0xff] }
  0x55   : > { %635 = vst [vmem:[#allocation2 + $0x10] sm:$0xff] %v632_v14  ;;  %v669_v40 = vadd.f32 %v668_v24, %v662_v32  ;;  %v614_v59 = vadd.f32 %v613_v31, %v606_v37  ;;  %v702_v60 = vadd.f32 %v701_v38, %v694_v35  ;;  %v698_v61 = vmul.f32 %v3450_v43, %v3520_v7 }
  0x56   : > { %v672_v36 = vadd.f32 %v671_v21, %v665_v27  ;;  %v723_v2 = vmul.f32 %v3535_v15, %v3465_v47  ;;  %v705_v3 = vmul.f32 %v3505_v0, %v3480_v53  ;;  %v713_v5 = vmul.f32 %v3558_v26, %v3483_v54 }
  0x57   : > { %v676_v1 = vadd.f32 %v675_v33, %v669_v40  ;;  %v622_v8 = vadd.f32 %v621_v34, %v614_v59  ;;  %v710_v9 = vadd.f32 %v709_v39, %v702_v60  ;;  %v731_v10 = vmul.f32 %v3587_v51, %v3468_v48  ;;  %v3634_v59 = vld [vmem:[%s3444_s28 + $0x60] sm:$0xff] }
  0x58   : > { %v680_v58 = vadd.f32 %v679_v28, %v672_v36  ;;  %v720_v11 = vmul.f32 %v3477_v52, %v3527_v13  ;;  %v706_v16 = vadd.f32 %v705_v3, %v698_v61  ;;  %v644_v17 = vmul.f32 %v3592_v63, %v3447_v42  ;;  %v3616_v28 = vld [vmem:[%s3444_s28 + $0x20] sm:$0xff] }
  0x59   : > { %v684_v14 = vadd.f32 %v683_v41, %v676_v1  ;;  %v651_v20 = vmul.f32 %v3450_v43, %v3542_v18  ;;  %v630_v21 = vadd.f32 %v629_v49, %v622_v8  ;;  %v717_v23 = vadd.f32 %v716_v50, %v710_v9 }
  0x5a   : > { %v636_v57 = vld [vmem:[#allocation2] sm:$0xff]  ;;  %v727_v24 = vmul.f32 %v3535_v15, %v3486_v55  ;;  %v735_v27 = vmul.f32 %v3587_v51, %v3489_v56  ;;  %v714_v30 = vadd.f32 %v713_v5, %v706_v16  ;;  %v645_v31 = vadd.f32 %v3555_v25, %v644_v17 }
  0x5b   : > { %685 = vst [vmem:[#allocation2 + $0x1] sm:$0xff] %v680_v58  ;;  %v659_v32 = vmul.f32 %v3505_v0, %v3545_v19  ;;  %v666_v33 = vmul.f32 %v3453_v44, %v3605_v12  ;;  %v638_v34 = vadd.f32 %v636_v57, %v630_v21  ;;  %v724_v35 = vadd.f32 %v723_v2, %v717_v23 }
  0x5c   : > { %v637_v6 = vld [vmem:[#allocation2 + $0x11] sm:$0xff]  ;;  %v746_v36 = vmul.f32 %v3505_v0, %v3500_v62  ;;  %v753_v37 = vmul.f32 %v3558_v26, %v3459_v45  ;;  %v721_v38 = vadd.f32 %v720_v11, %v714_v30  ;;  %v652_v39 = vadd.f32 %v651_v20, %v645_v31  ;;  %v3659_v30 = vld [vmem:[%s3444_s28 + $0x28] sm:$0xff] }
  0x5d   : > { %686 = vst [vmem:[#allocation2 + $0x10] sm:$0xff] %v684_v14  ;;  %v673_v40 = vmul.f32 %v3477_v52, %v3550_v22  ;;  %v761_v41 = vmul.f32 %v3616_v28, %v3462_v46  ;;  %v639_v49 = vadd.f32 %v638_v34, %v637_v6  ;;  %v732_v50 = vadd.f32 %v731_v10, %v724_v35 }
  0x5e   : > { %v754_v58 = vadd.f32 %v753_v37, %v746_v36  ;;  %v768_v57 = vmul.f32 %v3535_v15, %v3513_v4  ;;  %v728_v61 = vadd.f32 %v727_v24, %v721_v38  ;;  %v660_v1 = vadd.f32 %v659_v32, %v652_v39 }
  0x5f   : > { %v681_v2 = vmul.f32 %v3535_v15, %v3563_v29  ;;  %v750_v3 = vmul.f32 %v3505_v0, %v3520_v7  ;;  %640 = vst [vmem:[%s3641_s30] sm:$0xff] %v639_v49  ;;  %v775_v6 = vmul.f32 %v3587_v51, %v3465_v47  ;;  %v757_v8 = vmul.f32 %v3558_v26, %v3480_v53 }
  0x60   : > { %v762_v5 = vadd.f32 %v761_v41, %v754_v58  ;;  %v765_v9 = vmul.f32 %v3616_v28, %v3483_v54  ;;  %v736_v10 = vadd.f32 %v735_v27, %v728_v61  ;;  %v667_v11 = vadd.f32 %v666_v33, %v660_v1 }
  0x61   : > { %v783_v14 = vmul.f32 %v3634_v59, %v3468_v48  ;;  %v772_v16 = vmul.f32 %v3535_v15, %v3527_v13  ;;  %v758_v21 = vadd.f32 %v757_v8, %v750_v3  ;;  %v696_v23 = vmul.f32 %v3450_v43, %v3592_v63 }
  0x62   : > { %v687_v60 = vld [vmem:[#allocation2] sm:$0xff]  ;;  %v769_v20 = vadd.f32 %v768_v57, %v762_v5  ;;  %v703_v24 = vmul.f32 %v3505_v0, %v3542_v18  ;;  %v674_v27 = vadd.f32 %v673_v40, %v667_v11  ;;  %v779_v31 = vmul.f32 %v3587_v51, %v3486_v55 }
  0x63   : > { %737 = vst [vmem:[#allocation2 + $0x1] sm:$0xff] %v732_v50  ;;  %v787_v32 = vmul.f32 %v3634_v59, %v3489_v56  ;;  %v711_v33 = vmul.f32 %v3558_v26, %v3545_v19  ;;  %v766_v35 = vadd.f32 %v765_v9, %v758_v21  ;;  %v697_v36 = vadd.f32 %v3555_v25, %v696_v23  ;;  %v3683_v9 = vld [vmem:[%s3444_s28 + $0x68] sm:$0xff] }
  0x64   : > { %v688_v17 = vld [vmem:[#allocation2 + $0x11] sm:$0xff]  ;;  %v776_v34 = vadd.f32 %v775_v6, %v769_v20  ;;  %v718_v37 = vmul.f32 %v3477_v52, %v3605_v12  ;;  %v682_v38 = vadd.f32 %v681_v2, %v674_v27  ;;  %v798_v39 = vmul.f32 %v3558_v26, %v3500_v62 }
  0x65   : > { %738 = vst [vmem:[#allocation2 + $0x10] sm:$0xff] %v736_v10  ;;  %v805_v40 = vmul.f32 %v3616_v28, %v3459_v45  ;;  %v813_v41 = vmul.f32 %v3659_v30, %v3462_v46  ;;  %v773_v50 = vadd.f32 %v772_v16, %v766_v35  ;;  %v704_v58 = vadd.f32 %v703_v24, %v697_v36 }
  0x66   : > { %v784_v49 = vadd.f32 %v783_v14, %v776_v34  ;;  %v725_v57 = vmul.f32 %v3535_v15, %v3550_v22  ;;  %v689_v1 = vadd.f32 %v687_v60, %v682_v38  ;;  %v733_v2 = vmul.f32 %v3587_v51, %v3563_v29 }
  0x67   : > { %v806_v3 = vadd.f32 %v805_v40, %v798_v39  ;;  %v820_v5 = vmul.f32 %v3587_v51, %v3513_v4  ;;  %v780_v6 = vadd.f32 %v779_v31, %v773_v50  ;;  %v712_v8 = vadd.f32 %v711_v33, %v704_v58  ;;  %v3707_v39 = vld [vmem:[%s3444_s28 + $0x30] sm:$0xff] }
  0x68   : > { %v802_v10 = vmul.f32 %v3558_v26, %v3520_v7  ;;  %v809_v11 = vmul.f32 %v3616_v28, %v3480_v53  ;;  %v690_v60 = vadd.f32 %v689_v1, %v688_v17  ;;  %v827_v16 = vmul.f32 %v3634_v59, %v3465_v47 }
  0x69   : > { %v814_v14 = vadd.f32 %v813_v41, %v806_v3  ;;  %v817_v20 = vmul.f32 %v3659_v30, %v3483_v54  ;;  %v788_v23 = vadd.f32 %v787_v32, %v780_v6  ;;  %v719_v24 = vadd.f32 %v718_v37, %v712_v8 }
  0x6a   : > { %v739_v61 = vld [vmem:[#allocation2] sm:$0xff]  ;;  %v810_v27 = vadd.f32 %v809_v11, %v802_v10  ;;  %v824_v31 = vmul.f32 %v3587_v51, %v3527_v13  ;;  %2766 = vst [vmem:[%s3641_s30 + $0x8] sm:$0xff] %v690_v60  ;;  %v835_v17 = vmul.f32 %v3683_v9, %v3468_v48  ;;  %v748_v34 = vmul.f32 %v3505_v0, %v3592_v63 }
  0x6b   : > { %789 = vst [vmem:[#allocation2 + $0x1] sm:$0xff] %v784_v49  ;;  %v821_v33 = vadd.f32 %v820_v5, %v814_v14  ;;  %v755_v35 = vmul.f32 %v3558_v26, %v3542_v18  ;;  %v726_v36 = vadd.f32 %v725_v57, %v719_v24  ;;  %v831_v32 = vmul.f32 %v3634_v59, %v3486_v55  ;;  %v3727_v24 = vld [vmem:[%s3444_s28 + $0x70] sm:$0xff] }
  0x6c   : > { %v740_v21 = vld [vmem:[#allocation2 + $0x11] sm:$0xff]  ;;  %v818_v38 = vadd.f32 %v817_v20, %v810_v27  ;;  %v839_v37 = vmul.f32 %v3683_v9, %v3489_v56  ;;  %v749_v41 = vadd.f32 %v3555_v25, %v748_v34  ;;  %v763_v49 = vmul.f32 %v3616_v28, %v3545_v19 }
  0x6d   : > { %790 = vst [vmem:[#allocation2 + $0x10] sm:$0xff] %v788_v23  ;;  %v828_v40 = vadd.f32 %v827_v16, %v821_v33  ;;  %v770_v50 = vmul.f32 %v3535_v15, %v3605_v12  ;;  %v734_v58 = vadd.f32 %v733_v2, %v726_v36  ;;  %v850_v1 = vmul.f32 %v3616_v28, %v3500_v62 }
  0x6e   : > { %v825_v57 = vadd.f32 %v824_v31, %v818_v38  ;;  %v857_v3 = vmul.f32 %v3659_v30, %v3459_v45  ;;  %v756_v8 = vadd.f32 %v755_v35, %v749_v41  ;;  %v777_v10 = vmul.f32 %v3587_v51, %v3550_v22 }
  0x6f   : > { %v836_v6 = vadd.f32 %v835_v17, %v828_v40  ;;  %v865_v11 = vmul.f32 %v3707_v39, %v3462_v46  ;;  %v741_v60 = vadd.f32 %v739_v61, %v734_v58  ;;  %v872_v16 = vmul.f32 %v3634_v59, %v3513_v4 }
  0x70   : > { %v832_v14 = vadd.f32 %v831_v32, %v825_v57  ;;  %v858_v2 = vadd.f32 %v857_v3, %v850_v1  ;;  %v764_v20 = vadd.f32 %v763_v49, %v756_v8  ;;  %v879_v23 = vmul.f32 %v3683_v9, %v3465_v47  ;;  %v3751_v3 = vld [vmem:[%s3444_s28 + $0x38] sm:$0xff] }
  0x71   : > { %v854_v27 = vmul.f32 %v3616_v28, %v3520_v7  ;;  %v861_v31 = vmul.f32 %v3659_v30, %v3480_v53  ;;  %v742_v61 = vadd.f32 %v741_v60, %v740_v21  ;;  %v869_v34 = vmul.f32 %v3707_v39, %v3483_v54 }
  0x72   : > { %v791_v5 = vld [vmem:[#allocation2] sm:$0xff]  ;;  %v840_v33 = vadd.f32 %v839_v37, %v832_v14  ;;  %v866_v17 = vadd.f32 %v865_v11, %v858_v2  ;;  %v771_v36 = vadd.f32 %v770_v50, %v764_v20  ;;  %v785_v38 = vmul.f32 %v3634_v59, %v3563_v29 }
  0x73   : > { %841 = vst [vmem:[#allocation2 + $0x1] sm:$0xff] %v836_v6  ;;  %v862_v32 = vadd.f32 %v861_v31, %v854_v27  ;;  %v876_v40 = vmul.f32 %v3634_v59, %v3527_v13  ;;  %2773 = vst [vmem:[%s3641_s30 + $0x10] sm:$0xff] %v742_v61  ;;  %v887_v21 = vmul.f32 %v3727_v24, %v3468_v48 }
  0x74   : > { %v792_v35 = vld [vmem:[#allocation2 + $0x11] sm:$0xff]  ;;  %v873_v41 = vadd.f32 %v872_v16, %v866_v17  ;;  %v800_v37 = vmul.f32 %v3558_v26, %v3592_v63  ;;  %v807_v49 = vmul.f32 %v3616_v28, %v3542_v18  ;;  %v778_v50 = vadd.f32 %v777_v10, %v771_v36 }
  0x75   : > { %842 = vst [vmem:[#allocation2 + $0x10] sm:$0xff] %v840_v33  ;;  %v870_v58 = vadd.f32 %v869_v34, %v862_v32  ;;  %v883_v57 = vmul.f32 %v3683_v9, %v3486_v55  ;;  %v891_v1 = vmul.f32 %v3727_v24, %v3489_v56  ;;  %v815_v11 = vmul.f32 %v3659_v30, %v3545_v19 }
  0x76   : > { %v880_v6 = vadd.f32 %v879_v23, %v873_v41  ;;  %v801_v8 = vadd.f32 %v3555_v25, %v800_v37  ;;  %v822_v26 = vmul.f32 %v3587_v51, %v3605_v12  ;;  %v786_v60 = vadd.f32 %v785_v38, %v778_v50  ;;  %v3771_v38 = vld [vmem:[%s3444_s28 + $0x78] sm:$0xff] }
  0x77   : > { %v877_v10 = vadd.f32 %v876_v40, %v870_v58  ;;  %v902_v14 = vmul.f32 %v3659_v30, %v3500_v62  ;;  %v909_v2 = vmul.f32 %v3707_v39, %v3459_v45  ;;  %v829_v27 = vmul.f32 %v3634_v59, %v3550_v22 }
  0x78   : > { %v888_v20 = vadd.f32 %v887_v21, %v880_v6  ;;  %v808_v23 = vadd.f32 %v807_v49, %v801_v8  ;;  %v917_v31 = vmul.f32 %v3751_v3, %v3462_v46  ;;  %v793_v61 = vadd.f32 %v791_v5, %v786_v60 }
  0x79   : > { %v884_v51 = vadd.f32 %v883_v57, %v877_v10  ;;  %v910_v33 = vadd.f32 %v909_v2, %v902_v14  ;;  %v924_v17 = vmul.f32 %v3683_v9, %v3513_v4  ;;  %v931_v36 = vmul.f32 %v3727_v24, %v3465_v47 }
  0x7a   : > { %v843_v16 = vld [vmem:[#allocation2] sm:$0xff]  ;;  %v816_v34 = vadd.f32 %v815_v11, %v808_v23  ;;  %v906_v32 = vmul.f32 %v3659_v30, %v3520_v7  ;;  %v913_v40 = vmul.f32 %v3707_v39, %v3480_v53  ;;  %v794_v41 = vadd.f32 %v793_v61, %v792_v35 }
  0x7b   : > { %893 = vst [vmem:[#allocation2 + $0x1] sm:$0xff] %v888_v20  ;;  %v892_v21 = vadd.f32 %v891_v1, %v884_v51  ;;  %v918_v37 = vadd.f32 %v917_v31, %v910_v33  ;;  %v921_v49 = vmul.f32 %v3751_v3, %v3483_v54  ;;  %v837_v58 = vmul.f32 %v3683_v9, %v3563_v29 }
  0x7c   : > { %v844_v5 = vld [vmem:[#allocation2 + $0x11] sm:$0xff]  ;;  %v823_v50 = vadd.f32 %v822_v26, %v816_v34  ;;  %v914_v57 = vadd.f32 %v913_v40, %v906_v32  ;;  %v928_v6 = vmul.f32 %v3683_v9, %v3527_v13  ;;  %2780 = vst [vmem:[%s3641_s30 + $0x18] sm:$0xff] %v794_v41  ;;  %v939_v11 = vmul.f32 %v3771_v38, %v3468_v48 }
  0x7d   : > { %894 = vst [vmem:[#allocation2 + $0x10] sm:$0xff] %v892_v21  ;;  %v925_v8 = vadd.f32 %v924_v17, %v918_v37  ;;  %v852_v35 = vmul.f32 %v3616_v28, %v3592_v63  ;;  %v859_v1 = vmul.f32 %v3659_v30, %v3542_v18  ;;  %v935_v10 = vmul.f32 %v3727_v24, %v3486_v55 }
  0x7e   : > { %v830_v26 = vadd.f32 %v829_v27, %v823_v50  ;;  %v922_v60 = vadd.f32 %v921_v49, %v914_v57  ;;  %v943_v14 = vmul.f32 %v3771_v38, %v3489_v56  ;;  %v867_v23 = vmul.f32 %v3707_v39, %v3545_v19 }
  0x7f   : > { %v932_v2 = vadd.f32 %v931_v36, %v925_v8  ;;  %v853_v20 = vadd.f32 %v3555_v25, %v852_v35  ;;  %v874_v28 = vmul.f32 %v3634_v59, %v3605_v12  ;;  %v954_v27 = vmul.f32 %v3707_v39, %v3500_v62  ;;  %v3818_v35 = vld [vmem:[%s3456_s12 + $0x4] ss:$0 sm:$0xff] }
  0x80   : > { %v838_v31 = vadd.f32 %v837_v58, %v830_v26  ;;  %v929_v61 = vadd.f32 %v928_v6, %v922_v60  ;;  %v961_v51 = vmul.f32 %v3751_v3, %v3459_v45  ;;  %v881_v36 = vmul.f32 %v3683_v9, %v3550_v22  ;;  %5606 = vst [vmem:[#allocation6_spill] sm:$0xff] %v3818_v35 }
  0x81   : > { %v940_v17 = vadd.f32 %v939_v11, %v932_v2  ;;  %v860_v34 = vadd.f32 %v859_v1, %v853_v20  ;;  %v968_v32 = vmul.f32 %v3727_v24, %v3513_v4  ;;  %v958_v21 = vmul.f32 %v3707_v39, %v3520_v7  ;;  %v3825_v2 = vld [vmem:[%s3456_s12 + $0x8] ss:$0 sm:$0xff] }
  0x82   : > { %v895_v33 = vld [vmem:[#allocation2] sm:$0xff]  ;;  %v845_v40 = vadd.f32 %v843_v16, %v838_v31  ;;  %v936_v59 = vadd.f32 %v935_v10, %v929_v61  ;;  %v962_v41 = vadd.f32 %v961_v51, %v954_v27  ;;  %v975_v49 = vmul.f32 %v3771_v38, %v3465_v47  ;;  %5607 = vst [vmem:[#allocation7_spill] sm:$0xff] %v3825_v2 }
  0x83   : > { %945 = vst [vmem:[#allocation2 + $0x1] sm:$0xff] %v940_v17  ;;  %v868_v37 = vadd.f32 %v867_v23, %v860_v34  ;;  %v965_v50 = vmul.f32 %v3751_v3, %v3480_v53  ;;  %v972_v58 = vmul.f32 %v3727_v24, %v3527_v13  ;;  %v904_v11 = vmul.f32 %v3659_v30, %v3592_v63 }
  0x84   : > { %v896_v57 = vld [vmem:[#allocation2 + $0x11] sm:$0xff]  ;;  %v846_v16 = vadd.f32 %v845_v40, %v844_v5  ;;  %v944_v6 = vadd.f32 %v943_v14, %v936_v59  ;;  %v969_v8 = vadd.f32 %v968_v32, %v962_v41  ;;  %v889_v26 = vmul.f32 %v3727_v24, %v3563_v29  ;;  %v3844_v32 = vld [vmem:[%s3444_s28 + $0x80] sm:$0xff] }
  0x85   : > { %v875_v1 = vadd.f32 %v874_v28, %v868_v37  ;;  %v966_v60 = vadd.f32 %v965_v50, %v958_v21  ;;  %v911_v10 = vmul.f32 %v3707_v39, %v3542_v18  ;;  %v979_v5 = vmul.f32 %v3771_v38, %v3486_v55  ;;  %v3849_v50 = vld [vmem:[%s3444_s28 + $0x88] sm:$0xff] }
  0x86   : > { %2787 = vst [vmem:[%s3641_s30 + $0x20] sm:$0xff] %v846_v16  ;;  %946 = vst [vmem:[#allocation2 + $0x10] sm:$0xff] %v944_v6  ;;  %v905_v30 = vadd.f32 %v3555_v25, %v904_v11  ;;  %v919_v14 = vmul.f32 %v3751_v3, %v3545_v19  ;;  %v976_v23 = vadd.f32 %v975_v49, %v969_v8  ;;  %v3856_v11 = vld [vmem:[%s3456_s12 + $0x6] ss:$0 sm:$0xff] }
  0x87   : > { %v882_v20 = vadd.f32 %v881_v36, %v875_v1  ;;  %v973_v28 = vadd.f32 %v972_v58, %v966_v60  ;;  %v990_v31 = vmul.f32 %v3818_v35, %v3447_v42  ;;  %v926_v27 = vmul.f32 %v3683_v9, %v3605_v12  ;;  %v3859_v1 = vld [vmem:[%s3456_s12 + $0xa] ss:$0 sm:$0xff] }
  0x88   : > { %v912_v61 = vadd.f32 %v911_v10, %v905_v30  ;;  %v997_v51 = vmul.f32 %v3450_v43, %v3825_v2  ;;  %v1004_v17 = vmul.f32 %v3453_v44, %v3459_v45  ;;  %v933_v36 = vmul.f32 %v3727_v24, %v3550_v22 }
  0x89   : > { %v890_v34 = vadd.f32 %v889_v26, %v882_v20  ;;  %v980_v59 = vadd.f32 %v979_v5, %v973_v28  ;;  %v1011_v37 = vmul.f32 %v3477_v52, %v3462_v46  ;;  %v941_v16 = vmul.f32 %v3771_v38, %v3563_v29 }
  0x8a   : > { %v947_v40 = vld [vmem:[#allocation2] sm:$0xff]  ;;  %v920_v41 = vadd.f32 %v919_v14, %v912_v61  ;;  %v998_v21 = vadd.f32 %v997_v51, %v990_v31  ;;  %v1019_v8 = vmul.f32 %v3844_v32, %v3465_v47  ;;  %v1027_v5 = vmul.f32 %v3849_v50, %v3468_v48 }
  0x8b   : > { %v897_v49 = vadd.f32 %v895_v33, %v890_v34  ;;  %981 = vst [vmem:[#allocation2 + $0x1] sm:$0xff] %v976_v23  ;;  %v994_v30 = vmul.f32 %v3856_v11, %v3447_v42  ;;  %v1001_v14 = vmul.f32 %v3450_v43, %v3859_v1  ;;  %v1008_v20 = vmul.f32 %v3453_v44, %v3480_v53 }
  0x8c   : > { %v927_v58 = vadd.f32 %v926_v27, %v920_v41  ;;  %v1005_v6 = vadd.f32 %v1004_v17, %v998_v21  ;;  %v1015_v31 = vmul.f32 %v3477_v52, %v3483_v54  ;;  %v1023_v34 = vmul.f32 %v3844_v32, %v3486_v55 }
  0x8d   : > { %v948_v26 = vld [vmem:[#allocation2 + $0x11] sm:$0xff]  ;;  %v898_v60 = vadd.f32 %v897_v49, %v896_v57  ;;  %v1002_v28 = vadd.f32 %v1001_v14, %v994_v30  ;;  %v1031_v21 = vmul.f32 %v3849_v50, %v3489_v56  ;;  %v1070_v14 = vmul.f32 %v3477_v52, %v3459_v45 }
  0x8e   : > { %982 = vst [vmem:[#allocation2 + $0x10] sm:$0xff] %v980_v59  ;;  %v934_v10 = vadd.f32 %v933_v36, %v927_v58  ;;  %v1012_v33 = vadd.f32 %v1011_v37, %v1005_v6  ;;  %v3875_v59 = vld [vmem:[%s3456_s12] ss:$0 sm:$0xff]  ;;  %v956_v37 = vmul.f32 %v3707_v39, %v3592_v63  ;;  %v1056_v39 = vmul.f32 %v3505_v0, %v3825_v2 }
  0x8f   : > { %2794 = vst [vmem:[%s3641_s30 + $0x28] sm:$0xff] %v898_v60  ;;  %v1009_v17 = vadd.f32 %v1008_v20, %v1002_v28  ;;  %v1042_v58 = vmul.f32 %v3875_v59, %v3447_v42 }
  0x90   : > { %v942_v23 = vadd.f32 %v941_v16, %v934_v10  ;;  %v1020_v57 = vadd.f32 %v1019_v8, %v1012_v33  ;;  %v1049_v16 = vmul.f32 %v3450_v43, %v3818_v35  ;;  %v957_v8 = vadd.f32 %v3555_v25, %v956_v37 }
  0x91   : > { %v1016_v41 = vadd.f32 %v1015_v31, %v1009_v17 }
  0x92   : > { %v983_v61 = vld [vmem:[#allocation2] sm:$0xff]  ;;  %v949_v27 = vadd.f32 %v947_v40, %v942_v23  ;;  %v1028_v51 = vadd.f32 %v1027_v5, %v1020_v57  ;;  %v963_v40 = vmul.f32 %v3751_v3, %v3542_v18  ;;  %v1050_v10 = vadd.f32 %v1049_v16, %v1042_v58  ;;  %v2924_v16 = vld [vmem:[%s3444_s28 + $0xe8] sm:$0xff] }
  0x93   : > { %v1024_v49 = vadd.f32 %v1023_v34, %v1016_v41  ;;  %v1063_v3 = vmul.f32 %v3453_v44, %v3500_v62  ;;  %v977_v5 = vmul.f32 %v3771_v38, %v3550_v22  ;;  %v1077_v57 = vmul.f32 %v3535_v15, %v3462_v46 }
  0x94   : > { %v950_v36 = vadd.f32 %v949_v27, %v948_v26  ;;  %1033 = vst [vmem:[#allocation2 + $0x1] sm:$0xff] %v1028_v51  ;;  %v970_v26 = vmul.f32 %v3727_v24, %v3605_v12  ;;  %v964_v33 = vadd.f32 %v963_v40, %v957_v8  ;;  %v1057_v30 = vadd.f32 %v1056_v39, %v1050_v10  ;;  %v3904_v51 = vld [vmem:[%s3444_s28 + $0x90] sm:$0xff]  ;;  %v2944_v39 = vld [vmem:[%s3444_s28 + $0xf8] sm:$0xff] }
  0x95   : > { %v984_v6 = vld [vmem:[#allocation2 + $0x11] sm:$0xff]  ;;  %v1032_v60 = vadd.f32 %v1031_v21, %v1024_v49  ;;  %v1084_v27 = vmul.f32 %v3844_v32, %v3513_v4  ;;  %v1099_v37 = vmul.f32 %v3904_v51, %v3468_v48  ;;  %v3927_v10 = vmul.f32 %v2924_v16, %v3489_v56 }
  0x96   : > { %2801 = vst [vmem:[%s3641_s30 + $0x30] sm:$0xff] %v950_v36  ;;  %v971_v20 = vadd.f32 %v970_v26, %v964_v33  ;;  %v1064_v23 = vadd.f32 %v1063_v3, %v1057_v30  ;;  %v1091_v36 = vmul.f32 %v3849_v50, %v3465_v47  ;;  %v2934_v8 = vld [vmem:[%s3444_s28 + $0xf0] sm:$0xff]  ;;  %v3921_v26 = vmul.f32 %v2924_v16, %v3468_v48  ;;  %v3930_v3 = vld [vmem:[%s3444_s28 + $0xd8] sm:$0xff]  ;;  %v3933_v33 = vld [vmem:[%s3444_s28 + $0xe0] sm:$0xff] }
  0x97   : > { %1034 = vst [vmem:[#allocation2 + $0x10] sm:$0xff] %v1032_v60  ;;  %v1053_v60 = vmul.f32 %v3450_v43, %v3856_v11  ;;  %5609 = vst [vmem:[#allocation9_spill] sm:$0xff] %v3927_v10  ;;  %v2065_v30 = vmul.f32 %v3849_v50, %v3825_v2 }
  0x98   : > { %v978_v28 = vadd.f32 %v977_v5, %v971_v20  ;;  %v1071_v31 = vadd.f32 %v1070_v14, %v1064_v23  ;;  %5608 = vst [vmem:[#allocation8_spill] sm:$0xff] %v3921_v26  ;;  %v2058_v5 = vmul.f32 %v3844_v32, %v3818_v35  ;;  %v1060_v14 = vmul.f32 %v3505_v0, %v3859_v1 }
  0x99   : > { %v3942_v20 = vmul.f32 %v2934_v8, %v3468_v48  ;;  %v3945_v23 = vmul.f32 %v2934_v8, %v3489_v56  ;;  %v3959_v0 = vmul.f32 %v2944_v39, %v3465_v47  ;;  %v3978_v47 = vmul.f32 %v2934_v8, %v3513_v4 }
  0x9a   : > { %v985_v17 = vadd.f32 %v983_v61, %v978_v28  ;;  %v1078_v34 = vadd.f32 %v1077_v57, %v1071_v31  ;;  %v3914_v61 = vld [vmem:[%s3456_s12 + $0x2] ss:$0 sm:$0xff]  ;;  %v1067_v31 = vmul.f32 %v3453_v44, %v3520_v7  ;;  %v3970_v44 = vmul.f32 %v3933_v33, %v3513_v4 }
  0x9b   : > { %v3911_v49 = vld [vmem:[#allocation2] sm:$0xff]  ;;  %5610 = vst [vmem:[#allocation10_spill] sm:$0xff] %v3942_v20  ;;  %5611 = vst [vmem:[#allocation11_spill] sm:$0xff] %v3945_v23  ;;  %v4037_v23 = vld [vmem:[%s3444_s28 + $0xb8] sm:$0xff]  ;;  %v1103_v20 = vmul.f32 %v3904_v51, %v3489_v56 }
  0x9c   : > { %v986_v41 = vadd.f32 %v985_v17, %v984_v6  ;;  %v1085_v21 = vadd.f32 %v1084_v27, %v1078_v34  ;;  %v1046_v6 = vmul.f32 %v3914_v61, %v3447_v42  ;;  %v3948_v57 = vld [vmem:[%s3444_s28 + $0xc0] sm:$0xff]  ;;  %v3953_v27 = vmul.f32 %v2944_v39, %v3468_v48  ;;  %5616 = vst [vmem:[#allocation16_spill] sm:$0xff] %v3970_v44 }
  0x9d   : > { %v3956_v17 = vmul.f32 %v2944_v39, %v3489_v56  ;;  %v3962_v34 = vmul.f32 %v2944_v39, %v3486_v55  ;;  %v2015_v39 = vmul.f32 %v3771_v38, %v3818_v35  ;;  %v2029_v56 = vmul.f32 %v4037_v23, %v3459_v45 }
  0x9e   : > { %2806 = vst [vmem:[%s3641_s30 + $0x38] sm:$0xff] %v986_v41  ;;  %v1092_v40 = vadd.f32 %v1091_v36, %v1085_v21  ;;  %v1054_v28 = vadd.f32 %v1053_v60, %v1046_v6  ;;  %5612 = vst [vmem:[#allocation12_spill] sm:$0xff] %v3953_v27  ;;  %v3966_v36 = vmul.f32 %v3930_v3, %v3513_v4 }
  0x9f   : > { %5613 = vst [vmem:[#allocation13_spill] sm:$0xff] %v3956_v17  ;;  %5614 = vst [vmem:[#allocation14_spill] sm:$0xff] %v3962_v34  ;;  %v1074_v41 = vmul.f32 %v3477_v52, %v3480_v53  ;;  %v3975_v21 = vmul.f32 %v2924_v16, %v3513_v4  ;;  %v2008_v6 = vmul.f32 %v3727_v24, %v3875_v59 }
  0xa0   : > { %v1100_v58 = vadd.f32 %v1099_v37, %v1092_v40  ;;  %5615 = vst [vmem:[#allocation15_spill] sm:$0xff] %v3966_v36  ;;  %v1061_v48 = vadd.f32 %v1060_v14, %v1054_v28  ;;  %v2066_v37 = vadd.f32 %v2065_v30, %v2058_v5  ;;  %v2072_v40 = vmul.f32 %v3948_v57, %v3459_v45  ;;  %v4000_v30 = vld [vmem:[%s3444_s28 + $0xb0] sm:$0xff] }
  0xa1   : > { %5617 = vst [vmem:[#allocation17_spill] sm:$0xff] %v3975_v21  ;;  %v1081_v52 = vmul.f32 %v3535_v15, %v3483_v54  ;;  %v3993_v4 = vmul.f32 %v3930_v3, %v3527_v13  ;;  %v3997_v5 = vmul.f32 %v3933_v33, %v3527_v13  ;;  %v2062_v14 = vmul.f32 %v3844_v32, %v3856_v11  ;;  %v4319_v36 = vld [vmem:[%s3456_s12 + $0x11] ss:$0 sm:$0xff] }
  0xa2   : > { %1105 = vst [vmem:[#allocation2 + $0x1] sm:$0xff] %v1100_v58  ;;  %v3983_v58 = vld [vmem:[%s3444_s28 + $0xc8] sm:$0xff]  ;;  %v1068_v60 = vadd.f32 %v1067_v31, %v1061_v48  ;;  %v2069_v28 = vmul.f32 %v3849_v50, %v3859_v1  ;;  %v4007_v15 = vmul.f32 %v2924_v16, %v3527_v13  ;;  %v4010_v31 = vmul.f32 %v2934_v8, %v3527_v13 }
  0xa3   : > { %5618 = vst [vmem:[#allocation18_spill] sm:$0xff] %v3993_v4  ;;  %5619 = vst [vmem:[#allocation19_spill] sm:$0xff] %v3997_v5  ;;  %v1088_v17 = vmul.f32 %v3844_v32, %v3527_v13  ;;  %v2073_v34 = vadd.f32 %v2072_v40, %v2066_v37  ;;  %v2079_v27 = vmul.f32 %v3983_v58, %v3462_v46  ;;  %v4031_v40 = vld [vmem:[%s3444_s28 + $0x98] sm:$0xff] }
  0xa4   : > { %5620 = vst [vmem:[#allocation20_spill] sm:$0xff] %v4007_v15  ;;  %5621 = vst [vmem:[#allocation21_spill] sm:$0xff] %v4010_v31  ;;  %v1075_v48 = vadd.f32 %v1074_v41, %v1068_v60  ;;  %v2094_v21 = vmul.f32 %v3844_v32, %v3875_v59  ;;  %v2101_v16 = vmul.f32 %v3849_v50, %v3818_v35  ;;  %v4034_v60 = vld [vmem:[%s3444_s28 + $0xa0] sm:$0xff] }
  0xa5   : > { %v2016_v15 = vadd.f32 %v2015_v39, %v2008_v6  ;;  %v2022_v8 = vmul.f32 %v4000_v30, %v3500_v62  ;;  %v1095_v41 = vmul.f32 %v3849_v50, %v3486_v55  ;;  %v4026_v13 = vmul.f32 %v3771_v38, %v3825_v2  ;;  %5661 = vst [vmem:[#allocation61_spill] sm:$0xff] %v4319_v36 }
  0xa6   : > { %v1082_v31 = vadd.f32 %v1081_v52, %v1075_v48  ;;  %v2108_v37 = vmul.f32 %v3904_v51, %v3825_v2  ;;  %v2070_v6 = vadd.f32 %v2069_v28, %v2062_v14  ;;  %v2076_v39 = vmul.f32 %v3948_v57, %v3480_v53  ;;  %v4048_v48 = vld [vmem:[%s3444_s28 + $0xa8] sm:$0xff] }
  0xa7   : > { %5622 = vst [vmem:[#allocation22_spill] sm:$0xff] %v4026_v13  ;;  %v2158_v55 = vmul.f32 %v4031_v40, %v3825_v2  ;;  %v4045_v52 = vmul.f32 %v4034_v60, %v3825_v2  ;;  %5624 = vst [vmem:[#allocation24_spill] sm:$0xff] %v4048_v48  ;;  %v4054_v13 = vmul.f32 %v4048_v48, %v3825_v2 }
  0xa8   : > { %v1089_v5 = vadd.f32 %v1088_v17, %v1082_v31  ;;  %v4058_v14 = vmul.f32 %v4000_v30, %v3825_v2  ;;  %v4062_v28 = vmul.f32 %v4037_v23, %v3825_v2  ;;  %v2102_v44 = vadd.f32 %v2101_v16, %v2094_v21  ;;  %v4068_v31 = vld [vmem:[#allocation2 + $0x11] sm:$0xff] }
  0xa9   : > { %5623 = vst [vmem:[#allocation23_spill] sm:$0xff] %v4045_v52  ;;  %5625 = vst [vmem:[#allocation25_spill] sm:$0xff] %v4054_v13  ;;  %v4064_v52 = vadd.f32 %v2079_v27, %v2073_v34  ;;  %v2023_v10 = vadd.f32 %v2022_v8, %v2016_v15  ;;  %v2077_v13 = vadd.f32 %v2076_v39, %v2070_v6  ;;  %v2963_v6 = vld [vmem:[%s3444_s28 + $0xd0] sm:$0xff] }
  0xaa   : > { %5626 = vst [vmem:[#allocation26_spill] sm:$0xff] %v4058_v14  ;;  %5627 = vst [vmem:[#allocation27_spill] sm:$0xff] %v4062_v28  ;;  %v1096_v17 = vadd.f32 %v1095_v41, %v1089_v5  ;;  %v2083_v4 = vmul.f32 %v3983_v58, %v3483_v54  ;;  %v2144_v14 = vmul.f32 %v3849_v50, %v3875_v59 }
  0xab   : > { %5628 = vst [vmem:[#allocation28_spill] sm:$0xff] %v4064_v52  ;;  %v2151_v21 = vmul.f32 %v3904_v51, %v3818_v35  ;;  %v4078_v27 = vmul.f32 %v3771_v38, %v3859_v1  ;;  %v1936_v34 = vmul.f32 %v3683_v9, %v3875_v59  ;;  %v1943_v5 = vmul.f32 %v3727_v24, %v3818_v35 }
  0xac   : > { %v1104_v15 = vadd.f32 %v1103_v20, %v1096_v17  ;;  %v4086_v54 = vmul.f32 %v3904_v51, %v3859_v1  ;;  %v4090_v16 = vmul.f32 %v4031_v40, %v3859_v1  ;;  %v2109_v8 = vadd.f32 %v2108_v37, %v2102_v44 }
  0xad   : > { %5629 = vst [vmem:[#allocation29_spill] sm:$0xff] %v4078_v27  ;;  %v2115_v41 = vmul.f32 %v3948_v57, %v3500_v62  ;;  %v4097_v39 = vmul.f32 %v4034_v60, %v3859_v1  ;;  %v2030_v28 = vadd.f32 %v2029_v56, %v2023_v10  ;;  %v2012_v20 = vmul.f32 %v3727_v24, %v3914_v61 }
  0xae   : > { %5630 = vst [vmem:[#allocation30_spill] sm:$0xff] %v4086_v54  ;;  %5631 = vst [vmem:[#allocation31_spill] sm:$0xff] %v4090_v16  ;;  %v2019_v17 = vmul.f32 %v3771_v38, %v3856_v11  ;;  %v4103_v16 = vadd.f32 %v2083_v4, %v2077_v13  ;;  %v4107_v44 = vmul.f32 %v4048_v48, %v3859_v1  ;;  %v4125_v4 = vld [vmem:[%s3456_s12 + $0x5] ss:$0 sm:$0xff] }
  0xaf   : > { %5632 = vst [vmem:[#allocation32_spill] sm:$0xff] %v4097_v39  ;;  %1106 = vst [vmem:[#allocation2 + $0x10] sm:$0xff] %v1104_v15  ;;  %v4111_v37 = vmul.f32 %v4000_v30, %v3859_v1  ;;  %v2152_v39 = vadd.f32 %v2151_v21, %v2144_v14  ;;  %v4113_v10 = vadd.f32 %v1943_v5, %v1936_v34  ;;  %v4135_v34 = vld [vmem:[%s3456_s12 + $0x9] ss:$0 sm:$0xff]  ;;  %v4338_v48 = vld [vmem:[%s3444_s28 + $0x60] sm:$0xff] }
  0xb0   : > { %5633 = vst [vmem:[#allocation33_spill] sm:$0xff] %v4103_v16  ;;  %5634 = vst [vmem:[#allocation34_spill] sm:$0xff] %v4107_v44  ;;  %v2122_v56 = vmul.f32 %v3983_v58, %v3459_v45  ;;  %v4118_v15 = vmul.f32 %v2963_v6, %v3462_v46  ;;  %v4122_v38 = vmul.f32 %v3983_v58, %v3500_v62 }
  0xb1   : > { %5635 = vst [vmem:[#allocation35_spill] sm:$0xff] %v4111_v37  ;;  %5636 = vst [vmem:[#allocation36_spill] sm:$0xff] %v4113_v10  ;;  %v2116_v13 = vadd.f32 %v2115_v41, %v2109_v8  ;;  %v4128_v44 = vmul.f32 %v2963_v6, %v3459_v45  ;;  %v2194_v14 = vmul.f32 %v3904_v51, %v3875_v59  ;;  %v4316_v10 = vld [vmem:[%s3444_s28 + $0x20] sm:$0xff] }
  0xb2   : > { %5637 = vst [vmem:[#allocation37_spill] sm:$0xff] %v4118_v15  ;;  %5638 = vst [vmem:[#allocation38_spill] sm:$0xff] %v4122_v38  ;;  %v2201_v21 = vmul.f32 %v4031_v40, %v3818_v35  ;;  %v2037_v5 = vadd.f32 %v3978_v47, %v2030_v28  ;;  %v4140_v58 = vmul.f32 %v3930_v3, %v3462_v46  ;;  %v4273_v15 = vld [vmem:[%s3456_s12 + $0xe] ss:$0 sm:$0xff] }
  0xb3   : > { %5639 = vst [vmem:[#allocation39_spill] sm:$0xff] %v4128_v44  ;;  %v2020_v8 = vadd.f32 %v2019_v17, %v2012_v20  ;;  %v2026_v41 = vmul.f32 %v4000_v30, %v3520_v7  ;;  %v4144_v37 = vadd.f32 %v2158_v55, %v2152_v39  ;;  %v4147_v44 = vmul.f32 %v2963_v6, %v3500_v62  ;;  %v4177_v6 = vld [vmem:[%s3444_s28 + $0x40] sm:$0xff] }
  0xb4   : > { %5640 = vst [vmem:[#allocation40_spill] sm:$0xff] %v4140_v58  ;;  %v4151_v16 = vmul.f32 %v3930_v3, %v3459_v45  ;;  %v992_v47 = vmul.f32 %v4125_v4, %v3447_v42  ;;  %v4157_v28 = vmul.f32 %v3933_v33, %v3462_v46  ;;  %v1940_v30 = vmul.f32 %v3683_v9, %v3914_v61  ;;  %v4166_v45 = vld [vmem:[%s3444_s28 + $0x8] sm:$0xff]  ;;  %v4169_v3 = vld [vmem:[%s3444_s28 + $0x10] sm:$0xff] }
  0xb5   : > { %5641 = vst [vmem:[#allocation41_spill] sm:$0xff] %v4144_v37  ;;  %5642 = vst [vmem:[#allocation42_spill] sm:$0xff] %v4147_v44  ;;  %v1947_v55 = vmul.f32 %v3727_v24, %v3856_v11  ;;  %v999_v62 = vmul.f32 %v3450_v43, %v4135_v34  ;;  %v4171_v42 = vadd.f32 %v2122_v56, %v2116_v13  ;;  %v4182_v24 = vld [vmem:[%s3444_s28 + $0x18] sm:$0xff]  ;;  %v4197_v13 = vld [vmem:[%s3444_s28 + $0x48] sm:$0xff] }
  0xb6   : > { %5643 = vst [vmem:[#allocation43_spill] sm:$0xff] %v4151_v16  ;;  %5644 = vst [vmem:[#allocation44_spill] sm:$0xff] %v4157_v28  ;;  %v4173_v46 = vadd.f32 %v2201_v21, %v2194_v14  ;;  %v993_v33 = vadd.f32 %v3555_v25, %v992_v47  ;;  %v1006_v9 = vmul.f32 %v4177_v6, %v3542_v18  ;;  %v4194_v25 = vld [vmem:[%s3444_s28 + $0x48] sm:$0xff]  ;;  %v4206_v21 = vld [vmem:[%s3444_s28 + $0x50] sm:$0xff] }
  0xb7   : > { %5645 = vst [vmem:[#allocation45_spill] sm:$0xff] %v4171_v42  ;;  %v4185_v43 = vadd.f32 %v3959_v0, %v2037_v5  ;;  %v4189_v39 = vmul.f32 %v4031_v40, %v3875_v59  ;;  %v2027_v20 = vadd.f32 %v2026_v41, %v2020_v8  ;;  %v2033_v17 = vmul.f32 %v4037_v23, %v3480_v53  ;;  %v4221_v8 = vld [vmem:[%s3444_s28 + $0x58] sm:$0xff] }
  0xb8   : > { %5646 = vst [vmem:[#allocation46_spill] sm:$0xff] %v4173_v46  ;;  %5649 = vst [vmem:[#allocation49_spill] sm:$0xff] %v4194_v25  ;;  %v1000_v56 = vadd.f32 %v999_v62, %v993_v33  ;;  %v1013_v18 = vmul.f32 %v4197_v13, %v3545_v19  ;;  %v1114_v0 = vmul.f32 %v4166_v45, %v3875_v59  ;;  %v4244_v16 = vld [vmem:[%s3456_s12 + $0x14] ss:$0 sm:$0xff] }
  0xb9   : > { %5647 = vst [vmem:[#allocation47_spill] sm:$0xff] %v4185_v43  ;;  %5648 = vst [vmem:[#allocation48_spill] sm:$0xff] %v4189_v39  ;;  %v1121_v14 = vmul.f32 %v4169_v3, %v3818_v35  ;;  %v4208_v5 = vadd.f32 %v1947_v55, %v1940_v30  ;;  %v4212_v53 = vmul.f32 %v3844_v32, %v3914_v61  ;;  %v4226_v55 = vld [vmem:[%s3456_s12 + $0xc] ss:$0 sm:$0xff]  ;;  %v4268_v39 = vld [vmem:[%s3456_s12 + $0x20] ss:$0 sm:$0xff] }
  0xba   : > { %5650 = vst [vmem:[#allocation50_spill] sm:$0xff] %v4206_v21  ;;  %v4216_v23 = vmul.f32 %v3849_v50, %v3856_v11  ;;  %v1128_v19 = vmul.f32 %v4182_v24, %v3825_v2  ;;  %5654 = vst [vmem:[#allocation54_spill] sm:$0xff] %v4221_v8  ;;  %v1007_v41 = vadd.f32 %v1006_v9, %v1000_v56  ;;  %v4239_v56 = vld [vmem:[%s3456_s12 + $0x10] ss:$0 sm:$0xff]  ;;  %v4290_v43 = vld [vmem:[%s3456_s12 + $0x1a] ss:$0 sm:$0xff] }
  0xbb   : > { %5651 = vst [vmem:[#allocation51_spill] sm:$0xff] %v4208_v5  ;;  %5652 = vst [vmem:[#allocation52_spill] sm:$0xff] %v4212_v53  ;;  %v1021_v47 = vmul.f32 %v3844_v32, %v3550_v22  ;;  %v1122_v30 = vadd.f32 %v1121_v14, %v1114_v0  ;;  %v1135_v62 = vmul.f32 %v4226_v55, %v4194_v25 }
  0xbc   : > { %5653 = vst [vmem:[#allocation53_spill] sm:$0xff] %v4216_v23  ;;  %5655 = vst [vmem:[#allocation55_spill] sm:$0xff] %v4226_v55  ;;  %v4230_v33 = vadd.f32 %v2033_v17, %v2027_v20  ;;  %v4234_v28 = vmul.f32 %v3948_v57, %v3520_v7  ;;  %v1029_v9 = vmul.f32 %v3849_v50, %v3563_v29  ;;  %v4251_v57 = vld [vmem:[%s3456_s12 + $0x1] ss:$0 sm:$0xff]  ;;  %v4254_v29 = vld [vmem:[%s3456_s12 + $0x18] ss:$0 sm:$0xff] }
  0xbd   : > { %v1142_v22 = vmul.f32 %v4239_v56, %v4206_v21  ;;  %v1014_v0 = vadd.f32 %v1013_v18, %v1007_v41  ;;  %v1129_v14 = vadd.f32 %v1128_v19, %v1122_v30  ;;  %v1149_v20 = vmul.f32 %v4244_v16, %v4221_v8  ;;  %v4259_v18 = vld [vmem:[%s3456_s12 + $0x1c] ss:$0 sm:$0xff]  ;;  %5662 = vst [vmem:[#allocation62_spill] sm:$0xff] %v4338_v48 }
  0xbe   : > { %5656 = vst [vmem:[#allocation56_spill] sm:$0xff] %v4230_v33  ;;  %5657 = vst [vmem:[#allocation57_spill] sm:$0xff] %v4234_v28  ;;  %v1118_v7 = vmul.f32 %v4166_v45, %v3914_v61  ;;  %v1156_v17 = vmul.f32 %v4254_v29, %v3849_v50  ;;  %v1163_v19 = vmul.f32 %v4259_v18, %v3904_v51  ;;  %v4278_v28 = vld [vmem:[%s3456_s12 + $0x12] ss:$0 sm:$0xff]  ;;  %v4297_v33 = vld [vmem:[%s3456_s12 + $0x1e] ss:$0 sm:$0xff] }
  0xbf   : > { %5658 = vst [vmem:[#allocation58_spill] sm:$0xff] %v4259_v18  ;;  %v1125_v41 = vmul.f32 %v4169_v3, %v3856_v11  ;;  %v1132_v30 = vmul.f32 %v4182_v24, %v3859_v1  ;;  %v1022_v44 = vadd.f32 %v1021_v47, %v1014_v0  ;;  %v1136_v58 = vadd.f32 %v1135_v62, %v1129_v14  ;;  %v4283_v62 = vld [vmem:[%s3456_s12 + $0x16] ss:$0 sm:$0xff]  ;;  %v3096_v14 = vld [vmem:[%s3444_s28] sm:$0xff] }
  0xc0   : > { %v1171_v46 = vmul.f32 %v4268_v39, %v4031_v40  ;;  %v1139_v42 = vmul.f32 %v4273_v15, %v4194_v25  ;;  %v1146_v47 = vmul.f32 %v4278_v28, %v4206_v21  ;;  %5659 = vst [vmem:[#allocation59_spill] sm:$0xff] %v4283_v62  ;;  %v1153_v0 = vmul.f32 %v4283_v62, %v4221_v8 }
  0xc1   : > { %v1126_v52 = vadd.f32 %v1125_v41, %v1118_v7  ;;  %v1044_v38 = vmul.f32 %v3096_v14, %v4251_v57  ;;  %v1030_v37 = vadd.f32 %v1029_v9, %v1022_v44  ;;  %v1143_v54 = vadd.f32 %v1142_v22, %v1136_v58  ;;  %v3098_v41 = vld [vmem:[%s3444_s28 + $0x8] sm:$0xff]  ;;  %v4302_v44 = vld [vmem:[%s3532_s29] ss:$0 sm:$0xff]  ;;  %v3101_v9 = vld [vmem:[%s3444_s28 + $0x10] sm:$0xff] }
  0xc2   : > { %v1160_v7 = vmul.f32 %v4290_v43, %v3849_v50  ;;  %v1051_v23 = vmul.f32 %v3098_v41, %v4125_v4  ;;  %v1167_v14 = vmul.f32 %v4297_v33, %v3904_v51  ;;  %v1058_v22 = vmul.f32 %v3101_v9, %v4135_v34  ;;  %v4309_v41 = vld [vmem:[%s3456_s12 + $0x22] ss:$0 sm:$0xff] }
  0xc3   : > { %v1133_v53 = vadd.f32 %v1132_v30, %v1126_v52  ;;  %v1045_v58 = vadd.f32 %v4302_v44, %v1044_v38  ;;  %v1037_v27 = vadd.f32 %v3911_v49, %v1030_v37  ;;  %v1150_v5 = vadd.f32 %v1149_v20, %v1143_v54  ;;  %5660 = vst [vmem:[#allocation60_spill] sm:$0xff] %v4309_v41  ;;  %v3104_v54 = vld [vmem:[%s3444_s28 + $0x50] sm:$0xff] }
  0xc4   : > { %v1175_v52 = vmul.f32 %v4309_v41, %v4031_v40  ;;  %v1065_v30 = vmul.f32 %v4177_v6, %v3592_v63  ;;  %v1072_v49 = vmul.f32 %v4319_v36, %v4197_v13  ;;  %v4325_v37 = vld [vmem:[%s3456_s12 + $0x15] ss:$0 sm:$0xff]  ;;  %v1186_v6 = vmul.f32 %v4169_v3, %v3875_v59 }
  0xc5   : > { %v1140_v26 = vadd.f32 %v1139_v42, %v1133_v53  ;;  %v1052_v38 = vadd.f32 %v1051_v23, %v1045_v58  ;;  %v1079_v20 = vmul.f32 %v4325_v37, %v3104_v54  ;;  %v1038_v9 = vadd.f32 %v1037_v27, %v4068_v31  ;;  %v4342_v27 = vld [vmem:[%s3456_s12 + $0x1d] ss:$0 sm:$0xff] }
  0xc6   : > { %v1157_v63 = vadd.f32 %v1156_v17, %v1150_v5  ;;  %v1193_v42 = vmul.f32 %v4182_v24, %v3818_v35  ;;  %v1086_v13 = vmul.f32 %v3844_v32, %v3605_v12  ;;  %v1200_v58 = vmul.f32 %v4316_v10, %v3825_v2  ;;  %5663 = vst [vmem:[#allocation63_spill] sm:$0xff] %v4342_v27  ;;  %v4349_v12 = vld [vmem:[%s3456_s12 + $0x21] ss:$0 sm:$0xff] }
  0xc7   : > { %v1147_v53 = vadd.f32 %v1146_v47, %v1140_v26  ;;  %v1059_v23 = vadd.f32 %v1058_v22, %v1052_v38  ;;  %2812 = vst [vmem:[%s3641_s30 + $0x40] sm:$0xff] %v1038_v9  ;;  %v1093_v5 = vmul.f32 %v4342_v27, %v3849_v50  ;;  %v1207_v26 = vmul.f32 %v4226_v55, %v4206_v21  ;;  %v1107_v47 = vld [vmem:[#allocation2] sm:$0xff] }
  0xc8   : > { %v1164_v31 = vadd.f32 %v1163_v19, %v1157_v63  ;;  %v1194_v17 = vadd.f32 %v1193_v42, %v1186_v6  ;;  %v1101_v32 = vmul.f32 %v4349_v12, %v3904_v51  ;;  %v1214_v19 = vmul.f32 %v4239_v56, %v4221_v8 }
  0xc9   : > { %v1154_v22 = vadd.f32 %v1153_v0, %v1147_v53  ;;  %v1066_v38 = vadd.f32 %v1065_v30, %v1059_v23  ;;  %v1221_v63 = vmul.f32 %v4244_v16, %v4338_v48  ;;  %v1190_v6 = vmul.f32 %v4169_v3, %v3914_v61 }
  0xca   : > { %v1172_v54 = vadd.f32 %v1171_v46, %v1164_v31  ;;  %v1201_v9 = vadd.f32 %v1200_v58, %v1194_v17  ;;  %v1197_v0 = vmul.f32 %v4182_v24, %v3856_v11  ;;  %v1204_v30 = vmul.f32 %v4316_v10, %v3859_v1 }
  0xcb   : > { %v1161_v42 = vadd.f32 %v1160_v7, %v1154_v22  ;;  %v1073_v55 = vadd.f32 %v1072_v49, %v1066_v38  ;;  %v1228_v46 = vmul.f32 %v4254_v29, %v3904_v51  ;;  %v1235_v23 = vmul.f32 %v4259_v18, %v4031_v40  ;;  %v1108_v22 = vld [vmem:[#allocation2 + $0x11] sm:$0xff] }
  0xcc   : > { %1177 = vst [vmem:[#allocation2 + $0x1] sm:$0xff] %v1172_v54  ;;  %v1208_v53 = vadd.f32 %v1207_v26, %v1201_v9  ;;  %v1243_v58 = vmul.f32 %v4268_v39, %v4034_v60  ;;  %v1198_v49 = vadd.f32 %v1197_v0, %v1190_v6  ;;  %v1211_v17 = vmul.f32 %v4273_v15, %v4206_v21 }
  0xcd   : > { %v1168_v31 = vadd.f32 %v1167_v14, %v1161_v42  ;;  %v1080_v7 = vadd.f32 %v1079_v20, %v1073_v55  ;;  %v1218_v26 = vmul.f32 %v4278_v28, %v4221_v8  ;;  %v1225_v54 = vmul.f32 %v4283_v62, %v4338_v48 }
  0xce   : > { %v1215_v38 = vadd.f32 %v1214_v19, %v1208_v53  ;;  %v1116_v9 = vmul.f32 %v4166_v45, %v4251_v57  ;;  %v1205_v55 = vadd.f32 %v1204_v30, %v1198_v49  ;;  %v1123_v20 = vmul.f32 %v4169_v3, %v4125_v4 }
  0xcf   : > { %v1176_v18 = vadd.f32 %v1175_v52, %v1168_v31  ;;  %v1087_v14 = vadd.f32 %v1086_v13, %v1080_v7  ;;  %v1232_v19 = vmul.f32 %v4290_v43, %v3904_v51  ;;  %v1130_v0 = vmul.f32 %v4182_v24, %v4135_v34  ;;  %v4389_v13 = vld [vmem:[%s3444_s28 + $0x28] sm:$0xff] }
  0xd0   : > { %v1222_v6 = vadd.f32 %v1221_v63, %v1215_v38  ;;  %v1117_v42 = vadd.f32 %v4302_v44, %v1116_v9  ;;  %v1212_v62 = vadd.f32 %v1211_v17, %v1205_v55  ;;  %v1239_v45 = vmul.f32 %v4297_v33, %v4031_v40  ;;  %v4392_v31 = vld [vmem:[%s3456_s12 + $0xd] ss:$0 sm:$0xff] }
  0xd1   : > { %1178 = vst [vmem:[#allocation2 + $0x10] sm:$0xff] %v1176_v18  ;;  %v1094_v53 = vadd.f32 %v1093_v5, %v1087_v14  ;;  %v1247_v52 = vmul.f32 %v4309_v41, %v4034_v60  ;;  %5664 = vst [vmem:[#allocation64_spill] sm:$0xff] %v4392_v31  ;;  %v1137_v7 = vmul.f32 %v4392_v31, %v4194_v25  ;;  %v4407_v25 = vld [vmem:[%s3456_s12 + $0x19] ss:$0 sm:$0xff] }
  0xd2   : > { %v1229_v63 = vadd.f32 %v1228_v46, %v1222_v6  ;;  %v1124_v30 = vadd.f32 %v1123_v20, %v1117_v42  ;;  %v1144_v18 = vmul.f32 %v4319_v36, %v4206_v21  ;;  %v1219_v49 = vadd.f32 %v1218_v26, %v1212_v62  ;;  %5665 = vst [vmem:[#allocation65_spill] sm:$0xff] %v4407_v25 }
  0xd3   : > { %v1102_v5 = vadd.f32 %v1101_v32, %v1094_v53  ;;  %v1151_v17 = vmul.f32 %v4325_v37, %v4221_v8  ;;  %v1258_v38 = vmul.f32 %v4182_v24, %v3875_v59  ;;  %v1265_v14 = vmul.f32 %v4316_v10, %v3818_v35  ;;  %v1179_v20 = vld [vmem:[#allocation2] sm:$0xff] }
  0xd4   : > { %v1236_v46 = vadd.f32 %v1235_v23, %v1229_v63  ;;  %v1131_v9 = vadd.f32 %v1130_v0, %v1124_v30  ;;  %v1272_v55 = vmul.f32 %v4389_v13, %v3825_v2  ;;  %v1226_v42 = vadd.f32 %v1225_v54, %v1219_v49  ;;  %v4414_v23 = vld [vmem:[%s3444_s28 + $0x68] sm:$0xff]  ;;  %v5667_v63 = vld [vmem:[#allocation55_spill] sm:$0xff] }
  0xd5   : > { %v1109_v6 = vadd.f32 %v1107_v47, %v1102_v5  ;;  %v1158_v62 = vmul.f32 %v4407_v25, %v3849_v50  ;;  %v1165_v32 = vmul.f32 %v4342_v27, %v3904_v51  ;;  %5666 = vst [vmem:[#allocation66_spill] sm:$0xff] %v4414_v23  ;;  %v1266_v53 = vadd.f32 %v1265_v14, %v1258_v38  ;;  %v5668_v14 = vld [vmem:[#allocation58_spill] sm:$0xff] }
  0xd6   : > { %v1244_v26 = vadd.f32 %v1243_v58, %v1236_v46  ;;  %v1138_v0 = vadd.f32 %v1137_v7, %v1131_v9  ;;  %v1279_v30 = vmul.f32 %v5667_v63, %v4221_v8  ;;  %v1233_v47 = vadd.f32 %v1232_v19, %v1226_v42 }
  0xd7   : > { %v1110_v2 = vadd.f32 %v1109_v6, %v1108_v22  ;;  %v1173_v54 = vmul.f32 %v4349_v12, %v4031_v40  ;;  %v1286_v50 = vmul.f32 %v4239_v56, %v4338_v48  ;;  %v1273_v49 = vadd.f32 %v1272_v55, %v1266_v53  ;;  %v5669_v6 = vld [vmem:[#allocation24_spill] sm:$0xff] }
  0xd8   : > { %1249 = vst [vmem:[#allocation2 + $0x1] sm:$0xff] %v1244_v26  ;;  %v1145_v5 = vadd.f32 %v1144_v18, %v1138_v0  ;;  %v1293_v27 = vmul.f32 %v4244_v16, %v4414_v23  ;;  %v1262_v58 = vmul.f32 %v4182_v24, %v3914_v61  ;;  %v1240_v7 = vadd.f32 %v1239_v45, %v1233_v47  ;;  %v1180_v46 = vld [vmem:[#allocation2 + $0x11] sm:$0xff] }
  0xd9   : > { %2821 = vst [vmem:[%s3641_s30 + $0x48] sm:$0xff] %v1110_v2  ;;  %v1300_v22 = vmul.f32 %v4254_v29, %v4031_v40  ;;  %v1269_v19 = vmul.f32 %v4316_v10, %v3856_v11  ;;  %v1276_v38 = vmul.f32 %v4389_v13, %v3859_v1  ;;  %v1280_v9 = vadd.f32 %v1279_v30, %v1273_v49 }
  0xda   : > { %v1152_v18 = vadd.f32 %v1151_v17, %v1145_v5  ;;  %v1307_v55 = vmul.f32 %v5668_v14, %v4034_v60  ;;  %v1315_v42 = vmul.f32 %v4268_v39, %v5669_v6  ;;  %v1248_v2 = vadd.f32 %v1247_v52, %v1240_v7  ;;  %v5670_v17 = vld [vmem:[#allocation59_spill] sm:$0xff] }
  0xdb   : > { %v1270_v45 = vadd.f32 %v1269_v19, %v1262_v58  ;;  %v1283_v26 = vmul.f32 %v4273_v15, %v4221_v8  ;;  %v1290_v0 = vmul.f32 %v4278_v28, %v4338_v48  ;;  %v1287_v47 = vadd.f32 %v1286_v50, %v1280_v9  ;;  %v4455_v9 = vld [vmem:[%s3444_s28 + $0x30] sm:$0xff] }
  0xdc   : > { %v1159_v53 = vadd.f32 %v1158_v62, %v1152_v18  ;;  %v1297_v30 = vmul.f32 %v5670_v17, %v4414_v23  ;;  %v1188_v5 = vmul.f32 %v4169_v3, %v4251_v57  ;;  %1250 = vst [vmem:[#allocation2 + $0x10] sm:$0xff] %v1248_v2  ;;  %v1304_v52 = vmul.f32 %v4290_v43, %v4031_v40 }
  0xdd   : > { %v1277_v49 = vadd.f32 %v1276_v38, %v1270_v45  ;;  %v1311_v58 = vmul.f32 %v4297_v33, %v4034_v60  ;;  %v1195_v7 = vmul.f32 %v4182_v24, %v4125_v4  ;;  %v1294_v62 = vadd.f32 %v1293_v27, %v1287_v47 }
  0xde   : > { %v1166_v19 = vadd.f32 %v1165_v32, %v1159_v53  ;;  %v1189_v50 = vadd.f32 %v4302_v44, %v1188_v5  ;;  %v1202_v18 = vmul.f32 %v4316_v10, %v4135_v34  ;;  %v1319_v38 = vmul.f32 %v4309_v41, %v5669_v6  ;;  %v5671_v6 = vld [vmem:[#allocation7_spill] sm:$0xff] }
  0xdf   : > { %v1284_v3 = vadd.f32 %v1283_v26, %v1277_v49  ;;  %v1209_v2 = vmul.f32 %v4392_v31, %v4206_v21  ;;  %v1216_v45 = vmul.f32 %v4319_v36, %v4221_v8  ;;  %v1301_v27 = vadd.f32 %v1300_v22, %v1294_v62  ;;  %v5673_v62 = vld [vmem:[#allocation63_spill] sm:$0xff] }
  0xe0   : > { %v1174_v32 = vadd.f32 %v1173_v54, %v1166_v19  ;;  %v1196_v53 = vadd.f32 %v1195_v7, %v1189_v50  ;;  %v1223_v47 = vmul.f32 %v4325_v37, %v4338_v48  ;;  %v1330_v26 = vmul.f32 %v4316_v10, %v3875_v59  ;;  %v4474_v7 = vld [vmem:[%s3444_s28 + $0x70] sm:$0xff] }
  0xe1   : > { %v1291_v5 = vadd.f32 %v1290_v0, %v1284_v3  ;;  %v1337_v49 = vmul.f32 %v4389_v13, %v3818_v35  ;;  %v1344_v21 = vmul.f32 %v4455_v9, %v5671_v6  ;;  %v1308_v36 = vadd.f32 %v1307_v55, %v1301_v27  ;;  %5672 = vst [vmem:[#allocation58_spill] sm:$0xff] %v4474_v7  ;;  %v1251_v0 = vld [vmem:[#allocation2] sm:$0xff] }
  0xe2   : > { %v1181_v31 = vadd.f32 %v1179_v20, %v1174_v32  ;;  %v1203_v54 = vadd.f32 %v1202_v18, %v1196_v53  ;;  %v1230_v22 = vmul.f32 %v4407_v25, %v3904_v51  ;;  %v1237_v50 = vmul.f32 %v5673_v62, %v4031_v40  ;;  %v4483_v51 = vld [vmem:[%s3444_s28 + $0xa0] sm:$0xff]  ;;  %v4486_v32 = vld [vmem:[%s3444_s28 + $0xa8] sm:$0xff] }
  0xe3   : > { %v1298_v19 = vadd.f32 %v1297_v30, %v1291_v5  ;;  %v1338_v3 = vadd.f32 %v1337_v49, %v1330_v26  ;;  %v1351_v6 = vmul.f32 %v5667_v63, %v4338_v48  ;;  %v1316_v20 = vadd.f32 %v1315_v42, %v1308_v36  ;;  %5674 = vst [vmem:[#allocation59_spill] sm:$0xff] %v4483_v51  ;;  %v4493_v26 = vld [vmem:[%s3444_s28 + $0xb0] sm:$0xff] }
  0xe4   : > { %v1182_v35 = vadd.f32 %v1181_v31, %v1180_v46  ;;  %v1210_v55 = vadd.f32 %v1209_v2, %v1203_v54  ;;  %v1245_v18 = vmul.f32 %v4349_v12, %v4034_v60  ;;  %5675 = vst [vmem:[#allocation63_spill] sm:$0xff] %v4486_v32  ;;  %v1358_v30 = vmul.f32 %v4239_v56, %v4414_v23 }
  0xe5   : > { %v1305_v27 = vadd.f32 %v1304_v52, %v1298_v19  ;;  %v1345_v53 = vadd.f32 %v1344_v21, %v1338_v3  ;;  %v1365_v5 = vmul.f32 %v4244_v16, %v4474_v7  ;;  %5676 = vst [vmem:[#allocation67_spill] sm:$0xff] %v4493_v26  ;;  %1321 = vst [vmem:[#allocation2 + $0x1] sm:$0xff] %v1316_v20 }
  0xe6   : > { %2831 = vst [vmem:[%s3641_s30 + $0x50] sm:$0xff] %v1182_v35  ;;  %v1217_v36 = vadd.f32 %v1216_v45, %v1210_v55  ;;  %v1334_v31 = vmul.f32 %v4316_v10, %v3914_v61  ;;  %v1341_v46 = vmul.f32 %v4389_v13, %v3856_v11  ;;  %v1348_v21 = vmul.f32 %v4455_v9, %v3859_v1  ;;  %v1252_v35 = vld [vmem:[#allocation2 + $0x11] sm:$0xff] }
  0xe7   : > { %v1312_v42 = vadd.f32 %v1311_v58, %v1305_v27  ;;  %v1352_v52 = vadd.f32 %v1351_v6, %v1345_v53  ;;  %v1372_v2 = vmul.f32 %v4254_v29, %v4483_v51  ;;  %v1379_v49 = vmul.f32 %v5668_v14, %v4486_v32 }
  0xe8   : > { %v1224_v54 = vadd.f32 %v1223_v47, %v1217_v36  ;;  %v1387_v45 = vmul.f32 %v4268_v39, %v4493_v26  ;;  %v1342_v19 = vadd.f32 %v1341_v46, %v1334_v31  ;;  %v1355_v3 = vmul.f32 %v4273_v15, %v4338_v48 }
  0xe9   : > { %v1320_v20 = vadd.f32 %v1319_v38, %v1312_v42  ;;  %v1359_v55 = vadd.f32 %v1358_v30, %v1352_v52  ;;  %v1362_v6 = vmul.f32 %v4278_v28, %v4414_v23  ;;  %v1369_v58 = vmul.f32 %v5670_v17, %v4474_v7  ;;  %v4528_v52 = vld [vmem:[%s3444_s28 + $0x38] sm:$0xff] }
  0xea   : > { %v1231_v27 = vadd.f32 %v1230_v22, %v1224_v54  ;;  %v1349_v53 = vadd.f32 %v1348_v21, %v1342_v19  ;;  %v1260_v47 = vmul.f32 %v4182_v24, %v4251_v57  ;;  %v1267_v36 = vmul.f32 %v4316_v10, %v4125_v4 }
  0xeb   : > { %1322 = vst [vmem:[#allocation2 + $0x10] sm:$0xff] %v1320_v20  ;;  %v1366_v31 = vadd.f32 %v1365_v5, %v1359_v55  ;;  %v1376_v38 = vmul.f32 %v4290_v43, %v4483_v51  ;;  %v1383_v30 = vmul.f32 %v4297_v33, %v4486_v32  ;;  %v1391_v46 = vmul.f32 %v4309_v41, %v4493_v26  ;;  %v5677_v5 = vld [vmem:[#allocation64_spill] sm:$0xff]  ;;  %v5678_v20 = vld [vmem:[#allocation61_spill] sm:$0xff] }
  0xec   : > { %v1238_v42 = vadd.f32 %v1237_v50, %v1231_v27  ;;  %v1356_v22 = vadd.f32 %v1355_v3, %v1349_v53  ;;  %v1261_v21 = vadd.f32 %v4302_v44, %v1260_v47  ;;  %v1274_v24 = vmul.f32 %v4389_v13, %v4135_v34 }
  0xed   : > { %v1373_v54 = vadd.f32 %v1372_v2, %v1366_v31  ;;  %v1281_v19 = vmul.f32 %v5677_v5, %v4221_v8  ;;  %v1288_v55 = vmul.f32 %v5678_v20, %v4338_v48  ;;  %v1295_v51 = vmul.f32 %v4325_v37, %v4414_v23  ;;  %v5679_v31 = vld [vmem:[#allocation6_spill] sm:$0xff]  ;;  %v5680_v5 = vld [vmem:[#allocation7_spill] sm:$0xff]  ;;  %v4544_v20 = vld [vmem:[#allocation2] sm:$0xff] }
  0xee   : > { %v1246_v50 = vadd.f32 %v1245_v18, %v1238_v42  ;;  %v1363_v3 = vadd.f32 %v1362_v6, %v1356_v22  ;;  %v1268_v27 = vadd.f32 %v1267_v36, %v1261_v21  ;;  %v1402_v53 = vmul.f32 %v4389_v13, %v3875_v59 }
  0xef   : > { %v1380_v47 = vadd.f32 %v1379_v49, %v1373_v54  ;;  %v1302_v2 = vmul.f32 %v4407_v25, %v4031_v40  ;;  %v1409_v8 = vmul.f32 %v4455_v9, %v5679_v31  ;;  %v1416_v41 = vmul.f32 %v4528_v52, %v5680_v5  ;;  %v4549_v49 = vld [vmem:[%s3444_s28 + $0x78] sm:$0xff] }
  0xf0   : > { %v1253_v48 = vadd.f32 %v1251_v0, %v1246_v50  ;;  %v1370_v18 = vadd.f32 %v1369_v58, %v1363_v3  ;;  %v1275_v6 = vadd.f32 %v1274_v24, %v1268_v27  ;;  %v1309_v36 = vmul.f32 %v5673_v62, %v4034_v60  ;;  %v5681_v40 = vld [vmem:[#allocation24_spill] sm:$0xff] }
  0xf1   : > { %v1388_v42 = vadd.f32 %v1387_v45, %v1380_v47  ;;  %v1317_v22 = vmul.f32 %v4349_v12, %v5681_v40  ;;  %v1410_v21 = vadd.f32 %v1409_v8, %v1402_v53  ;;  %v1423_v54 = vmul.f32 %v5667_v63, %v4414_v23  ;;  %v4560_v50 = vld [vmem:[%s3444_s28 + $0xb8] sm:$0xff] }
  0xf2   : > { %v1254_v5 = vadd.f32 %v1253_v48, %v1252_v35  ;;  %v1377_v31 = vadd.f32 %v1376_v38, %v1370_v18  ;;  %v1282_v0 = vadd.f32 %v1281_v19, %v1275_v6  ;;  %v1430_v58 = vmul.f32 %v4239_v56, %v4474_v7  ;;  %5682 = vst [vmem:[#allocation6_spill] sm:$0xff] %v4560_v50  ;;  %v1324_v19 = vld [vmem:[#allocation2 + $0x11] sm:$0xff] }
  0xf3   : > { %1393 = vst [vmem:[#allocation2 + $0x1] sm:$0xff] %v1388_v42  ;;  %v1417_v24 = vadd.f32 %v1416_v41, %v1410_v21  ;;  %v1437_v60 = vmul.f32 %v4244_v16, %v4549_v49  ;;  %v1406_v45 = vmul.f32 %v4389_v13, %v3914_v61  ;;  %v1413_v8 = vmul.f32 %v4455_v9, %v3856_v11 }
  0xf4   : > { %2841 = vst [vmem:[%s3641_s30 + $0x58] sm:$0xff] %v1254_v5  ;;  %v1384_v48 = vadd.f32 %v1383_v30, %v1377_v31  ;;  %v1289_v35 = vadd.f32 %v1288_v55, %v1282_v0  ;;  %v1444_v38 = vmul.f32 %v4254_v29, %v4486_v32  ;;  %v1420_v41 = vmul.f32 %v4528_v52, %v3859_v1 }
  0xf5   : > { %v1424_v3 = vadd.f32 %v1423_v54, %v1417_v24  ;;  %v1451_v27 = vmul.f32 %v5668_v14, %v4493_v26  ;;  %v1414_v53 = vadd.f32 %v1413_v8, %v1406_v45  ;;  %v1427_v47 = vmul.f32 %v4273_v15, %v4414_v23  ;;  %v5684_v8 = vld [vmem:[#allocation62_spill] sm:$0xff] }
  0xf6   : > { %v1392_v18 = vadd.f32 %v1391_v46, %v1384_v48  ;;  %v1296_v6 = vadd.f32 %v1295_v51, %v1289_v35  ;;  %v1459_v30 = vmul.f32 %v4268_v39, %v4560_v50  ;;  %v1434_v55 = vmul.f32 %v4278_v28, %v4474_v7  ;;  %v5685_v48 = vld [vmem:[#allocation64_spill] sm:$0xff] }
  0xf7   : > { %v1431_v42 = vadd.f32 %v1430_v58, %v1424_v3  ;;  %v1421_v40 = vadd.f32 %v1420_v41, %v1414_v53  ;;  %v1441_v1 = vmul.f32 %v5670_v17, %v4549_v49  ;;  %v1332_v21 = vmul.f32 %v4316_v10, %v4251_v57  ;;  %v5686_v41 = vld [vmem:[#allocation61_spill] sm:$0xff] }
  0xf8   : > { %1394 = vst [vmem:[#allocation2 + $0x10] sm:$0xff] %v1392_v18  ;;  %v1303_v54 = vadd.f32 %v1302_v2, %v1296_v6  ;;  %v1448_v46 = vmul.f32 %v4290_v43, %v4486_v32  ;;  %v1455_v51 = vmul.f32 %v4297_v33, %v4493_v26  ;;  %v1339_v5 = vmul.f32 %v4389_v13, %v4125_v4  ;;  %v5683_v2 = vld [vmem:[#allocation60_spill] sm:$0xff] }
  0xf9   : > { %v1438_v31 = vadd.f32 %v1437_v60, %v1431_v42  ;;  %v1428_v0 = vadd.f32 %v1427_v47, %v1421_v40  ;;  %v1333_v58 = vadd.f32 %v4302_v44, %v1332_v21  ;;  %v1346_v24 = vmul.f32 %v4455_v9, %v4135_v34 }
  0xfa   : > { %v1310_v10 = vadd.f32 %v1309_v36, %v1303_v54  ;;  %v1463_v45 = vmul.f32 %v5683_v2, %v4560_v50  ;;  %v1353_v35 = vmul.f32 %v5685_v48, %v5684_v8  ;;  %v1360_v3 = vmul.f32 %v5686_v41, %v4414_v23  ;;  %v4603_v36 = vld [vmem:[%s3456_s12 + $0x4] ss:$0 sm:$0xff] }
  0xfb   : > { %v1445_v53 = vadd.f32 %v1444_v38, %v1438_v31  ;;  %v1435_v18 = vadd.f32 %v1434_v55, %v1428_v0  ;;  %v1340_v6 = vadd.f32 %v1339_v5, %v1333_v58  ;;  %v1367_v60 = vmul.f32 %v4325_v37, %v4474_v7  ;;  %v5687_v55 = vld [vmem:[#allocation59_spill] sm:$0xff]  ;;  %v4611_v31 = vld [vmem:[#allocation2] sm:$0xff] }
  0xfc   : > { %v1318_v47 = vadd.f32 %v1317_v22, %v1310_v10  ;;  %v1474_v42 = vmul.f32 %v4455_v9, %v3875_v59  ;;  %v1481_v40 = vmul.f32 %v4603_v36, %v4528_v52  ;;  %v1488_v21 = vmul.f32 %v5667_v63, %v4474_v7 }
  0xfd   : > { %v1452_v54 = vadd.f32 %v1451_v27, %v1445_v53  ;;  %v1442_v8 = vadd.f32 %v1441_v1, %v1435_v18  ;;  %v1347_v38 = vadd.f32 %v1346_v24, %v1340_v6  ;;  %v1374_v5 = vmul.f32 %v4407_v25, %v5687_v55 }
  0xfe   : > { %v1325_v22 = vadd.f32 %v4544_v20, %v1318_v47  ;;  %v1482_v0 = vadd.f32 %v1481_v40, %v1474_v42  ;;  %v1495_v59 = vmul.f32 %v4239_v56, %v4549_v49  ;;  %v1502_v58 = vmul.f32 %v4254_v29, %v4493_v26 }
  0xff   : > { %v1460_v10 = vadd.f32 %v1459_v30, %v1452_v54  ;;  %v1449_v63 = vadd.f32 %v1448_v46, %v1442_v8  ;;  %v1354_v27 = vadd.f32 %v1353_v35, %v1347_v38  ;;  %v1478_v1 = vmul.f32 %v4455_v9, %v3914_v61  ;;  %v1396_v46 = vld [vmem:[#allocation2 + $0x11] sm:$0xff] }
 0x100   : > { %v1326_v24 = vadd.f32 %v1325_v22, %v1324_v19  ;;  %v1489_v53 = vadd.f32 %v1488_v21, %v1482_v0  ;;  %v1485_v18 = vmul.f32 %v4528_v52, %v3856_v11  ;;  %v1492_v20 = vmul.f32 %v4273_v15, %v4474_v7  ;;  %v4641_v22 = vld [vmem:[%s3444_s28 + $0x40] sm:$0xff] }
 0x101   : > { %1465 = vst [vmem:[#allocation2 + $0x1] sm:$0xff] %v1460_v10  ;;  %v1456_v6 = vadd.f32 %v1455_v51, %v1449_v63  ;;  %v1361_v47 = vadd.f32 %v1360_v3, %v1354_v27  ;;  %v1381_v42 = vmul.f32 %v5673_v62, %v4486_v32  ;;  %v1509_v30 = vmul.f32 %v5668_v14, %v4560_v50 }
 0x102   : > { %2851 = vst [vmem:[%s3641_s30 + $0x60] sm:$0xff] %v1326_v24  ;;  %v1496_v61 = vadd.f32 %v1495_v59, %v1489_v53  ;;  %v1486_v19 = vadd.f32 %v1485_v18, %v1478_v1  ;;  %v1499_v11 = vmul.f32 %v4278_v28, %v4549_v49  ;;  %v1404_v8 = vmul.f32 %v4389_v13, %v4251_v57  ;;  %v4650_v59 = vld [vmem:[%s3444_s28 + $0x80] sm:$0xff]  ;;  %v4655_v24 = vld [vmem:[%s3444_s28 + $0x88] sm:$0xff] }
 0x103   : > { %v1464_v63 = vadd.f32 %v1463_v45, %v1456_v6  ;;  %v1368_v51 = vadd.f32 %v1367_v60, %v1361_v47  ;;  %v1506_v35 = vmul.f32 %v4290_v43, %v4493_v26  ;;  %v1411_v3 = vmul.f32 %v4455_v9, %v4125_v4  ;;  %v5688_v6 = vld [vmem:[#allocation49_spill] sm:$0xff] }
 0x104   : > { %v1503_v40 = vadd.f32 %v1502_v58, %v1496_v61  ;;  %v1493_v21 = vadd.f32 %v1492_v20, %v1486_v19  ;;  %v1405_v54 = vadd.f32 %v4302_v44, %v1404_v8  ;;  %v1418_v38 = vmul.f32 %v4528_v52, %v4135_v34  ;;  %v4662_v20 = vld [vmem:[%s3456_s12 + $0x8] ss:$0 sm:$0xff]  ;;  %v4673_v8 = vld [vmem:[%s3444_s28 + $0xc0] sm:$0xff] }
 0x105   : > { %1466 = vst [vmem:[#allocation2 + $0x10] sm:$0xff] %v1464_v63  ;;  %v1375_v13 = vadd.f32 %v1374_v5, %v1368_v51  ;;  %v1389_v45 = vmul.f32 %v4349_v12, %v4493_v26  ;;  %v1513_v60 = vmul.f32 %v4297_v33, %v4560_v50  ;;  %v1425_v0 = vmul.f32 %v5685_v48, %v4414_v23 }
 0x106   : > { %v1510_v58 = vadd.f32 %v1509_v30, %v1503_v40  ;;  %v1500_v10 = vadd.f32 %v1499_v11, %v1493_v21  ;;  %v1412_v27 = vadd.f32 %v1411_v3, %v1405_v54  ;;  %v1432_v1 = vmul.f32 %v5686_v41, %v4474_v7  ;;  %v4680_v21 = vld [vmem:[%s3444_s28 + $0xc8] sm:$0xff] }
 0x107   : > { %v1382_v5 = vadd.f32 %v1381_v42, %v1375_v13  ;;  %v1439_v53 = vmul.f32 %v4325_v37, %v4549_v49  ;;  %v1524_v18 = vmul.f32 %v4603_v36, %v4641_v22  ;;  %v1531_v47 = vmul.f32 %v4662_v20, %v5688_v6 }
 0x108   : > { %v4666_v30 = vld [vmem:[#allocation2] sm:$0xff]  ;;  %v1507_v61 = vadd.f32 %v1506_v35, %v1500_v10  ;;  %v1419_v19 = vadd.f32 %v1418_v38, %v1412_v27  ;;  %v1446_v42 = vmul.f32 %v4407_v25, %v4486_v32  ;;  %v1538_v11 = vmul.f32 %v4239_v56, %v4650_v59  ;;  %v4688_v10 = vld [vmem:[%s3456_s12 + $0xa] ss:$0 sm:$0xff] }
 0x109   : > { %v1390_v63 = vadd.f32 %v1389_v45, %v1382_v5  ;;  %1515 = vst [vmem:[#allocation2 + $0x1] sm:$0xff] %v1510_v58  ;;  %v1453_v51 = vmul.f32 %v5673_v62, %v4493_v26  ;;  %v1532_v3 = vadd.f32 %v1531_v47, %v1524_v18  ;;  %v1545_v40 = vmul.f32 %v4244_v16, %v4655_v24  ;;  %v4683_v38 = vld [vmem:[%s3456_s12 + $0x6] ss:$0 sm:$0xff] }
 0x10a   : > { %v1514_v35 = vadd.f32 %v1513_v60, %v1507_v61  ;;  %v1426_v54 = vadd.f32 %v1425_v0, %v1419_v19  ;;  %v1528_v13 = vmul.f32 %v4683_v38, %v4641_v22  ;;  %v1535_v45 = vmul.f32 %v4688_v10, %v5688_v6 }
 0x10b   : > { %v1397_v58 = vadd.f32 %v4611_v31, %v1390_v63  ;;  %v1539_v27 = vadd.f32 %v1538_v11, %v1532_v3  ;;  %v1553_v5 = vmul.f32 %v5668_v14, %v4673_v8  ;;  %v1542_v60 = vmul.f32 %v4278_v28, %v4650_v59 }
 0x10c   : > { %v1468_v0 = vld [vmem:[#allocation2 + $0x11] sm:$0xff]  ;;  %v1433_v18 = vadd.f32 %v1432_v1, %v1426_v54  ;;  %v1561_v47 = vmul.f32 %v4268_v39, %v4680_v21  ;;  %v1536_v61 = vadd.f32 %v1535_v45, %v1528_v13  ;;  %v1549_v19 = vmul.f32 %v5670_v17, %v4655_v24 }
 0x10d   : > { %v1398_v32 = vadd.f32 %v1397_v58, %v1396_v46  ;;  %1516 = vst [vmem:[#allocation2 + $0x10] sm:$0xff] %v1514_v35  ;;  %v1546_v31 = vadd.f32 %v1545_v40, %v1539_v27  ;;  %v1476_v11 = vmul.f32 %v4455_v9, %v4251_v57  ;;  %v1483_v63 = vmul.f32 %v4528_v52, %v4125_v4  ;;  %v4716_v58 = vld [vmem:[%s3456_s12] ss:$0 sm:$0xff] }
 0x10e   : > { %v1440_v3 = vadd.f32 %v1439_v53, %v1433_v18  ;;  %v1461_v1 = vmul.f32 %v4349_v12, %v4560_v50  ;;  %v1543_v54 = vadd.f32 %v1542_v60, %v1536_v61  ;;  %v1557_v13 = vmul.f32 %v4297_v33, %v4673_v8  ;;  %v5689_v61 = vld [vmem:[#allocation50_spill] sm:$0xff] }
 0x10f   : > { %2861 = vst [vmem:[%s3641_s30 + $0x68] sm:$0xff] %v1398_v32  ;;  %v1554_v46 = vadd.f32 %v1553_v5, %v1546_v31  ;;  %v1565_v40 = vmul.f32 %v5683_v2, %v4680_v21  ;;  %v1477_v35 = vadd.f32 %v4302_v44, %v1476_v11  ;;  %v1490_v9 = vmul.f32 %v5685_v48, %v4474_v7  ;;  %v4727_v11 = vld [vmem:[%s3444_s28 + $0x90] sm:$0xff] }
 0x110   : > { %v1517_v52 = vld [vmem:[#allocation2] sm:$0xff]  ;;  %v1447_v53 = vadd.f32 %v1446_v42, %v1440_v3  ;;  %v1550_v45 = vadd.f32 %v1549_v19, %v1543_v54  ;;  %v1576_v27 = vmul.f32 %v4716_v58, %v4641_v22  ;;  %v1583_v32 = vmul.f32 %v4603_v36, %v5688_v6  ;;  %v5690_v54 = vld [vmem:[#allocation55_spill] sm:$0xff] }
 0x111   : > { %v1562_v5 = vadd.f32 %v1561_v47, %v1554_v46  ;;  %v1484_v60 = vadd.f32 %v1483_v63, %v1477_v35  ;;  %v1497_v18 = vmul.f32 %v5686_v41, %v4549_v49  ;;  %v1590_v31 = vmul.f32 %v4662_v20, %v5689_v61 }
 0x112   : > { %v1454_v42 = vadd.f32 %v1453_v51, %v1447_v53  ;;  %v1558_v19 = vadd.f32 %v1557_v13, %v1550_v45  ;;  %v1584_v3 = vadd.f32 %v1583_v32, %v1576_v27  ;;  %v1597_v7 = vmul.f32 %v5690_v54, %v4650_v59  ;;  %v4740_v45 = vld [vmem:[%s3444_s28 + $0xd0] sm:$0xff] }
 0x113   : > { %1567 = vst [vmem:[#allocation2 + $0x1] sm:$0xff] %v1562_v5  ;;  %v1491_v23 = vadd.f32 %v1490_v9, %v1484_v60  ;;  %v1504_v47 = vmul.f32 %v4407_v25, %v4493_v26  ;;  %v1511_v49 = vmul.f32 %v5673_v62, %v4560_v50  ;;  %v1604_v63 = vmul.f32 %v4239_v56, %v4655_v24  ;;  %v4743_v9 = vld [vmem:[%s3456_s12 + $0x2] ss:$0 sm:$0xff] }
 0x114   : > { %v1518_v46 = vld [vmem:[#allocation2 + $0x11] sm:$0xff]  ;;  %v1462_v35 = vadd.f32 %v1461_v1, %v1454_v42  ;;  %v1566_v51 = vadd.f32 %v1565_v40, %v1558_v19  ;;  %v1591_v53 = vadd.f32 %v1590_v31, %v1584_v3  ;;  %v1611_v13 = vmul.f32 %v4244_v16, %v4727_v11 }
 0x115   : > { %v1498_v27 = vadd.f32 %v1497_v18, %v1491_v23  ;;  %v1580_v32 = vmul.f32 %v4743_v9, %v4641_v22  ;;  %v1587_v5 = vmul.f32 %v4683_v38, %v5688_v6  ;;  %v1594_v60 = vmul.f32 %v4688_v10, %v5689_v61 }
 0x116   : > { %v1469_v1 = vadd.f32 %v4666_v30, %v1462_v35  ;;  %1568 = vst [vmem:[#allocation2 + $0x10] sm:$0xff] %v1566_v51  ;;  %v1598_v40 = vadd.f32 %v1597_v7, %v1591_v53  ;;  %v1618_v31 = vmul.f32 %v4254_v29, %v4673_v8  ;;  %v1625_v23 = vmul.f32 %v5668_v14, %v4680_v21 }
 0x117   : > { %v1505_v18 = vadd.f32 %v1504_v47, %v1498_v27  ;;  %v1633_v42 = vmul.f32 %v4268_v39, %v4740_v45  ;;  %v1588_v19 = vadd.f32 %v1587_v5, %v1580_v32  ;;  %v1601_v3 = vmul.f32 %v4273_v15, %v4650_v59 }
 0x118   : > { %v1470_v50 = vadd.f32 %v1469_v1, %v1468_v0  ;;  %v1605_v26 = vadd.f32 %v1604_v63, %v1598_v40  ;;  %v1608_v30 = vmul.f32 %v4278_v28, %v4655_v24  ;;  %v1615_v7 = vmul.f32 %v5670_v17, %v4727_v11 }
 0x119   : > { %v1512_v35 = vadd.f32 %v1511_v49, %v1505_v18  ;;  %v1595_v51 = vadd.f32 %v1594_v60, %v1588_v19  ;;  %v1526_v47 = vmul.f32 %v4641_v22, %v4125_v4  ;;  %v1533_v53 = vmul.f32 %v5688_v6, %v4135_v34 }
 0x11a   : > { %2871 = vst [vmem:[%s3641_s30 + $0x70] sm:$0xff] %v1470_v50  ;;  %v1612_v27 = vadd.f32 %v1611_v13, %v1605_v26  ;;  %v1622_v0 = vmul.f32 %v4290_v43, %v4673_v8  ;;  %v1629_v63 = vmul.f32 %v4297_v33, %v4680_v21  ;;  %v1637_v32 = vmul.f32 %v5683_v2, %v4740_v45  ;;  %v5691_v13 = vld [vmem:[#allocation54_spill] sm:$0xff] }
 0x11b   : > { %v1519_v49 = vadd.f32 %v1517_v52, %v1512_v35  ;;  %v1602_v5 = vadd.f32 %v1601_v3, %v1595_v51  ;;  %v1527_v60 = vadd.f32 %v4302_v44, %v1526_v47  ;;  %v1540_v4 = vmul.f32 %v5686_v41, %v4650_v59  ;;  %v4787_v3 = vld [vmem:[%s3444_s28 + $0x98] sm:$0xff] }
 0x11c   : > { %v1619_v34 = vadd.f32 %v1618_v31, %v1612_v27  ;;  %v1648_v26 = vmul.f32 %v4716_v58, %v5688_v6  ;;  %v1655_v50 = vmul.f32 %v4603_v36, %v5689_v61  ;;  %v1662_v1 = vmul.f32 %v4662_v20, %v5691_v13  ;;  %v1569_v27 = vld [vmem:[#allocation2] sm:$0xff] }
 0x11d   : > { %v1520_v40 = vadd.f32 %v1519_v49, %v1518_v46  ;;  %v1609_v52 = vadd.f32 %v1608_v30, %v1602_v5  ;;  %v1534_v18 = vadd.f32 %v1533_v53, %v1527_v60  ;;  %v1547_v19 = vmul.f32 %v4325_v37, %v4655_v24  ;;  %v4799_v53 = vld [vmem:[%s3444_s28 + $0xd8] sm:$0xff] }
 0x11e   : > { %v1626_v35 = vadd.f32 %v1625_v23, %v1619_v34  ;;  %v1555_v31 = vmul.f32 %v5673_v62, %v4673_v8  ;;  %v1656_v51 = vadd.f32 %v1655_v50, %v1648_v26  ;;  %v1669_v47 = vmul.f32 %v5690_v54, %v4655_v24 }
 0x11f   : > { %2878 = vst [vmem:[%s3641_s30 + $0x78] sm:$0xff] %v1520_v40  ;;  %v1616_v55 = vadd.f32 %v1615_v7, %v1609_v52  ;;  %v1541_v25 = vadd.f32 %v1540_v4, %v1534_v18  ;;  %v1563_v46 = vmul.f32 %v4349_v12, %v4680_v21  ;;  %v1676_v30 = vmul.f32 %v4239_v56, %v4727_v11 }
 0x120   : > { %v1634_v23 = vadd.f32 %v1633_v42, %v1626_v35  ;;  %v1663_v49 = vadd.f32 %v1662_v1, %v1656_v51  ;;  %v1683_v5 = vmul.f32 %v4244_v16, %v4787_v3  ;;  %v1652_v54 = vmul.f32 %v4743_v9, %v5688_v6  ;;  %v4832_v51 = vld [vmem:[%s3456_s12 + $0x9] ss:$0 sm:$0xff] }
 0x121   : > { %v1623_v60 = vadd.f32 %v1622_v0, %v1616_v55  ;;  %v1548_v34 = vadd.f32 %v1547_v19, %v1541_v25  ;;  %v1659_v7 = vmul.f32 %v4683_v38, %v5689_v61  ;;  %v1666_v4 = vmul.f32 %v4688_v10, %v5691_v13  ;;  %v1570_v13 = vld [vmem:[#allocation2 + $0x11] sm:$0xff]  ;;  %v4824_v19 = vld [vmem:[%s3456_s12 + $0x5] ss:$0 sm:$0xff] }
 0x122   : > { %1639 = vst [vmem:[#allocation2 + $0x1] sm:$0xff] %v1634_v23  ;;  %v1670_v56 = vadd.f32 %v1669_v47, %v1663_v49  ;;  %v1690_v42 = vmul.f32 %v4254_v29, %v4680_v21  ;;  %v1697_v26 = vmul.f32 %v5668_v14, %v4740_v45  ;;  %v1705_v50 = vmul.f32 %v4268_v39, %v4799_v53 }
 0x123   : > { %v1630_v55 = vadd.f32 %v1629_v63, %v1623_v60  ;;  %v1556_v25 = vadd.f32 %v1555_v31, %v1548_v34  ;;  %v1660_v0 = vadd.f32 %v1659_v7, %v1652_v54  ;;  %v1673_v1 = vmul.f32 %v4273_v15, %v4655_v24  ;;  %v5693_v7 = vld [vmem:[#allocation65_spill] sm:$0xff] }
 0x124   : > { %v1677_v40 = vadd.f32 %v1676_v30, %v1670_v56  ;;  %v1680_v52 = vmul.f32 %v4278_v28, %v4727_v11  ;;  %v1687_v29 = vmul.f32 %v5670_v17, %v4787_v3  ;;  %v1578_v14 = vmul.f32 %v4641_v22, %v4251_v57  ;;  %v4837_v17 = vld [vmem:[%s3444_s28 + $0x50] sm:$0xff] }
 0x125   : > { %v1638_v39 = vadd.f32 %v1637_v32, %v1630_v55  ;;  %v1564_v63 = vadd.f32 %v1563_v46, %v1556_v25  ;;  %v1667_v18 = vadd.f32 %v1666_v4, %v1660_v0  ;;  %v1585_v15 = vmul.f32 %v4824_v19, %v5688_v6  ;;  %v4870_v25 = vld [vmem:[%s3456_s12 + $0xc] ss:$0 sm:$0xff] }
 0x126   : > { %v1684_v35 = vadd.f32 %v1683_v5, %v1677_v40  ;;  %v1694_v31 = vmul.f32 %v4290_v43, %v4680_v21  ;;  %v1579_v28 = vadd.f32 %v4302_v44, %v1578_v14  ;;  %v1592_v57 = vmul.f32 %v4832_v51, %v5689_v61  ;;  %v4844_v43 = vld [vmem:[%s3444_s28 + $0x58] sm:$0xff] }
 0x127   : > { %1640 = vst [vmem:[#allocation2 + $0x10] sm:$0xff] %v1638_v39  ;;  %v1571_v22 = vadd.f32 %v1569_v27, %v1564_v63  ;;  %v1674_v32 = vadd.f32 %v1673_v1, %v1667_v18  ;;  %v1701_v47 = vmul.f32 %v4297_v33, %v4740_v45  ;;  %v1709_v6 = vmul.f32 %v5683_v2, %v4799_v53  ;;  %v4875_v1 = vld [vmem:[%s3444_s28 + $0xe0] sm:$0xff]  ;;  %v3120_v18 = vld [vmem:[%s3456_s12 + $0x18] ss:$0 sm:$0xff] }
 0x128   : > { %v1691_v44 = vadd.f32 %v1690_v42, %v1684_v35  ;;  %v1586_v46 = vadd.f32 %v1585_v15, %v1579_v28  ;;  %v1599_v30 = vmul.f32 %v5685_v48, %v4650_v59  ;;  %v1606_v61 = vmul.f32 %v5686_v41, %v4655_v24  ;;  %v5692_v59 = vld [vmem:[#allocation62_spill] sm:$0xff] }
 0x129   : > { %v1572_v23 = vadd.f32 %v1571_v22, %v1570_v13  ;;  %v1681_v27 = vadd.f32 %v1680_v52, %v1674_v32  ;;  %v1613_v33 = vmul.f32 %v4325_v37, %v4727_v11  ;;  %v1720_v49 = vmul.f32 %v4716_v58, %v4837_v17  ;;  %v4858_v41 = vld [vmem:[#allocation2] sm:$0xff]  ;;  %v4878_v13 = vld [vmem:[%s3456_s12 + $0x10] ss:$0 sm:$0xff] }
 0x12a   : > { %v1698_v2 = vadd.f32 %v1697_v26, %v1691_v44  ;;  %v1593_v5 = vadd.f32 %v1592_v57, %v1586_v46  ;;  %v1727_v54 = vmul.f32 %v4603_v36, %v4844_v43  ;;  %v1734_v60 = vmul.f32 %v4662_v20, %v5692_v59 }
 0x12b   : > { %2885 = vst [vmem:[%s3641_s30 + $0x80] sm:$0xff] %v1572_v23  ;;  %v1688_v34 = vadd.f32 %v1687_v29, %v1681_v27  ;;  %v1620_v37 = vmul.f32 %v5693_v7, %v4673_v8  ;;  %v1627_v4 = vmul.f32 %v5673_v62, %v4680_v21  ;;  %v4867_v56 = vmul.f32 %v4349_v12, %v4740_v45  ;;  %v5694_v62 = vld [vmem:[#allocation59_spill] sm:$0xff] }
 0x12c   : > { %v1706_v42 = vadd.f32 %v1705_v50, %v1698_v2  ;;  %v1600_v26 = vadd.f32 %v1599_v30, %v1593_v5  ;;  %v1728_v55 = vadd.f32 %v1727_v54, %v1720_v49  ;;  %v1741_v0 = vmul.f32 %v4870_v25, %v4727_v11  ;;  %v4910_v27 = vld [vmem:[%s3456_s12 + $0x16] ss:$0 sm:$0xff]  ;;  %v3126_v49 = vld [vmem:[%s3444_s28 + $0x48] sm:$0xff]  ;;  %v4916_v2 = vld [vmem:[%s3456_s12 + $0x1] ss:$0 sm:$0xff] }
 0x12d   : > { %v1695_v8 = vadd.f32 %v1694_v31, %v1688_v34  ;;  %v1748_v12 = vmul.f32 %v4878_v13, %v4787_v3  ;;  %v1755_v50 = vmul.f32 %v4244_v16, %v5694_v62  ;;  %v1724_v40 = vmul.f32 %v4743_v9, %v4837_v17  ;;  %v4893_v16 = vld [vmem:[%s3456_s12 + $0x1c] ss:$0 sm:$0xff]  ;;  %v3122_v31 = vld [vmem:[%s3456_s12 + $0x20] ss:$0 sm:$0xff] }
 0x12e   : > { %1711 = vst [vmem:[#allocation2 + $0x1] sm:$0xff] %v1706_v42  ;;  %v1607_v52 = vadd.f32 %v1606_v61, %v1600_v26  ;;  %v1735_v29 = vadd.f32 %v1734_v60, %v1728_v55  ;;  %v1731_v14 = vmul.f32 %v4683_v38, %v4844_v43  ;;  %v1738_v39 = vmul.f32 %v4688_v10, %v5692_v59  ;;  %v1642_v57 = vld [vmem:[#allocation2 + $0x11] sm:$0xff]  ;;  %v3129_v42 = vld [vmem:[%s3456_s12 + $0x1a] ss:$0 sm:$0xff]  ;;  %v4924_v55 = vld [vmem:[%s3456_s12 + $0x1e] ss:$0 sm:$0xff] }
 0x12f   : > { %v1702_v63 = vadd.f32 %v1701_v47, %v1695_v8  ;;  %v1762_v15 = vmul.f32 %v3120_v18, %v4740_v45  ;;  %v1769_v35 = vmul.f32 %v4893_v16, %v4799_v53  ;;  %v1777_v28 = vmul.f32 %v3122_v31, %v4875_v1  ;;  %v4900_v47 = vld [vmem:[%s3456_s12 + $0xe] ss:$0 sm:$0xff]  ;;  %v4905_v61 = vld [vmem:[%s3456_s12 + $0x12] ss:$0 sm:$0xff]  ;;  %v4929_v8 = vld [vmem:[%s3532_s29] ss:$0 sm:$0xff] }
 0x130   : > { %v1614_v22 = vadd.f32 %v1613_v33, %v1607_v52  ;;  %v1742_v32 = vadd.f32 %v1741_v0, %v1735_v29  ;;  %v1732_v44 = vadd.f32 %v1731_v14, %v1724_v40  ;;  %v1745_v46 = vmul.f32 %v4900_v47, %v4727_v11  ;;  %v3128_v60 = vld [vmem:[%s3444_s28 + $0x50] sm:$0xff]  ;;  %v4937_v18 = vld [vmem:[%s3444_s28 + $0x60] sm:$0xff] }
 0x131   : > { %v1710_v30 = vadd.f32 %v1709_v6, %v1702_v63  ;;  %v1752_v23 = vmul.f32 %v4905_v61, %v4787_v3  ;;  %v1759_v33 = vmul.f32 %v4910_v27, %v5694_v62  ;;  %v1650_v5 = vmul.f32 %v4916_v2, %v3126_v49 }
 0x132   : > { %v1621_v54 = vadd.f32 %v1620_v37, %v1614_v22  ;;  %v1749_v6 = vadd.f32 %v1748_v12, %v1742_v32  ;;  %v1739_v59 = vadd.f32 %v1738_v39, %v1732_v44  ;;  %v1657_v34 = vmul.f32 %v3128_v60, %v4824_v19  ;;  %v3132_v12 = vld [vmem:[%s3444_s28 + $0x58] sm:$0xff]  ;;  %v3133_v39 = vld [vmem:[%s3456_s12 + $0x22] ss:$0 sm:$0xff]  ;;  %v4942_v32 = vld [vmem:[%s3456_s12 + $0x11] ss:$0 sm:$0xff] }
 0x133   : > { %1712 = vst [vmem:[#allocation2 + $0x10] sm:$0xff] %v1710_v30  ;;  %v1766_v26 = vmul.f32 %v3129_v42, %v4740_v45  ;;  %v1773_v0 = vmul.f32 %v4924_v55, %v4799_v53  ;;  %v1651_v37 = vadd.f32 %v4929_v8, %v1650_v5  ;;  %v1664_v40 = vmul.f32 %v3132_v12, %v4832_v51  ;;  %v4947_v30 = vld [vmem:[%s3456_s12 + $0x15] ss:$0 sm:$0xff] }
 0x134   : > { %v1628_v52 = vadd.f32 %v1627_v4, %v1621_v54  ;;  %v1756_v29 = vadd.f32 %v1755_v50, %v1749_v6  ;;  %v1746_v14 = vadd.f32 %v1745_v46, %v1739_v59  ;;  %v1781_v63 = vmul.f32 %v3133_v39, %v4875_v1  ;;  %v5695_v59 = vld [vmem:[#allocation66_spill] sm:$0xff] }
 0x135   : > { %v1658_v31 = vadd.f32 %v1657_v34, %v1651_v37  ;;  %v1671_v22 = vmul.f32 %v5685_v48, %v4655_v24  ;;  %v1678_v44 = vmul.f32 %v4942_v32, %v4727_v11  ;;  %v1685_v4 = vmul.f32 %v4947_v30, %v4787_v3 }
 0x136   : > { %v1636_v50 = vadd.f32 %v4867_v56, %v1628_v52  ;;  %v1763_v46 = vadd.f32 %v1762_v15, %v1756_v29  ;;  %v1753_v49 = vadd.f32 %v1752_v23, %v1746_v14  ;;  %v1792_v5 = vmul.f32 %v4716_v58, %v4844_v43  ;;  %v4962_v56 = vld [vmem:[%s3456_s12 + $0x1d] ss:$0 sm:$0xff] }
 0x137   : > { %v1665_v54 = vadd.f32 %v1664_v40, %v1658_v31  ;;  %v1692_v24 = vmul.f32 %v5693_v7, %v4680_v21  ;;  %v1799_v6 = vmul.f32 %v4603_v36, %v4937_v18  ;;  %v1806_v60 = vmul.f32 %v4662_v20, %v5695_v59  ;;  %v1713_v23 = vld [vmem:[#allocation2] sm:$0xff] }
 0x138   : > { %v1643_v34 = vadd.f32 %v4858_v41, %v1636_v50  ;;  %v1770_v42 = vadd.f32 %v1769_v35, %v1763_v46  ;;  %v1760_v37 = vadd.f32 %v1759_v33, %v1753_v49  ;;  %v1699_v15 = vmul.f32 %v4962_v56, %v4740_v45  ;;  %v4978_v46 = vld [vmem:[%s3456_s12 + $0x21] ss:$0 sm:$0xff] }
 0x139   : > { %v1672_v12 = vadd.f32 %v1671_v22, %v1665_v54  ;;  %v1800_v21 = vadd.f32 %v1799_v6, %v1792_v5  ;;  %v1813_v40 = vmul.f32 %v4870_v25, %v4787_v3  ;;  %v1820_v52 = vmul.f32 %v4878_v13, %v5694_v62 }
 0x13a   : > { %v1644_v41 = vadd.f32 %v1643_v34, %v1642_v57  ;;  %v1778_v35 = vadd.f32 %v1777_v28, %v1770_v42  ;;  %v1767_v33 = vadd.f32 %v1766_v26, %v1760_v37  ;;  %v1796_v29 = vmul.f32 %v4743_v9, %v4844_v43  ;;  %v4983_v57 = vld [vmem:[%s3456_s12 + $0x14] ss:$0 sm:$0xff] }
 0x13b   : > { %v1679_v14 = vadd.f32 %v1678_v44, %v1672_v12  ;;  %v1807_v39 = vadd.f32 %v1806_v60, %v1800_v21  ;;  %v1803_v31 = vmul.f32 %v4683_v38, %v4937_v18  ;;  %v1810_v22 = vmul.f32 %v4688_v10, %v5695_v59  ;;  %v5696_v26 = vld [vmem:[#allocation63_spill] sm:$0xff] }
 0x13c   : > { %2895 = vst [vmem:[%s3641_s30 + $0x88] sm:$0xff] %v1644_v41  ;;  %1783 = vst [vmem:[#allocation2 + $0x1] sm:$0xff] %v1778_v35  ;;  %v1774_v50 = vadd.f32 %v1773_v0, %v1767_v33  ;;  %v1707_v28 = vmul.f32 %v4978_v46, %v4799_v53  ;;  %v1827_v44 = vmul.f32 %v4983_v57, %v5696_v26  ;;  %v1714_v5 = vld [vmem:[#allocation2 + $0x11] sm:$0xff]  ;;  %v3139_v33 = vld [vmem:[%s3444_s28 + $0x60] sm:$0xff] }
 0x13d   : > { %v1841_v49 = vmul.f32 %v4893_v16, %v4875_v1  ;;  %v1686_v54 = vadd.f32 %v1685_v4, %v1679_v14  ;;  %v1814_v6 = vadd.f32 %v1813_v40, %v1807_v39  ;;  %v1804_v59 = vadd.f32 %v1803_v31, %v1796_v29  ;;  %v5000_v40 = vld [vmem:[%s3444_s28 + $0x68] sm:$0xff] }
 0x13e   : > { %v1817_v0 = vmul.f32 %v4900_v47, %v4787_v3  ;;  %v1782_v60 = vadd.f32 %v1781_v63, %v1774_v50  ;;  %v1824_v34 = vmul.f32 %v4905_v61, %v5694_v62  ;;  %v1722_v42 = vmul.f32 %v4916_v2, %v4837_v17 }
 0x13f   : > { %v1729_v37 = vmul.f32 %v4824_v19, %v4844_v43  ;;  %v1693_v12 = vadd.f32 %v1692_v24, %v1686_v54  ;;  %v1821_v21 = vadd.f32 %v1820_v52, %v1814_v6  ;;  %v1811_v41 = vadd.f32 %v1810_v22, %v1804_v59  ;;  %v5697_v59 = vld [vmem:[#allocation15_spill] sm:$0xff] }
 0x140   : > { %v1831_v4 = vmul.f32 %v4910_v27, %v5696_v26  ;;  %1784 = vst [vmem:[#allocation2 + $0x10] sm:$0xff] %v1782_v60  ;;  %v1845_v63 = vmul.f32 %v4924_v55, %v4875_v1  ;;  %v1723_v35 = vadd.f32 %v4929_v8, %v1722_v42  ;;  %v1736_v17 = vmul.f32 %v3139_v33, %v4832_v51 }
 0x141   : > { %v1743_v29 = vmul.f32 %v5685_v48, %v4727_v11  ;;  %v1700_v24 = vadd.f32 %v1699_v15, %v1693_v12  ;;  %v1828_v52 = vadd.f32 %v1827_v44, %v1821_v21  ;;  %v1818_v14 = vadd.f32 %v1817_v0, %v1811_v41  ;;  %v5698_v11 = vld [vmem:[#allocation58_spill] sm:$0xff] }
 0x142   : > { %v1750_v39 = vmul.f32 %v4942_v32, %v4787_v3  ;;  %v1730_v31 = vadd.f32 %v1729_v37, %v1723_v35  ;;  %v1757_v22 = vmul.f32 %v4947_v30, %v5694_v62  ;;  %v1864_v50 = vmul.f32 %v4716_v58, %v4937_v18 }
 0x143   : > { %v1871_v54 = vmul.f32 %v4603_v36, %v5000_v40  ;;  %v1708_v6 = vadd.f32 %v1707_v28, %v1700_v24  ;;  %v1835_v60 = vadd.f32 %v5697_v59, %v1828_v52  ;;  %v1825_v48 = vadd.f32 %v1824_v34, %v1818_v14  ;;  %v1785_v34 = vld [vmem:[#allocation2] sm:$0xff]  ;;  %v5700_v52 = vld [vmem:[#allocation18_spill] sm:$0xff] }
 0x144   : > { %v1878_v15 = vmul.f32 %v4662_v20, %v5698_v11  ;;  %v1737_v44 = vadd.f32 %v1736_v17, %v1730_v31  ;;  %v1764_v0 = vmul.f32 %v5693_v7, %v4740_v45  ;;  %v1885_v37 = vmul.f32 %v4870_v25, %v5694_v62  ;;  %v5699_v17 = vld [vmem:[#allocation8_spill] sm:$0xff] }
 0x145   : > { %v1872_v42 = vadd.f32 %v1871_v54, %v1864_v50  ;;  %v1715_v12 = vadd.f32 %v1713_v23, %v1708_v6  ;;  %v1842_v21 = vadd.f32 %v1841_v49, %v1835_v60  ;;  %v1832_v41 = vadd.f32 %v1831_v4, %v1825_v48  ;;  %v5033_v49 = vld [vmem:[%s3444_s28 + $0xe8] sm:$0xff] }
 0x146   : > { %v1771_v28 = vmul.f32 %v4962_v56, %v4799_v53  ;;  %v1744_v35 = vadd.f32 %v1743_v29, %v1737_v44  ;;  %v1892_v20 = vmul.f32 %v4878_v13, %v5696_v26  ;;  %v1868_v45 = vmul.f32 %v4743_v9, %v4937_v18  ;;  %v5701_v29 = vld [vmem:[#allocation67_spill] sm:$0xff] }
 0x147   : > { %v1879_v33 = vadd.f32 %v1878_v15, %v1872_v42  ;;  %v1716_v7 = vadd.f32 %v1715_v12, %v1714_v5  ;;  %v1850_v24 = vadd.f32 %v5699_v17, %v1842_v21  ;;  %v1839_v23 = vadd.f32 %v5700_v52, %v1832_v41  ;;  %v3140_v41 = vld [vmem:[%s3444_s28 + $0x68] sm:$0xff]  ;;  %v5071_v17 = vld [vmem:[%s3444_s28 + $0xb0] sm:$0xff]  ;;  %v5703_v52 = vld [vmem:[#allocation16_spill] sm:$0xff] }
 0x148   : > { %v1875_v4 = vmul.f32 %v4683_v38, %v5000_v40  ;;  %v1751_v53 = vadd.f32 %v1750_v39, %v1744_v35  ;;  %v1899_v31 = vmul.f32 %v4983_v57, %v5701_v29  ;;  %v1882_v50 = vmul.f32 %v4688_v10, %v5698_v11  ;;  %v1786_v39 = vld [vmem:[#allocation2 + $0x11] sm:$0xff] }
 0x149   : > { %v1886_v14 = vadd.f32 %v1885_v37, %v1879_v33  ;;  %2905 = vst [vmem:[%s3641_s30 + $0x90] sm:$0xff] %v1716_v7  ;;  %1855 = vst [vmem:[#allocation2 + $0x1] sm:$0xff] %v1850_v24  ;;  %v1846_v5 = vadd.f32 %v1845_v63, %v1839_v23  ;;  %v1779_v54 = vmul.f32 %v4978_v46, %v4875_v1  ;;  %v5702_v63 = vld [vmem:[#allocation9_spill] sm:$0xff]  ;;  %v5059_v33 = vld [vmem:[%s3444_s28 + $0xa8] sm:$0xff] }
 0x14a   : > { %v1876_v6 = vadd.f32 %v1875_v4, %v1868_v45  ;;  %v1889_v59 = vmul.f32 %v4900_v47, %v5694_v62  ;;  %v1758_v60 = vadd.f32 %v1757_v22, %v1751_v53  ;;  %v1913_v15 = vmul.f32 %v4893_v16, %v5033_v49  ;;  %v5066_v7 = vld [vmem:[%s3456_s12 + $0xd] ss:$0 sm:$0xff] }
 0x14b   : > { %v1893_v48 = vadd.f32 %v1892_v20, %v1886_v14  ;;  %v1794_v10 = vmul.f32 %v4916_v2, %v4844_v43  ;;  %v1854_v11 = vadd.f32 %v5702_v63, %v1846_v5  ;;  %v1896_v42 = vmul.f32 %v4905_v61, %v5696_v26  ;;  %v5090_v63 = vld [vmem:[%s3444_s28 + $0xd8] sm:$0xff] }
 0x14c   : > { %v1883_v44 = vadd.f32 %v1882_v50, %v1876_v6  ;;  %v1801_v37 = vmul.f32 %v4824_v19, %v4937_v18  ;;  %v1765_v12 = vadd.f32 %v1764_v0, %v1758_v60  ;;  %v1808_v35 = vmul.f32 %v3140_v41, %v4832_v51  ;;  %v5705_v50 = vld [vmem:[#allocation22_spill] sm:$0xff]  ;;  %v5709_v41 = vld [vmem:[#allocation29_spill] sm:$0xff] }
 0x14d   : > { %v1900_v22 = vadd.f32 %v1899_v31, %v1893_v48  ;;  %v1795_v21 = vadd.f32 %v4929_v8, %v1794_v10  ;;  %1856 = vst [vmem:[#allocation2 + $0x10] sm:$0xff] %v1854_v11  ;;  %v1903_v20 = vmul.f32 %v4910_v27, %v5701_v29  ;;  %v1917_v45 = vmul.f32 %v4924_v55, %v5033_v49  ;;  %v5704_v31 = vld [vmem:[#allocation36_spill] sm:$0xff] }
 0x14e   : > { %v1890_v43 = vadd.f32 %v1889_v59, %v1883_v44  ;;  %v1815_v0 = vmul.f32 %v5066_v7, %v4787_v3  ;;  %v1772_v24 = vadd.f32 %v1771_v28, %v1765_v12  ;;  %v1822_v53 = vmul.f32 %v4942_v32, %v5694_v62  ;;  %v5087_v10 = vld [vmem:[%s3456_s12 + $0x19] ss:$0 sm:$0xff]  ;;  %v5706_v44 = vld [vmem:[#allocation6_spill] sm:$0xff] }
 0x14f   : > { %v1907_v23 = vadd.f32 %v5703_v52, %v1900_v22  ;;  %v1802_v4 = vadd.f32 %v1801_v37, %v1795_v21  ;;  %v1829_v29 = vmul.f32 %v4947_v30, %v5696_v26  ;;  %v1951_v5 = vadd.f32 %v5705_v50, %v5704_v31  ;;  %v5707_v37 = vld [vmem:[#allocation10_spill] sm:$0xff]  ;;  %v5708_v21 = vld [vmem:[#allocation51_spill] sm:$0xff] }
 0x150   : > { %v1897_v14 = vadd.f32 %v1896_v42, %v1890_v43  ;;  %v1957_v3 = vmul.f32 %v4870_v25, %v5059_v33  ;;  %v1780_v6 = vadd.f32 %v1779_v54, %v1772_v24  ;;  %v1964_v60 = vmul.f32 %v4878_v13, %v5071_v17  ;;  %v5084_v48 = vld [vmem:[#allocation2] sm:$0xff]  ;;  %v5097_v54 = vld [vmem:[%s3444_s28 + $0xf0] sm:$0xff] }
 0x151   : > { %v1914_v59 = vadd.f32 %v1913_v15, %v1907_v23  ;;  %v1809_v28 = vadd.f32 %v1808_v35, %v1802_v4  ;;  %v1836_v26 = vmul.f32 %v5090_v63, %v5087_v10  ;;  %v1971_v42 = vmul.f32 %v4983_v57, %v5706_v44  ;;  %v5710_v43 = vld [vmem:[#allocation19_spill] sm:$0xff] }
 0x152   : > { %v1904_v62 = vadd.f32 %v1903_v20, %v1897_v14  ;;  %v1958_v11 = vadd.f32 %v1957_v3, %v1951_v5  ;;  %v1787_v15 = vadd.f32 %v1785_v34, %v1780_v6  ;;  %v1955_v35 = vadd.f32 %v5709_v41, %v5708_v21 }
 0x153   : > { %v1922_v12 = vadd.f32 %v5707_v37, %v1914_v59  ;;  %v1816_v22 = vadd.f32 %v1815_v0, %v1809_v28  ;;  %v1961_v52 = vmul.f32 %v4900_v47, %v5059_v33  ;;  %v1968_v23 = vmul.f32 %v4905_v61, %v5071_v17 }
 0x154   : > { %v1911_v20 = vadd.f32 %v5710_v43, %v1904_v62  ;;  %v1965_v24 = vadd.f32 %v1964_v60, %v1958_v11  ;;  %v1788_v4 = vadd.f32 %v1787_v15, %v1786_v39  ;;  %v1985_v0 = vmul.f32 %v4893_v16, %v5097_v54  ;;  %v1858_v6 = vld [vmem:[#allocation2 + $0x11] sm:$0xff]  ;;  %v5712_v62 = vld [vmem:[#allocation17_spill] sm:$0xff] }
 0x155   : > { %1927 = vst [vmem:[#allocation2 + $0x1] sm:$0xff] %v1922_v12  ;;  %v1823_v34 = vadd.f32 %v1822_v53, %v1816_v22  ;;  %v1975_v14 = vmul.f32 %v4910_v27, %v5706_v44  ;;  %v1962_v5 = vadd.f32 %v1961_v52, %v1955_v35  ;;  %v1866_v3 = vmul.f32 %v4916_v2, %v4937_v18  ;;  %v3144_v16 = vld [vmem:[%s3444_s28 + $0x70] sm:$0xff]  ;;  %v5713_v15 = vld [vmem:[#allocation56_spill] sm:$0xff]  ;;  %v3145_v12 = vld [vmem:[%s3444_s28 + $0xe8] sm:$0xff] }
 0x156   : > { %v1918_v31 = vadd.f32 %v1917_v45, %v1911_v20  ;;  %v1972_v50 = vadd.f32 %v1971_v42, %v1965_v24  ;;  %2915 = vst [vmem:[%s3641_s30 + $0x98] sm:$0xff] %v1788_v4  ;;  %v1843_v39 = vmul.f32 %v4962_v56, %v4875_v1  ;;  %v1873_v53 = vmul.f32 %v4824_v19, %v5000_v40  ;;  %v5711_v45 = vld [vmem:[#allocation11_spill] sm:$0xff]  ;;  %v3146_v43 = vld [vmem:[%s3444_s28 + $0xa0] sm:$0xff]  ;;  %v5715_v24 = vld [vmem:[#allocation52_spill] sm:$0xff] }
 0x157   : > { %v1830_v59 = vadd.f32 %v1829_v29, %v1823_v34  ;;  %v1880_v28 = vmul.f32 %v3144_v16, %v4832_v51  ;;  %v1969_v42 = vadd.f32 %v1968_v23, %v1962_v5  ;;  %v1867_v18 = vadd.f32 %v4929_v8, %v1866_v3  ;;  %v5714_v29 = vld [vmem:[#allocation21_spill] sm:$0xff]  ;;  %v3147_v4 = vld [vmem:[%s3444_s28 + $0x68] sm:$0xff]  ;;  %v5718_v5 = vld [vmem:[#allocation20_spill] sm:$0xff] }
 0x158   : > { %v1926_v60 = vadd.f32 %v5711_v45, %v1918_v31  ;;  %v1979_v11 = vadd.f32 %v5712_v62, %v1972_v50  ;;  %v2041_v37 = vadd.f32 %v5714_v29, %v5713_v15  ;;  %v1851_v40 = vmul.f32 %v3145_v12, %v4978_v46  ;;  %v5716_v52 = vld [vmem:[#allocation53_spill] sm:$0xff]  ;;  %v3148_v31 = vld [vmem:[%s3444_s28 + $0x70] sm:$0xff]  ;;  %v5146_v45 = vld [vmem:[%s3444_s28 + $0x88] sm:$0xff] }
 0x159   : > { %v1837_v1 = vadd.f32 %v1836_v26, %v1830_v59  ;;  %v1989_v22 = vmul.f32 %v4924_v55, %v5097_v54  ;;  %v1976_v41 = vadd.f32 %v1975_v14, %v1969_v42  ;;  %v1874_v35 = vadd.f32 %v1873_v53, %v1867_v18  ;;  %v3149_v53 = vld [vmem:[%s3444_s28 + $0xa8] sm:$0xff] }
 0x15a   : > { %1928 = vst [vmem:[#allocation2 + $0x10] sm:$0xff] %v1926_v60  ;;  %v1986_v21 = vadd.f32 %v1985_v0, %v1979_v11  ;;  %v1887_v20 = vmul.f32 %v3146_v43, %v5066_v7  ;;  %v5133_v23 = vadd.f32 %v5716_v52, %v5715_v24  ;;  %v1938_v34 = vmul.f32 %v3147_v4, %v4916_v2  ;;  %v5717_v0 = vld [vmem:[#allocation12_spill] sm:$0xff]  ;;  %v5719_v18 = vld [vmem:[#allocation14_spill] sm:$0xff]  ;;  %v5720_v24 = vld [vmem:[#allocation13_spill] sm:$0xff] }
 0x15b   : > { %v1844_v26 = vadd.f32 %v1843_v39, %v1837_v1  ;;  %v1945_v55 = vmul.f32 %v3148_v31, %v4824_v19  ;;  %v1983_v3 = vadd.f32 %v5718_v5, %v1976_v41  ;;  %v1881_v59 = vadd.f32 %v1880_v28, %v1874_v35  ;;  %v3151_v11 = vld [vmem:[%s3444_s28 + $0x78] sm:$0xff]  ;;  %v3152_v1 = vld [vmem:[%s3444_s28 + $0xb0] sm:$0xff]  ;;  %v5162_v35 = vld [vmem:[%s3444_s28 + $0xe0] sm:$0xff] }
 0x15c   : > { %v5139_v50 = vld [vmem:[#allocation2] sm:$0xff]  ;;  %v1994_v14 = vadd.f32 %v5717_v0, %v1986_v21  ;;  %v1894_v16 = vmul.f32 %v3149_v53, %v4942_v32  ;;  %v5150_v39 = vmul.f32 %v5146_v45, %v4743_v9  ;;  %v1939_v62 = vadd.f32 %v4929_v8, %v1938_v34 }
 0x15d   : > { %v1852_v60 = vadd.f32 %v1851_v40, %v1844_v26  ;;  %v1952_v42 = vmul.f32 %v3151_v11, %v4832_v51  ;;  %v5156_v15 = vadd.f32 %v5719_v18, %v2041_v37  ;;  %v1990_v28 = vadd.f32 %v1989_v22, %v1983_v3  ;;  %v5179_v3 = vld [vmem:[%s3444_s28 + $0xb0] sm:$0xff]  ;;  %v3156_v53 = vld [vmem:[%s3444_s28 + $0x80] sm:$0xff] }
 0x15e   : > { %1999 = vst [vmem:[#allocation2 + $0x1] sm:$0xff] %v1994_v14  ;;  %v1888_v29 = vadd.f32 %v1887_v20, %v1881_v59  ;;  %v1901_v21 = vmul.f32 %v3152_v1, %v4947_v30  ;;  %v1908_v40 = vmul.f32 %v5162_v35, %v5087_v10  ;;  %v1946_v43 = vadd.f32 %v1945_v55, %v1939_v62  ;;  %v3154_v14 = vld [vmem:[%s3444_s28 + $0xf0] sm:$0xff] }
 0x15f   : > { %v1859_v41 = vadd.f32 %v5084_v48, %v1852_v60  ;;  %v1959_v37 = vmul.f32 %v5066_v7, %v5059_v33  ;;  %v1998_v52 = vadd.f32 %v5720_v24, %v1990_v28  ;;  %v2010_v20 = vmul.f32 %v3148_v31, %v4916_v2  ;;  %v5722_v24 = vld [vmem:[#allocation30_spill] sm:$0xff] }
 0x160   : > { %v1895_v22 = vadd.f32 %v1894_v16, %v1888_v29  ;;  %v2017_v26 = vmul.f32 %v3151_v11, %v4824_v19  ;;  %v1915_v34 = vmul.f32 %v4962_v56, %v5033_v49  ;;  %v1953_v0 = vadd.f32 %v1952_v42, %v1946_v43  ;;  %v5190_v11 = vld [vmem:[%s3444_s28 + $0xb8] sm:$0xff] }
 0x161   : > { %v1930_v48 = vld [vmem:[#allocation2 + $0x11] sm:$0xff]  ;;  %v1860_v4 = vadd.f32 %v1859_v41, %v1858_v6  ;;  %v1966_v55 = vmul.f32 %v4942_v32, %v5071_v17  ;;  %v1923_v5 = vmul.f32 %v3154_v14, %v4978_v46  ;;  %v2011_v31 = vadd.f32 %v4929_v8, %v2010_v20 }
 0x162   : > { %2000 = vst [vmem:[#allocation2 + $0x10] sm:$0xff] %v1998_v52  ;;  %v1902_v33 = vadd.f32 %v1901_v21, %v1895_v22  ;;  %v2024_v6 = vmul.f32 %v5179_v3, %v5066_v7  ;;  %v1960_v59 = vadd.f32 %v1959_v37, %v1953_v0  ;;  %v1973_v49 = vmul.f32 %v4947_v30, %v5706_v44  ;;  %v5721_v21 = vld [vmem:[#allocation47_spill] sm:$0xff]  ;;  %v3159_v0 = vld [vmem:[%s3444_s28 + $0xf8] sm:$0xff] }
 0x163   : > { %2925 = vst [vmem:[%s3641_s30 + $0xa0] sm:$0xff] %v1860_v4  ;;  %v1980_v17 = vmul.f32 %v3145_v12, %v5087_v10  ;;  %v2060_v16 = vmul.f32 %v3156_v53, %v4824_v19  ;;  %v2018_v62 = vadd.f32 %v2017_v26, %v2011_v31  ;;  %v2031_v42 = vmul.f32 %v5190_v11, %v4942_v32  ;;  %v3158_v22 = vld [vmem:[%s3444_s28 + $0x90] sm:$0xff] }
 0x164   : > { %v1909_v60 = vadd.f32 %v1908_v40, %v1902_v33  ;;  %v2096_v18 = vmul.f32 %v3156_v53, %v4916_v2  ;;  %v1967_v29 = vadd.f32 %v1966_v55, %v1960_v59  ;;  %v2038_v44 = vmul.f32 %v3154_v14, %v5087_v10 }
 0x165   : > { %v2001_v28 = vld [vmem:[#allocation2] sm:$0xff]  ;;  %v2067_v12 = vmul.f32 %v5146_v45, %v4832_v51  ;;  %v2103_v1 = vmul.f32 %v5146_v45, %v4824_v19  ;;  %v2025_v40 = vadd.f32 %v2024_v6, %v2018_v62  ;;  %v2061_v43 = vadd.f32 %v4929_v8, %v2060_v16 }
 0x166   : > { %2049 = vst [vmem:[#allocation2 + $0x1] sm:$0xff] %v5721_v21  ;;  %v1916_v41 = vadd.f32 %v1915_v34, %v1909_v60  ;;  %v2097_v37 = vadd.f32 %v4929_v8, %v2096_v18  ;;  %v2113_v52 = vadd.f32 %v5722_v24, %v5133_v23  ;;  %v2155_v10 = vmul.f32 %v3158_v22, %v4683_v38  ;;  %v3160_v6 = vld [vmem:[%s3444_s28 + $0xc0] sm:$0xff]  ;;  %v5724_v60 = vld [vmem:[#allocation38_spill] sm:$0xff] }
 0x167   : > { %v1974_v20 = vadd.f32 %v1973_v49, %v1967_v29  ;;  %v1987_v26 = vmul.f32 %v4962_v56, %v5097_v54  ;;  %v1995_v34 = vmul.f32 %v3159_v0, %v4978_v46  ;;  %v2032_v55 = vadd.f32 %v2031_v42, %v2025_v40  ;;  %v5723_v16 = vld [vmem:[#allocation41_spill] sm:$0xff]  ;;  %v3162_v42 = vld [vmem:[%s3444_s28 + $0xc8] sm:$0xff] }
 0x168   : > { %v1924_v4 = vadd.f32 %v1923_v5, %v1916_v41  ;;  %v2045_v33 = vmul.f32 %v3159_v0, %v4962_v56  ;;  %v2074_v23 = vmul.f32 %v3160_v6, %v4942_v32  ;;  %v2104_v59 = vadd.f32 %v2103_v1, %v2097_v37  ;;  %v5725_v29 = vld [vmem:[#allocation57_spill] sm:$0xff] }
 0x169   : > { %v2002_v14 = vld [vmem:[#allocation2 + $0x11] sm:$0xff]  ;;  %v1981_v31 = vadd.f32 %v1980_v17, %v1974_v20  ;;  %v2110_v49 = vmul.f32 %v3158_v22, %v4832_v51  ;;  %v2039_v5 = vadd.f32 %v2038_v44, %v2032_v55  ;;  %v2068_v53 = vadd.f32 %v2067_v12, %v2061_v43  ;;  %v5222_v17 = vld [vmem:[%s3444_s28 + $0xa0] sm:$0xff] }
 0x16a   : > { %2050 = vst [vmem:[#allocation2 + $0x10] sm:$0xff] %v5156_v15  ;;  %v1931_v54 = vadd.f32 %v5139_v50, %v1924_v4  ;;  %v2146_v46 = vmul.f32 %v5146_v45, %v4916_v2  ;;  %v2166_v56 = vadd.f32 %v5724_v60, %v5723_v16  ;;  %v2251_v62 = vmul.f32 %v5222_v17, %v4603_v36  ;;  %v5726_v36 = vld [vmem:[#allocation28_spill] sm:$0xff]  ;;  %v5730_v16 = vld [vmem:[#allocation33_spill] sm:$0xff] }
 0x16b   : > { %v2126_v18 = vmul.f32 %v3162_v42, %v4905_v61  ;;  %v1988_v15 = vadd.f32 %v1987_v26, %v1981_v31  ;;  %v2120_v50 = vadd.f32 %v5725_v29, %v2113_v52  ;;  %v2156_v44 = vadd.f32 %v2155_v10, %v5150_v39  ;;  %v5727_v39 = vld [vmem:[#allocation45_spill] sm:$0xff]  ;;  %v5239_v26 = vld [vmem:[%s3444_s28 + $0xd0] sm:$0xff] }
 0x16c   : > { %v1932_v12 = vadd.f32 %v1931_v54, %v1930_v48  ;;  %v2046_v45 = vadd.f32 %v2045_v33, %v2039_v5  ;;  %v2081_v41 = vmul.f32 %v3162_v42, %v4947_v30  ;;  %v2111_v40 = vadd.f32 %v2110_v49, %v2104_v59  ;;  %v5728_v48 = vld [vmem:[#allocation37_spill] sm:$0xff]  ;;  %v5729_v33 = vld [vmem:[#allocation31_spill] sm:$0xff] }
 0x16d   : > { %v2051_v1 = vld [vmem:[#allocation2] sm:$0xff]  ;;  %v1996_v21 = vadd.f32 %v1995_v34, %v1988_v15  ;;  %v2117_v43 = vmul.f32 %v3160_v6, %v5066_v7  ;;  %v2075_v24 = vadd.f32 %v2074_v23, %v2068_v53  ;;  %v2147_v52 = vadd.f32 %v4929_v8, %v2146_v46  ;;  %v3164_v23 = vld [vmem:[%s3444_s28 + $0x98] sm:$0xff]  ;;  %v5731_v29 = vld [vmem:[#allocation39_spill] sm:$0xff] }
 0x16e   : > { %2935 = vst [vmem:[%s3641_s30 + $0xa8] sm:$0xff] %v1932_v12  ;;  %2085 = vst [vmem:[#allocation2 + $0x1] sm:$0xff] %v5726_v36  ;;  %v2053_v37 = vadd.f32 %v2051_v1, %v2046_v45  ;;  %v2153_v20 = vmul.f32 %v3158_v22, %v4824_v19  ;;  %v2130_v10 = vadd.f32 %v5728_v48, %v5727_v39  ;;  %v5733_v12 = vld [vmem:[#allocation23_spill] sm:$0xff] }
 0x16f   : > { %v2133_v4 = vmul.f32 %v5239_v26, %v4910_v27  ;;  %v2169_v0 = vmul.f32 %v3162_v42, %v4900_v47  ;;  %v2003_v34 = vadd.f32 %v2001_v28, %v1996_v21  ;;  %v2127_v55 = vadd.f32 %v2126_v18, %v2120_v50  ;;  %v5734_v21 = vld [vmem:[#allocation48_spill] sm:$0xff] }
 0x170   : > { %v2163_v31 = vadd.f32 %v5729_v33, %v2156_v44  ;;  %v2198_v6 = vmul.f32 %v3158_v22, %v4743_v9  ;;  %v2205_v59 = vmul.f32 %v3164_v23, %v4683_v38  ;;  %v2118_v5 = vadd.f32 %v2117_v43, %v2111_v40  ;;  %v5732_v44 = vld [vmem:[#allocation46_spill] sm:$0xff] }
 0x171   : > { %v2052_v49 = vld [vmem:[#allocation2 + $0x11] sm:$0xff]  ;;  %v2004_v54 = vadd.f32 %v2003_v34, %v2002_v14  ;;  %v2124_v53 = vmul.f32 %v3162_v42, %v4942_v32  ;;  %v2160_v46 = vmul.f32 %v3164_v23, %v4832_v51  ;;  %v2082_v60 = vadd.f32 %v2081_v41, %v2075_v24  ;;  %v5264_v43 = vld [vmem:[%s3444_s28 + $0xe8] sm:$0xff] }
 0x172   : > { %2086 = vst [vmem:[#allocation2 + $0x10] sm:$0xff] %v5730_v16  ;;  %v2054_v28 = vadd.f32 %v2053_v37, %v2052_v49  ;;  %v2154_v18 = vadd.f32 %v2153_v20, %v2147_v52  ;;  %v2196_v15 = vmul.f32 %v3158_v22, %v4916_v2  ;;  %v2173_v50 = vadd.f32 %v5731_v29, %v2166_v56  ;;  %v5735_v34 = vld [vmem:[#allocation40_spill] sm:$0xff] }
 0x173   : > { %v2209_v45 = vadd.f32 %v5733_v12, %v5732_v44  ;;  %v2265_v14 = vmul.f32 %v5090_v63, %v4870_v25  ;;  %v5259_v1 = vmul.f32 %v5162_v35, %v4878_v13  ;;  %2945 = vst [vmem:[%s3641_s30 + $0xb0] sm:$0xff] %v2004_v54  ;;  %v2252_v40 = vadd.f32 %v2251_v62, %v5734_v21  ;;  %v5739_v12 = vld [vmem:[#allocation25_spill] sm:$0xff] }
 0x174   : > { %v2170_v41 = vadd.f32 %v2169_v0, %v2163_v31  ;;  %v2176_v22 = vmul.f32 %v5239_v26, %v4905_v61  ;;  %v2206_v56 = vadd.f32 %v2205_v59, %v2198_v6  ;;  %2952 = vst [vmem:[%s3641_s30 + $0xb8] sm:$0xff] %v2054_v28  ;;  %v2134_v36 = vadd.f32 %v2133_v4, %v2127_v55  ;;  %v5736_v31 = vld [vmem:[#allocation42_spill] sm:$0xff]  ;;  %v5737_v59 = vld [vmem:[#allocation32_spill] sm:$0xff] }
 0x175   : > { %v2087_v37 = vld [vmem:[#allocation2] sm:$0xff]  ;;  %v2125_v24 = vadd.f32 %v2124_v53, %v2118_v5  ;;  %v2131_v52 = vmul.f32 %v5239_v26, %v4947_v30  ;;  %v2167_v20 = vmul.f32 %v3162_v42, %v5066_v7  ;;  %v2161_v62 = vadd.f32 %v2160_v46, %v2154_v18 }
 0x176   : > { %2135 = vst [vmem:[#allocation2 + $0x1] sm:$0xff] %v2130_v10  ;;  %v2089_v39 = vadd.f32 %v2087_v37, %v2082_v60  ;;  %v2197_v48 = vadd.f32 %v4929_v8, %v2196_v15  ;;  %v2203_v0 = vmul.f32 %v3164_v23, %v4824_v19  ;;  %v2180_v33 = vadd.f32 %v5735_v34, %v2173_v50  ;;  %v5289_v5 = vld [vmem:[%s3444_s28 + $0xe0] sm:$0xff] }
 0x177   : > { %v2216_v6 = vadd.f32 %v5736_v31, %v2209_v45  ;;  %v5278_v4 = vmul.f32 %v4983_v57, %v5264_v43  ;;  %v2183_v55 = vmul.f32 %v5090_v63, %v4910_v27  ;;  %v2213_v42 = vadd.f32 %v5737_v59, %v2206_v56  ;;  %v5740_v31 = vld [vmem:[#allocation44_spill] sm:$0xff] }
 0x178   : > { %v2219_v10 = vmul.f32 %v5239_v26, %v4900_v47  ;;  %v2248_v49 = vmul.f32 %v3164_v23, %v4743_v9  ;;  %v2255_v54 = vmul.f32 %v5222_v17, %v4683_v38  ;;  %v2177_v53 = vadd.f32 %v2176_v22, %v2170_v41  ;;  %v5738_v38 = vld [vmem:[#allocation43_spill] sm:$0xff]  ;;  %v5301_v41 = vld [vmem:[%s3456_s12 + $0x4] ss:$0 sm:$0xff] }
 0x179   : > { %v2088_v46 = vld [vmem:[#allocation2 + $0x11] sm:$0xff]  ;;  %v2132_v16 = vadd.f32 %v2131_v52, %v2125_v24  ;;  %v2174_v28 = vmul.f32 %v5239_v26, %v4942_v32  ;;  %v2210_v60 = vmul.f32 %v5222_v17, %v4832_v51  ;;  %v2168_v15 = vadd.f32 %v2167_v20, %v2161_v62  ;;  %v5304_v22 = vld [vmem:[%s3444_s28 + $0xa8] sm:$0xff] }
 0x17a   : > { %2136 = vst [vmem:[#allocation2 + $0x10] sm:$0xff] %v2134_v36  ;;  %v2090_v18 = vadd.f32 %v2089_v39, %v2088_v46  ;;  %v2204_v29 = vadd.f32 %v2203_v0, %v2197_v48  ;;  %v2246_v50 = vmul.f32 %v3164_v23, %v4916_v2  ;;  %v2223_v44 = vadd.f32 %v5738_v38, %v2216_v6  ;;  %v5742_v38 = vld [vmem:[#allocation26_spill] sm:$0xff] }
 0x17b   : > { %v2259_v45 = vadd.f32 %v5739_v12, %v2252_v40  ;;  %v2294_v21 = vmul.f32 %v5222_v17, %v4716_v58  ;;  %v2301_v56 = vmul.f32 %v5304_v22, %v5301_v41  ;;  %v2315_v36 = vmul.f32 %v4870_v25, %v5289_v5  ;;  %v5342_v12 = vld [vmem:[%s3456_s12] ss:$0 sm:$0xff] }
 0x17c   : > { %v2220_v37 = vadd.f32 %v2219_v10, %v2213_v42  ;;  %v2226_v23 = vmul.f32 %v5090_v63, %v4905_v61  ;;  %v2256_v24 = vadd.f32 %v2255_v54, %v2248_v49  ;;  %2957 = vst [vmem:[%s3641_s30 + $0xc0] sm:$0xff] %v2090_v18  ;;  %v2184_v40 = vadd.f32 %v2183_v55, %v2177_v53  ;;  %v5741_v10 = vld [vmem:[#allocation34_spill] sm:$0xff] }
 0x17d   : > { %v2137_v52 = vld [vmem:[#allocation2] sm:$0xff]  ;;  %v2181_v58 = vmul.f32 %v5090_v63, %v4947_v30  ;;  %v2217_v20 = vmul.f32 %v5239_v26, %v5066_v7  ;;  %v2253_v39 = vmul.f32 %v5222_v17, %v4824_v19  ;;  %v2175_v48 = vadd.f32 %v2174_v28, %v2168_v15 }
 0x17e   : > { %2185 = vst [vmem:[#allocation2 + $0x1] sm:$0xff] %v2180_v33  ;;  %v2139_v62 = vadd.f32 %v2137_v52, %v2132_v16  ;;  %v2211_v0 = vadd.f32 %v2210_v60, %v2204_v29  ;;  %v2247_v34 = vadd.f32 %v4929_v8, %v2246_v50  ;;  %v2230_v6 = vadd.f32 %v5740_v31, %v2223_v44  ;;  %v5329_v54 = vld [vmem:[%s3456_s12 + $0x6] ss:$0 sm:$0xff] }
 0x17f   : > { %v2266_v55 = vadd.f32 %v2265_v14, %v2259_v45  ;;  %v2302_v59 = vadd.f32 %v2301_v56, %v2294_v21  ;;  %v2233_v42 = vmul.f32 %v5162_v35, %v4910_v27  ;;  %v2263_v49 = vadd.f32 %v5741_v10, %v2256_v24 }
 0x180   : > { %v2269_v26 = vmul.f32 %v5090_v63, %v4900_v47  ;;  %v2298_v33 = vmul.f32 %v5222_v17, %v4743_v9  ;;  %v2305_v53 = vmul.f32 %v5329_v54, %v5304_v22  ;;  %v2227_v46 = vadd.f32 %v2226_v23, %v2220_v37 }
 0x181   : > { %v2138_v14 = vld [vmem:[#allocation2 + $0x11] sm:$0xff]  ;;  %v2224_v16 = vmul.f32 %v5090_v63, %v4942_v32  ;;  %v2260_v28 = vmul.f32 %v5304_v22, %v4832_v51  ;;  %v2296_v60 = vmul.f32 %v5222_v17, %v4916_v2  ;;  %v2182_v9 = vadd.f32 %v2181_v58, %v2175_v48 }
 0x182   : > { %2186 = vst [vmem:[#allocation2 + $0x10] sm:$0xff] %v2184_v40  ;;  %v2140_v18 = vadd.f32 %v2139_v62, %v2138_v14  ;;  %v2218_v15 = vadd.f32 %v2217_v20, %v2211_v0  ;;  %v2254_v29 = vadd.f32 %v2253_v39, %v2247_v34  ;;  %v2273_v50 = vadd.f32 %v5259_v1, %v2266_v55 }
 0x183   : > { %v2309_v44 = vadd.f32 %v5742_v38, %v2302_v59  ;;  %v2344_v45 = vmul.f32 %v5342_v12, %v5304_v22  ;;  %v2351_v21 = vmul.f32 %v5301_v41, %v5179_v3  ;;  %v2322_v17 = vmul.f32 %v4878_v13, %v5264_v43  ;;  %v5364_v59 = vld [vmem:[%s3444_s28 + $0xf0] sm:$0xff] }
 0x184   : > { %v2270_v56 = vadd.f32 %v2269_v26, %v2263_v49  ;;  %v2276_v37 = vmul.f32 %v5162_v35, %v4905_v61  ;;  %v2306_v23 = vadd.f32 %v2305_v53, %v2298_v33  ;;  %2964 = vst [vmem:[%s3641_s30 + $0xc8] sm:$0xff] %v2140_v18  ;;  %v2234_v1 = vadd.f32 %v2233_v42, %v2227_v46  ;;  %v3170_v18 = vld [vmem:[%s3456_s12 + $0xa] ss:$0 sm:$0xff] }
 0x185   : > { %v2187_v24 = vld [vmem:[#allocation2] sm:$0xff]  ;;  %v2231_v40 = vmul.f32 %v5162_v35, %v4947_v30  ;;  %v2267_v52 = vmul.f32 %v5090_v63, %v5066_v7  ;;  %v2303_v58 = vmul.f32 %v5304_v22, %v4824_v19  ;;  %v2225_v39 = vadd.f32 %v2224_v16, %v2218_v15 }
 0x186   : > { %2235 = vst [vmem:[#allocation2 + $0x1] sm:$0xff] %v2230_v6  ;;  %v2189_v20 = vadd.f32 %v2187_v24, %v2182_v9  ;;  %v2261_v62 = vadd.f32 %v2260_v28, %v2254_v29  ;;  %v2297_v48 = vadd.f32 %v4929_v8, %v2296_v60  ;;  %v2280_v0 = vadd.f32 %v5278_v4, %v2273_v50  ;;  %v5369_v6 = vld [vmem:[%s3456_s12 + $0x2] ss:$0 sm:$0xff]  ;;  %v5744_v29 = vld [vmem:[#allocation27_spill] sm:$0xff] }
 0x187   : > { %v2316_v34 = vadd.f32 %v2315_v36, %v2309_v44  ;;  %v2352_v31 = vadd.f32 %v2351_v21, %v2344_v45  ;;  %v2283_v55 = vmul.f32 %v4910_v27, %v5264_v43  ;;  %v2277_v63 = vadd.f32 %v2276_v37, %v2270_v56  ;;  %v5743_v36 = vld [vmem:[#allocation35_spill] sm:$0xff] }
 0x188   : > { %v2319_v42 = vmul.f32 %v4900_v47, %v5289_v5  ;;  %v2348_v10 = vmul.f32 %v5369_v6, %v5304_v22  ;;  %v2355_v4 = vmul.f32 %v5329_v54, %v5179_v3  ;;  %v2313_v49 = vadd.f32 %v5743_v36, %v2306_v23 }
 0x189   : > { %v2188_v26 = vld [vmem:[#allocation2 + $0x11] sm:$0xff]  ;;  %v2274_v33 = vmul.f32 %v5162_v35, %v4942_v32  ;;  %v2310_v53 = vmul.f32 %v5179_v3, %v4832_v51  ;;  %v2346_v46 = vmul.f32 %v5304_v22, %v4916_v2  ;;  %v2232_v16 = vadd.f32 %v2231_v40, %v2225_v39 }
 0x18a   : > { %2236 = vst [vmem:[#allocation2 + $0x10] sm:$0xff] %v2234_v1  ;;  %v2190_v14 = vadd.f32 %v2189_v20, %v2188_v26  ;;  %v2268_v28 = vadd.f32 %v2267_v52, %v2261_v62  ;;  %v2304_v60 = vadd.f32 %v2303_v58, %v2297_v48  ;;  %v2362_v9 = vmul.f32 %v3170_v18, %v5190_v11  ;;  %v5406_v48 = vld [vmem:[%s3444_s28 + $0xf8] sm:$0xff] }
 0x18b   : > { %v2329_v15 = vmul.f32 %v4983_v57, %v5364_v59  ;;  %v2359_v35 = vadd.f32 %v5744_v29, %v2352_v31  ;;  %v2365_v50 = vmul.f32 %v4870_v25, %v5264_v43  ;;  %v2323_v38 = vadd.f32 %v2322_v17, %v2316_v34 }
 0x18c   : > { %v2284_v44 = vadd.f32 %v2283_v55, %v2277_v63  ;;  %v2326_v22 = vmul.f32 %v4905_v61, %v5264_v43  ;;  %v2356_v45 = vadd.f32 %v2355_v4, %v2348_v10  ;;  %2971 = vst [vmem:[%s3641_s30 + $0xd0] sm:$0xff] %v2190_v14  ;;  %v2320_v21 = vadd.f32 %v2319_v42, %v2313_v49 }
 0x18d   : > { %v2237_v56 = vld [vmem:[#allocation2] sm:$0xff]  ;;  %v2281_v37 = vmul.f32 %v4947_v30, %v5264_v43  ;;  %v2317_v23 = vmul.f32 %v5066_v7, %v5289_v5  ;;  %v2353_v1 = vmul.f32 %v5179_v3, %v4824_v19  ;;  %v2275_v24 = vadd.f32 %v2274_v33, %v2268_v28 }
 0x18e   : > { %2285 = vst [vmem:[#allocation2 + $0x1] sm:$0xff] %v2280_v0  ;;  %v2239_v17 = vadd.f32 %v2237_v56, %v2232_v16  ;;  %v2311_v40 = vadd.f32 %v2310_v53, %v2304_v60  ;;  %v2347_v52 = vadd.f32 %v4929_v8, %v2346_v46  ;;  %v2372_v58 = vmul.f32 %v4878_v13, %v5364_v59 }
 0x18f   : > { %v2330_v20 = vadd.f32 %v2329_v15, %v2323_v38  ;;  %v2366_v39 = vadd.f32 %v2365_v50, %v2359_v35  ;;  %v2333_v62 = vmul.f32 %v4910_v27, %v5364_v59  ;;  %v2369_v5 = vmul.f32 %v4900_v47, %v5264_v43 }
 0x190   : > { %v2327_v19 = vadd.f32 %v2326_v22, %v2320_v21  ;;  %v2363_v0 = vadd.f32 %v2362_v9, %v2356_v45  ;;  %v2324_v31 = vmul.f32 %v4942_v32, %v5264_v43  ;;  %v2360_v55 = vmul.f32 %v5190_v11, %v4832_v51 }
 0x191   : > { %v2238_v34 = vld [vmem:[#allocation2 + $0x11] sm:$0xff]  ;;  %v2282_v42 = vadd.f32 %v2281_v37, %v2275_v24  ;;  %v2318_v10 = vadd.f32 %v2317_v23, %v2311_v40  ;;  %v2354_v4 = vadd.f32 %v2353_v1, %v2347_v52  ;;  %v2373_v36 = vadd.f32 %v2372_v58, %v2366_v39 }
 0x192   : > { %2286 = vst [vmem:[#allocation2 + $0x10] sm:$0xff] %v2284_v44  ;;  %v2240_v63 = vadd.f32 %v2239_v17, %v2238_v34  ;;  %v2379_v49 = vmul.f32 %v4983_v57, %v5406_v48  ;;  %v2394_v26 = vmul.f32 %v5342_v12, %v5179_v3  ;;  %v2401_v33 = vmul.f32 %v5301_v41, %v5190_v11 }
 0x193   : > { %v2334_v53 = vadd.f32 %v2333_v62, %v2327_v19  ;;  %v2370_v46 = vadd.f32 %v2369_v5, %v2363_v0  ;;  %v2376_v51 = vmul.f32 %v4905_v61, %v5364_v59  ;;  %v2331_v16 = vmul.f32 %v4947_v30, %v5364_v59 }
 0x194   : > { %2978 = vst [vmem:[%s3641_s30 + $0xd8] sm:$0xff] %v2240_v63  ;;  %v2325_v60 = vadd.f32 %v2324_v31, %v2318_v10  ;;  %v2361_v57 = vadd.f32 %v2360_v55, %v2354_v4  ;;  %v2367_v12 = vmul.f32 %v5066_v7, %v5264_v43  ;;  %v2380_v18 = vadd.f32 %v2379_v49, %v2373_v36  ;;  %v2537_v10 = vld [vmem:[%s3641_s30 + $0x20] sm:$0xff] (%p3343_p10)  ;;  %v2539_v4 = vld [vmem:[%s3641_s30 + $0x28] sm:$0xff] (%p3343_p10)  ;;  %v2541_v36 = vld [vmem:[%s3641_s30 + $0x30] sm:$0xff] (%p3343_p10) }
 0x195   : > { %v2287_v14 = vld [vmem:[#allocation2] sm:$0xff]  ;;  %v2402_v41 = vadd.f32 %v2401_v33, %v2394_v26  ;;  %v2408_v9 = vmul.f32 %v4870_v25, %v5364_v59  ;;  %v2383_v15 = vmul.f32 %v4910_v27, %v5406_v48  ;;  %v2377_v29 = vadd.f32 %v2376_v51, %v2370_v46  ;;  %v2545_v26 = vld [vmem:[%s3641_s30 + $0x40] sm:$0xff] (%p3343_p10)  ;;  %v2547_v33 = vld [vmem:[%s3641_s30 + $0x48] sm:$0xff] (%p3343_p10)  ;;  %2538 = vst [vmem:[%s5472_s27 + $0x40] sm:$0xff] (%p3343_p10), %v2537_v10 }
 0x196   : > { %2335 = vst [vmem:[#allocation2 + $0x1] sm:$0xff] %v2330_v20  ;;  %v2289_v28 = vadd.f32 %v2287_v14, %v2282_v42  ;;  %v2398_v35 = vmul.f32 %v5369_v6, %v5179_v3  ;;  %v2405_v50 = vmul.f32 %v5329_v54, %v5190_v11  ;;  %v2374_v43 = vmul.f32 %v4942_v32, %v5364_v59  ;;  %v2543_v49 = vld [vmem:[%s3641_s30 + $0x38] sm:$0xff] (%p3343_p10)  ;;  %v2553_v51 = vld [vmem:[%s3641_s30 + $0x60] sm:$0xff] (%p3343_p10)  ;;  %v2555_v14 = vld [vmem:[%s3641_s30 + $0x68] sm:$0xff] (%p3343_p10) }
 0x197   : > { %v2332_v22 = vadd.f32 %v2331_v16, %v2325_v60  ;;  %v2368_v45 = vadd.f32 %v2367_v12, %v2361_v57  ;;  %v2396_v25 = vmul.f32 %v5179_v3, %v4916_v2  ;;  %v2409_v27 = vadd.f32 %v2408_v9, %v2402_v41  ;;  %v3171_v3 = vld [vmem:[%s3456_s12 + $0x5] ss:$0 sm:$0xff]  ;;  %2540 = vst [vmem:[%s5472_s27 + $0x50] sm:$0xff] (%p3343_p10), %v2539_v4  ;;  %v2557_v16 = vld [vmem:[%s3641_s30 + $0x70] sm:$0xff] (%p3343_p10)  ;;  %v2563_v57 = vld [vmem:[%s3641_s30 + $0x88] sm:$0xff] (%p3343_p10) }
 0x198   : > { %v2415_v21 = vmul.f32 %v4878_v13, %v5406_v48  ;;  %v2384_v6 = vadd.f32 %v2383_v15, %v2377_v29  ;;  %v2406_v56 = vadd.f32 %v2405_v50, %v2398_v35  ;;  %v2412_v54 = vmul.f32 %v4900_v47, %v5364_v59  ;;  %v2551_v46 = vld [vmem:[%s3641_s30 + $0x58] sm:$0xff] (%p3343_p10)  ;;  %2542 = vst [vmem:[%s5472_s27 + $0x60] sm:$0xff] (%p3343_p10), %v2541_v36  ;;  %v2561_v60 = vld [vmem:[%s3641_s30 + $0x80] sm:$0xff] (%p3343_p10)  ;;  %v2565_v12 = vld [vmem:[%s3641_s30 + $0x90] sm:$0xff] (%p3343_p10) }
 0x199   : > { %v2288_v38 = vld [vmem:[#allocation2 + $0x11] sm:$0xff]  ;;  %v2381_v23 = vmul.f32 %v4947_v30, %v5406_v48  ;;  %v2375_v17 = vadd.f32 %v2374_v43, %v2368_v45  ;;  %v2397_v2 = vadd.f32 %v4929_v8, %v2396_v25  ;;  %v2403_v24 = vmul.f32 %v3171_v3, %v5190_v11  ;;  %2544 = vst [vmem:[%s5472_s27 + $0x70] sm:$0xff] (%p3343_p10), %v2543_v49  ;;  %v2569_v41 = vld [vmem:[%s3641_s30 + $0xa0] sm:$0xff] (%p3343_p10)  ;;  %v2575_v29 = vld [vmem:[%s3641_s30 + $0xb8] sm:$0xff] (%p3343_p10) }
 0x19a   : > { %2336 = vst [vmem:[#allocation2 + $0x10] sm:$0xff] %v2334_v53  ;;  %v2290_v44 = vadd.f32 %v2289_v28, %v2288_v38  ;;  %v2416_v13 = vadd.f32 %v2415_v21, %v2409_v27  ;;  %v2413_v40 = vadd.f32 %v2412_v54, %v2406_v56  ;;  %v2419_v52 = vmul.f32 %v4905_v61, %v5406_v48  ;;  %v2549_v53 = vld [vmem:[%s3641_s30 + $0x50] sm:$0xff] (%p3343_p10)  ;;  %v2559_v28 = vld [vmem:[%s3641_s30 + $0x78] sm:$0xff] (%p3343_p10)  ;;  %v2571_v9 = vld [vmem:[%s3641_s30 + $0xa8] sm:$0xff] (%p3343_p10) }
 0x19b   : > { %v2382_v20 = vadd.f32 %v2381_v23, %v2375_v17  ;;  %v2404_v30 = vadd.f32 %v2403_v24, %v2397_v2  ;;  %v2410_v39 = vmul.f32 %v5066_v7, %v5364_v59  ;;  %v2417_v19 = vmul.f32 %v4942_v32, %v5406_v48  ;;  %v2529_v32 = vld [vmem:[%s3641_s30] sm:$0xff] (%p3343_p10)  ;;  %v2531_v7 = vld [vmem:[%s3641_s30 + $0x8] sm:$0xff] (%p3343_p10)  ;;  %v2533_v59 = vld [vmem:[%s3641_s30 + $0x10] sm:$0xff] (%p3343_p10)  ;;  %2546 = vst [vmem:[%s5472_s27 + $0x80] sm:$0xff] (%p3343_p10), %v2545_v26 }
 0x19c   : > { %2985 = vst [vmem:[%s3641_s30 + $0xe0] sm:$0xff] %v2290_v44  ;;  %v2420_v62 = vadd.f32 %v2419_v52, %v2413_v40  ;;  %v2535_v48 = vld [vmem:[%s3641_s30 + $0x18] sm:$0xff] (%p3343_p10)  ;;  %2530 = vst [vmem:[%s5472_s27] sm:$0xff] (%p3343_p10), %v2529_v32  ;;  %v2573_v15 = vld [vmem:[%s3641_s30 + $0xb0] sm:$0xff] (%p3343_p10) }
 0x19d   : > { %v2337_v37 = vld [vmem:[#allocation2] sm:$0xff]  ;;  %v2411_v5 = vadd.f32 %v2410_v39, %v2404_v30  ;;  %2532 = vst [vmem:[%s5472_s27 + $0x10] sm:$0xff] (%p3343_p10), %v2531_v7  ;;  %2534 = vst [vmem:[%s5472_s27 + $0x20] sm:$0xff] (%p3343_p10), %v2533_v59  ;;  %v2577_v35 = vld [vmem:[%s3641_s30 + $0xc0] sm:$0xff] (%p3343_p10) }
 0x19e   : > { %2385 = vst [vmem:[#allocation2 + $0x1] sm:$0xff] %v2380_v18  ;;  %v2339_v1 = vadd.f32 %v2337_v37, %v2332_v22  ;;  %2536 = vst [vmem:[%s5472_s27 + $0x30] sm:$0xff] (%p3343_p10), %v2535_v48  ;;  %v2567_v18 = vld [vmem:[%s3641_s30 + $0x98] sm:$0xff] (%p3343_p10)  ;;  %v2579_v50 = vld [vmem:[%s3641_s30 + $0xc8] sm:$0xff] (%p3343_p10) }
 0x19f   : > { %v2418_v34 = vadd.f32 %v2417_v19, %v2411_v5  ;;  %2548 = vst [vmem:[%s5472_s27 + $0x90] sm:$0xff] (%p3343_p10), %v2547_v33  ;;  %2550 = vst [vmem:[%s5472_s27 + $0xa0] sm:$0xff] (%p3343_p10), %v2549_v53  ;;  %v2581_v38 = vld [vmem:[%s3641_s30 + $0xd0] sm:$0xff] (%p3343_p10)  ;;  %v2583_v43 = vld [vmem:[%s3641_s30 + $0xd8] sm:$0xff] (%p3343_p10) }
 0x1a0   : > { %2552 = vst [vmem:[%s5472_s27 + $0xb0] sm:$0xff] (%p3343_p10), %v2551_v46  ;;  %2554 = vst [vmem:[%s5472_s27 + $0xc0] sm:$0xff] (%p3343_p10), %v2553_v51 }
 0x1a1   : > { %v2338_v58 = vld [vmem:[#allocation2 + $0x11] sm:$0xff]  ;;  %2556 = vst [vmem:[%s5472_s27 + $0xd0] sm:$0xff] (%p3343_p10), %v2555_v14  ;;  %2558 = vst [vmem:[%s5472_s27 + $0xe0] sm:$0xff] (%p3343_p10), %v2557_v16 }
 0x1a2   : > { %2386 = vst [vmem:[#allocation2 + $0x10] sm:$0xff] %v2384_v6  ;;  %v2340_v47 = vadd.f32 %v2339_v1, %v2338_v58  ;;  %2560 = vst [vmem:[%s5472_s27 + $0xf0] sm:$0xff] (%p3343_p10), %v2559_v28 }
 0x1a3   : > { %2562 = vst [vmem:[%s5472_s27 + $0x100] sm:$0xff] (%p3343_p10), %v2561_v60  ;;  %2564 = vst [vmem:[%s5472_s27 + $0x110] sm:$0xff] (%p3343_p10), %v2563_v57  ;;  %v2585_v44 = vld [vmem:[%s3641_s30 + $0xe0] sm:$0xff] (%p3343_p10) }
 0x1a4   : > { %2992 = vst [vmem:[%s3641_s30 + $0xe8] sm:$0xff] %v2340_v47  ;;  %2566 = vst [vmem:[%s5472_s27 + $0x120] sm:$0xff] (%p3343_p10), %v2565_v12 }
 0x1a5   : > { %v2387_v8 = vld [vmem:[#allocation2] sm:$0xff]  ;;  %2568 = vst [vmem:[%s5472_s27 + $0x130] sm:$0xff] (%p3343_p10), %v2567_v18  ;;  %2570 = vst [vmem:[%s5472_s27 + $0x140] sm:$0xff] (%p3343_p10), %v2569_v41 }
 0x1a6   : > { %2421 = vst [vmem:[#allocation2 + $0x1] sm:$0xff] %v2416_v13  ;;  %v2389_v11 = vadd.f32 %v2387_v8, %v2382_v20  ;;  %2572 = vst [vmem:[%s5472_s27 + $0x150] sm:$0xff] (%p3343_p10), %v2571_v9 }
 0x1a7   : > { %2574 = vst [vmem:[%s5472_s27 + $0x160] sm:$0xff] (%p3343_p10), %v2573_v15  ;;  %2576 = vst [vmem:[%s5472_s27 + $0x170] sm:$0xff] (%p3343_p10), %v2575_v29 }
 0x1a8   : > { %2578 = vst [vmem:[%s5472_s27 + $0x180] sm:$0xff] (%p3343_p10), %v2577_v35  ;;  %2580 = vst [vmem:[%s5472_s27 + $0x190] sm:$0xff] (%p3343_p10), %v2579_v50 }
 0x1a9   : > { %v2388_v61 = vld [vmem:[#allocation2 + $0x11] sm:$0xff]  ;;  %2582 = vst [vmem:[%s5472_s27 + $0x1a0] sm:$0xff] (%p3343_p10), %v2581_v38  ;;  %2584 = vst [vmem:[%s5472_s27 + $0x1b0] sm:$0xff] (%p3343_p10), %v2583_v43 }
 0x1aa   : > { %2422 = vst [vmem:[#allocation2 + $0x10] sm:$0xff] %v2420_v62  ;;  %v2390_v0 = vadd.f32 %v2389_v11, %v2388_v61  ;;  %2586 = vst [vmem:[%s5472_s27 + $0x1c0] sm:$0xff] (%p3343_p10), %v2585_v44 }
 0x1ab   : > { %v2587_v22 = vld [vmem:[%s3641_s30 + $0xe8] sm:$0xff] (%p3343_p10) }
 0x1ac   : > { %2999 = vst [vmem:[%s3641_s30 + $0xf0] sm:$0xff] %v2390_v0  ;;  %2588 = vst [vmem:[%s5472_s27 + $0x1d0] sm:$0xff] (%p3343_p10), %v2587_v22 }
 0x1ad   : > { %v2423_v31 = vld [vmem:[#allocation2] sm:$0xff] }
 0x1ae   : > { %v2425_v55 = vadd.f32 %v2423_v31, %v2418_v34  ;;  %2435 = sbr.rel (!%p3343_p10) target bundleno = 445 (0x1bd), region = 115 }
 0x1b1   : > { %v2424_v63 = vld [vmem:[#allocation2 + $0x11] sm:$0xff] }
 0x1b2   : > { %v2426_v42 = vadd.f32 %v2425_v55, %v2424_v63 }
 0x1b3   : > { %v2589_v45 = vld [vmem:[%s3641_s30 + $0xf0] sm:$0xff] (%p3343_p10) }
 0x1b4   : > { %3004 = vst [vmem:[%s3641_s30 + $0xf8] sm:$0xff] %v2426_v42  ;;  %2590 = vst [vmem:[%s5472_s27 + $0x1e0] sm:$0xff] (%p3343_p10), %v2589_v45 }
 0x1bb   : > { %v2591_v25 = vld [vmem:[%s3641_s30 + $0xf8] sm:$0xff] }
 0x1bc   : > { %2592 = vst [vmem:[%s5472_s27 + $0x1f0] sm:$0xff] %v2591_v25 }
 0x1bd PF: > { %s13_s20 = sadd.s32 1, %s3242_s20   ;;  %s5745_s12 = smov %s3214_s13 }
 0x1be   : > { %p10_p2 = scmp.ge.s32.totalorder %s13_s20, 6   ;;  %s5746_s13 = smov %s3348_s5 }
 0x1bf   : > { %s5747_s14 = smov %s3222_s15  ;;  %s5748_s15 = smov %s3351_s6 }
 0x1c0   : > { %s5749_s16 = smov %s3234_s18  ;;  %s5750_s17 = smov %s3238_s19 }
 0x1c1   : > { %s5751_s18 = smov %s5754_s21  ;;  %s5752_s19 = smov %s5758_s22 }
 0x1c2   :  { %12 = sbr.rel (!%p10_p2) target bundleno = 5 (0x5), region = 266 }

</bundles_post_ra>
